<compile_context>
chip_gen: v5e
topology: v5e:2x2
jax: 0.10.0
libtpu: 0.0.40
codegen_flags: <defaults>
</compile_context>

<pallas_src>
import functools

import jax
import jax.numpy as jnp
from jax.experimental import pallas as pl
from jax.experimental.pallas import tpu as pltpu


# --------------------------------------------------------------------------- helpers
def _round_up(x, m):
    return (x + m - 1) // m * m


def _pad_and_tile(dim, pref, mult):
    """Return (padded_dim, tile) with padded_dim % tile == 0 and tile % mult == 0.
    `pref` must be a multiple of `mult`."""
    p = _round_up(dim, mult)
    if p <= pref:
        return p, p
    return _round_up(dim, pref), pref


# --------------------------------------------------------------------------- kernels
def _fused_gemm_kernel(a_ref, scale_ref, shift_ref, b_ref, bias_ref, o_ref, acc_ref,
                       *, act_in, act_out):
    """o = act_out( act_in(a * scale + shift) @ b + bias ).

    Grid = (phase, M, N, K) with K (reduction) last.  `a` is a bf16 im2col slab,
    `b` a bf16 weight panel.  (scale, shift) is the *producer* BatchNorm collapsed to a
    per-K-column affine and fused into this consumer's prologue (identity when the
    producer had no norm)."""
    k = pl.program_id(3)

    @pl.when(k == 0)
    def _():
        acc_ref[...] = jnp.zeros_like(acc_ref)

    # Prologue: producer-BN affine + pre-activation, in f32 (zero K-padding stays zero).
    a = a_ref[...].astype(jnp.float32) * scale_ref[...] + shift_ref[...]
    if act_in == "lrelu":
        a = jnp.where(a >= 0.0, a, 0.2 * a)
    elif act_in == "relu":
        a = jnp.maximum(a, 0.0)

    # bf16 MXU inputs, f32 accumulation.
    acc_ref[...] += jnp.dot(a.astype(jnp.bfloat16), b_ref[...],
                            preferred_element_type=jnp.float32)

    @pl.when(k == pl.num_programs(3) - 1)
    def _():
        r = acc_ref[...] + bias_ref[...]
        if act_out == "tanh":
            r = jnp.tanh(r)
        o_ref[...] = r


def _bn_stats_kernel(x_ref, mean_ref, inv_ref, sum_ref, sq_ref, *, inv_count):
    """Row-tiled sum / sum-of-squares -> per-channel mean and rsqrt(var + eps).
    Accumulates into (8, C) scratch (VPU adds only); the cross-sublane reduce happens
    once in the final grid step."""
    i = pl.program_id(0)

    @pl.when(i == 0)
    def _():
        sum_ref[...] = jnp.zeros_like(sum_ref)
        sq_ref[...] = jnp.zeros_like(sq_ref)

    x = x_ref[...]                                    # (tm, C), tm % 8 == 0
    xr = x.reshape(x.shape[0] // 8, 8, x.shape[1])    # tile-aligned split of sublanes
    sum_ref[...] += jnp.sum(xr, axis=0)
    sq_ref[...] += jnp.sum(xr * xr, axis=0)

    @pl.when(i == pl.num_programs(0) - 1)
    def _():
        s = jnp.sum(sum_ref[...], axis=0, keepdims=True)
        q = jnp.sum(sq_ref[...], axis=0, keepdims=True)
        mean = s * inv_count
        var = jnp.maximum(q * inv_count - mean * mean, 0.0)   # biased var, clamped >= 0
        mean_ref[...] = mean
        inv_ref[...] = jax.lax.rsqrt(var + 1e-5)


# --------------------------------------------------------------------------- pallas wrappers
def fused_gemm(a, b, bias, scale, shift, act_in="none", act_out="none"):
    """act_out( act_in(a*scale + shift) @ b + bias ) per phase.

    a: (P, M, K) bf16 im2col slabs, b: (P, K, N) bf16 weight panels,
    bias: (N,) f32, scale/shift: (K,) f32.  Returns (P, M, N) f32."""
    P, M, K = a.shape
    N = b.shape[-1]
    Mp, tm = _pad_and_tile(M, 512, 8)
    Kp, tk = _pad_and_tile(K, 1024, 128)
    Np, tn = _pad_and_tile(N, 512, 128)

    if (Mp, Kp) != (M, K):
        a = jnp.pad(a, ((0, 0), (0, Mp - M), (0, Kp - K)))
    if (Kp, Np) != (K, N):
        b = jnp.pad(b, ((0, 0), (0, Kp - K), (0, Np - N)))
    if Np != N:
        bias = jnp.pad(bias, (0, Np - N))
    if Kp != K:
        scale = jnp.pad(scale, (0, Kp - K), constant_values=1.0)
        shift = jnp.pad(shift, (0, Kp - K))

    kernel = functools.partial(_fused_gemm_kernel, act_in=act_in, act_out=act_out)
    out = pl.pallas_call(
        kernel,
        out_shape=jax.ShapeDtypeStruct((P, Mp, Np), jnp.float32),
        grid=(P, Mp // tm, Np // tn, Kp // tk),
        in_specs=[
            pl.BlockSpec((None, tm, tk), lambda p, i, j, k: (p, i, k)),
            pl.BlockSpec((1, tk), lambda p, i, j, k: (0, k)),
            pl.BlockSpec((1, tk), lambda p, i, j, k: (0, k)),
            pl.BlockSpec((None, tk, tn), lambda p, i, j, k: (p, k, j)),
            pl.BlockSpec((1, tn), lambda p, i, j, k: (0, j)),
        ],
        out_specs=pl.BlockSpec((None, tm, tn), lambda p, i, j, k: (p, i, j)),
        scratch_shapes=[pltpu.VMEM((tm, tn), jnp.float32)],
        compiler_params=pltpu.CompilerParams(
            dimension_semantics=("parallel", "parallel", "parallel", "arbitrary")
        ),
    )(a.astype(jnp.bfloat16), scale.reshape(1, Kp).astype(jnp.float32),
      shift.reshape(1, Kp).astype(jnp.float32), b.astype(jnp.bfloat16),
      bias.reshape(1, Np).astype(jnp.float32))

    if (Mp, Np) != (M, N):
        out = out[:, :M, :N]
    return out


def bn_stats(x):
    """Training-mode BatchNorm2d batch statistics over NHWC x.
    Returns (mean, rsqrt(var + 1e-5)), each shape (C,)."""
    N, H, W, C = x.shape
    M = N * H * W
    Mp, tm = _pad_and_tile(M, 1024, 8)
    x2 = x.reshape(M, C)
    if Mp != M:
        x2 = jnp.pad(x2, ((0, Mp - M), (0, 0)))

    mean, inv = pl.pallas_call(
        functools.partial(_bn_stats_kernel, inv_count=1.0 / float(M)),
        out_shape=(jax.ShapeDtypeStruct((1, C), jnp.float32),
                   jax.ShapeDtypeStruct((1, C), jnp.float32)),
        grid=(Mp // tm,),
        in_specs=[pl.BlockSpec((tm, C), lambda i: (i, 0))],
        out_specs=(pl.BlockSpec((1, C), lambda i: (0, 0)),
                   pl.BlockSpec((1, C), lambda i: (0, 0))),
        scratch_shapes=[pltpu.VMEM((8, C), jnp.float32),
                        pltpu.VMEM((8, C), jnp.float32)],
        compiler_params=pltpu.CompilerParams(dimension_semantics=("arbitrary",)),
    )(x2)
    return mean[0], inv[0]


# --------------------------------------------------------------------------- conv layers
def conv_down(x, w, bias, scale, shift, act_in):
    """Conv2d(k=4, s=2, p=1), producer-BN + pre-activation fused into the GEMM prologue.
    x:(N,H,W,Cin) f32 (un-normalized producer output), w:(4,4,Cin,Cout) bf16
    (= torch Conv2d weight.permute(2,3,1,0)), scale/shift:(Cin,)."""
    N, H, W, Cin = x.shape
    Cout = w.shape[-1]
    Ho, Wo = H // 2, W // 2
    xp = jnp.pad(x, ((0, 0), (1, 1), (1, 1), (0, 0)))
    # TODO(synk): im2col is still materialized once by XLA (slices+concat); a strided-DMA
    # tap-streaming GEMM could remove this copy entirely.
    cols = []
    for kh in range(4):
        for kw in range(4):
            cols.append(xp[:, kh:kh + 2 * Ho - 1:2, kw:kw + 2 * Wo - 1:2, :])
    a = jnp.concatenate(cols, axis=-1).reshape(1, N * Ho * Wo, 16 * Cin)
    a = a.astype(jnp.bfloat16)                     # stream the im2col slab in bf16
    b = w.reshape(1, 16 * Cin, Cout)
    out = fused_gemm(a, b, bias, jnp.tile(scale, 16), jnp.tile(shift, 16),
                     act_in=act_in, act_out="none")
    return out.reshape(N, Ho, Wo, Cout)


# For output row parity a: (padded-input row offset dh, kernel tap kh) pairs satisfying
# oh = 2p + a = 2*ih + kh - 1 (ConvTranspose2d k=4, s=2, p=1; only the non-zero taps).
_PHASE_TAPS = {0: ((0, 3), (1, 1)), 1: ((1, 2), (2, 0))}


def conv_up(x, w, bias, scale, shift, act_in, act_out):
    """ConvTranspose2d(k=4, s=2, p=1) via 2x2 polyphase decomposition: a single
    pallas_call with a parallel phase axis (4 phases, K = 4*Cin non-zero taps each).
    x:(N,H,W,Cin) f32, w:(4,4,Cin,Cout) bf16 (= torch weight.permute(2,3,0,1))."""
    N, H, W, Cin = x.shape
    Cout = w.shape[-1]
    xp = jnp.pad(x, ((0, 0), (1, 1), (1, 1), (0, 0)))

    a_ph, b_ph = [], []
    for a_par in (0, 1):
        for b_par in (0, 1):
            cols, wrows = [], []
            for dh, kh in _PHASE_TAPS[a_par]:
                for dw, kw in _PHASE_TAPS[b_par]:
                    cols.append(xp[:, dh:dh + H, dw:dw + W, :])
                    wrows.append(w[kh, kw])                      # (Cin, Cout)
            a_ph.append(jnp.concatenate(cols, axis=-1)
                        .reshape(N * H * W, 4 * Cin).astype(jnp.bfloat16))
            b_ph.append(jnp.concatenate(wrows, axis=0))          # (4*Cin, Cout)
    A = jnp.stack(a_ph, axis=0)                                  # (4, M, 4*Cin)
    B = jnp.stack(b_ph, axis=0)                                  # (4, 4*Cin, Cout)

    out = fused_gemm(A, B, bias, jnp.tile(scale, 4), jnp.tile(shift, 4),
                     act_in=act_in, act_out=act_out)             # (4, M, Cout)
    # De-interleave: y[n, 2p+a, 2q+b, c] = out[2a+b, n*H*W + p*W + q, c]
    out = out.reshape(2, 2, N, H, W, Cout)                       # (a, b, N, H, W, C)
    out = jnp.transpose(out, (2, 3, 0, 4, 1, 5))                 # (N, H, a, W, b, C)
    return out.reshape(N, 2 * H, 2 * W, Cout)


# --------------------------------------------------------------------------- parameters
def _init_block(key, outer_nc, inner_nc, input_nc, outermost, innermost, sub):
    ks = jax.random.split(key, 3)
    p = {"outermost": outermost, "innermost": innermost, "sub": sub}
    # down conv: input_nc -> inner_nc, bias=False (BatchNorm norm layer); weights bf16.
    p["dw"] = (0.02 * jax.random.normal(ks[0], (4, 4, input_nc, inner_nc), jnp.float32)
               ).astype(jnp.bfloat16)
    p["db"] = jnp.zeros((inner_nc,), jnp.float32)
    # up conv: (inner_nc or 2*inner_nc) -> outer_nc.
    up_in = inner_nc if innermost else inner_nc * 2
    p["uw"] = (0.02 * jax.random.normal(ks[1], (4, 4, up_in, outer_nc), jnp.float32)
               ).astype(jnp.bfloat16)
    p["ub"] = (0.02 * jax.random.normal(ks[2], (outer_nc,), jnp.float32)
               if outermost else jnp.zeros((outer_nc,), jnp.float32))
    # BatchNorm2d affine init: gamma=1, beta=0.
    if (not outermost) and (not innermost):
        p["dn_g"] = jnp.ones((inner_nc,), jnp.float32)
        p["dn_b"] = jnp.zeros((inner_nc,), jnp.float32)
    if not outermost:
        p["un_g"] = jnp.ones((outer_nc,), jnp.float32)
        p["un_b"] = jnp.zeros((outer_nc,), jnp.float32)
    return p


def build_unet_params(key, input_nc, output_nc, num_downs, ngf):
    keys = jax.random.split(key, num_downs + 1)
    ki = 0
    block = _init_block(keys[ki], ngf * 8, ngf * 8, ngf * 8, False, True, None); ki += 1
    for _ in range(num_downs - 5):
        block = _init_block(keys[ki], ngf * 8, ngf * 8, ngf * 8, False, False, block); ki += 1
    block = _init_block(keys[ki], ngf * 4, ngf * 8, ngf * 4, False, False, block); ki += 1
    block = _init_block(keys[ki], ngf * 2, ngf * 4, ngf * 2, False, False, block); ki += 1
    block = _init_block(keys[ki], ngf, ngf * 2, ngf, False, False, block); ki += 1
    block = _init_block(keys[ki], output_nc, ngf, input_nc, True, False, block)
    return block


# --------------------------------------------------------------------------- forward (NHWC)
def _identity_affine(c):
    return jnp.ones((c,), jnp.float32), jnp.zeros((c,), jnp.float32)


def unet_block_forward(p, x, x_scale, x_shift):
    """x is the *un-normalized* producer output; (x_scale, x_shift) is the per-channel
    BN affine any consumer of x must apply first (identity if no producer BN)."""
    outermost, innermost = p["outermost"], p["innermost"]

    # down: [LeakyReLU(0.2)] -> Conv2d k4s2p1 ; producer BN fused into the GEMM prologue.
    h = conv_down(x, p["dw"], p["db"], x_scale, x_shift,
                  act_in=("none" if outermost else "lrelu"))
    if (not outermost) and (not innermost):
        mean, inv = bn_stats(h)                       # downnorm: stats only; apply fused below
        h_scale = p["dn_g"] * inv
        h_shift = p["dn_b"] - mean * h_scale
    else:
        h_scale, h_shift = _identity_affine(h.shape[-1])

    if not innermost:
        h, h_scale, h_shift = unet_block_forward(p["sub"], h, h_scale, h_shift)

    # up: ReLU -> ConvTranspose2d k4s2p1 [-> Tanh if outermost]
    u = conv_up(h, p["uw"], p["ub"], h_scale, h_shift, act_in="relu",
                act_out=("tanh" if outermost else "none"))
    if outermost:
        return u

    mean, inv = bn_stats(u)                           # upnorm: apply fused into the consumer
    u_scale = p["un_g"] * inv
    u_shift = p["un_b"] - mean * u_scale
    # TODO(synk): the skip concat still materializes one copy of (x, u); writing the up-conv
    # output directly into a channel slice of a preallocated buffer would remove it.
    cat = jnp.concatenate([x, u], axis=-1)
    return (cat,
            jnp.concatenate([x_scale, u_scale]),
            jnp.concatenate([x_shift, u_shift]))


def unet_generator_forward(params, x_nchw):
    x = jnp.transpose(x_nchw, (0, 2, 3, 1)).astype(jnp.float32)   # NCHW -> NHWC
    s, b = _identity_affine(x.shape[-1])
    y = unet_block_forward(params, x, s, b)
    return jnp.transpose(y, (0, 3, 1, 2))                         # NHWC -> NCHW


# --------------------------------------------------------------------------- main
if __name__ == "__main__":
    # Small configuration consistent with the module: num_downs=5 needs spatial >= 32.
    input_nc, output_nc, num_downs, ngf = 3, 3, 5, 8
    N, H, W = 2, 32, 32

    key = jax.random.PRNGKey(0)
    kx, kp = jax.random.split(key)
    x = jax.random.normal(kx, (N, input_nc, H, W), jnp.float32)   # NCHW, like PyTorch

    params = build_unet_params(kp, input_nc, output_nc, num_downs, ngf)

    fwd = jax.jit(lambda inp: unet_generator_forward(params, inp))
    y = jax.block_until_ready(fwd(x))

    assert y.shape == (N, output_nc, H, W), y.shape
    assert bool(jnp.all(jnp.isfinite(y)))
    assert float(jnp.max(jnp.abs(y))) <= 1.0 + 1e-5   # tanh output range

    print("KERNEL_OK")
</pallas_src>

<mosaic_0001>
module attributes {stable_mosaic.version = 11 : i64} {
  func.func @_fused_gemm_kernel(%arg0: i32, %arg1: i32, %arg2: i32, %arg3: i32, %arg4: memref<1x512x128xbf16, #tpu.memory_space<vmem>>, %arg5: memref<1x128xf32, #tpu.memory_space<vmem>>, %arg6: memref<1x128xf32, #tpu.memory_space<vmem>>, %arg7: memref<1x128x128xbf16, #tpu.memory_space<vmem>>, %arg8: memref<1x128xf32, #tpu.memory_space<vmem>>, %arg9: memref<1x512x128xf32, #tpu.memory_space<vmem>>, %arg10: memref<512x128xf32, #tpu.memory_space<vmem>>) attributes {dimension_semantics = [#tpu.dimension_semantics<parallel>, #tpu.dimension_semantics<parallel>, #tpu.dimension_semantics<parallel>, #tpu.dimension_semantics<arbitrary>], iteration_bounds = array<i64: 1, 1, 1, 1>, scalar_prefetch = 0 : i64, scratch_operands = 1 : i64, tpu.core_type = #tpu.core_type<tc>, window_params = [{transform_indices = @transform_0, window_bounds = array<i64: 1, 512, 128>}, {transform_indices = @transform_1, window_bounds = array<i64: 1, 128>}, {transform_indices = @transform_2, window_bounds = array<i64: 1, 128>}, {transform_indices = @transform_3, window_bounds = array<i64: 1, 128, 128>}, {transform_indices = @transform_4, window_bounds = array<i64: 1, 128>}, {transform_indices = @transform_5, window_bounds = array<i64: 1, 512, 128>}]} {
    %c0_i32 = arith.constant 0 : i32
    %0 = arith.cmpi eq, %arg3, %c0_i32 : i32
    %1 = arith.extui %0 : i1 to i32
    %c0_i32_0 = arith.constant 0 : i32
    %2 = arith.cmpi ne, %1, %c0_i32_0 : i32
    scf.if %2 {
      %cst_16 = arith.constant 0.000000e+00 : f32
      %22 = vector.broadcast %cst_16 : f32 to vector<512x128xf32>
      %c0_17 = arith.constant 0 : index
      %c0_18 = arith.constant 0 : index
      %23 = vector.load %arg10[%c0_17, %c0_18] : memref<512x128xf32, #tpu.memory_space<vmem>>, vector<512x128xf32>
      tpu.vector_store %arg10[%c0_17, %c0_18], %22 {strides = array<i32>} : memref<512x128xf32, #tpu.memory_space<vmem>>, vector<512x128xf32>,
    } else {
    }
    %c0 = arith.constant 0 : index
    %c0_1 = arith.constant 0 : index
    %c0_2 = arith.constant 0 : index
    %3 = vector.load %arg4[%c0, %c0_1, %c0_2] : memref<1x512x128xbf16, #tpu.memory_space<vmem>>, vector<1x512x128xbf16>
    %4 = vector.shape_cast %3 : vector<1x512x128xbf16> to vector<512x128xbf16>
    %5 = arith.extf %4 : vector<512x128xbf16> to vector<512x128xf32>
    %c0_3 = arith.constant 0 : index
    %c0_4 = arith.constant 0 : index
    %6 = vector.load %arg5[%c0_3, %c0_4] : memref<1x128xf32, #tpu.memory_space<vmem>>, vector<1x128xf32>
    %7 = vector.broadcast %6 : vector<1x128xf32> to vector<512x128xf32>
    %8 = arith.mulf %5, %7 : vector<512x128xf32>
    %c0_5 = arith.constant 0 : index
    %c0_6 = arith.constant 0 : index
    %9 = vector.load %arg6[%c0_5, %c0_6] : memref<1x128xf32, #tpu.memory_space<vmem>>, vector<1x128xf32>
    %10 = vector.broadcast %9 : vector<1x128xf32> to vector<512x128xf32>
    %11 = arith.addf %8, %10 : vector<512x128xf32>
    %c0_7 = arith.constant 0 : index
    %c0_8 = arith.constant 0 : index
    %12 = vector.load %arg10[%c0_7, %c0_8] : memref<512x128xf32, #tpu.memory_space<vmem>>, vector<512x128xf32>
    %13 = arith.truncf %11 : vector<512x128xf32> to vector<512x128xbf16>
    %c0_9 = arith.constant 0 : index
    %c0_10 = arith.constant 0 : index
    %c0_11 = arith.constant 0 : index
    %14 = vector.load %arg7[%c0_9, %c0_10, %c0_11] : memref<1x128x128xbf16, #tpu.memory_space<vmem>>, vector<1x128x128xbf16>
    %15 = vector.shape_cast %14 : vector<1x128x128xbf16> to vector<128x128xbf16>
    %cst = arith.constant dense<0.000000e+00> : vector<512x128xf32>
    %16 = tpu.matmul %13, %15, %cst {dimension_numbers = #tpu.dot_dimension_numbers<[1], [0], [0], [1], [0, 0, 1, 1], [], []>} : vector<512x128xbf16>, vector<128x128xbf16>, vector<512x128xf32> -> vector<512x128xf32>
    %17 = arith.addf %12, %16 : vector<512x128xf32>
    %c0_12 = arith.constant 0 : index
    %c0_13 = arith.constant 0 : index
    %18 = vector.load %arg10[%c0_12, %c0_13] : memref<512x128xf32, #tpu.memory_space<vmem>>, vector<512x128xf32>
    tpu.vector_store %arg10[%c0_12, %c0_13], %17 {strides = array<i32>} : memref<512x128xf32, #tpu.memory_space<vmem>>, vector<512x128xf32>,
    %c0_i32_14 = arith.constant 0 : i32
    %19 = arith.cmpi eq, %arg3, %c0_i32_14 : i32
    %20 = arith.extui %19 : i1 to i32
    %c0_i32_15 = arith.constant 0 : i32
    %21 = arith.cmpi ne, %20, %c0_i32_15 : i32
    scf.if %21 {
      %c0_16 = arith.constant 0 : index
      %c0_17 = arith.constant 0 : index
      %22 = vector.load %arg10[%c0_16, %c0_17] : memref<512x128xf32, #tpu.memory_space<vmem>>, vector<512x128xf32>
      %c0_18 = arith.constant 0 : index
      %c0_19 = arith.constant 0 : index
      %23 = vector.load %arg8[%c0_18, %c0_19] : memref<1x128xf32, #tpu.memory_space<vmem>>, vector<1x128xf32>
      %24 = vector.broadcast %23 : vector<1x128xf32> to vector<512x128xf32>
      %25 = arith.addf %22, %24 : vector<512x128xf32>
      %c0_20 = arith.constant 0 : index
      %c0_21 = arith.constant 0 : index
      %c0_22 = arith.constant 0 : index
      %26 = vector.load %arg9[%c0_20, %c0_21, %c0_22] : memref<1x512x128xf32, #tpu.memory_space<vmem>>, vector<1x512x128xf32>
      %27 = vector.shape_cast %26 : vector<1x512x128xf32> to vector<512x128xf32>
      %28 = vector.shape_cast %25 : vector<512x128xf32> to vector<1x512x128xf32>
      tpu.vector_store %arg9[%c0_20, %c0_21, %c0_22], %28 {strides = array<i32>} : memref<1x512x128xf32, #tpu.memory_space<vmem>>, vector<1x512x128xf32>,
    } else {
    }
    return
  }
  func.func @transform_0(%arg0: i32, %arg1: i32, %arg2: i32, %arg3: i32) -> (i32, i32, i32) {
    %c0_i32 = arith.constant 0 : i32
    return %arg0, %arg1, %arg3 : i32, i32, i32
  }
  func.func @transform_1(%arg0: i32, %arg1: i32, %arg2: i32, %arg3: i32) -> (i32, i32) {
    %c0_i32 = arith.constant 0 : i32
    %c0_i32_0 = arith.constant 0 : i32
    return %c0_i32, %arg3 : i32, i32
  }
  func.func @transform_2(%arg0: i32, %arg1: i32, %arg2: i32, %arg3: i32) -> (i32, i32) {
    %c0_i32 = arith.constant 0 : i32
    %c0_i32_0 = arith.constant 0 : i32
    return %c0_i32, %arg3 : i32, i32
  }
  func.func @transform_3(%arg0: i32, %arg1: i32, %arg2: i32, %arg3: i32) -> (i32, i32, i32) {
    %c0_i32 = arith.constant 0 : i32
    return %arg0, %arg3, %arg2 : i32, i32, i32
  }
  func.func @transform_4(%arg0: i32, %arg1: i32, %arg2: i32, %arg3: i32) -> (i32, i32) {
    %c0_i32 = arith.constant 0 : i32
    %c0_i32_0 = arith.constant 0 : i32
    return %c0_i32, %arg2 : i32, i32
  }
  func.func @transform_5(%arg0: i32, %arg1: i32, %arg2: i32, %arg3: i32) -> (i32, i32, i32) {
    %c0_i32 = arith.constant 0 : i32
    return %arg0, %arg1, %arg2 : i32, i32, i32
  }
}

module attributes {stable_mosaic.version = 11 : i64} {
  func.func @_fused_gemm_kernel(%arg0: i32, %arg1: i32, %arg2: i32, %arg3: i32, %arg4: memref<1x128x128xbf16, #tpu.memory_space<vmem>>, %arg5: memref<1x128xf32, #tpu.memory_space<vmem>>, %arg6: memref<1x128xf32, #tpu.memory_space<vmem>>, %arg7: memref<1x128x128xbf16, #tpu.memory_space<vmem>>, %arg8: memref<1x128xf32, #tpu.memory_space<vmem>>, %arg9: memref<1x128x128xf32, #tpu.memory_space<vmem>>, %arg10: memref<128x128xf32, #tpu.memory_space<vmem>>) attributes {dimension_semantics = [#tpu.dimension_semantics<parallel>, #tpu.dimension_semantics<parallel>, #tpu.dimension_semantics<parallel>, #tpu.dimension_semantics<arbitrary>], iteration_bounds = array<i64: 1, 1, 1, 1>, scalar_prefetch = 0 : i64, scratch_operands = 1 : i64, tpu.core_type = #tpu.core_type<tc>, window_params = [{transform_indices = @transform_0, window_bounds = array<i64: 1, 128, 128>}, {transform_indices = @transform_1, window_bounds = array<i64: 1, 128>}, {transform_indices = @transform_2, window_bounds = array<i64: 1, 128>}, {transform_indices = @transform_3, window_bounds = array<i64: 1, 128, 128>}, {transform_indices = @transform_4, window_bounds = array<i64: 1, 128>}, {transform_indices = @transform_5, window_bounds = array<i64: 1, 128, 128>}]} {
    %c0_i32 = arith.constant 0 : i32
    %0 = arith.cmpi eq, %arg3, %c0_i32 : i32
    %1 = arith.extui %0 : i1 to i32
    %c0_i32_0 = arith.constant 0 : i32
    %2 = arith.cmpi ne, %1, %c0_i32_0 : i32
    scf.if %2 {
      %cst_18 = arith.constant 0.000000e+00 : f32
      %27 = vector.broadcast %cst_18 : f32 to vector<128x128xf32>
      %c0_19 = arith.constant 0 : index
      %c0_20 = arith.constant 0 : index
      %28 = vector.load %arg10[%c0_19, %c0_20] : memref<128x128xf32, #tpu.memory_space<vmem>>, vector<128x128xf32>
      tpu.vector_store %arg10[%c0_19, %c0_20], %27 {strides = array<i32>} : memref<128x128xf32, #tpu.memory_space<vmem>>, vector<128x128xf32>,
    } else {
    }
    %c0 = arith.constant 0 : index
    %c0_1 = arith.constant 0 : index
    %c0_2 = arith.constant 0 : index
    %3 = vector.load %arg4[%c0, %c0_1, %c0_2] : memref<1x128x128xbf16, #tpu.memory_space<vmem>>, vector<1x128x128xbf16>
    %4 = vector.shape_cast %3 : vector<1x128x128xbf16> to vector<128x128xbf16>
    %5 = arith.extf %4 : vector<128x128xbf16> to vector<128x128xf32>
    %c0_3 = arith.constant 0 : index
    %c0_4 = arith.constant 0 : index
    %6 = vector.load %arg5[%c0_3, %c0_4] : memref<1x128xf32, #tpu.memory_space<vmem>>, vector<1x128xf32>
    %7 = vector.broadcast %6 : vector<1x128xf32> to vector<128x128xf32>
    %8 = arith.mulf %5, %7 : vector<128x128xf32>
    %c0_5 = arith.constant 0 : index
    %c0_6 = arith.constant 0 : index
    %9 = vector.load %arg6[%c0_5, %c0_6] : memref<1x128xf32, #tpu.memory_space<vmem>>, vector<1x128xf32>
    %10 = vector.broadcast %9 : vector<1x128xf32> to vector<128x128xf32>
    %11 = arith.addf %8, %10 : vector<128x128xf32>
    %cst = arith.constant 0.000000e+00 : f32
    %12 = vector.broadcast %cst : f32 to vector<128x128xf32>
    %13 = arith.cmpf oge, %11, %12 : vector<128x128xf32>
    %cst_7 = arith.constant 2.000000e-01 : f32
    %14 = vector.broadcast %cst_7 : f32 to vector<128x128xf32>
    %15 = arith.mulf %14, %11 : vector<128x128xf32>
    %16 = arith.select %13, %11, %15 : vector<128x128xi1>, vector<128x128xf32>
    %c0_8 = arith.constant 0 : index
    %c0_9 = arith.constant 0 : index
    %17 = vector.load %arg10[%c0_8, %c0_9] : memref<128x128xf32, #tpu.memory_space<vmem>>, vector<128x128xf32>
    %18 = arith.truncf %16 : vector<128x128xf32> to vector<128x128xbf16>
    %c0_10 = arith.constant 0 : index
    %c0_11 = arith.constant 0 : index
    %c0_12 = arith.constant 0 : index
    %19 = vector.load %arg7[%c0_10, %c0_11, %c0_12] : memref<1x128x128xbf16, #tpu.memory_space<vmem>>, vector<1x128x128xbf16>
    %20 = vector.shape_cast %19 : vector<1x128x128xbf16> to vector<128x128xbf16>
    %cst_13 = arith.constant dense<0.000000e+00> : vector<128x128xf32>
    %21 = tpu.matmul %18, %20, %cst_13 {dimension_numbers = #tpu.dot_dimension_numbers<[1], [0], [0], [1], [0, 0, 1, 1], [], []>} : vector<128x128xbf16>, vector<128x128xbf16>, vector<128x128xf32> -> vector<128x128xf32>
    %22 = arith.addf %17, %21 : vector<128x128xf32>
    %c0_14 = arith.constant 0 : index
    %c0_15 = arith.constant 0 : index
    %23 = vector.load %arg10[%c0_14, %c0_15] : memref<128x128xf32, #tpu.memory_space<vmem>>, vector<128x128xf32>
    tpu.vector_store %arg10[%c0_14, %c0_15], %22 {strides = array<i32>} : memref<128x128xf32, #tpu.memory_space<vmem>>, vector<128x128xf32>,
    %c0_i32_16 = arith.constant 0 : i32
    %24 = arith.cmpi eq, %arg3, %c0_i32_16 : i32
    %25 = arith.extui %24 : i1 to i32
    %c0_i32_17 = arith.constant 0 : i32
    %26 = arith.cmpi ne, %25, %c0_i32_17 : i32
    scf.if %26 {
      %c0_18 = arith.constant 0 : index
      %c0_19 = arith.constant 0 : index
      %27 = vector.load %arg10[%c0_18, %c0_19] : memref<128x128xf32, #tpu.memory_space<vmem>>, vector<128x128xf32>
      %c0_20 = arith.constant 0 : index
      %c0_21 = arith.constant 0 : index
      %28 = vector.load %arg8[%c0_20, %c0_21] : memref<1x128xf32, #tpu.memory_space<vmem>>, vector<1x128xf32>
      %29 = vector.broadcast %28 : vector<1x128xf32> to vector<128x128xf32>
      %30 = arith.addf %27, %29 : vector<128x128xf32>
      %c0_22 = arith.constant 0 : index
      %c0_23 = arith.constant 0 : index
      %c0_24 = arith.constant 0 : index
      %31 = vector.load %arg9[%c0_22, %c0_23, %c0_24] : memref<1x128x128xf32, #tpu.memory_space<vmem>>, vector<1x128x128xf32>
      %32 = vector.shape_cast %31 : vector<1x128x128xf32> to vector<128x128xf32>
      %33 = vector.shape_cast %30 : vector<128x128xf32> to vector<1x128x128xf32>
      tpu.vector_store %arg9[%c0_22, %c0_23, %c0_24], %33 {strides = array<i32>} : memref<1x128x128xf32, #tpu.memory_space<vmem>>, vector<1x128x128xf32>,
    } else {
    }
    return
  }
  func.func @transform_0(%arg0: i32, %arg1: i32, %arg2: i32, %arg3: i32) -> (i32, i32, i32) {
    %c0_i32 = arith.constant 0 : i32
    return %arg0, %arg1, %arg3 : i32, i32, i32
  }
  func.func @transform_1(%arg0: i32, %arg1: i32, %arg2: i32, %arg3: i32) -> (i32, i32) {
    %c0_i32 = arith.constant 0 : i32
    %c0_i32_0 = arith.constant 0 : i32
    return %c0_i32, %arg3 : i32, i32
  }
  func.func @transform_2(%arg0: i32, %arg1: i32, %arg2: i32, %arg3: i32) -> (i32, i32) {
    %c0_i32 = arith.constant 0 : i32
    %c0_i32_0 = arith.constant 0 : i32
    return %c0_i32, %arg3 : i32, i32
  }
  func.func @transform_3(%arg0: i32, %arg1: i32, %arg2: i32, %arg3: i32) -> (i32, i32, i32) {
    %c0_i32 = arith.constant 0 : i32
    return %arg0, %arg3, %arg2 : i32, i32, i32
  }
  func.func @transform_4(%arg0: i32, %arg1: i32, %arg2: i32, %arg3: i32) -> (i32, i32) {
    %c0_i32 = arith.constant 0 : i32
    %c0_i32_0 = arith.constant 0 : i32
    return %c0_i32, %arg2 : i32, i32
  }
  func.func @transform_5(%arg0: i32, %arg1: i32, %arg2: i32, %arg3: i32) -> (i32, i32, i32) {
    %c0_i32 = arith.constant 0 : i32
    return %arg0, %arg1, %arg2 : i32, i32, i32
  }
}

module attributes {stable_mosaic.version = 11 : i64} {
  func.func @_bn_stats_kernel(%arg0: i32, %arg1: memref<128x16xf32, #tpu.memory_space<vmem>>, %arg2: memref<1x16xf32, #tpu.memory_space<vmem>>, %arg3: memref<1x16xf32, #tpu.memory_space<vmem>>, %arg4: memref<8x16xf32, #tpu.memory_space<vmem>>, %arg5: memref<8x16xf32, #tpu.memory_space<vmem>>) attributes {dimension_semantics = [#tpu.dimension_semantics<arbitrary>], iteration_bounds = array<i64: 1>, scalar_prefetch = 0 : i64, scratch_operands = 2 : i64, tpu.core_type = #tpu.core_type<tc>, window_params = [{transform_indices = @transform_0, window_bounds = array<i64: 128, 16>}, {pipeline_mode = #tpu.pipeline_mode<synchronous>, transform_indices = @transform_1, window_bounds = array<i64: 1, 16>}, {pipeline_mode = #tpu.pipeline_mode<synchronous>, transform_indices = @transform_2, window_bounds = array<i64: 1, 16>}]} {
    %c0_i32 = arith.constant 0 : i32
    %0 = arith.cmpi eq, %arg0, %c0_i32 : i32
    %1 = arith.extui %0 : i1 to i32
    %c0_i32_0 = arith.constant 0 : i32
    %2 = arith.cmpi ne, %1, %c0_i32_0 : i32
    scf.if %2 {
      %cst_13 = arith.constant 0.000000e+00 : f32
      %17 = vector.broadcast %cst_13 : f32 to vector<8x16xf32>
      %c0_14 = arith.constant 0 : index
      %c0_15 = arith.constant 0 : index
      %18 = vector.load %arg4[%c0_14, %c0_15] : memref<8x16xf32, #tpu.memory_space<vmem>>, vector<8x16xf32>
      tpu.vector_store %arg4[%c0_14, %c0_15], %17 {strides = array<i32>} : memref<8x16xf32, #tpu.memory_space<vmem>>, vector<8x16xf32>,
      %cst_16 = arith.constant 0.000000e+00 : f32
      %19 = vector.broadcast %cst_16 : f32 to vector<8x16xf32>
      %c0_17 = arith.constant 0 : index
      %c0_18 = arith.constant 0 : index
      %20 = vector.load %arg5[%c0_17, %c0_18] : memref<8x16xf32, #tpu.memory_space<vmem>>, vector<8x16xf32>
      tpu.vector_store %arg5[%c0_17, %c0_18], %19 {strides = array<i32>} : memref<8x16xf32, #tpu.memory_space<vmem>>, vector<8x16xf32>,
    } else {
    }
    %c0 = arith.constant 0 : index
    %c0_1 = arith.constant 0 : index
    %3 = vector.load %arg1[%c0, %c0_1] : memref<128x16xf32, #tpu.memory_space<vmem>>, vector<128x16xf32>
    %4 = vector.shape_cast %3 : vector<128x16xf32> to vector<16x8x16xf32>
    %c0_2 = arith.constant 0 : index
    %c0_3 = arith.constant 0 : index
    %5 = vector.load %arg4[%c0_2, %c0_3] : memref<8x16xf32, #tpu.memory_space<vmem>>, vector<8x16xf32>
    %cst = arith.constant dense<0.000000e+00> : vector<8x16xf32>
    %6 = vector.multi_reduction <add>, %4, %cst [0] : vector<16x8x16xf32> to vector<8x16xf32>
    %7 = arith.addf %5, %6 : vector<8x16xf32>
    %c0_4 = arith.constant 0 : index
    %c0_5 = arith.constant 0 : index
    %8 = vector.load %arg4[%c0_4, %c0_5] : memref<8x16xf32, #tpu.memory_space<vmem>>, vector<8x16xf32>
    tpu.vector_store %arg4[%c0_4, %c0_5], %7 {strides = array<i32>} : memref<8x16xf32, #tpu.memory_space<vmem>>, vector<8x16xf32>,
    %c0_6 = arith.constant 0 : index
    %c0_7 = arith.constant 0 : index
    %9 = vector.load %arg5[%c0_6, %c0_7] : memref<8x16xf32, #tpu.memory_space<vmem>>, vector<8x16xf32>
    %10 = arith.mulf %4, %4 : vector<16x8x16xf32>
    %cst_8 = arith.constant dense<0.000000e+00> : vector<8x16xf32>
    %11 = vector.multi_reduction <add>, %10, %cst_8 [0] : vector<16x8x16xf32> to vector<8x16xf32>
    %12 = arith.addf %9, %11 : vector<8x16xf32>
    %c0_9 = arith.constant 0 : index
    %c0_10 = arith.constant 0 : index
    %13 = vector.load %arg5[%c0_9, %c0_10] : memref<8x16xf32, #tpu.memory_space<vmem>>, vector<8x16xf32>
    tpu.vector_store %arg5[%c0_9, %c0_10], %12 {strides = array<i32>} : memref<8x16xf32, #tpu.memory_space<vmem>>, vector<8x16xf32>,
    %c0_i32_11 = arith.constant 0 : i32
    %14 = arith.cmpi eq, %arg0, %c0_i32_11 : i32
    %15 = arith.extui %14 : i1 to i32
    %c0_i32_12 = arith.constant 0 : i32
    %16 = arith.cmpi ne, %15, %c0_i32_12 : i32
    scf.if %16 {
      %c0_13 = arith.constant 0 : index
      %c0_14 = arith.constant 0 : index
      %17 = vector.load %arg4[%c0_13, %c0_14] : memref<8x16xf32, #tpu.memory_space<vmem>>, vector<8x16xf32>
      %cst_15 = arith.constant dense<0.000000e+00> : vector<16xf32>
      %18 = vector.multi_reduction <add>, %17, %cst_15 [0] : vector<8x16xf32> to vector<16xf32>
      %19 = vector.shape_cast %18 : vector<16xf32> to vector<1x16xf32>
      %c0_16 = arith.constant 0 : index
      %c0_17 = arith.constant 0 : index
      %20 = vector.load %arg5[%c0_16, %c0_17] : memref<8x16xf32, #tpu.memory_space<vmem>>, vector<8x16xf32>
      %cst_18 = arith.constant dense<0.000000e+00> : vector<16xf32>
      %21 = vector.multi_reduction <add>, %20, %cst_18 [0] : vector<8x16xf32> to vector<16xf32>
      %22 = vector.shape_cast %21 : vector<16xf32> to vector<1x16xf32>
      %cst_19 = arith.constant 7.812500e-03 : f32
      %23 = vector.broadcast %cst_19 : f32 to vector<1x16xf32>
      %24 = arith.mulf %19, %23 : vector<1x16xf32>
      %cst_20 = arith.constant 7.812500e-03 : f32
      %25 = vector.broadcast %cst_20 : f32 to vector<1x16xf32>
      %26 = arith.mulf %22, %25 : vector<1x16xf32>
      %27 = arith.mulf %24, %24 : vector<1x16xf32>
      %28 = arith.subf %26, %27 : vector<1x16xf32>
      %cst_21 = arith.constant 0.000000e+00 : f32
      %29 = vector.broadcast %cst_21 : f32 to vector<1x16xf32>
      %30 = arith.maximumf %28, %29 : vector<1x16xf32>
      %c0_22 = arith.constant 0 : index
      %c0_23 = arith.constant 0 : index
      %31 = vector.load %arg2[%c0_22, %c0_23] : memref<1x16xf32, #tpu.memory_space<vmem>>, vector<1x16xf32>
      tpu.vector_store %arg2[%c0_22, %c0_23], %24 {strides = array<i32>} : memref<1x16xf32, #tpu.memory_space<vmem>>, vector<1x16xf32>,
      %cst_24 = arith.constant 9.99999974E-6 : f32
      %32 = vector.broadcast %cst_24 : f32 to vector<1x16xf32>
      %33 = arith.addf %30, %32 : vector<1x16xf32>
      %34 = math.rsqrt %33 : vector<1x16xf32>
      %c0_25 = arith.constant 0 : index
      %c0_26 = arith.constant 0 : index
      %35 = vector.load %arg3[%c0_25, %c0_26] : memref<1x16xf32, #tpu.memory_space<vmem>>, vector<1x16xf32>
      tpu.vector_store %arg3[%c0_25, %c0_26], %34 {strides = array<i32>} : memref<1x16xf32, #tpu.memory_space<vmem>>, vector<1x16xf32>,
    } else {
    }
    return
  }
  func.func @transform_0(%arg0: i32) -> (i32, i32) {
    %c0_i32 = arith.constant 0 : i32
    %c0_i32_0 = arith.constant 0 : i32
    return %arg0, %c0_i32 : i32, i32
  }
  func.func @transform_1(%arg0: i32) -> (i32, i32) {
    %c0_i32 = arith.constant 0 : i32
    %c0_i32_0 = arith.constant 0 : i32
    %c0_i32_1 = arith.constant 0 : i32
    return %c0_i32, %c0_i32_0 : i32, i32
  }
  func.func @transform_2(%arg0: i32) -> (i32, i32) {
    %c0_i32 = arith.constant 0 : i32
    %c0_i32_0 = arith.constant 0 : i32
    %c0_i32_1 = arith.constant 0 : i32
    return %c0_i32, %c0_i32_0 : i32, i32
  }
}

module attributes {stable_mosaic.version = 11 : i64} {
  func.func @_bn_stats_kernel(%arg0: i32, %arg1: memref<32x32xf32, #tpu.memory_space<vmem>>, %arg2: memref<1x32xf32, #tpu.memory_space<vmem>>, %arg3: memref<1x32xf32, #tpu.memory_space<vmem>>, %arg4: memref<8x32xf32, #tpu.memory_space<vmem>>, %arg5: memref<8x32xf32, #tpu.memory_space<vmem>>) attributes {dimension_semantics = [#tpu.dimension_semantics<arbitrary>], iteration_bounds = array<i64: 1>, scalar_prefetch = 0 : i64, scratch_operands = 2 : i64, tpu.core_type = #tpu.core_type<tc>, window_params = [{transform_indices = @transform_0, window_bounds = array<i64: 32, 32>}, {pipeline_mode = #tpu.pipeline_mode<synchronous>, transform_indices = @transform_1, window_bounds = array<i64: 1, 32>}, {pipeline_mode = #tpu.pipeline_mode<synchronous>, transform_indices = @transform_2, window_bounds = array<i64: 1, 32>}]} {
    %c0_i32 = arith.constant 0 : i32
    %0 = arith.cmpi eq, %arg0, %c0_i32 : i32
    %1 = arith.extui %0 : i1 to i32
    %c0_i32_0 = arith.constant 0 : i32
    %2 = arith.cmpi ne, %1, %c0_i32_0 : i32
    scf.if %2 {
      %cst_13 = arith.constant 0.000000e+00 : f32
      %17 = vector.broadcast %cst_13 : f32 to vector<8x32xf32>
      %c0_14 = arith.constant 0 : index
      %c0_15 = arith.constant 0 : index
      %18 = vector.load %arg4[%c0_14, %c0_15] : memref<8x32xf32, #tpu.memory_space<vmem>>, vector<8x32xf32>
      tpu.vector_store %arg4[%c0_14, %c0_15], %17 {strides = array<i32>} : memref<8x32xf32, #tpu.memory_space<vmem>>, vector<8x32xf32>,
      %cst_16 = arith.constant 0.000000e+00 : f32
      %19 = vector.broadcast %cst_16 : f32 to vector<8x32xf32>
      %c0_17 = arith.constant 0 : index
      %c0_18 = arith.constant 0 : index
      %20 = vector.load %arg5[%c0_17, %c0_18] : memref<8x32xf32, #tpu.memory_space<vmem>>, vector<8x32xf32>
      tpu.vector_store %arg5[%c0_17, %c0_18], %19 {strides = array<i32>} : memref<8x32xf32, #tpu.memory_space<vmem>>, vector<8x32xf32>,
    } else {
    }
    %c0 = arith.constant 0 : index
    %c0_1 = arith.constant 0 : index
    %3 = vector.load %arg1[%c0, %c0_1] : memref<32x32xf32, #tpu.memory_space<vmem>>, vector<32x32xf32>
    %4 = vector.shape_cast %3 : vector<32x32xf32> to vector<4x8x32xf32>
    %c0_2 = arith.constant 0 : index
    %c0_3 = arith.constant 0 : index
    %5 = vector.load %arg4[%c0_2, %c0_3] : memref<8x32xf32, #tpu.memory_space<vmem>>, vector<8x32xf32>
    %cst = arith.constant dense<0.000000e+00> : vector<8x32xf32>
    %6 = vector.multi_reduction <add>, %4, %cst [0] : vector<4x8x32xf32> to vector<8x32xf32>
    %7 = arith.addf %5, %6 : vector<8x32xf32>
    %c0_4 = arith.constant 0 : index
    %c0_5 = arith.constant 0 : index
    %8 = vector.load %arg4[%c0_4, %c0_5] : memref<8x32xf32, #tpu.memory_space<vmem>>, vector<8x32xf32>
    tpu.vector_store %arg4[%c0_4, %c0_5], %7 {strides = array<i32>} : memref<8x32xf32, #tpu.memory_space<vmem>>, vector<8x32xf32>,
    %c0_6 = arith.constant 0 : index
    %c0_7 = arith.constant 0 : index
    %9 = vector.load %arg5[%c0_6, %c0_7] : memref<8x32xf32, #tpu.memory_space<vmem>>, vector<8x32xf32>
    %10 = arith.mulf %4, %4 : vector<4x8x32xf32>
    %cst_8 = arith.constant dense<0.000000e+00> : vector<8x32xf32>
    %11 = vector.multi_reduction <add>, %10, %cst_8 [0] : vector<4x8x32xf32> to vector<8x32xf32>
    %12 = arith.addf %9, %11 : vector<8x32xf32>
    %c0_9 = arith.constant 0 : index
    %c0_10 = arith.constant 0 : index
    %13 = vector.load %arg5[%c0_9, %c0_10] : memref<8x32xf32, #tpu.memory_space<vmem>>, vector<8x32xf32>
    tpu.vector_store %arg5[%c0_9, %c0_10], %12 {strides = array<i32>} : memref<8x32xf32, #tpu.memory_space<vmem>>, vector<8x32xf32>,
    %c0_i32_11 = arith.constant 0 : i32
    %14 = arith.cmpi eq, %arg0, %c0_i32_11 : i32
    %15 = arith.extui %14 : i1 to i32
    %c0_i32_12 = arith.constant 0 : i32
    %16 = arith.cmpi ne, %15, %c0_i32_12 : i32
    scf.if %16 {
      %c0_13 = arith.constant 0 : index
      %c0_14 = arith.constant 0 : index
      %17 = vector.load %arg4[%c0_13, %c0_14] : memref<8x32xf32, #tpu.memory_space<vmem>>, vector<8x32xf32>
      %cst_15 = arith.constant dense<0.000000e+00> : vector<32xf32>
      %18 = vector.multi_reduction <add>, %17, %cst_15 [0] : vector<8x32xf32> to vector<32xf32>
      %19 = vector.shape_cast %18 : vector<32xf32> to vector<1x32xf32>
      %c0_16 = arith.constant 0 : index
      %c0_17 = arith.constant 0 : index
      %20 = vector.load %arg5[%c0_16, %c0_17] : memref<8x32xf32, #tpu.memory_space<vmem>>, vector<8x32xf32>
      %cst_18 = arith.constant dense<0.000000e+00> : vector<32xf32>
      %21 = vector.multi_reduction <add>, %20, %cst_18 [0] : vector<8x32xf32> to vector<32xf32>
      %22 = vector.shape_cast %21 : vector<32xf32> to vector<1x32xf32>
      %cst_19 = arith.constant 3.125000e-02 : f32
      %23 = vector.broadcast %cst_19 : f32 to vector<1x32xf32>
      %24 = arith.mulf %19, %23 : vector<1x32xf32>
      %cst_20 = arith.constant 3.125000e-02 : f32
      %25 = vector.broadcast %cst_20 : f32 to vector<1x32xf32>
      %26 = arith.mulf %22, %25 : vector<1x32xf32>
      %27 = arith.mulf %24, %24 : vector<1x32xf32>
      %28 = arith.subf %26, %27 : vector<1x32xf32>
      %cst_21 = arith.constant 0.000000e+00 : f32
      %29 = vector.broadcast %cst_21 : f32 to vector<1x32xf32>
      %30 = arith.maximumf %28, %29 : vector<1x32xf32>
      %c0_22 = arith.constant 0 : index
      %c0_23 = arith.constant 0 : index
      %31 = vector.load %arg2[%c0_22, %c0_23] : memref<1x32xf32, #tpu.memory_space<vmem>>, vector<1x32xf32>
      tpu.vector_store %arg2[%c0_22, %c0_23], %24 {strides = array<i32>} : memref<1x32xf32, #tpu.memory_space<vmem>>, vector<1x32xf32>,
      %cst_24 = arith.constant 9.99999974E-6 : f32
      %32 = vector.broadcast %cst_24 : f32 to vector<1x32xf32>
      %33 = arith.addf %30, %32 : vector<1x32xf32>
      %34 = math.rsqrt %33 : vector<1x32xf32>
      %c0_25 = arith.constant 0 : index
      %c0_26 = arith.constant 0 : index
      %35 = vector.load %arg3[%c0_25, %c0_26] : memref<1x32xf32, #tpu.memory_space<vmem>>, vector<1x32xf32>
      tpu.vector_store %arg3[%c0_25, %c0_26], %34 {strides = array<i32>} : memref<1x32xf32, #tpu.memory_space<vmem>>, vector<1x32xf32>,
    } else {
    }
    return
  }
  func.func @transform_0(%arg0: i32) -> (i32, i32) {
    %c0_i32 = arith.constant 0 : i32
    %c0_i32_0 = arith.constant 0 : i32
    return %arg0, %c0_i32 : i32, i32
  }
  func.func @transform_1(%arg0: i32) -> (i32, i32) {
    %c0_i32 = arith.constant 0 : i32
    %c0_i32_0 = arith.constant 0 : i32
    %c0_i32_1 = arith.constant 0 : i32
    return %c0_i32, %c0_i32_0 : i32, i32
  }
  func.func @transform_2(%arg0: i32) -> (i32, i32) {
    %c0_i32 = arith.constant 0 : i32
    %c0_i32_0 = arith.constant 0 : i32
    %c0_i32_1 = arith.constant 0 : i32
    return %c0_i32, %c0_i32_0 : i32, i32
  }
}

module attributes {stable_mosaic.version = 11 : i64} {
  func.func @_fused_gemm_kernel(%arg0: i32, %arg1: i32, %arg2: i32, %arg3: i32, %arg4: memref<1x32x256xbf16, #tpu.memory_space<vmem>>, %arg5: memref<1x256xf32, #tpu.memory_space<vmem>>, %arg6: memref<1x256xf32, #tpu.memory_space<vmem>>, %arg7: memref<1x256x128xbf16, #tpu.memory_space<vmem>>, %arg8: memref<1x128xf32, #tpu.memory_space<vmem>>, %arg9: memref<1x32x128xf32, #tpu.memory_space<vmem>>, %arg10: memref<32x128xf32, #tpu.memory_space<vmem>>) attributes {dimension_semantics = [#tpu.dimension_semantics<parallel>, #tpu.dimension_semantics<parallel>, #tpu.dimension_semantics<parallel>, #tpu.dimension_semantics<arbitrary>], iteration_bounds = array<i64: 1, 1, 1, 1>, scalar_prefetch = 0 : i64, scratch_operands = 1 : i64, tpu.core_type = #tpu.core_type<tc>, window_params = [{transform_indices = @transform_0, window_bounds = array<i64: 1, 32, 256>}, {transform_indices = @transform_1, window_bounds = array<i64: 1, 256>}, {transform_indices = @transform_2, window_bounds = array<i64: 1, 256>}, {transform_indices = @transform_3, window_bounds = array<i64: 1, 256, 128>}, {transform_indices = @transform_4, window_bounds = array<i64: 1, 128>}, {transform_indices = @transform_5, window_bounds = array<i64: 1, 32, 128>}]} {
    %c0_i32 = arith.constant 0 : i32
    %0 = arith.cmpi eq, %arg3, %c0_i32 : i32
    %1 = arith.extui %0 : i1 to i32
    %c0_i32_0 = arith.constant 0 : i32
    %2 = arith.cmpi ne, %1, %c0_i32_0 : i32
    scf.if %2 {
      %cst_18 = arith.constant 0.000000e+00 : f32
      %27 = vector.broadcast %cst_18 : f32 to vector<32x128xf32>
      %c0_19 = arith.constant 0 : index
      %c0_20 = arith.constant 0 : index
      %28 = vector.load %arg10[%c0_19, %c0_20] : memref<32x128xf32, #tpu.memory_space<vmem>>, vector<32x128xf32>
      tpu.vector_store %arg10[%c0_19, %c0_20], %27 {strides = array<i32>} : memref<32x128xf32, #tpu.memory_space<vmem>>, vector<32x128xf32>,
    } else {
    }
    %c0 = arith.constant 0 : index
    %c0_1 = arith.constant 0 : index
    %c0_2 = arith.constant 0 : index
    %3 = vector.load %arg4[%c0, %c0_1, %c0_2] : memref<1x32x256xbf16, #tpu.memory_space<vmem>>, vector<1x32x256xbf16>
    %4 = vector.shape_cast %3 : vector<1x32x256xbf16> to vector<32x256xbf16>
    %5 = arith.extf %4 : vector<32x256xbf16> to vector<32x256xf32>
    %c0_3 = arith.constant 0 : index
    %c0_4 = arith.constant 0 : index
    %6 = vector.load %arg5[%c0_3, %c0_4] : memref<1x256xf32, #tpu.memory_space<vmem>>, vector<1x256xf32>
    %7 = vector.broadcast %6 : vector<1x256xf32> to vector<32x256xf32>
    %8 = arith.mulf %5, %7 : vector<32x256xf32>
    %c0_5 = arith.constant 0 : index
    %c0_6 = arith.constant 0 : index
    %9 = vector.load %arg6[%c0_5, %c0_6] : memref<1x256xf32, #tpu.memory_space<vmem>>, vector<1x256xf32>
    %10 = vector.broadcast %9 : vector<1x256xf32> to vector<32x256xf32>
    %11 = arith.addf %8, %10 : vector<32x256xf32>
    %cst = arith.constant 0.000000e+00 : f32
    %12 = vector.broadcast %cst : f32 to vector<32x256xf32>
    %13 = arith.cmpf oge, %11, %12 : vector<32x256xf32>
    %cst_7 = arith.constant 2.000000e-01 : f32
    %14 = vector.broadcast %cst_7 : f32 to vector<32x256xf32>
    %15 = arith.mulf %14, %11 : vector<32x256xf32>
    %16 = arith.select %13, %11, %15 : vector<32x256xi1>, vector<32x256xf32>
    %c0_8 = arith.constant 0 : index
    %c0_9 = arith.constant 0 : index
    %17 = vector.load %arg10[%c0_8, %c0_9] : memref<32x128xf32, #tpu.memory_space<vmem>>, vector<32x128xf32>
    %18 = arith.truncf %16 : vector<32x256xf32> to vector<32x256xbf16>
    %c0_10 = arith.constant 0 : index
    %c0_11 = arith.constant 0 : index
    %c0_12 = arith.constant 0 : index
    %19 = vector.load %arg7[%c0_10, %c0_11, %c0_12] : memref<1x256x128xbf16, #tpu.memory_space<vmem>>, vector<1x256x128xbf16>
    %20 = vector.shape_cast %19 : vector<1x256x128xbf16> to vector<256x128xbf16>
    %cst_13 = arith.constant dense<0.000000e+00> : vector<32x128xf32>
    %21 = tpu.matmul %18, %20, %cst_13 {dimension_numbers = #tpu.dot_dimension_numbers<[1], [0], [0], [1], [0, 0, 1, 1], [], []>} : vector<32x256xbf16>, vector<256x128xbf16>, vector<32x128xf32> -> vector<32x128xf32>
    %22 = arith.addf %17, %21 : vector<32x128xf32>
    %c0_14 = arith.constant 0 : index
    %c0_15 = arith.constant 0 : index
    %23 = vector.load %arg10[%c0_14, %c0_15] : memref<32x128xf32, #tpu.memory_space<vmem>>, vector<32x128xf32>
    tpu.vector_store %arg10[%c0_14, %c0_15], %22 {strides = array<i32>} : memref<32x128xf32, #tpu.memory_space<vmem>>, vector<32x128xf32>,
    %c0_i32_16 = arith.constant 0 : i32
    %24 = arith.cmpi eq, %arg3, %c0_i32_16 : i32
    %25 = arith.extui %24 : i1 to i32
    %c0_i32_17 = arith.constant 0 : i32
    %26 = arith.cmpi ne, %25, %c0_i32_17 : i32
    scf.if %26 {
      %c0_18 = arith.constant 0 : index
      %c0_19 = arith.constant 0 : index
      %27 = vector.load %arg10[%c0_18, %c0_19] : memref<32x128xf32, #tpu.memory_space<vmem>>, vector<32x128xf32>
      %c0_20 = arith.constant 0 : index
      %c0_21 = arith.constant 0 : index
      %28 = vector.load %arg8[%c0_20, %c0_21] : memref<1x128xf32, #tpu.memory_space<vmem>>, vector<1x128xf32>
      %29 = vector.broadcast %28 : vector<1x128xf32> to vector<32x128xf32>
      %30 = arith.addf %27, %29 : vector<32x128xf32>
      %c0_22 = arith.constant 0 : index
      %c0_23 = arith.constant 0 : index
      %c0_24 = arith.constant 0 : index
      %31 = vector.load %arg9[%c0_22, %c0_23, %c0_24] : memref<1x32x128xf32, #tpu.memory_space<vmem>>, vector<1x32x128xf32>
      %32 = vector.shape_cast %31 : vector<1x32x128xf32> to vector<32x128xf32>
      %33 = vector.shape_cast %30 : vector<32x128xf32> to vector<1x32x128xf32>
      tpu.vector_store %arg9[%c0_22, %c0_23, %c0_24], %33 {strides = array<i32>} : memref<1x32x128xf32, #tpu.memory_space<vmem>>, vector<1x32x128xf32>,
    } else {
    }
    return
  }
  func.func @transform_0(%arg0: i32, %arg1: i32, %arg2: i32, %arg3: i32) -> (i32, i32, i32) {
    %c0_i32 = arith.constant 0 : i32
    return %arg0, %arg1, %arg3 : i32, i32, i32
  }
  func.func @transform_1(%arg0: i32, %arg1: i32, %arg2: i32, %arg3: i32) -> (i32, i32) {
    %c0_i32 = arith.constant 0 : i32
    %c0_i32_0 = arith.constant 0 : i32
    return %c0_i32, %arg3 : i32, i32
  }
  func.func @transform_2(%arg0: i32, %arg1: i32, %arg2: i32, %arg3: i32) -> (i32, i32) {
    %c0_i32 = arith.constant 0 : i32
    %c0_i32_0 = arith.constant 0 : i32
    return %c0_i32, %arg3 : i32, i32
  }
  func.func @transform_3(%arg0: i32, %arg1: i32, %arg2: i32, %arg3: i32) -> (i32, i32, i32) {
    %c0_i32 = arith.constant 0 : i32
    return %arg0, %arg3, %arg2 : i32, i32, i32
  }
  func.func @transform_4(%arg0: i32, %arg1: i32, %arg2: i32, %arg3: i32) -> (i32, i32) {
    %c0_i32 = arith.constant 0 : i32
    %c0_i32_0 = arith.constant 0 : i32
    return %c0_i32, %arg2 : i32, i32
  }
  func.func @transform_5(%arg0: i32, %arg1: i32, %arg2: i32, %arg3: i32) -> (i32, i32, i32) {
    %c0_i32 = arith.constant 0 : i32
    return %arg0, %arg1, %arg2 : i32, i32, i32
  }
}

module attributes {stable_mosaic.version = 11 : i64} {
  func.func @_fused_gemm_kernel(%arg0: i32, %arg1: i32, %arg2: i32, %arg3: i32, %arg4: memref<1x8x512xbf16, #tpu.memory_space<vmem>>, %arg5: memref<1x512xf32, #tpu.memory_space<vmem>>, %arg6: memref<1x512xf32, #tpu.memory_space<vmem>>, %arg7: memref<1x512x128xbf16, #tpu.memory_space<vmem>>, %arg8: memref<1x128xf32, #tpu.memory_space<vmem>>, %arg9: memref<1x8x128xf32, #tpu.memory_space<vmem>>, %arg10: memref<8x128xf32, #tpu.memory_space<vmem>>) attributes {dimension_semantics = [#tpu.dimension_semantics<parallel>, #tpu.dimension_semantics<parallel>, #tpu.dimension_semantics<parallel>, #tpu.dimension_semantics<arbitrary>], iteration_bounds = array<i64: 1, 1, 1, 1>, scalar_prefetch = 0 : i64, scratch_operands = 1 : i64, tpu.core_type = #tpu.core_type<tc>, window_params = [{transform_indices = @transform_0, window_bounds = array<i64: 1, 8, 512>}, {transform_indices = @transform_1, window_bounds = array<i64: 1, 512>}, {transform_indices = @transform_2, window_bounds = array<i64: 1, 512>}, {transform_indices = @transform_3, window_bounds = array<i64: 1, 512, 128>}, {transform_indices = @transform_4, window_bounds = array<i64: 1, 128>}, {transform_indices = @transform_5, window_bounds = array<i64: 1, 8, 128>}]} {
    %c0_i32 = arith.constant 0 : i32
    %0 = arith.cmpi eq, %arg3, %c0_i32 : i32
    %1 = arith.extui %0 : i1 to i32
    %c0_i32_0 = arith.constant 0 : i32
    %2 = arith.cmpi ne, %1, %c0_i32_0 : i32
    scf.if %2 {
      %cst_18 = arith.constant 0.000000e+00 : f32
      %27 = vector.broadcast %cst_18 : f32 to vector<8x128xf32>
      %c0_19 = arith.constant 0 : index
      %c0_20 = arith.constant 0 : index
      %28 = vector.load %arg10[%c0_19, %c0_20] : memref<8x128xf32, #tpu.memory_space<vmem>>, vector<8x128xf32>
      tpu.vector_store %arg10[%c0_19, %c0_20], %27 {strides = array<i32>} : memref<8x128xf32, #tpu.memory_space<vmem>>, vector<8x128xf32>,
    } else {
    }
    %c0 = arith.constant 0 : index
    %c0_1 = arith.constant 0 : index
    %c0_2 = arith.constant 0 : index
    %3 = vector.load %arg4[%c0, %c0_1, %c0_2] : memref<1x8x512xbf16, #tpu.memory_space<vmem>>, vector<1x8x512xbf16>
    %4 = vector.shape_cast %3 : vector<1x8x512xbf16> to vector<8x512xbf16>
    %5 = arith.extf %4 : vector<8x512xbf16> to vector<8x512xf32>
    %c0_3 = arith.constant 0 : index
    %c0_4 = arith.constant 0 : index
    %6 = vector.load %arg5[%c0_3, %c0_4] : memref<1x512xf32, #tpu.memory_space<vmem>>, vector<1x512xf32>
    %7 = vector.broadcast %6 : vector<1x512xf32> to vector<8x512xf32>
    %8 = arith.mulf %5, %7 : vector<8x512xf32>
    %c0_5 = arith.constant 0 : index
    %c0_6 = arith.constant 0 : index
    %9 = vector.load %arg6[%c0_5, %c0_6] : memref<1x512xf32, #tpu.memory_space<vmem>>, vector<1x512xf32>
    %10 = vector.broadcast %9 : vector<1x512xf32> to vector<8x512xf32>
    %11 = arith.addf %8, %10 : vector<8x512xf32>
    %cst = arith.constant 0.000000e+00 : f32
    %12 = vector.broadcast %cst : f32 to vector<8x512xf32>
    %13 = arith.cmpf oge, %11, %12 : vector<8x512xf32>
    %cst_7 = arith.constant 2.000000e-01 : f32
    %14 = vector.broadcast %cst_7 : f32 to vector<8x512xf32>
    %15 = arith.mulf %14, %11 : vector<8x512xf32>
    %16 = arith.select %13, %11, %15 : vector<8x512xi1>, vector<8x512xf32>
    %c0_8 = arith.constant 0 : index
    %c0_9 = arith.constant 0 : index
    %17 = vector.load %arg10[%c0_8, %c0_9] : memref<8x128xf32, #tpu.memory_space<vmem>>, vector<8x128xf32>
    %18 = arith.truncf %16 : vector<8x512xf32> to vector<8x512xbf16>
    %c0_10 = arith.constant 0 : index
    %c0_11 = arith.constant 0 : index
    %c0_12 = arith.constant 0 : index
    %19 = vector.load %arg7[%c0_10, %c0_11, %c0_12] : memref<1x512x128xbf16, #tpu.memory_space<vmem>>, vector<1x512x128xbf16>
    %20 = vector.shape_cast %19 : vector<1x512x128xbf16> to vector<512x128xbf16>
    %cst_13 = arith.constant dense<0.000000e+00> : vector<8x128xf32>
    %21 = tpu.matmul %18, %20, %cst_13 {dimension_numbers = #tpu.dot_dimension_numbers<[1], [0], [0], [1], [0, 0, 1, 1], [], []>} : vector<8x512xbf16>, vector<512x128xbf16>, vector<8x128xf32> -> vector<8x128xf32>
    %22 = arith.addf %17, %21 : vector<8x128xf32>
    %c0_14 = arith.constant 0 : index
    %c0_15 = arith.constant 0 : index
    %23 = vector.load %arg10[%c0_14, %c0_15] : memref<8x128xf32, #tpu.memory_space<vmem>>, vector<8x128xf32>
    tpu.vector_store %arg10[%c0_14, %c0_15], %22 {strides = array<i32>} : memref<8x128xf32, #tpu.memory_space<vmem>>, vector<8x128xf32>,
    %c0_i32_16 = arith.constant 0 : i32
    %24 = arith.cmpi eq, %arg3, %c0_i32_16 : i32
    %25 = arith.extui %24 : i1 to i32
    %c0_i32_17 = arith.constant 0 : i32
    %26 = arith.cmpi ne, %25, %c0_i32_17 : i32
    scf.if %26 {
      %c0_18 = arith.constant 0 : index
      %c0_19 = arith.constant 0 : index
      %27 = vector.load %arg10[%c0_18, %c0_19] : memref<8x128xf32, #tpu.memory_space<vmem>>, vector<8x128xf32>
      %c0_20 = arith.constant 0 : index
      %c0_21 = arith.constant 0 : index
      %28 = vector.load %arg8[%c0_20, %c0_21] : memref<1x128xf32, #tpu.memory_space<vmem>>, vector<1x128xf32>
      %29 = vector.broadcast %28 : vector<1x128xf32> to vector<8x128xf32>
      %30 = arith.addf %27, %29 : vector<8x128xf32>
      %c0_22 = arith.constant 0 : index
      %c0_23 = arith.constant 0 : index
      %c0_24 = arith.constant 0 : index
      %31 = vector.load %arg9[%c0_22, %c0_23, %c0_24] : memref<1x8x128xf32, #tpu.memory_space<vmem>>, vector<1x8x128xf32>
      %32 = vector.shape_cast %31 : vector<1x8x128xf32> to vector<8x128xf32>
      %33 = vector.shape_cast %30 : vector<8x128xf32> to vector<1x8x128xf32>
      tpu.vector_store %arg9[%c0_22, %c0_23, %c0_24], %33 {strides = array<i32>} : memref<1x8x128xf32, #tpu.memory_space<vmem>>, vector<1x8x128xf32>,
    } else {
    }
    return
  }
  func.func @transform_0(%arg0: i32, %arg1: i32, %arg2: i32, %arg3: i32) -> (i32, i32, i32) {
    %c0_i32 = arith.constant 0 : i32
    return %arg0, %arg1, %arg3 : i32, i32, i32
  }
  func.func @transform_1(%arg0: i32, %arg1: i32, %arg2: i32, %arg3: i32) -> (i32, i32) {
    %c0_i32 = arith.constant 0 : i32
    %c0_i32_0 = arith.constant 0 : i32
    return %c0_i32, %arg3 : i32, i32
  }
  func.func @transform_2(%arg0: i32, %arg1: i32, %arg2: i32, %arg3: i32) -> (i32, i32) {
    %c0_i32 = arith.constant 0 : i32
    %c0_i32_0 = arith.constant 0 : i32
    return %c0_i32, %arg3 : i32, i32
  }
  func.func @transform_3(%arg0: i32, %arg1: i32, %arg2: i32, %arg3: i32) -> (i32, i32, i32) {
    %c0_i32 = arith.constant 0 : i32
    return %arg0, %arg3, %arg2 : i32, i32, i32
  }
  func.func @transform_4(%arg0: i32, %arg1: i32, %arg2: i32, %arg3: i32) -> (i32, i32) {
    %c0_i32 = arith.constant 0 : i32
    %c0_i32_0 = arith.constant 0 : i32
    return %c0_i32, %arg2 : i32, i32
  }
  func.func @transform_5(%arg0: i32, %arg1: i32, %arg2: i32, %arg3: i32) -> (i32, i32, i32) {
    %c0_i32 = arith.constant 0 : i32
    return %arg0, %arg1, %arg2 : i32, i32, i32
  }
}

module attributes {stable_mosaic.version = 11 : i64} {
  func.func @_bn_stats_kernel(%arg0: i32, %arg1: memref<8x64xf32, #tpu.memory_space<vmem>>, %arg2: memref<1x64xf32, #tpu.memory_space<vmem>>, %arg3: memref<1x64xf32, #tpu.memory_space<vmem>>, %arg4: memref<8x64xf32, #tpu.memory_space<vmem>>, %arg5: memref<8x64xf32, #tpu.memory_space<vmem>>) attributes {dimension_semantics = [#tpu.dimension_semantics<arbitrary>], iteration_bounds = array<i64: 1>, scalar_prefetch = 0 : i64, scratch_operands = 2 : i64, tpu.core_type = #tpu.core_type<tc>, window_params = [{transform_indices = @transform_0, window_bounds = array<i64: 8, 64>}, {pipeline_mode = #tpu.pipeline_mode<synchronous>, transform_indices = @transform_1, window_bounds = array<i64: 1, 64>}, {pipeline_mode = #tpu.pipeline_mode<synchronous>, transform_indices = @transform_2, window_bounds = array<i64: 1, 64>}]} {
    %c0_i32 = arith.constant 0 : i32
    %0 = arith.cmpi eq, %arg0, %c0_i32 : i32
    %1 = arith.extui %0 : i1 to i32
    %c0_i32_0 = arith.constant 0 : i32
    %2 = arith.cmpi ne, %1, %c0_i32_0 : i32
    scf.if %2 {
      %cst_13 = arith.constant 0.000000e+00 : f32
      %17 = vector.broadcast %cst_13 : f32 to vector<8x64xf32>
      %c0_14 = arith.constant 0 : index
      %c0_15 = arith.constant 0 : index
      %18 = vector.load %arg4[%c0_14, %c0_15] : memref<8x64xf32, #tpu.memory_space<vmem>>, vector<8x64xf32>
      tpu.vector_store %arg4[%c0_14, %c0_15], %17 {strides = array<i32>} : memref<8x64xf32, #tpu.memory_space<vmem>>, vector<8x64xf32>,
      %cst_16 = arith.constant 0.000000e+00 : f32
      %19 = vector.broadcast %cst_16 : f32 to vector<8x64xf32>
      %c0_17 = arith.constant 0 : index
      %c0_18 = arith.constant 0 : index
      %20 = vector.load %arg5[%c0_17, %c0_18] : memref<8x64xf32, #tpu.memory_space<vmem>>, vector<8x64xf32>
      tpu.vector_store %arg5[%c0_17, %c0_18], %19 {strides = array<i32>} : memref<8x64xf32, #tpu.memory_space<vmem>>, vector<8x64xf32>,
    } else {
    }
    %c0 = arith.constant 0 : index
    %c0_1 = arith.constant 0 : index
    %3 = vector.load %arg1[%c0, %c0_1] : memref<8x64xf32, #tpu.memory_space<vmem>>, vector<8x64xf32>
    %4 = vector.shape_cast %3 : vector<8x64xf32> to vector<1x8x64xf32>
    %c0_2 = arith.constant 0 : index
    %c0_3 = arith.constant 0 : index
    %5 = vector.load %arg4[%c0_2, %c0_3] : memref<8x64xf32, #tpu.memory_space<vmem>>, vector<8x64xf32>
    %cst = arith.constant dense<0.000000e+00> : vector<8x64xf32>
    %6 = vector.multi_reduction <add>, %4, %cst [0] : vector<1x8x64xf32> to vector<8x64xf32>
    %7 = arith.addf %5, %6 : vector<8x64xf32>
    %c0_4 = arith.constant 0 : index
    %c0_5 = arith.constant 0 : index
    %8 = vector.load %arg4[%c0_4, %c0_5] : memref<8x64xf32, #tpu.memory_space<vmem>>, vector<8x64xf32>
    tpu.vector_store %arg4[%c0_4, %c0_5], %7 {strides = array<i32>} : memref<8x64xf32, #tpu.memory_space<vmem>>, vector<8x64xf32>,
    %c0_6 = arith.constant 0 : index
    %c0_7 = arith.constant 0 : index
    %9 = vector.load %arg5[%c0_6, %c0_7] : memref<8x64xf32, #tpu.memory_space<vmem>>, vector<8x64xf32>
    %10 = arith.mulf %4, %4 : vector<1x8x64xf32>
    %cst_8 = arith.constant dense<0.000000e+00> : vector<8x64xf32>
    %11 = vector.multi_reduction <add>, %10, %cst_8 [0] : vector<1x8x64xf32> to vector<8x64xf32>
    %12 = arith.addf %9, %11 : vector<8x64xf32>
    %c0_9 = arith.constant 0 : index
    %c0_10 = arith.constant 0 : index
    %13 = vector.load %arg5[%c0_9, %c0_10] : memref<8x64xf32, #tpu.memory_space<vmem>>, vector<8x64xf32>
    tpu.vector_store %arg5[%c0_9, %c0_10], %12 {strides = array<i32>} : memref<8x64xf32, #tpu.memory_space<vmem>>, vector<8x64xf32>,
    %c0_i32_11 = arith.constant 0 : i32
    %14 = arith.cmpi eq, %arg0, %c0_i32_11 : i32
    %15 = arith.extui %14 : i1 to i32
    %c0_i32_12 = arith.constant 0 : i32
    %16 = arith.cmpi ne, %15, %c0_i32_12 : i32
    scf.if %16 {
      %c0_13 = arith.constant 0 : index
      %c0_14 = arith.constant 0 : index
      %17 = vector.load %arg4[%c0_13, %c0_14] : memref<8x64xf32, #tpu.memory_space<vmem>>, vector<8x64xf32>
      %cst_15 = arith.constant dense<0.000000e+00> : vector<64xf32>
      %18 = vector.multi_reduction <add>, %17, %cst_15 [0] : vector<8x64xf32> to vector<64xf32>
      %19 = vector.shape_cast %18 : vector<64xf32> to vector<1x64xf32>
      %c0_16 = arith.constant 0 : index
      %c0_17 = arith.constant 0 : index
      %20 = vector.load %arg5[%c0_16, %c0_17] : memref<8x64xf32, #tpu.memory_space<vmem>>, vector<8x64xf32>
      %cst_18 = arith.constant dense<0.000000e+00> : vector<64xf32>
      %21 = vector.multi_reduction <add>, %20, %cst_18 [0] : vector<8x64xf32> to vector<64xf32>
      %22 = vector.shape_cast %21 : vector<64xf32> to vector<1x64xf32>
      %cst_19 = arith.constant 1.250000e-01 : f32
      %23 = vector.broadcast %cst_19 : f32 to vector<1x64xf32>
      %24 = arith.mulf %19, %23 : vector<1x64xf32>
      %cst_20 = arith.constant 1.250000e-01 : f32
      %25 = vector.broadcast %cst_20 : f32 to vector<1x64xf32>
      %26 = arith.mulf %22, %25 : vector<1x64xf32>
      %27 = arith.mulf %24, %24 : vector<1x64xf32>
      %28 = arith.subf %26, %27 : vector<1x64xf32>
      %cst_21 = arith.constant 0.000000e+00 : f32
      %29 = vector.broadcast %cst_21 : f32 to vector<1x64xf32>
      %30 = arith.maximumf %28, %29 : vector<1x64xf32>
      %c0_22 = arith.constant 0 : index
      %c0_23 = arith.constant 0 : index
      %31 = vector.load %arg2[%c0_22, %c0_23] : memref<1x64xf32, #tpu.memory_space<vmem>>, vector<1x64xf32>
      tpu.vector_store %arg2[%c0_22, %c0_23], %24 {strides = array<i32>} : memref<1x64xf32, #tpu.memory_space<vmem>>, vector<1x64xf32>,
      %cst_24 = arith.constant 9.99999974E-6 : f32
      %32 = vector.broadcast %cst_24 : f32 to vector<1x64xf32>
      %33 = arith.addf %30, %32 : vector<1x64xf32>
      %34 = math.rsqrt %33 : vector<1x64xf32>
      %c0_25 = arith.constant 0 : index
      %c0_26 = arith.constant 0 : index
      %35 = vector.load %arg3[%c0_25, %c0_26] : memref<1x64xf32, #tpu.memory_space<vmem>>, vector<1x64xf32>
      tpu.vector_store %arg3[%c0_25, %c0_26], %34 {strides = array<i32>} : memref<1x64xf32, #tpu.memory_space<vmem>>, vector<1x64xf32>,
    } else {
    }
    return
  }
  func.func @transform_0(%arg0: i32) -> (i32, i32) {
    %c0_i32 = arith.constant 0 : i32
    %c0_i32_0 = arith.constant 0 : i32
    return %arg0, %c0_i32 : i32, i32
  }
  func.func @transform_1(%arg0: i32) -> (i32, i32) {
    %c0_i32 = arith.constant 0 : i32
    %c0_i32_0 = arith.constant 0 : i32
    %c0_i32_1 = arith.constant 0 : i32
    return %c0_i32, %c0_i32_0 : i32, i32
  }
  func.func @transform_2(%arg0: i32) -> (i32, i32) {
    %c0_i32 = arith.constant 0 : i32
    %c0_i32_0 = arith.constant 0 : i32
    %c0_i32_1 = arith.constant 0 : i32
    return %c0_i32, %c0_i32_0 : i32, i32
  }
}

module attributes {stable_mosaic.version = 11 : i64} {
  func.func @_fused_gemm_kernel(%arg0: i32, %arg1: i32, %arg2: i32, %arg3: i32, %arg4: memref<1x8x1024xbf16, #tpu.memory_space<vmem>>, %arg5: memref<1x1024xf32, #tpu.memory_space<vmem>>, %arg6: memref<1x1024xf32, #tpu.memory_space<vmem>>, %arg7: memref<1x1024x128xbf16, #tpu.memory_space<vmem>>, %arg8: memref<1x128xf32, #tpu.memory_space<vmem>>, %arg9: memref<1x8x128xf32, #tpu.memory_space<vmem>>, %arg10: memref<8x128xf32, #tpu.memory_space<vmem>>) attributes {dimension_semantics = [#tpu.dimension_semantics<parallel>, #tpu.dimension_semantics<parallel>, #tpu.dimension_semantics<parallel>, #tpu.dimension_semantics<arbitrary>], iteration_bounds = array<i64: 1, 1, 1, 1>, scalar_prefetch = 0 : i64, scratch_operands = 1 : i64, tpu.core_type = #tpu.core_type<tc>, window_params = [{transform_indices = @transform_0, window_bounds = array<i64: 1, 8, 1024>}, {transform_indices = @transform_1, window_bounds = array<i64: 1, 1024>}, {transform_indices = @transform_2, window_bounds = array<i64: 1, 1024>}, {transform_indices = @transform_3, window_bounds = array<i64: 1, 1024, 128>}, {transform_indices = @transform_4, window_bounds = array<i64: 1, 128>}, {transform_indices = @transform_5, window_bounds = array<i64: 1, 8, 128>}]} {
    %c0_i32 = arith.constant 0 : i32
    %0 = arith.cmpi eq, %arg3, %c0_i32 : i32
    %1 = arith.extui %0 : i1 to i32
    %c0_i32_0 = arith.constant 0 : i32
    %2 = arith.cmpi ne, %1, %c0_i32_0 : i32
    scf.if %2 {
      %cst_18 = arith.constant 0.000000e+00 : f32
      %27 = vector.broadcast %cst_18 : f32 to vector<8x128xf32>
      %c0_19 = arith.constant 0 : index
      %c0_20 = arith.constant 0 : index
      %28 = vector.load %arg10[%c0_19, %c0_20] : memref<8x128xf32, #tpu.memory_space<vmem>>, vector<8x128xf32>
      tpu.vector_store %arg10[%c0_19, %c0_20], %27 {strides = array<i32>} : memref<8x128xf32, #tpu.memory_space<vmem>>, vector<8x128xf32>,
    } else {
    }
    %c0 = arith.constant 0 : index
    %c0_1 = arith.constant 0 : index
    %c0_2 = arith.constant 0 : index
    %3 = vector.load %arg4[%c0, %c0_1, %c0_2] : memref<1x8x1024xbf16, #tpu.memory_space<vmem>>, vector<1x8x1024xbf16>
    %4 = vector.shape_cast %3 : vector<1x8x1024xbf16> to vector<8x1024xbf16>
    %5 = arith.extf %4 : vector<8x1024xbf16> to vector<8x1024xf32>
    %c0_3 = arith.constant 0 : index
    %c0_4 = arith.constant 0 : index
    %6 = vector.load %arg5[%c0_3, %c0_4] : memref<1x1024xf32, #tpu.memory_space<vmem>>, vector<1x1024xf32>
    %7 = vector.broadcast %6 : vector<1x1024xf32> to vector<8x1024xf32>
    %8 = arith.mulf %5, %7 : vector<8x1024xf32>
    %c0_5 = arith.constant 0 : index
    %c0_6 = arith.constant 0 : index
    %9 = vector.load %arg6[%c0_5, %c0_6] : memref<1x1024xf32, #tpu.memory_space<vmem>>, vector<1x1024xf32>
    %10 = vector.broadcast %9 : vector<1x1024xf32> to vector<8x1024xf32>
    %11 = arith.addf %8, %10 : vector<8x1024xf32>
    %cst = arith.constant 0.000000e+00 : f32
    %12 = vector.broadcast %cst : f32 to vector<8x1024xf32>
    %13 = arith.cmpf oge, %11, %12 : vector<8x1024xf32>
    %cst_7 = arith.constant 2.000000e-01 : f32
    %14 = vector.broadcast %cst_7 : f32 to vector<8x1024xf32>
    %15 = arith.mulf %14, %11 : vector<8x1024xf32>
    %16 = arith.select %13, %11, %15 : vector<8x1024xi1>, vector<8x1024xf32>
    %c0_8 = arith.constant 0 : index
    %c0_9 = arith.constant 0 : index
    %17 = vector.load %arg10[%c0_8, %c0_9] : memref<8x128xf32, #tpu.memory_space<vmem>>, vector<8x128xf32>
    %18 = arith.truncf %16 : vector<8x1024xf32> to vector<8x1024xbf16>
    %c0_10 = arith.constant 0 : index
    %c0_11 = arith.constant 0 : index
    %c0_12 = arith.constant 0 : index
    %19 = vector.load %arg7[%c0_10, %c0_11, %c0_12] : memref<1x1024x128xbf16, #tpu.memory_space<vmem>>, vector<1x1024x128xbf16>
    %20 = vector.shape_cast %19 : vector<1x1024x128xbf16> to vector<1024x128xbf16>
    %cst_13 = arith.constant dense<0.000000e+00> : vector<8x128xf32>
    %21 = tpu.matmul %18, %20, %cst_13 {dimension_numbers = #tpu.dot_dimension_numbers<[1], [0], [0], [1], [0, 0, 1, 1], [], []>} : vector<8x1024xbf16>, vector<1024x128xbf16>, vector<8x128xf32> -> vector<8x128xf32>
    %22 = arith.addf %17, %21 : vector<8x128xf32>
    %c0_14 = arith.constant 0 : index
    %c0_15 = arith.constant 0 : index
    %23 = vector.load %arg10[%c0_14, %c0_15] : memref<8x128xf32, #tpu.memory_space<vmem>>, vector<8x128xf32>
    tpu.vector_store %arg10[%c0_14, %c0_15], %22 {strides = array<i32>} : memref<8x128xf32, #tpu.memory_space<vmem>>, vector<8x128xf32>,
    %c0_i32_16 = arith.constant 0 : i32
    %24 = arith.cmpi eq, %arg3, %c0_i32_16 : i32
    %25 = arith.extui %24 : i1 to i32
    %c0_i32_17 = arith.constant 0 : i32
    %26 = arith.cmpi ne, %25, %c0_i32_17 : i32
    scf.if %26 {
      %c0_18 = arith.constant 0 : index
      %c0_19 = arith.constant 0 : index
      %27 = vector.load %arg10[%c0_18, %c0_19] : memref<8x128xf32, #tpu.memory_space<vmem>>, vector<8x128xf32>
      %c0_20 = arith.constant 0 : index
      %c0_21 = arith.constant 0 : index
      %28 = vector.load %arg8[%c0_20, %c0_21] : memref<1x128xf32, #tpu.memory_space<vmem>>, vector<1x128xf32>
      %29 = vector.broadcast %28 : vector<1x128xf32> to vector<8x128xf32>
      %30 = arith.addf %27, %29 : vector<8x128xf32>
      %c0_22 = arith.constant 0 : index
      %c0_23 = arith.constant 0 : index
      %c0_24 = arith.constant 0 : index
      %31 = vector.load %arg9[%c0_22, %c0_23, %c0_24] : memref<1x8x128xf32, #tpu.memory_space<vmem>>, vector<1x8x128xf32>
      %32 = vector.shape_cast %31 : vector<1x8x128xf32> to vector<8x128xf32>
      %33 = vector.shape_cast %30 : vector<8x128xf32> to vector<1x8x128xf32>
      tpu.vector_store %arg9[%c0_22, %c0_23, %c0_24], %33 {strides = array<i32>} : memref<1x8x128xf32, #tpu.memory_space<vmem>>, vector<1x8x128xf32>,
    } else {
    }
    return
  }
  func.func @transform_0(%arg0: i32, %arg1: i32, %arg2: i32, %arg3: i32) -> (i32, i32, i32) {
    %c0_i32 = arith.constant 0 : i32
    return %arg0, %arg1, %arg3 : i32, i32, i32
  }
  func.func @transform_1(%arg0: i32, %arg1: i32, %arg2: i32, %arg3: i32) -> (i32, i32) {
    %c0_i32 = arith.constant 0 : i32
    %c0_i32_0 = arith.constant 0 : i32
    return %c0_i32, %arg3 : i32, i32
  }
  func.func @transform_2(%arg0: i32, %arg1: i32, %arg2: i32, %arg3: i32) -> (i32, i32) {
    %c0_i32 = arith.constant 0 : i32
    %c0_i32_0 = arith.constant 0 : i32
    return %c0_i32, %arg3 : i32, i32
  }
  func.func @transform_3(%arg0: i32, %arg1: i32, %arg2: i32, %arg3: i32) -> (i32, i32, i32) {
    %c0_i32 = arith.constant 0 : i32
    return %arg0, %arg3, %arg2 : i32, i32, i32
  }
  func.func @transform_4(%arg0: i32, %arg1: i32, %arg2: i32, %arg3: i32) -> (i32, i32) {
    %c0_i32 = arith.constant 0 : i32
    %c0_i32_0 = arith.constant 0 : i32
    return %c0_i32, %arg2 : i32, i32
  }
  func.func @transform_5(%arg0: i32, %arg1: i32, %arg2: i32, %arg3: i32) -> (i32, i32, i32) {
    %c0_i32 = arith.constant 0 : i32
    return %arg0, %arg1, %arg2 : i32, i32, i32
  }
}

module attributes {stable_mosaic.version = 11 : i64} {
  func.func @_fused_gemm_kernel(%arg0: i32, %arg1: i32, %arg2: i32, %arg3: i32, %arg4: memref<1x8x256xbf16, #tpu.memory_space<vmem>>, %arg5: memref<1x256xf32, #tpu.memory_space<vmem>>, %arg6: memref<1x256xf32, #tpu.memory_space<vmem>>, %arg7: memref<1x256x128xbf16, #tpu.memory_space<vmem>>, %arg8: memref<1x128xf32, #tpu.memory_space<vmem>>, %arg9: memref<1x8x128xf32, #tpu.memory_space<vmem>>, %arg10: memref<8x128xf32, #tpu.memory_space<vmem>>) attributes {dimension_semantics = [#tpu.dimension_semantics<parallel>, #tpu.dimension_semantics<parallel>, #tpu.dimension_semantics<parallel>, #tpu.dimension_semantics<arbitrary>], iteration_bounds = array<i64: 4, 1, 1, 1>, scalar_prefetch = 0 : i64, scratch_operands = 1 : i64, tpu.core_type = #tpu.core_type<tc>, window_params = [{transform_indices = @transform_0, window_bounds = array<i64: 1, 8, 256>}, {transform_indices = @transform_1, window_bounds = array<i64: 1, 256>}, {transform_indices = @transform_2, window_bounds = array<i64: 1, 256>}, {transform_indices = @transform_3, window_bounds = array<i64: 1, 256, 128>}, {transform_indices = @transform_4, window_bounds = array<i64: 1, 128>}, {transform_indices = @transform_5, window_bounds = array<i64: 1, 8, 128>}]} {
    %c0_i32 = arith.constant 0 : i32
    %0 = arith.cmpi eq, %arg3, %c0_i32 : i32
    %1 = arith.extui %0 : i1 to i32
    %c0_i32_0 = arith.constant 0 : i32
    %2 = arith.cmpi ne, %1, %c0_i32_0 : i32
    scf.if %2 {
      %cst_17 = arith.constant 0.000000e+00 : f32
      %24 = vector.broadcast %cst_17 : f32 to vector<8x128xf32>
      %c0_18 = arith.constant 0 : index
      %c0_19 = arith.constant 0 : index
      %25 = vector.load %arg10[%c0_18, %c0_19] : memref<8x128xf32, #tpu.memory_space<vmem>>, vector<8x128xf32>
      tpu.vector_store %arg10[%c0_18, %c0_19], %24 {strides = array<i32>} : memref<8x128xf32, #tpu.memory_space<vmem>>, vector<8x128xf32>,
    } else {
    }
    %c0 = arith.constant 0 : index
    %c0_1 = arith.constant 0 : index
    %c0_2 = arith.constant 0 : index
    %3 = vector.load %arg4[%c0, %c0_1, %c0_2] : memref<1x8x256xbf16, #tpu.memory_space<vmem>>, vector<1x8x256xbf16>
    %4 = vector.shape_cast %3 : vector<1x8x256xbf16> to vector<8x256xbf16>
    %5 = arith.extf %4 : vector<8x256xbf16> to vector<8x256xf32>
    %c0_3 = arith.constant 0 : index
    %c0_4 = arith.constant 0 : index
    %6 = vector.load %arg5[%c0_3, %c0_4] : memref<1x256xf32, #tpu.memory_space<vmem>>, vector<1x256xf32>
    %7 = vector.broadcast %6 : vector<1x256xf32> to vector<8x256xf32>
    %8 = arith.mulf %5, %7 : vector<8x256xf32>
    %c0_5 = arith.constant 0 : index
    %c0_6 = arith.constant 0 : index
    %9 = vector.load %arg6[%c0_5, %c0_6] : memref<1x256xf32, #tpu.memory_space<vmem>>, vector<1x256xf32>
    %10 = vector.broadcast %9 : vector<1x256xf32> to vector<8x256xf32>
    %11 = arith.addf %8, %10 : vector<8x256xf32>
    %cst = arith.constant 0.000000e+00 : f32
    %12 = vector.broadcast %cst : f32 to vector<8x256xf32>
    %13 = arith.maximumf %11, %12 : vector<8x256xf32>
    %c0_7 = arith.constant 0 : index
    %c0_8 = arith.constant 0 : index
    %14 = vector.load %arg10[%c0_7, %c0_8] : memref<8x128xf32, #tpu.memory_space<vmem>>, vector<8x128xf32>
    %15 = arith.truncf %13 : vector<8x256xf32> to vector<8x256xbf16>
    %c0_9 = arith.constant 0 : index
    %c0_10 = arith.constant 0 : index
    %c0_11 = arith.constant 0 : index
    %16 = vector.load %arg7[%c0_9, %c0_10, %c0_11] : memref<1x256x128xbf16, #tpu.memory_space<vmem>>, vector<1x256x128xbf16>
    %17 = vector.shape_cast %16 : vector<1x256x128xbf16> to vector<256x128xbf16>
    %cst_12 = arith.constant dense<0.000000e+00> : vector<8x128xf32>
    %18 = tpu.matmul %15, %17, %cst_12 {dimension_numbers = #tpu.dot_dimension_numbers<[1], [0], [0], [1], [0, 0, 1, 1], [], []>} : vector<8x256xbf16>, vector<256x128xbf16>, vector<8x128xf32> -> vector<8x128xf32>
    %19 = arith.addf %14, %18 : vector<8x128xf32>
    %c0_13 = arith.constant 0 : index
    %c0_14 = arith.constant 0 : index
    %20 = vector.load %arg10[%c0_13, %c0_14] : memref<8x128xf32, #tpu.memory_space<vmem>>, vector<8x128xf32>
    tpu.vector_store %arg10[%c0_13, %c0_14], %19 {strides = array<i32>} : memref<8x128xf32, #tpu.memory_space<vmem>>, vector<8x128xf32>,
    %c0_i32_15 = arith.constant 0 : i32
    %21 = arith.cmpi eq, %arg3, %c0_i32_15 : i32
    %22 = arith.extui %21 : i1 to i32
    %c0_i32_16 = arith.constant 0 : i32
    %23 = arith.cmpi ne, %22, %c0_i32_16 : i32
    scf.if %23 {
      %c0_17 = arith.constant 0 : index
      %c0_18 = arith.constant 0 : index
      %24 = vector.load %arg10[%c0_17, %c0_18] : memref<8x128xf32, #tpu.memory_space<vmem>>, vector<8x128xf32>
      %c0_19 = arith.constant 0 : index
      %c0_20 = arith.constant 0 : index
      %25 = vector.load %arg8[%c0_19, %c0_20] : memref<1x128xf32, #tpu.memory_space<vmem>>, vector<1x128xf32>
      %26 = vector.broadcast %25 : vector<1x128xf32> to vector<8x128xf32>
      %27 = arith.addf %24, %26 : vector<8x128xf32>
      %c0_21 = arith.constant 0 : index
      %c0_22 = arith.constant 0 : index
      %c0_23 = arith.constant 0 : index
      %28 = vector.load %arg9[%c0_21, %c0_22, %c0_23] : memref<1x8x128xf32, #tpu.memory_space<vmem>>, vector<1x8x128xf32>
      %29 = vector.shape_cast %28 : vector<1x8x128xf32> to vector<8x128xf32>
      %30 = vector.shape_cast %27 : vector<8x128xf32> to vector<1x8x128xf32>
      tpu.vector_store %arg9[%c0_21, %c0_22, %c0_23], %30 {strides = array<i32>} : memref<1x8x128xf32, #tpu.memory_space<vmem>>, vector<1x8x128xf32>,
    } else {
    }
    return
  }
  func.func @transform_0(%arg0: i32, %arg1: i32, %arg2: i32, %arg3: i32) -> (i32, i32, i32) {
    %c0_i32 = arith.constant 0 : i32
    return %arg0, %arg1, %arg3 : i32, i32, i32
  }
  func.func @transform_1(%arg0: i32, %arg1: i32, %arg2: i32, %arg3: i32) -> (i32, i32) {
    %c0_i32 = arith.constant 0 : i32
    %c0_i32_0 = arith.constant 0 : i32
    return %c0_i32, %arg3 : i32, i32
  }
  func.func @transform_2(%arg0: i32, %arg1: i32, %arg2: i32, %arg3: i32) -> (i32, i32) {
    %c0_i32 = arith.constant 0 : i32
    %c0_i32_0 = arith.constant 0 : i32
    return %c0_i32, %arg3 : i32, i32
  }
  func.func @transform_3(%arg0: i32, %arg1: i32, %arg2: i32, %arg3: i32) -> (i32, i32, i32) {
    %c0_i32 = arith.constant 0 : i32
    return %arg0, %arg3, %arg2 : i32, i32, i32
  }
  func.func @transform_4(%arg0: i32, %arg1: i32, %arg2: i32, %arg3: i32) -> (i32, i32) {
    %c0_i32 = arith.constant 0 : i32
    %c0_i32_0 = arith.constant 0 : i32
    return %c0_i32, %arg2 : i32, i32
  }
  func.func @transform_5(%arg0: i32, %arg1: i32, %arg2: i32, %arg3: i32) -> (i32, i32, i32) {
    %c0_i32 = arith.constant 0 : i32
    return %arg0, %arg1, %arg2 : i32, i32, i32
  }
}

module attributes {stable_mosaic.version = 11 : i64} {
  func.func @_fused_gemm_kernel(%arg0: i32, %arg1: i32, %arg2: i32, %arg3: i32, %arg4: memref<1x8x512xbf16, #tpu.memory_space<vmem>>, %arg5: memref<1x512xf32, #tpu.memory_space<vmem>>, %arg6: memref<1x512xf32, #tpu.memory_space<vmem>>, %arg7: memref<1x512x128xbf16, #tpu.memory_space<vmem>>, %arg8: memref<1x128xf32, #tpu.memory_space<vmem>>, %arg9: memref<1x8x128xf32, #tpu.memory_space<vmem>>, %arg10: memref<8x128xf32, #tpu.memory_space<vmem>>) attributes {dimension_semantics = [#tpu.dimension_semantics<parallel>, #tpu.dimension_semantics<parallel>, #tpu.dimension_semantics<parallel>, #tpu.dimension_semantics<arbitrary>], iteration_bounds = array<i64: 4, 1, 1, 1>, scalar_prefetch = 0 : i64, scratch_operands = 1 : i64, tpu.core_type = #tpu.core_type<tc>, window_params = [{transform_indices = @transform_0, window_bounds = array<i64: 1, 8, 512>}, {transform_indices = @transform_1, window_bounds = array<i64: 1, 512>}, {transform_indices = @transform_2, window_bounds = array<i64: 1, 512>}, {transform_indices = @transform_3, window_bounds = array<i64: 1, 512, 128>}, {transform_indices = @transform_4, window_bounds = array<i64: 1, 128>}, {transform_indices = @transform_5, window_bounds = array<i64: 1, 8, 128>}]} {
    %c0_i32 = arith.constant 0 : i32
    %0 = arith.cmpi eq, %arg3, %c0_i32 : i32
    %1 = arith.extui %0 : i1 to i32
    %c0_i32_0 = arith.constant 0 : i32
    %2 = arith.cmpi ne, %1, %c0_i32_0 : i32
    scf.if %2 {
      %cst_17 = arith.constant 0.000000e+00 : f32
      %24 = vector.broadcast %cst_17 : f32 to vector<8x128xf32>
      %c0_18 = arith.constant 0 : index
      %c0_19 = arith.constant 0 : index
      %25 = vector.load %arg10[%c0_18, %c0_19] : memref<8x128xf32, #tpu.memory_space<vmem>>, vector<8x128xf32>
      tpu.vector_store %arg10[%c0_18, %c0_19], %24 {strides = array<i32>} : memref<8x128xf32, #tpu.memory_space<vmem>>, vector<8x128xf32>,
    } else {
    }
    %c0 = arith.constant 0 : index
    %c0_1 = arith.constant 0 : index
    %c0_2 = arith.constant 0 : index
    %3 = vector.load %arg4[%c0, %c0_1, %c0_2] : memref<1x8x512xbf16, #tpu.memory_space<vmem>>, vector<1x8x512xbf16>
    %4 = vector.shape_cast %3 : vector<1x8x512xbf16> to vector<8x512xbf16>
    %5 = arith.extf %4 : vector<8x512xbf16> to vector<8x512xf32>
    %c0_3 = arith.constant 0 : index
    %c0_4 = arith.constant 0 : index
    %6 = vector.load %arg5[%c0_3, %c0_4] : memref<1x512xf32, #tpu.memory_space<vmem>>, vector<1x512xf32>
    %7 = vector.broadcast %6 : vector<1x512xf32> to vector<8x512xf32>
    %8 = arith.mulf %5, %7 : vector<8x512xf32>
    %c0_5 = arith.constant 0 : index
    %c0_6 = arith.constant 0 : index
    %9 = vector.load %arg6[%c0_5, %c0_6] : memref<1x512xf32, #tpu.memory_space<vmem>>, vector<1x512xf32>
    %10 = vector.broadcast %9 : vector<1x512xf32> to vector<8x512xf32>
    %11 = arith.addf %8, %10 : vector<8x512xf32>
    %cst = arith.constant 0.000000e+00 : f32
    %12 = vector.broadcast %cst : f32 to vector<8x512xf32>
    %13 = arith.maximumf %11, %12 : vector<8x512xf32>
    %c0_7 = arith.constant 0 : index
    %c0_8 = arith.constant 0 : index
    %14 = vector.load %arg10[%c0_7, %c0_8] : memref<8x128xf32, #tpu.memory_space<vmem>>, vector<8x128xf32>
    %15 = arith.truncf %13 : vector<8x512xf32> to vector<8x512xbf16>
    %c0_9 = arith.constant 0 : index
    %c0_10 = arith.constant 0 : index
    %c0_11 = arith.constant 0 : index
    %16 = vector.load %arg7[%c0_9, %c0_10, %c0_11] : memref<1x512x128xbf16, #tpu.memory_space<vmem>>, vector<1x512x128xbf16>
    %17 = vector.shape_cast %16 : vector<1x512x128xbf16> to vector<512x128xbf16>
    %cst_12 = arith.constant dense<0.000000e+00> : vector<8x128xf32>
    %18 = tpu.matmul %15, %17, %cst_12 {dimension_numbers = #tpu.dot_dimension_numbers<[1], [0], [0], [1], [0, 0, 1, 1], [], []>} : vector<8x512xbf16>, vector<512x128xbf16>, vector<8x128xf32> -> vector<8x128xf32>
    %19 = arith.addf %14, %18 : vector<8x128xf32>
    %c0_13 = arith.constant 0 : index
    %c0_14 = arith.constant 0 : index
    %20 = vector.load %arg10[%c0_13, %c0_14] : memref<8x128xf32, #tpu.memory_space<vmem>>, vector<8x128xf32>
    tpu.vector_store %arg10[%c0_13, %c0_14], %19 {strides = array<i32>} : memref<8x128xf32, #tpu.memory_space<vmem>>, vector<8x128xf32>,
    %c0_i32_15 = arith.constant 0 : i32
    %21 = arith.cmpi eq, %arg3, %c0_i32_15 : i32
    %22 = arith.extui %21 : i1 to i32
    %c0_i32_16 = arith.constant 0 : i32
    %23 = arith.cmpi ne, %22, %c0_i32_16 : i32
    scf.if %23 {
      %c0_17 = arith.constant 0 : index
      %c0_18 = arith.constant 0 : index
      %24 = vector.load %arg10[%c0_17, %c0_18] : memref<8x128xf32, #tpu.memory_space<vmem>>, vector<8x128xf32>
      %c0_19 = arith.constant 0 : index
      %c0_20 = arith.constant 0 : index
      %25 = vector.load %arg8[%c0_19, %c0_20] : memref<1x128xf32, #tpu.memory_space<vmem>>, vector<1x128xf32>
      %26 = vector.broadcast %25 : vector<1x128xf32> to vector<8x128xf32>
      %27 = arith.addf %24, %26 : vector<8x128xf32>
      %c0_21 = arith.constant 0 : index
      %c0_22 = arith.constant 0 : index
      %c0_23 = arith.constant 0 : index
      %28 = vector.load %arg9[%c0_21, %c0_22, %c0_23] : memref<1x8x128xf32, #tpu.memory_space<vmem>>, vector<1x8x128xf32>
      %29 = vector.shape_cast %28 : vector<1x8x128xf32> to vector<8x128xf32>
      %30 = vector.shape_cast %27 : vector<8x128xf32> to vector<1x8x128xf32>
      tpu.vector_store %arg9[%c0_21, %c0_22, %c0_23], %30 {strides = array<i32>} : memref<1x8x128xf32, #tpu.memory_space<vmem>>, vector<1x8x128xf32>,
    } else {
    }
    return
  }
  func.func @transform_0(%arg0: i32, %arg1: i32, %arg2: i32, %arg3: i32) -> (i32, i32, i32) {
    %c0_i32 = arith.constant 0 : i32
    return %arg0, %arg1, %arg3 : i32, i32, i32
  }
  func.func @transform_1(%arg0: i32, %arg1: i32, %arg2: i32, %arg3: i32) -> (i32, i32) {
    %c0_i32 = arith.constant 0 : i32
    %c0_i32_0 = arith.constant 0 : i32
    return %c0_i32, %arg3 : i32, i32
  }
  func.func @transform_2(%arg0: i32, %arg1: i32, %arg2: i32, %arg3: i32) -> (i32, i32) {
    %c0_i32 = arith.constant 0 : i32
    %c0_i32_0 = arith.constant 0 : i32
    return %c0_i32, %arg3 : i32, i32
  }
  func.func @transform_3(%arg0: i32, %arg1: i32, %arg2: i32, %arg3: i32) -> (i32, i32, i32) {
    %c0_i32 = arith.constant 0 : i32
    return %arg0, %arg3, %arg2 : i32, i32, i32
  }
  func.func @transform_4(%arg0: i32, %arg1: i32, %arg2: i32, %arg3: i32) -> (i32, i32) {
    %c0_i32 = arith.constant 0 : i32
    %c0_i32_0 = arith.constant 0 : i32
    return %c0_i32, %arg2 : i32, i32
  }
  func.func @transform_5(%arg0: i32, %arg1: i32, %arg2: i32, %arg3: i32) -> (i32, i32, i32) {
    %c0_i32 = arith.constant 0 : i32
    return %arg0, %arg1, %arg2 : i32, i32, i32
  }
}

module attributes {stable_mosaic.version = 11 : i64} {
  func.func @_fused_gemm_kernel(%arg0: i32, %arg1: i32, %arg2: i32, %arg3: i32, %arg4: memref<1x32x256xbf16, #tpu.memory_space<vmem>>, %arg5: memref<1x256xf32, #tpu.memory_space<vmem>>, %arg6: memref<1x256xf32, #tpu.memory_space<vmem>>, %arg7: memref<1x256x128xbf16, #tpu.memory_space<vmem>>, %arg8: memref<1x128xf32, #tpu.memory_space<vmem>>, %arg9: memref<1x32x128xf32, #tpu.memory_space<vmem>>, %arg10: memref<32x128xf32, #tpu.memory_space<vmem>>) attributes {dimension_semantics = [#tpu.dimension_semantics<parallel>, #tpu.dimension_semantics<parallel>, #tpu.dimension_semantics<parallel>, #tpu.dimension_semantics<arbitrary>], iteration_bounds = array<i64: 4, 1, 1, 1>, scalar_prefetch = 0 : i64, scratch_operands = 1 : i64, tpu.core_type = #tpu.core_type<tc>, window_params = [{transform_indices = @transform_0, window_bounds = array<i64: 1, 32, 256>}, {transform_indices = @transform_1, window_bounds = array<i64: 1, 256>}, {transform_indices = @transform_2, window_bounds = array<i64: 1, 256>}, {transform_indices = @transform_3, window_bounds = array<i64: 1, 256, 128>}, {transform_indices = @transform_4, window_bounds = array<i64: 1, 128>}, {transform_indices = @transform_5, window_bounds = array<i64: 1, 32, 128>}]} {
    %c0_i32 = arith.constant 0 : i32
    %0 = arith.cmpi eq, %arg3, %c0_i32 : i32
    %1 = arith.extui %0 : i1 to i32
    %c0_i32_0 = arith.constant 0 : i32
    %2 = arith.cmpi ne, %1, %c0_i32_0 : i32
    scf.if %2 {
      %cst_17 = arith.constant 0.000000e+00 : f32
      %24 = vector.broadcast %cst_17 : f32 to vector<32x128xf32>
      %c0_18 = arith.constant 0 : index
      %c0_19 = arith.constant 0 : index
      %25 = vector.load %arg10[%c0_18, %c0_19] : memref<32x128xf32, #tpu.memory_space<vmem>>, vector<32x128xf32>
      tpu.vector_store %arg10[%c0_18, %c0_19], %24 {strides = array<i32>} : memref<32x128xf32, #tpu.memory_space<vmem>>, vector<32x128xf32>,
    } else {
    }
    %c0 = arith.constant 0 : index
    %c0_1 = arith.constant 0 : index
    %c0_2 = arith.constant 0 : index
    %3 = vector.load %arg4[%c0, %c0_1, %c0_2] : memref<1x32x256xbf16, #tpu.memory_space<vmem>>, vector<1x32x256xbf16>
    %4 = vector.shape_cast %3 : vector<1x32x256xbf16> to vector<32x256xbf16>
    %5 = arith.extf %4 : vector<32x256xbf16> to vector<32x256xf32>
    %c0_3 = arith.constant 0 : index
    %c0_4 = arith.constant 0 : index
    %6 = vector.load %arg5[%c0_3, %c0_4] : memref<1x256xf32, #tpu.memory_space<vmem>>, vector<1x256xf32>
    %7 = vector.broadcast %6 : vector<1x256xf32> to vector<32x256xf32>
    %8 = arith.mulf %5, %7 : vector<32x256xf32>
    %c0_5 = arith.constant 0 : index
    %c0_6 = arith.constant 0 : index
    %9 = vector.load %arg6[%c0_5, %c0_6] : memref<1x256xf32, #tpu.memory_space<vmem>>, vector<1x256xf32>
    %10 = vector.broadcast %9 : vector<1x256xf32> to vector<32x256xf32>
    %11 = arith.addf %8, %10 : vector<32x256xf32>
    %cst = arith.constant 0.000000e+00 : f32
    %12 = vector.broadcast %cst : f32 to vector<32x256xf32>
    %13 = arith.maximumf %11, %12 : vector<32x256xf32>
    %c0_7 = arith.constant 0 : index
    %c0_8 = arith.constant 0 : index
    %14 = vector.load %arg10[%c0_7, %c0_8] : memref<32x128xf32, #tpu.memory_space<vmem>>, vector<32x128xf32>
    %15 = arith.truncf %13 : vector<32x256xf32> to vector<32x256xbf16>
    %c0_9 = arith.constant 0 : index
    %c0_10 = arith.constant 0 : index
    %c0_11 = arith.constant 0 : index
    %16 = vector.load %arg7[%c0_9, %c0_10, %c0_11] : memref<1x256x128xbf16, #tpu.memory_space<vmem>>, vector<1x256x128xbf16>
    %17 = vector.shape_cast %16 : vector<1x256x128xbf16> to vector<256x128xbf16>
    %cst_12 = arith.constant dense<0.000000e+00> : vector<32x128xf32>
    %18 = tpu.matmul %15, %17, %cst_12 {dimension_numbers = #tpu.dot_dimension_numbers<[1], [0], [0], [1], [0, 0, 1, 1], [], []>} : vector<32x256xbf16>, vector<256x128xbf16>, vector<32x128xf32> -> vector<32x128xf32>
    %19 = arith.addf %14, %18 : vector<32x128xf32>
    %c0_13 = arith.constant 0 : index
    %c0_14 = arith.constant 0 : index
    %20 = vector.load %arg10[%c0_13, %c0_14] : memref<32x128xf32, #tpu.memory_space<vmem>>, vector<32x128xf32>
    tpu.vector_store %arg10[%c0_13, %c0_14], %19 {strides = array<i32>} : memref<32x128xf32, #tpu.memory_space<vmem>>, vector<32x128xf32>,
    %c0_i32_15 = arith.constant 0 : i32
    %21 = arith.cmpi eq, %arg3, %c0_i32_15 : i32
    %22 = arith.extui %21 : i1 to i32
    %c0_i32_16 = arith.constant 0 : i32
    %23 = arith.cmpi ne, %22, %c0_i32_16 : i32
    scf.if %23 {
      %c0_17 = arith.constant 0 : index
      %c0_18 = arith.constant 0 : index
      %24 = vector.load %arg10[%c0_17, %c0_18] : memref<32x128xf32, #tpu.memory_space<vmem>>, vector<32x128xf32>
      %c0_19 = arith.constant 0 : index
      %c0_20 = arith.constant 0 : index
      %25 = vector.load %arg8[%c0_19, %c0_20] : memref<1x128xf32, #tpu.memory_space<vmem>>, vector<1x128xf32>
      %26 = vector.broadcast %25 : vector<1x128xf32> to vector<32x128xf32>
      %27 = arith.addf %24, %26 : vector<32x128xf32>
      %c0_21 = arith.constant 0 : index
      %c0_22 = arith.constant 0 : index
      %c0_23 = arith.constant 0 : index
      %28 = vector.load %arg9[%c0_21, %c0_22, %c0_23] : memref<1x32x128xf32, #tpu.memory_space<vmem>>, vector<1x32x128xf32>
      %29 = vector.shape_cast %28 : vector<1x32x128xf32> to vector<32x128xf32>
      %30 = vector.shape_cast %27 : vector<32x128xf32> to vector<1x32x128xf32>
      tpu.vector_store %arg9[%c0_21, %c0_22, %c0_23], %30 {strides = array<i32>} : memref<1x32x128xf32, #tpu.memory_space<vmem>>, vector<1x32x128xf32>,
    } else {
    }
    return
  }
  func.func @transform_0(%arg0: i32, %arg1: i32, %arg2: i32, %arg3: i32) -> (i32, i32, i32) {
    %c0_i32 = arith.constant 0 : i32
    return %arg0, %arg1, %arg3 : i32, i32, i32
  }
  func.func @transform_1(%arg0: i32, %arg1: i32, %arg2: i32, %arg3: i32) -> (i32, i32) {
    %c0_i32 = arith.constant 0 : i32
    %c0_i32_0 = arith.constant 0 : i32
    return %c0_i32, %arg3 : i32, i32
  }
  func.func @transform_2(%arg0: i32, %arg1: i32, %arg2: i32, %arg3: i32) -> (i32, i32) {
    %c0_i32 = arith.constant 0 : i32
    %c0_i32_0 = arith.constant 0 : i32
    return %c0_i32, %arg3 : i32, i32
  }
  func.func @transform_3(%arg0: i32, %arg1: i32, %arg2: i32, %arg3: i32) -> (i32, i32, i32) {
    %c0_i32 = arith.constant 0 : i32
    return %arg0, %arg3, %arg2 : i32, i32, i32
  }
  func.func @transform_4(%arg0: i32, %arg1: i32, %arg2: i32, %arg3: i32) -> (i32, i32) {
    %c0_i32 = arith.constant 0 : i32
    %c0_i32_0 = arith.constant 0 : i32
    return %c0_i32, %arg2 : i32, i32
  }
  func.func @transform_5(%arg0: i32, %arg1: i32, %arg2: i32, %arg3: i32) -> (i32, i32, i32) {
    %c0_i32 = arith.constant 0 : i32
    return %arg0, %arg1, %arg2 : i32, i32, i32
  }
}

module attributes {stable_mosaic.version = 11 : i64} {
  func.func @_fused_gemm_kernel(%arg0: i32, %arg1: i32, %arg2: i32, %arg3: i32, %arg4: memref<1x128x128xbf16, #tpu.memory_space<vmem>>, %arg5: memref<1x128xf32, #tpu.memory_space<vmem>>, %arg6: memref<1x128xf32, #tpu.memory_space<vmem>>, %arg7: memref<1x128x128xbf16, #tpu.memory_space<vmem>>, %arg8: memref<1x128xf32, #tpu.memory_space<vmem>>, %arg9: memref<1x128x128xf32, #tpu.memory_space<vmem>>, %arg10: memref<128x128xf32, #tpu.memory_space<vmem>>) attributes {dimension_semantics = [#tpu.dimension_semantics<parallel>, #tpu.dimension_semantics<parallel>, #tpu.dimension_semantics<parallel>, #tpu.dimension_semantics<arbitrary>], iteration_bounds = array<i64: 4, 1, 1, 1>, scalar_prefetch = 0 : i64, scratch_operands = 1 : i64, tpu.core_type = #tpu.core_type<tc>, window_params = [{transform_indices = @transform_0, window_bounds = array<i64: 1, 128, 128>}, {transform_indices = @transform_1, window_bounds = array<i64: 1, 128>}, {transform_indices = @transform_2, window_bounds = array<i64: 1, 128>}, {transform_indices = @transform_3, window_bounds = array<i64: 1, 128, 128>}, {transform_indices = @transform_4, window_bounds = array<i64: 1, 128>}, {transform_indices = @transform_5, window_bounds = array<i64: 1, 128, 128>}]} {
    %c0_i32 = arith.constant 0 : i32
    %0 = arith.cmpi eq, %arg3, %c0_i32 : i32
    %1 = arith.extui %0 : i1 to i32
    %c0_i32_0 = arith.constant 0 : i32
    %2 = arith.cmpi ne, %1, %c0_i32_0 : i32
    scf.if %2 {
      %cst_17 = arith.constant 0.000000e+00 : f32
      %24 = vector.broadcast %cst_17 : f32 to vector<128x128xf32>
      %c0_18 = arith.constant 0 : index
      %c0_19 = arith.constant 0 : index
      %25 = vector.load %arg10[%c0_18, %c0_19] : memref<128x128xf32, #tpu.memory_space<vmem>>, vector<128x128xf32>
      tpu.vector_store %arg10[%c0_18, %c0_19], %24 {strides = array<i32>} : memref<128x128xf32, #tpu.memory_space<vmem>>, vector<128x128xf32>,
    } else {
    }
    %c0 = arith.constant 0 : index
    %c0_1 = arith.constant 0 : index
    %c0_2 = arith.constant 0 : index
    %3 = vector.load %arg4[%c0, %c0_1, %c0_2] : memref<1x128x128xbf16, #tpu.memory_space<vmem>>, vector<1x128x128xbf16>
    %4 = vector.shape_cast %3 : vector<1x128x128xbf16> to vector<128x128xbf16>
    %5 = arith.extf %4 : vector<128x128xbf16> to vector<128x128xf32>
    %c0_3 = arith.constant 0 : index
    %c0_4 = arith.constant 0 : index
    %6 = vector.load %arg5[%c0_3, %c0_4] : memref<1x128xf32, #tpu.memory_space<vmem>>, vector<1x128xf32>
    %7 = vector.broadcast %6 : vector<1x128xf32> to vector<128x128xf32>
    %8 = arith.mulf %5, %7 : vector<128x128xf32>
    %c0_5 = arith.constant 0 : index
    %c0_6 = arith.constant 0 : index
    %9 = vector.load %arg6[%c0_5, %c0_6] : memref<1x128xf32, #tpu.memory_space<vmem>>, vector<1x128xf32>
    %10 = vector.broadcast %9 : vector<1x128xf32> to vector<128x128xf32>
    %11 = arith.addf %8, %10 : vector<128x128xf32>
    %cst = arith.constant 0.000000e+00 : f32
    %12 = vector.broadcast %cst : f32 to vector<128x128xf32>
    %13 = arith.maximumf %11, %12 : vector<128x128xf32>
    %c0_7 = arith.constant 0 : index
    %c0_8 = arith.constant 0 : index
    %14 = vector.load %arg10[%c0_7, %c0_8] : memref<128x128xf32, #tpu.memory_space<vmem>>, vector<128x128xf32>
    %15 = arith.truncf %13 : vector<128x128xf32> to vector<128x128xbf16>
    %c0_9 = arith.constant 0 : index
    %c0_10 = arith.constant 0 : index
    %c0_11 = arith.constant 0 : index
    %16 = vector.load %arg7[%c0_9, %c0_10, %c0_11] : memref<1x128x128xbf16, #tpu.memory_space<vmem>>, vector<1x128x128xbf16>
    %17 = vector.shape_cast %16 : vector<1x128x128xbf16> to vector<128x128xbf16>
    %cst_12 = arith.constant dense<0.000000e+00> : vector<128x128xf32>
    %18 = tpu.matmul %15, %17, %cst_12 {dimension_numbers = #tpu.dot_dimension_numbers<[1], [0], [0], [1], [0, 0, 1, 1], [], []>} : vector<128x128xbf16>, vector<128x128xbf16>, vector<128x128xf32> -> vector<128x128xf32>
    %19 = arith.addf %14, %18 : vector<128x128xf32>
    %c0_13 = arith.constant 0 : index
    %c0_14 = arith.constant 0 : index
    %20 = vector.load %arg10[%c0_13, %c0_14] : memref<128x128xf32, #tpu.memory_space<vmem>>, vector<128x128xf32>
    tpu.vector_store %arg10[%c0_13, %c0_14], %19 {strides = array<i32>} : memref<128x128xf32, #tpu.memory_space<vmem>>, vector<128x128xf32>,
    %c0_i32_15 = arith.constant 0 : i32
    %21 = arith.cmpi eq, %arg3, %c0_i32_15 : i32
    %22 = arith.extui %21 : i1 to i32
    %c0_i32_16 = arith.constant 0 : i32
    %23 = arith.cmpi ne, %22, %c0_i32_16 : i32
    scf.if %23 {
      %c0_17 = arith.constant 0 : index
      %c0_18 = arith.constant 0 : index
      %24 = vector.load %arg10[%c0_17, %c0_18] : memref<128x128xf32, #tpu.memory_space<vmem>>, vector<128x128xf32>
      %c0_19 = arith.constant 0 : index
      %c0_20 = arith.constant 0 : index
      %25 = vector.load %arg8[%c0_19, %c0_20] : memref<1x128xf32, #tpu.memory_space<vmem>>, vector<1x128xf32>
      %26 = vector.broadcast %25 : vector<1x128xf32> to vector<128x128xf32>
      %27 = arith.addf %24, %26 : vector<128x128xf32>
      %c0_21 = arith.constant 0 : index
      %c0_22 = arith.constant 0 : index
      %c0_23 = arith.constant 0 : index
      %28 = vector.load %arg9[%c0_21, %c0_22, %c0_23] : memref<1x128x128xf32, #tpu.memory_space<vmem>>, vector<1x128x128xf32>
      %29 = vector.shape_cast %28 : vector<1x128x128xf32> to vector<128x128xf32>
      %30 = vector.shape_cast %27 : vector<128x128xf32> to vector<1x128x128xf32>
      tpu.vector_store %arg9[%c0_21, %c0_22, %c0_23], %30 {strides = array<i32>} : memref<1x128x128xf32, #tpu.memory_space<vmem>>, vector<1x128x128xf32>,
    } else {
    }
    return
  }
  func.func @transform_0(%arg0: i32, %arg1: i32, %arg2: i32, %arg3: i32) -> (i32, i32, i32) {
    %c0_i32 = arith.constant 0 : i32
    return %arg0, %arg1, %arg3 : i32, i32, i32
  }
  func.func @transform_1(%arg0: i32, %arg1: i32, %arg2: i32, %arg3: i32) -> (i32, i32) {
    %c0_i32 = arith.constant 0 : i32
    %c0_i32_0 = arith.constant 0 : i32
    return %c0_i32, %arg3 : i32, i32
  }
  func.func @transform_2(%arg0: i32, %arg1: i32, %arg2: i32, %arg3: i32) -> (i32, i32) {
    %c0_i32 = arith.constant 0 : i32
    %c0_i32_0 = arith.constant 0 : i32
    return %c0_i32, %arg3 : i32, i32
  }
  func.func @transform_3(%arg0: i32, %arg1: i32, %arg2: i32, %arg3: i32) -> (i32, i32, i32) {
    %c0_i32 = arith.constant 0 : i32
    return %arg0, %arg3, %arg2 : i32, i32, i32
  }
  func.func @transform_4(%arg0: i32, %arg1: i32, %arg2: i32, %arg3: i32) -> (i32, i32) {
    %c0_i32 = arith.constant 0 : i32
    %c0_i32_0 = arith.constant 0 : i32
    return %c0_i32, %arg2 : i32, i32
  }
  func.func @transform_5(%arg0: i32, %arg1: i32, %arg2: i32, %arg3: i32) -> (i32, i32, i32) {
    %c0_i32 = arith.constant 0 : i32
    return %arg0, %arg1, %arg2 : i32, i32, i32
  }
}

module attributes {stable_mosaic.version = 11 : i64} {
  func.func @_bn_stats_kernel(%arg0: i32, %arg1: memref<512x8xf32, #tpu.memory_space<vmem>>, %arg2: memref<1x8xf32, #tpu.memory_space<vmem>>, %arg3: memref<1x8xf32, #tpu.memory_space<vmem>>, %arg4: memref<8x8xf32, #tpu.memory_space<vmem>>, %arg5: memref<8x8xf32, #tpu.memory_space<vmem>>) attributes {dimension_semantics = [#tpu.dimension_semantics<arbitrary>], iteration_bounds = array<i64: 1>, scalar_prefetch = 0 : i64, scratch_operands = 2 : i64, tpu.core_type = #tpu.core_type<tc>, window_params = [{transform_indices = @transform_0, window_bounds = array<i64: 512, 8>}, {pipeline_mode = #tpu.pipeline_mode<synchronous>, transform_indices = @transform_1, window_bounds = array<i64: 1, 8>}, {pipeline_mode = #tpu.pipeline_mode<synchronous>, transform_indices = @transform_2, window_bounds = array<i64: 1, 8>}]} {
    %c0_i32 = arith.constant 0 : i32
    %0 = arith.cmpi eq, %arg0, %c0_i32 : i32
    %1 = arith.extui %0 : i1 to i32
    %c0_i32_0 = arith.constant 0 : i32
    %2 = arith.cmpi ne, %1, %c0_i32_0 : i32
    scf.if %2 {
      %cst_13 = arith.constant 0.000000e+00 : f32
      %17 = vector.broadcast %cst_13 : f32 to vector<8x8xf32>
      %c0_14 = arith.constant 0 : index
      %c0_15 = arith.constant 0 : index
      %18 = vector.load %arg4[%c0_14, %c0_15] : memref<8x8xf32, #tpu.memory_space<vmem>>, vector<8x8xf32>
      tpu.vector_store %arg4[%c0_14, %c0_15], %17 {strides = array<i32>} : memref<8x8xf32, #tpu.memory_space<vmem>>, vector<8x8xf32>,
      %cst_16 = arith.constant 0.000000e+00 : f32
      %19 = vector.broadcast %cst_16 : f32 to vector<8x8xf32>
      %c0_17 = arith.constant 0 : index
      %c0_18 = arith.constant 0 : index
      %20 = vector.load %arg5[%c0_17, %c0_18] : memref<8x8xf32, #tpu.memory_space<vmem>>, vector<8x8xf32>
      tpu.vector_store %arg5[%c0_17, %c0_18], %19 {strides = array<i32>} : memref<8x8xf32, #tpu.memory_space<vmem>>, vector<8x8xf32>,
    } else {
    }
    %c0 = arith.constant 0 : index
    %c0_1 = arith.constant 0 : index
    %3 = vector.load %arg1[%c0, %c0_1] : memref<512x8xf32, #tpu.memory_space<vmem>>, vector<512x8xf32>
    %4 = vector.shape_cast %3 : vector<512x8xf32> to vector<64x8x8xf32>
    %c0_2 = arith.constant 0 : index
    %c0_3 = arith.constant 0 : index
    %5 = vector.load %arg4[%c0_2, %c0_3] : memref<8x8xf32, #tpu.memory_space<vmem>>, vector<8x8xf32>
    %cst = arith.constant dense<0.000000e+00> : vector<8x8xf32>
    %6 = vector.multi_reduction <add>, %4, %cst [0] : vector<64x8x8xf32> to vector<8x8xf32>
    %7 = arith.addf %5, %6 : vector<8x8xf32>
    %c0_4 = arith.constant 0 : index
    %c0_5 = arith.constant 0 : index
    %8 = vector.load %arg4[%c0_4, %c0_5] : memref<8x8xf32, #tpu.memory_space<vmem>>, vector<8x8xf32>
    tpu.vector_store %arg4[%c0_4, %c0_5], %7 {strides = array<i32>} : memref<8x8xf32, #tpu.memory_space<vmem>>, vector<8x8xf32>,
    %c0_6 = arith.constant 0 : index
    %c0_7 = arith.constant 0 : index
    %9 = vector.load %arg5[%c0_6, %c0_7] : memref<8x8xf32, #tpu.memory_space<vmem>>, vector<8x8xf32>
    %10 = arith.mulf %4, %4 : vector<64x8x8xf32>
    %cst_8 = arith.constant dense<0.000000e+00> : vector<8x8xf32>
    %11 = vector.multi_reduction <add>, %10, %cst_8 [0] : vector<64x8x8xf32> to vector<8x8xf32>
    %12 = arith.addf %9, %11 : vector<8x8xf32>
    %c0_9 = arith.constant 0 : index
    %c0_10 = arith.constant 0 : index
    %13 = vector.load %arg5[%c0_9, %c0_10] : memref<8x8xf32, #tpu.memory_space<vmem>>, vector<8x8xf32>
    tpu.vector_store %arg5[%c0_9, %c0_10], %12 {strides = array<i32>} : memref<8x8xf32, #tpu.memory_space<vmem>>, vector<8x8xf32>,
    %c0_i32_11 = arith.constant 0 : i32
    %14 = arith.cmpi eq, %arg0, %c0_i32_11 : i32
    %15 = arith.extui %14 : i1 to i32
    %c0_i32_12 = arith.constant 0 : i32
    %16 = arith.cmpi ne, %15, %c0_i32_12 : i32
    scf.if %16 {
      %c0_13 = arith.constant 0 : index
      %c0_14 = arith.constant 0 : index
      %17 = vector.load %arg4[%c0_13, %c0_14] : memref<8x8xf32, #tpu.memory_space<vmem>>, vector<8x8xf32>
      %cst_15 = arith.constant dense<0.000000e+00> : vector<8xf32>
      %18 = vector.multi_reduction <add>, %17, %cst_15 [0] : vector<8x8xf32> to vector<8xf32>
      %19 = vector.shape_cast %18 : vector<8xf32> to vector<1x8xf32>
      %c0_16 = arith.constant 0 : index
      %c0_17 = arith.constant 0 : index
      %20 = vector.load %arg5[%c0_16, %c0_17] : memref<8x8xf32, #tpu.memory_space<vmem>>, vector<8x8xf32>
      %cst_18 = arith.constant dense<0.000000e+00> : vector<8xf32>
      %21 = vector.multi_reduction <add>, %20, %cst_18 [0] : vector<8x8xf32> to vector<8xf32>
      %22 = vector.shape_cast %21 : vector<8xf32> to vector<1x8xf32>
      %cst_19 = arith.constant 0.001953125 : f32
      %23 = vector.broadcast %cst_19 : f32 to vector<1x8xf32>
      %24 = arith.mulf %19, %23 : vector<1x8xf32>
      %cst_20 = arith.constant 0.001953125 : f32
      %25 = vector.broadcast %cst_20 : f32 to vector<1x8xf32>
      %26 = arith.mulf %22, %25 : vector<1x8xf32>
      %27 = arith.mulf %24, %24 : vector<1x8xf32>
      %28 = arith.subf %26, %27 : vector<1x8xf32>
      %cst_21 = arith.constant 0.000000e+00 : f32
      %29 = vector.broadcast %cst_21 : f32 to vector<1x8xf32>
      %30 = arith.maximumf %28, %29 : vector<1x8xf32>
      %c0_22 = arith.constant 0 : index
      %c0_23 = arith.constant 0 : index
      %31 = vector.load %arg2[%c0_22, %c0_23] : memref<1x8xf32, #tpu.memory_space<vmem>>, vector<1x8xf32>
      tpu.vector_store %arg2[%c0_22, %c0_23], %24 {strides = array<i32>} : memref<1x8xf32, #tpu.memory_space<vmem>>, vector<1x8xf32>,
      %cst_24 = arith.constant 9.99999974E-6 : f32
      %32 = vector.broadcast %cst_24 : f32 to vector<1x8xf32>
      %33 = arith.addf %30, %32 : vector<1x8xf32>
      %34 = math.rsqrt %33 : vector<1x8xf32>
      %c0_25 = arith.constant 0 : index
      %c0_26 = arith.constant 0 : index
      %35 = vector.load %arg3[%c0_25, %c0_26] : memref<1x8xf32, #tpu.memory_space<vmem>>, vector<1x8xf32>
      tpu.vector_store %arg3[%c0_25, %c0_26], %34 {strides = array<i32>} : memref<1x8xf32, #tpu.memory_space<vmem>>, vector<1x8xf32>,
    } else {
    }
    return
  }
  func.func @transform_0(%arg0: i32) -> (i32, i32) {
    %c0_i32 = arith.constant 0 : i32
    %c0_i32_0 = arith.constant 0 : i32
    return %arg0, %c0_i32 : i32, i32
  }
  func.func @transform_1(%arg0: i32) -> (i32, i32) {
    %c0_i32 = arith.constant 0 : i32
    %c0_i32_0 = arith.constant 0 : i32
    %c0_i32_1 = arith.constant 0 : i32
    return %c0_i32, %c0_i32_0 : i32, i32
  }
  func.func @transform_2(%arg0: i32) -> (i32, i32) {
    %c0_i32 = arith.constant 0 : i32
    %c0_i32_0 = arith.constant 0 : i32
    %c0_i32_1 = arith.constant 0 : i32
    return %c0_i32, %c0_i32_0 : i32, i32
  }
}

module attributes {stable_mosaic.version = 11 : i64} {
  func.func @_fused_gemm_kernel(%arg0: i32, %arg1: i32, %arg2: i32, %arg3: i32, %arg4: memref<1x512x128xbf16, #tpu.memory_space<vmem>>, %arg5: memref<1x128xf32, #tpu.memory_space<vmem>>, %arg6: memref<1x128xf32, #tpu.memory_space<vmem>>, %arg7: memref<1x128x128xbf16, #tpu.memory_space<vmem>>, %arg8: memref<1x128xf32, #tpu.memory_space<vmem>>, %arg9: memref<1x512x128xf32, #tpu.memory_space<vmem>>, %arg10: memref<512x128xf32, #tpu.memory_space<vmem>>) attributes {dimension_semantics = [#tpu.dimension_semantics<parallel>, #tpu.dimension_semantics<parallel>, #tpu.dimension_semantics<parallel>, #tpu.dimension_semantics<arbitrary>], iteration_bounds = array<i64: 4, 1, 1, 1>, scalar_prefetch = 0 : i64, scratch_operands = 1 : i64, tpu.core_type = #tpu.core_type<tc>, window_params = [{transform_indices = @transform_0, window_bounds = array<i64: 1, 512, 128>}, {transform_indices = @transform_1, window_bounds = array<i64: 1, 128>}, {transform_indices = @transform_2, window_bounds = array<i64: 1, 128>}, {transform_indices = @transform_3, window_bounds = array<i64: 1, 128, 128>}, {transform_indices = @transform_4, window_bounds = array<i64: 1, 128>}, {transform_indices = @transform_5, window_bounds = array<i64: 1, 512, 128>}]} {
    %c0_i32 = arith.constant 0 : i32
    %0 = arith.cmpi eq, %arg3, %c0_i32 : i32
    %1 = arith.extui %0 : i1 to i32
    %c0_i32_0 = arith.constant 0 : i32
    %2 = arith.cmpi ne, %1, %c0_i32_0 : i32
    scf.if %2 {
      %cst_17 = arith.constant 0.000000e+00 : f32
      %24 = vector.broadcast %cst_17 : f32 to vector<512x128xf32>
      %c0_18 = arith.constant 0 : index
      %c0_19 = arith.constant 0 : index
      %25 = vector.load %arg10[%c0_18, %c0_19] : memref<512x128xf32, #tpu.memory_space<vmem>>, vector<512x128xf32>
      tpu.vector_store %arg10[%c0_18, %c0_19], %24 {strides = array<i32>} : memref<512x128xf32, #tpu.memory_space<vmem>>, vector<512x128xf32>,
    } else {
    }
    %c0 = arith.constant 0 : index
    %c0_1 = arith.constant 0 : index
    %c0_2 = arith.constant 0 : index
    %3 = vector.load %arg4[%c0, %c0_1, %c0_2] : memref<1x512x128xbf16, #tpu.memory_space<vmem>>, vector<1x512x128xbf16>
    %4 = vector.shape_cast %3 : vector<1x512x128xbf16> to vector<512x128xbf16>
    %5 = arith.extf %4 : vector<512x128xbf16> to vector<512x128xf32>
    %c0_3 = arith.constant 0 : index
    %c0_4 = arith.constant 0 : index
    %6 = vector.load %arg5[%c0_3, %c0_4] : memref<1x128xf32, #tpu.memory_space<vmem>>, vector<1x128xf32>
    %7 = vector.broadcast %6 : vector<1x128xf32> to vector<512x128xf32>
    %8 = arith.mulf %5, %7 : vector<512x128xf32>
    %c0_5 = arith.constant 0 : index
    %c0_6 = arith.constant 0 : index
    %9 = vector.load %arg6[%c0_5, %c0_6] : memref<1x128xf32, #tpu.memory_space<vmem>>, vector<1x128xf32>
    %10 = vector.broadcast %9 : vector<1x128xf32> to vector<512x128xf32>
    %11 = arith.addf %8, %10 : vector<512x128xf32>
    %cst = arith.constant 0.000000e+00 : f32
    %12 = vector.broadcast %cst : f32 to vector<512x128xf32>
    %13 = arith.maximumf %11, %12 : vector<512x128xf32>
    %c0_7 = arith.constant 0 : index
    %c0_8 = arith.constant 0 : index
    %14 = vector.load %arg10[%c0_7, %c0_8] : memref<512x128xf32, #tpu.memory_space<vmem>>, vector<512x128xf32>
    %15 = arith.truncf %13 : vector<512x128xf32> to vector<512x128xbf16>
    %c0_9 = arith.constant 0 : index
    %c0_10 = arith.constant 0 : index
    %c0_11 = arith.constant 0 : index
    %16 = vector.load %arg7[%c0_9, %c0_10, %c0_11] : memref<1x128x128xbf16, #tpu.memory_space<vmem>>, vector<1x128x128xbf16>
    %17 = vector.shape_cast %16 : vector<1x128x128xbf16> to vector<128x128xbf16>
    %cst_12 = arith.constant dense<0.000000e+00> : vector<512x128xf32>
    %18 = tpu.matmul %15, %17, %cst_12 {dimension_numbers = #tpu.dot_dimension_numbers<[1], [0], [0], [1], [0, 0, 1, 1], [], []>} : vector<512x128xbf16>, vector<128x128xbf16>, vector<512x128xf32> -> vector<512x128xf32>
    %19 = arith.addf %14, %18 : vector<512x128xf32>
    %c0_13 = arith.constant 0 : index
    %c0_14 = arith.constant 0 : index
    %20 = vector.load %arg10[%c0_13, %c0_14] : memref<512x128xf32, #tpu.memory_space<vmem>>, vector<512x128xf32>
    tpu.vector_store %arg10[%c0_13, %c0_14], %19 {strides = array<i32>} : memref<512x128xf32, #tpu.memory_space<vmem>>, vector<512x128xf32>,
    %c0_i32_15 = arith.constant 0 : i32
    %21 = arith.cmpi eq, %arg3, %c0_i32_15 : i32
    %22 = arith.extui %21 : i1 to i32
    %c0_i32_16 = arith.constant 0 : i32
    %23 = arith.cmpi ne, %22, %c0_i32_16 : i32
    scf.if %23 {
      %c0_17 = arith.constant 0 : index
      %c0_18 = arith.constant 0 : index
      %24 = vector.load %arg10[%c0_17, %c0_18] : memref<512x128xf32, #tpu.memory_space<vmem>>, vector<512x128xf32>
      %c0_19 = arith.constant 0 : index
      %c0_20 = arith.constant 0 : index
      %25 = vector.load %arg8[%c0_19, %c0_20] : memref<1x128xf32, #tpu.memory_space<vmem>>, vector<1x128xf32>
      %26 = vector.broadcast %25 : vector<1x128xf32> to vector<512x128xf32>
      %27 = arith.addf %24, %26 : vector<512x128xf32>
      %28 = math.tanh %27 : vector<512x128xf32>
      %c0_21 = arith.constant 0 : index
      %c0_22 = arith.constant 0 : index
      %c0_23 = arith.constant 0 : index
      %29 = vector.load %arg9[%c0_21, %c0_22, %c0_23] : memref<1x512x128xf32, #tpu.memory_space<vmem>>, vector<1x512x128xf32>
      %30 = vector.shape_cast %29 : vector<1x512x128xf32> to vector<512x128xf32>
      %31 = vector.shape_cast %28 : vector<512x128xf32> to vector<1x512x128xf32>
      tpu.vector_store %arg9[%c0_21, %c0_22, %c0_23], %31 {strides = array<i32>} : memref<1x512x128xf32, #tpu.memory_space<vmem>>, vector<1x512x128xf32>,
    } else {
    }
    return
  }
  func.func @transform_0(%arg0: i32, %arg1: i32, %arg2: i32, %arg3: i32) -> (i32, i32, i32) {
    %c0_i32 = arith.constant 0 : i32
    return %arg0, %arg1, %arg3 : i32, i32, i32
  }
  func.func @transform_1(%arg0: i32, %arg1: i32, %arg2: i32, %arg3: i32) -> (i32, i32) {
    %c0_i32 = arith.constant 0 : i32
    %c0_i32_0 = arith.constant 0 : i32
    return %c0_i32, %arg3 : i32, i32
  }
  func.func @transform_2(%arg0: i32, %arg1: i32, %arg2: i32, %arg3: i32) -> (i32, i32) {
    %c0_i32 = arith.constant 0 : i32
    %c0_i32_0 = arith.constant 0 : i32
    return %c0_i32, %arg3 : i32, i32
  }
  func.func @transform_3(%arg0: i32, %arg1: i32, %arg2: i32, %arg3: i32) -> (i32, i32, i32) {
    %c0_i32 = arith.constant 0 : i32
    return %arg0, %arg3, %arg2 : i32, i32, i32
  }
  func.func @transform_4(%arg0: i32, %arg1: i32, %arg2: i32, %arg3: i32) -> (i32, i32) {
    %c0_i32 = arith.constant 0 : i32
    %c0_i32_0 = arith.constant 0 : i32
    return %c0_i32, %arg2 : i32, i32
  }
  func.func @transform_5(%arg0: i32, %arg1: i32, %arg2: i32, %arg3: i32) -> (i32, i32, i32) {
    %c0_i32 = arith.constant 0 : i32
    return %arg0, %arg1, %arg2 : i32, i32, i32
  }
}

</mosaic_0001>

<bundles_post_ra>
// kernel: tile.77
= control target key start
LH: loop header
LB: loop body
LE: loop exit
PB: predicated region body
PF: predicated region fallthrough
CT: control target
= control target key end

     0   :  { %s20_s0 = inlined_call_operand.<no memory space> [shape: f32[], index: 0, kind: input, shape index: {}]   ;;  %s21_s1 = inlined_call_operand.vmem [shape: f32[48], index: 1, kind: output, shape index: {}]  }
   0x1   :  { %v2_v0 = vstv %s20_s0 }
   0x2   :  { %3 = vst [vmem:[%s21_s1] sm:$0x1] %v2_v0 }

// kernel: tile.75
= control target key start
LH: loop header
LB: loop body
LE: loop exit
PB: predicated region body
PF: predicated region fallthrough
CT: control target
= control target key end

     0   :  { %s20_s0 = inlined_call_operand.<no memory space> [shape: f32[], index: 0, kind: input, shape index: {}]   ;;  %s21_s1 = inlined_call_operand.vmem [shape: f32[1,128], index: 1, kind: output, shape index: {}]  }
   0x1   :  { %v2_v0 = vstv %s20_s0 }
   0x2   :  { %3 = vst [vmem:[%s21_s1] sm:$0x1] %v2_v0 }

// kernel: _lambda_.17
= control target key start
LH: loop header
LB: loop body
LE: loop exit
PB: predicated region body
PF: predicated region fallthrough
CT: control target
= control target key end

     0   :  { %s1787_s3 = inlined_call_operand.vmem [shape: bf16[1,128,128], index: 3, kind: input, shape index: {}]   ;;  %s1788_s1 = inlined_call_operand.vmem [shape: f32[1,128], index: 1, kind: input, shape index: {}]   ;;  %s1789_s2 = inlined_call_operand.vmem [shape: f32[1,128], index: 2, kind: input, shape index: {}]   ;;  %s1790_s0 = inlined_call_operand.vmem [shape: bf16[1,512,128], index: 0, kind: input, shape index: {}]   ;;  %s1791_s4 = inlined_call_operand.vmem [shape: f32[1,128], index: 4, kind: input, shape index: {}]   ;;  %s1792_s5 = inlined_call_operand.vmem [shape: f32[1,512,128], index: 5, kind: output, shape index: {}]  }
   0x1   :  { %v1051_v0 = vld [vmem:[%s1787_s3 + $0x38] sm:$0xff]  ;;  %v1050_v1 = vld [vmem:[%s1787_s3 + $0x30] sm:$0xff]  ;;  %v1049_v2 = vld [vmem:[%s1787_s3 + $0x28] sm:$0xff] }
   0x2   :  { %512 = vmatpush.bf16.msra.mxu0 %v1051_v0  ;;  %1211 = vmatpush.bf16.msra.mxu1 %v1051_v0  ;;  %v1048_v3 = vld [vmem:[%s1787_s3 + $0x20] sm:$0xff]  ;;  %v1047_v5 = vld [vmem:[%s1787_s3 + $0x18] sm:$0xff]  ;;  %v1046_v15 = vld [vmem:[%s1787_s3 + $0x10] sm:$0xff] }
   0x3   :  { %1212 = vmatpush.bf16.msra.mxu2 %v1051_v0  ;;  %1213 = vmatpush.bf16.msra.mxu3 %v1051_v0  ;;  %v1053_v4 = vld [vmem:[%s1790_s0] sm:$0xff]   ;;  %v1045_v25 = vld [vmem:[%s1787_s3 + $0x8] sm:$0xff] }
   0x4   :  { %v1187_v6 = vld [vmem:[%s1790_s0 + $0x40] sm:$0xff]   ;;  %v1054_v9 = vunpack.c.l.bf16 %v1053_v4  ;;  %v1055_v11 = vunpack.c.h.bf16 %v1053_v4  ;;  %v1180_v42 = vld [vmem:[%s1790_s0 + $0x8] sm:$0xff]  }
   0x5   :  { %v1195_v7 = vld [vmem:[%s1790_s0 + $0x80] sm:$0xff]   ;;  %v1086_v12 = vunpack.c.l.bf16 %v1187_v6  ;;  %v1087_v13 = vunpack.c.h.bf16 %v1187_v6  ;;  %v1188_v43 = vld [vmem:[%s1790_s0 + $0x48] sm:$0xff]   ;;  %v1058_v46 = vunpack.c.l.bf16 %v1180_v42  ;;  %v1059_v47 = vunpack.c.h.bf16 %v1180_v42 }
   0x6   :  { %513 = vmatpush.bf16.msra.mxu0 %v1050_v1  ;;  %1214 = vmatpush.bf16.msra.mxu1 %v1050_v1  ;;  %v1203_v8 = vld [vmem:[%s1790_s0 + $0xc0] sm:$0xff]   ;;  %v1118_v14 = vunpack.c.l.bf16 %v1195_v7  ;;  %v1119_v16 = vunpack.c.h.bf16 %v1195_v7  ;;  %v1196_v44 = vld [vmem:[%s1790_s0 + $0x88] sm:$0xff]   ;;  %v1090_v48 = vunpack.c.l.bf16 %v1188_v43  ;;  %v1091_v49 = vunpack.c.h.bf16 %v1188_v43 }
   0x7   :  { %1215 = vmatpush.bf16.msra.mxu2 %v1050_v1  ;;  %1216 = vmatpush.bf16.msra.mxu3 %v1050_v1  ;;  %v1298_v10 = vld [vmem:[%s1788_s1] ss:$0 sm:$0xff]  ;;  %v1150_v17 = vunpack.c.l.bf16 %v1203_v8  ;;  %v1151_v18 = vunpack.c.h.bf16 %v1203_v8  ;;  %v1204_v45 = vld [vmem:[%s1790_s0 + $0xc8] sm:$0xff]   ;;  %v1122_v50 = vunpack.c.l.bf16 %v1196_v44  ;;  %v1123_v51 = vunpack.c.h.bf16 %v1196_v44  ;;  %v1182_v44 = vld [vmem:[%s1790_s0 + $0x18] sm:$0xff]  }
   0x8   :  { %v220_v19 = vmul.f32 %v1298_v10, %v1054_v9  ;;  %v1307_v20 = vld [vmem:[%s1789_s2] ss:$0 sm:$0xff]  ;;  %v221_v21 = vmul.f32 %v1298_v10, %v1055_v11  ;;  %v236_v22 = vmul.f32 %v1298_v10, %v1086_v12  ;;  %v237_v23 = vmul.f32 %v1298_v10, %v1087_v13  ;;  %v1181_v11 = vld [vmem:[%s1790_s0 + $0x10] sm:$0xff]  }
   0x9   :  { %v252_v24 = vmul.f32 %v1298_v10, %v1118_v14  ;;  %v253_v26 = vmul.f32 %v1298_v10, %v1119_v16  ;;  %v268_v27 = vmul.f32 %v1298_v10, %v1150_v17  ;;  %v269_v28 = vmul.f32 %v1298_v10, %v1151_v18  ;;  %v1044_v34 = vld [vmem:[%s1787_s3] sm:$0xff]  ;;  %v1189_v12 = vld [vmem:[%s1790_s0 + $0x50] sm:$0xff]  }
   0xa   :  { %514 = vmatpush.bf16.msra.mxu0 %v1049_v2  ;;  %1217 = vmatpush.bf16.msra.mxu1 %v1049_v2  ;;  %v288_v29 = vadd.f32 %v1307_v20, %v220_v19  ;;  %v289_v30 = vadd.f32 %v1307_v20, %v221_v21  ;;  %v304_v31 = vadd.f32 %v1307_v20, %v236_v22  ;;  %v1154_v52 = vunpack.c.l.bf16 %v1204_v45  ;;  %v1197_v13 = vld [vmem:[%s1790_s0 + $0x90] sm:$0xff]  }
   0xb   :  { %1218 = vmatpush.bf16.msra.mxu2 %v1049_v2  ;;  %1219 = vmatpush.bf16.msra.mxu3 %v1049_v2  ;;  %v305_v32 = vadd.f32 %v1307_v20, %v237_v23  ;;  %v320_v33 = vadd.f32 %v1307_v20, %v252_v24  ;;  %v321_v35 = vadd.f32 %v1307_v20, %v253_v26  ;;  %v1155_v53 = vunpack.c.h.bf16 %v1204_v45  ;;  %v1205_v14 = vld [vmem:[%s1790_s0 + $0xd0] sm:$0xff]   ;;  %v1190_v45 = vld [vmem:[%s1790_s0 + $0x58] sm:$0xff]  }
   0xc   :  { %v336_v36 = vadd.f32 %v1307_v20, %v268_v27  ;;  %v337_v37 = vadd.f32 %v1307_v20, %v269_v28  ;;  %v416_v38 = vpack.c.bf16 %v289_v30, %v288_v29  ;;  %v222_v54 = vmul.f32 %v1298_v10, %v1058_v46  ;;  %v1198_v46 = vld [vmem:[%s1790_s0 + $0x98] sm:$0xff]  }
   0xd   :  { %v424_v39 = vpack.c.bf16 %v305_v32, %v304_v31  ;;  %v432_v40 = vpack.c.bf16 %v321_v35, %v320_v33  ;;  %v223_v55 = vmul.f32 %v1298_v10, %v1059_v47  ;;  %v238_v56 = vmul.f32 %v1298_v10, %v1090_v48  ;;  %v1206_v47 = vld [vmem:[%s1790_s0 + $0xd8] sm:$0xff]  }
   0xe   :  { %515 = vmatpush.bf16.msra.mxu0 %v1048_v3  ;;  %1220 = vmatpush.bf16.msra.mxu1 %v1048_v3  ;;  %v440_v41 = vpack.c.bf16 %v337_v37, %v336_v36  ;;  %v239_v57 = vmul.f32 %v1298_v10, %v1091_v49  ;;  %v254_v58 = vmul.f32 %v1298_v10, %v1122_v50  ;;  %v1063_v16 = vunpack.c.h.bf16 %v1181_v11 }
   0xf   :  { %1221 = vmatpush.bf16.msra.mxu2 %v1048_v3  ;;  %1222 = vmatpush.bf16.msra.mxu3 %v1048_v3  ;;  %v255_v59 = vmul.f32 %v1298_v10, %v1123_v51  ;;  %v270_v60 = vmul.f32 %v1298_v10, %v1154_v52  ;;  %v271_v61 = vmul.f32 %v1298_v10, %v1155_v53  ;;  %v1094_v17 = vunpack.c.l.bf16 %v1189_v12 }
  0x10   :  { %v290_v62 = vadd.f32 %v1307_v20, %v222_v54  ;;  %v291_v63 = vadd.f32 %v1307_v20, %v223_v55  ;;  %v306_v0 = vadd.f32 %v1307_v20, %v238_v56  ;;  %v307_v1 = vadd.f32 %v1307_v20, %v239_v57 }
  0x11   :  { %v322_v2 = vadd.f32 %v1307_v20, %v254_v58  ;;  %v323_v3 = vadd.f32 %v1307_v20, %v255_v59  ;;  %v338_v4 = vadd.f32 %v1307_v20, %v270_v60  ;;  %v1095_v18 = vunpack.c.h.bf16 %v1189_v12 }
  0x12   :  { %516 = vmatpush.bf16.msra.mxu0 %v1047_v5  ;;  %1223 = vmatpush.bf16.msra.mxu1 %v1047_v5  ;;  %v417_v6 = vpack.c.bf16 %v291_v63, %v290_v62  ;;  %v425_v7 = vpack.c.bf16 %v307_v1, %v306_v0  ;;  %v1126_v19 = vunpack.c.l.bf16 %v1197_v13  ;;  %v1127_v21 = vunpack.c.h.bf16 %v1197_v13  ;;  %v1183_v13 = vld [vmem:[%s1790_s0 + $0x20] sm:$0xff]  }
  0x13   :  { %1224 = vmatpush.bf16.msra.mxu2 %v1047_v5  ;;  %1225 = vmatpush.bf16.msra.mxu3 %v1047_v5  ;;  %v339_v5 = vadd.f32 %v1307_v20, %v271_v61  ;;  %v433_v8 = vpack.c.bf16 %v323_v3, %v322_v2  ;;  %v1158_v22 = vunpack.c.l.bf16 %v1205_v14  ;;  %v1159_v23 = vunpack.c.h.bf16 %v1205_v14  ;;  %v1191_v14 = vld [vmem:[%s1790_s0 + $0x60] sm:$0xff]  }
  0x14   :  { %v240_v26 = vmul.f32 %v1298_v10, %v1094_v17  ;;  %v241_v27 = vmul.f32 %v1298_v10, %v1095_v18  ;;  %v256_v28 = vmul.f32 %v1298_v10, %v1126_v19  ;;  %v257_v29 = vmul.f32 %v1298_v10, %v1127_v21 }
  0x15   :  { %v441_v9 = vpack.c.bf16 %v339_v5, %v338_v4  ;;  %v272_v30 = vmul.f32 %v1298_v10, %v1158_v22  ;;  %v273_v31 = vmul.f32 %v1298_v10, %v1159_v23  ;;  %v1066_v48 = vunpack.c.l.bf16 %v1182_v44 }
  0x16   :  { %517 = vmatpush.bf16.msra.mxu0 %v1046_v15  ;;  %1226 = vmatpush.bf16.msra.mxu1 %v1046_v15  ;;  %v309_v35 = vadd.f32 %v1307_v20, %v241_v27  ;;  %v324_v36 = vadd.f32 %v1307_v20, %v256_v28  ;;  %v325_v37 = vadd.f32 %v1307_v20, %v257_v29  ;;  %v1067_v49 = vunpack.c.h.bf16 %v1182_v44 }
  0x17   :  { %1227 = vmatpush.bf16.msra.mxu2 %v1046_v15  ;;  %1228 = vmatpush.bf16.msra.mxu3 %v1046_v15  ;;  %v1062_v15 = vunpack.c.l.bf16 %v1181_v11  ;;  %v1098_v50 = vunpack.c.l.bf16 %v1190_v45  ;;  %v1099_v51 = vunpack.c.h.bf16 %v1190_v45  ;;  %v1130_v52 = vunpack.c.l.bf16 %v1198_v46 }
  0x18   :  { %v434_v42 = vpack.c.bf16 %v325_v37, %v324_v36  ;;  %v1131_v53 = vunpack.c.h.bf16 %v1198_v46  ;;  %v1162_v54 = vunpack.c.l.bf16 %v1206_v47  ;;  %v1163_v55 = vunpack.c.h.bf16 %v1206_v47  ;;  %v1184_v46 = vld [vmem:[%s1790_s0 + $0x28] sm:$0xff]  }
  0x19   :  { %v224_v24 = vmul.f32 %v1298_v10, %v1062_v15  ;;  %v226_v56 = vmul.f32 %v1298_v10, %v1066_v48  ;;  %v227_v57 = vmul.f32 %v1298_v10, %v1067_v49  ;;  %v242_v58 = vmul.f32 %v1298_v10, %v1098_v50  ;;  %v1199_v15 = vld [vmem:[%s1790_s0 + $0xa0] sm:$0xff]   ;;  %v1192_v47 = vld [vmem:[%s1790_s0 + $0x68] sm:$0xff]  }
  0x1a   :  { %518 = vmatpush.bf16.msra.mxu0 %v1045_v25  ;;  %1229 = vmatpush.bf16.msra.mxu1 %v1045_v25  ;;  %v243_v59 = vmul.f32 %v1298_v10, %v1099_v51  ;;  %v258_v60 = vmul.f32 %v1298_v10, %v1130_v52  ;;  %v259_v61 = vmul.f32 %v1298_v10, %v1131_v53  ;;  %v1070_v17 = vunpack.c.l.bf16 %v1183_v13  ;;  %v1200_v48 = vld [vmem:[%s1790_s0 + $0xa8] sm:$0xff]  }
  0x1b   :  { %1230 = vmatpush.bf16.msra.mxu2 %v1045_v25  ;;  %1231 = vmatpush.bf16.msra.mxu3 %v1045_v25  ;;  %v225_v25 = vmul.f32 %v1298_v10, %v1063_v16  ;;  %v292_v32 = vadd.f32 %v1307_v20, %v224_v24  ;;  %v274_v62 = vmul.f32 %v1298_v10, %v1162_v54  ;;  %v1207_v16 = vld [vmem:[%s1790_s0 + $0xe0] sm:$0xff]   ;;  %v1071_v18 = vunpack.c.h.bf16 %v1183_v13  ;;  %v1208_v49 = vld [vmem:[%s1790_s0 + $0xe8] sm:$0xff]  }
  0x1c   :  { %v275_v63 = vmul.f32 %v1298_v10, %v1163_v55  ;;  %v294_v0 = vadd.f32 %v1307_v20, %v226_v56  ;;  %v295_v1 = vadd.f32 %v1307_v20, %v227_v57  ;;  %v310_v2 = vadd.f32 %v1307_v20, %v242_v58 }
  0x1d   :  { %v293_v33 = vadd.f32 %v1307_v20, %v225_v25  ;;  %v311_v3 = vadd.f32 %v1307_v20, %v243_v59  ;;  %v326_v4 = vadd.f32 %v1307_v20, %v258_v60  ;;  %v327_v5 = vadd.f32 %v1307_v20, %v259_v61 }
  0x1e   :  { %519 = vmatpush.bf16.msra.mxu0 %v1044_v34  ;;  %1232 = vmatpush.bf16.msra.mxu1 %v1044_v34  ;;  %v1102_v19 = vunpack.c.l.bf16 %v1191_v14  ;;  %v1103_v21 = vunpack.c.h.bf16 %v1191_v14  ;;  %v1134_v22 = vunpack.c.l.bf16 %v1199_v15  ;;  %v1135_v23 = vunpack.c.h.bf16 %v1199_v15  ;;  %v1185_v15 = vld [vmem:[%s1790_s0 + $0x30] sm:$0xff]  }
  0x1f   :  { %1233 = vmatpush.bf16.msra.mxu2 %v1044_v34  ;;  %1234 = vmatpush.bf16.msra.mxu3 %v1044_v34  ;;  %v308_v34 = vadd.f32 %v1307_v20, %v240_v26  ;;  %v435_v11 = vpack.c.bf16 %v327_v5, %v326_v4  ;;  %v1166_v24 = vunpack.c.l.bf16 %v1207_v16  ;;  %v1167_v25 = vunpack.c.h.bf16 %v1207_v16  ;;  %v1193_v16 = vld [vmem:[%s1790_s0 + $0x70] sm:$0xff]  }
  0x20   :  { %v228_v26 = vmul.f32 %v1298_v10, %v1070_v17  ;;  %v229_v27 = vmul.f32 %v1298_v10, %v1071_v18  ;;  %v244_v28 = vmul.f32 %v1298_v10, %v1102_v19  ;;  %v245_v29 = vmul.f32 %v1298_v10, %v1103_v21  ;;  %v1201_v17 = vld [vmem:[%s1790_s0 + $0xb0] sm:$0xff]  }
  0x21   :  { %520 = vmatmul.bf16.vlgmr.msra.gmra.mxu0 %v416_v38  ;;  %560 = vmatmul.bf16.vlgmr.msra.gmra.mxu1 %v424_v39  ;;  %v340_v38 = vadd.f32 %v1307_v20, %v272_v30  ;;  %v341_v39 = vadd.f32 %v1307_v20, %v273_v31  ;;  %v260_v30 = vmul.f32 %v1298_v10, %v1134_v22  ;;  %v1074_v50 = vunpack.c.l.bf16 %v1184_v46  ;;  %v1209_v18 = vld [vmem:[%s1790_s0 + $0xf0] sm:$0xff]  }
  0x22   :  { %600 = vmatmul.bf16.vlgmr.msra.gmra.mxu2 %v432_v40  ;;  %640 = vmatmul.bf16.vlgmr.msra.gmra.mxu3 %v440_v41  ;;  %v418_v40 = vpack.c.bf16 %v293_v33, %v292_v32  ;;  %v426_v41 = vpack.c.bf16 %v309_v35, %v308_v34  ;;  %v261_v31 = vmul.f32 %v1298_v10, %v1135_v23  ;;  %v1075_v51 = vunpack.c.h.bf16 %v1184_v46 }
  0x23   :  { %v442_v43 = vpack.c.bf16 %v341_v39, %v340_v38  ;;  %v276_v32 = vmul.f32 %v1298_v10, %v1166_v24  ;;  %v277_v33 = vmul.f32 %v1298_v10, %v1167_v25  ;;  %v296_v34 = vadd.f32 %v1307_v20, %v228_v26 }
  0x24   :  { %v297_v35 = vadd.f32 %v1307_v20, %v229_v27  ;;  %v312_v36 = vadd.f32 %v1307_v20, %v244_v28  ;;  %v313_v37 = vadd.f32 %v1307_v20, %v245_v29  ;;  %v328_v38 = vadd.f32 %v1307_v20, %v260_v30 }
  0x25   :  { %v329_v39 = vadd.f32 %v1307_v20, %v261_v31  ;;  %v1106_v52 = vunpack.c.l.bf16 %v1192_v47  ;;  %v1107_v53 = vunpack.c.h.bf16 %v1192_v47  ;;  %v1138_v54 = vunpack.c.l.bf16 %v1200_v48 }
  0x26   :  { %v1139_v55 = vunpack.c.h.bf16 %v1200_v48  ;;  %v1170_v56 = vunpack.c.l.bf16 %v1208_v49  ;;  %v1171_v57 = vunpack.c.h.bf16 %v1208_v49  ;;  %v230_v58 = vmul.f32 %v1298_v10, %v1074_v50  ;;  %v1186_v48 = vld [vmem:[%s1790_s0 + $0x38] sm:$0xff]  }
  0x27   :  { %v436_v44 = vpack.c.bf16 %v329_v39, %v328_v38  ;;  %v231_v59 = vmul.f32 %v1298_v10, %v1075_v51  ;;  %v246_v60 = vmul.f32 %v1298_v10, %v1106_v52  ;;  %v247_v61 = vmul.f32 %v1298_v10, %v1107_v53  ;;  %v1194_v49 = vld [vmem:[%s1790_s0 + $0x78] sm:$0xff]  }
  0x28   :  { %v1078_v19 = vunpack.c.l.bf16 %v1185_v15  ;;  %v1079_v21 = vunpack.c.h.bf16 %v1185_v15  ;;  %v1110_v22 = vunpack.c.l.bf16 %v1193_v16  ;;  %v1111_v23 = vunpack.c.h.bf16 %v1193_v16  ;;  %v1202_v50 = vld [vmem:[%s1790_s0 + $0xb8] sm:$0xff]   ;;  %v1529_v16 = vld [vmem:[%s1791_s4] ss:$0 sm:$0xff] }
  0x29   :  { %v314_v4 = vadd.f32 %v1307_v20, %v246_v60  ;;  %v315_v5 = vadd.f32 %v1307_v20, %v247_v61  ;;  %v1142_v24 = vunpack.c.l.bf16 %v1201_v17  ;;  %v1143_v25 = vunpack.c.h.bf16 %v1201_v17  ;;  %v1210_v51 = vld [vmem:[%s1790_s0 + $0xf8] sm:$0xff]  }
  0x2a   :  { %v1174_v26 = vunpack.c.l.bf16 %v1209_v18  ;;  %v1175_v27 = vunpack.c.h.bf16 %v1209_v18  ;;  %v232_v28 = vmul.f32 %v1298_v10, %v1078_v19  ;;  %v233_v29 = vmul.f32 %v1298_v10, %v1079_v21 }
  0x2b   :  { %v248_v30 = vmul.f32 %v1298_v10, %v1110_v22  ;;  %v249_v31 = vmul.f32 %v1298_v10, %v1111_v23  ;;  %v1082_v52 = vunpack.c.l.bf16 %v1186_v48  ;;  %v1083_v53 = vunpack.c.h.bf16 %v1186_v48 }
  0x2d   :  { %v316_v38 = vadd.f32 %v1307_v20, %v248_v30  ;;  %v317_v39 = vadd.f32 %v1307_v20, %v249_v31  ;;  %v234_v60 = vmul.f32 %v1298_v10, %v1082_v52  ;;  %v235_v61 = vmul.f32 %v1298_v10, %v1083_v53 }
  0x31   :  { %525 = vmatmul.bf16.gmra.mxu0 %v417_v6  ;;  %565 = vmatmul.bf16.gmra.mxu1 %v425_v7  ;;  %v342_v6 = vadd.f32 %v1307_v20, %v274_v62  ;;  %v343_v7 = vadd.f32 %v1307_v20, %v275_v63  ;;  %v262_v62 = vmul.f32 %v1298_v10, %v1138_v54  ;;  %v1114_v54 = vunpack.c.l.bf16 %v1194_v49 }
  0x32   :  { %605 = vmatmul.bf16.gmra.mxu2 %v433_v8  ;;  %645 = vmatmul.bf16.gmra.mxu3 %v441_v9  ;;  %v419_v8 = vpack.c.bf16 %v295_v1, %v294_v0  ;;  %v427_v9 = vpack.c.bf16 %v311_v3, %v310_v2  ;;  %v263_v63 = vmul.f32 %v1298_v10, %v1139_v55  ;;  %v1115_v55 = vunpack.c.h.bf16 %v1194_v49 }
  0x33   :  { %v443_v12 = vpack.c.bf16 %v343_v7, %v342_v6  ;;  %v278_v0 = vmul.f32 %v1298_v10, %v1170_v56  ;;  %v279_v1 = vmul.f32 %v1298_v10, %v1171_v57  ;;  %v298_v2 = vadd.f32 %v1307_v20, %v230_v58 }
  0x34   :  { %v299_v3 = vadd.f32 %v1307_v20, %v231_v59  ;;  %v330_v6 = vadd.f32 %v1307_v20, %v262_v62  ;;  %v331_v7 = vadd.f32 %v1307_v20, %v263_v63  ;;  %v1146_v56 = vunpack.c.l.bf16 %v1202_v50 }
  0x35   :  { %v1147_v57 = vunpack.c.h.bf16 %v1202_v50  ;;  %v1178_v58 = vunpack.c.l.bf16 %v1210_v51  ;;  %v1179_v59 = vunpack.c.h.bf16 %v1210_v51  ;;  %v250_v62 = vmul.f32 %v1298_v10, %v1114_v54 }
  0x36   :  { %v437_v13 = vpack.c.bf16 %v331_v7, %v330_v6  ;;  %v251_v63 = vmul.f32 %v1298_v10, %v1115_v55 }
  0x37   :  { %v318_v6 = vadd.f32 %v1307_v20, %v250_v62 }
  0x38   :  { %v319_v7 = vadd.f32 %v1307_v20, %v251_v63 }
  0x41   :  { %530 = vmatmul.bf16.gmra.mxu0 %v418_v40  ;;  %570 = vmatmul.bf16.gmra.mxu1 %v426_v41  ;;  %v344_v40 = vadd.f32 %v1307_v20, %v276_v32  ;;  %v345_v41 = vadd.f32 %v1307_v20, %v277_v33  ;;  %v264_v32 = vmul.f32 %v1298_v10, %v1142_v24 }
  0x42   :  { %610 = vmatmul.bf16.gmra.mxu2 %v434_v42  ;;  %650 = vmatmul.bf16.gmra.mxu3 %v442_v43  ;;  %v420_v42 = vpack.c.bf16 %v297_v35, %v296_v34  ;;  %v428_v43 = vpack.c.bf16 %v313_v37, %v312_v36  ;;  %v265_v33 = vmul.f32 %v1298_v10, %v1143_v25 }
  0x43   :  { %v444_v45 = vpack.c.bf16 %v345_v41, %v344_v40  ;;  %v280_v34 = vmul.f32 %v1298_v10, %v1174_v26  ;;  %v281_v35 = vmul.f32 %v1298_v10, %v1175_v27  ;;  %v300_v36 = vadd.f32 %v1307_v20, %v232_v28 }
  0x44   :  { %v301_v37 = vadd.f32 %v1307_v20, %v233_v29  ;;  %v332_v40 = vadd.f32 %v1307_v20, %v264_v32  ;;  %v333_v41 = vadd.f32 %v1307_v20, %v265_v33 }
  0x46   :  { %v438_v46 = vpack.c.bf16 %v333_v41, %v332_v40 }
  0x51   :  { %535 = vmatmul.bf16.gmra.mxu0 %v419_v8  ;;  %575 = vmatmul.bf16.gmra.mxu1 %v427_v9  ;;  %v346_v8 = vadd.f32 %v1307_v20, %v278_v0  ;;  %v347_v9 = vadd.f32 %v1307_v20, %v279_v1  ;;  %v266_v0 = vmul.f32 %v1298_v10, %v1146_v56 }
  0x52   :  { %615 = vmatmul.bf16.gmra.mxu2 %v435_v11  ;;  %655 = vmatmul.bf16.gmra.mxu3 %v443_v12  ;;  %v421_v11 = vpack.c.bf16 %v299_v3, %v298_v2  ;;  %v429_v12 = vpack.c.bf16 %v315_v5, %v314_v4  ;;  %v267_v1 = vmul.f32 %v1298_v10, %v1147_v57 }
  0x53   :  { %v445_v14 = vpack.c.bf16 %v347_v9, %v346_v8  ;;  %v282_v2 = vmul.f32 %v1298_v10, %v1178_v58  ;;  %v283_v3 = vmul.f32 %v1298_v10, %v1179_v59  ;;  %v302_v4 = vadd.f32 %v1307_v20, %v234_v60 }
  0x54   :  { %v303_v5 = vadd.f32 %v1307_v20, %v235_v61  ;;  %v334_v8 = vadd.f32 %v1307_v20, %v266_v0  ;;  %v335_v9 = vadd.f32 %v1307_v20, %v267_v1 }
  0x56   :  { %v439_v15 = vpack.c.bf16 %v335_v9, %v334_v8 }
  0x61   :  { %540 = vmatmul.bf16.gmra.mxu0 %v420_v42  ;;  %580 = vmatmul.bf16.gmra.mxu1 %v428_v43  ;;  %v348_v42 = vadd.f32 %v1307_v20, %v280_v34  ;;  %v349_v43 = vadd.f32 %v1307_v20, %v281_v35 }
  0x62   :  { %620 = vmatmul.bf16.gmra.mxu2 %v436_v44  ;;  %660 = vmatmul.bf16.gmra.mxu3 %v444_v45  ;;  %v422_v44 = vpack.c.bf16 %v301_v37, %v300_v36  ;;  %v430_v45 = vpack.c.bf16 %v317_v39, %v316_v38 }
  0x63   :  { %v446_v47 = vpack.c.bf16 %v349_v43, %v348_v42 }
  0x71   :  { %545 = vmatmul.bf16.gmra.mxu0 %v421_v11  ;;  %585 = vmatmul.bf16.gmra.mxu1 %v429_v12  ;;  %v350_v11 = vadd.f32 %v1307_v20, %v282_v2  ;;  %v351_v12 = vadd.f32 %v1307_v20, %v283_v3 }
  0x72   :  { %625 = vmatmul.bf16.gmra.mxu2 %v437_v13  ;;  %665 = vmatmul.bf16.gmra.mxu3 %v445_v14  ;;  %v423_v13 = vpack.c.bf16 %v303_v5, %v302_v4  ;;  %v431_v14 = vpack.c.bf16 %v319_v7, %v318_v6 }
  0x73   :  { %v447_v10 = vpack.c.bf16 %v351_v12, %v350_v11 }
  0x81   :  { %550 = vmatmul.bf16.gmra.mxu0 %v422_v44  ;;  %590 = vmatmul.bf16.gmra.mxu1 %v430_v45 }
  0x82   :  { %630 = vmatmul.bf16.gmra.mxu2 %v438_v46  ;;  %670 = vmatmul.bf16.gmra.mxu3 %v446_v47 }
  0x91   :  { %555 = vmatmul.bf16.gmra.mxu0 %v423_v13  ;;  %595 = vmatmul.bf16.gmra.mxu1 %v431_v14 }
  0x92   :  { %635 = vmatmul.bf16.gmra.mxu2 %v439_v15  ;;  %675 = vmatmul.bf16.gmra.mxu3 %v447_v10 }
  0x9e   :  { %v521_v17 = vpop.f32.mrf.mxu0  ;;  %v561_v18 = vpop.f32.mrf.mxu1 }
  0x9f   :  { %v880_v19 = vadd.f32 %v1529_v16, %v521_v17  ;;  %v896_v21 = vadd.f32 %v1529_v16, %v561_v18 }
  0xa1   :  { %944 = vst [vmem:[%s1792_s5] sm:$0xff] %v880_v19 }
  0xa2   :  { %960 = vst [vmem:[%s1792_s5 + $0x80] sm:$0xff] %v896_v21 }
  0xa5   :  { %v601_v20 = vpop.f32.mrf.mxu2  ;;  %v641_v22 = vpop.f32.mrf.mxu3 }
  0xa6   :  { %v912_v23 = vadd.f32 %v1529_v16, %v601_v20  ;;  %v928_v24 = vadd.f32 %v1529_v16, %v641_v22  ;;  %v523_v25 = vpop.f32.mrf.mxu0  ;;  %v563_v26 = vpop.f32.mrf.mxu1 }
  0xa7   :  { %v881_v27 = vadd.f32 %v1529_v16, %v523_v25  ;;  %v897_v28 = vadd.f32 %v1529_v16, %v563_v26 }
  0xa8   :  { %976 = vst [vmem:[%s1792_s5 + $0x100] sm:$0xff] %v912_v23 }
  0xa9   :  { %992 = vst [vmem:[%s1792_s5 + $0x180] sm:$0xff] %v928_v24 }
  0xaa   :  { %945 = vst [vmem:[%s1792_s5 + $0x8] sm:$0xff] %v881_v27 }
  0xab   :  { %961 = vst [vmem:[%s1792_s5 + $0x88] sm:$0xff] %v897_v28 }
  0xad   :  { %v603_v29 = vpop.f32.mrf.mxu2  ;;  %v643_v30 = vpop.f32.mrf.mxu3 }
  0xae   :  { %v913_v31 = vadd.f32 %v1529_v16, %v603_v29  ;;  %v929_v32 = vadd.f32 %v1529_v16, %v643_v30  ;;  %v526_v33 = vpop.f32.mrf.mxu0  ;;  %v566_v34 = vpop.f32.mrf.mxu1 }
  0xaf   :  { %v882_v35 = vadd.f32 %v1529_v16, %v526_v33  ;;  %v898_v36 = vadd.f32 %v1529_v16, %v566_v34 }
  0xb0   :  { %977 = vst [vmem:[%s1792_s5 + $0x108] sm:$0xff] %v913_v31 }
  0xb1   :  { %993 = vst [vmem:[%s1792_s5 + $0x188] sm:$0xff] %v929_v32 }
  0xb2   :  { %946 = vst [vmem:[%s1792_s5 + $0x10] sm:$0xff] %v882_v35 }
  0xb3   :  { %962 = vst [vmem:[%s1792_s5 + $0x90] sm:$0xff] %v898_v36 }
  0xb5   :  { %v606_v37 = vpop.f32.mrf.mxu2  ;;  %v646_v38 = vpop.f32.mrf.mxu3 }
  0xb6   :  { %v914_v39 = vadd.f32 %v1529_v16, %v606_v37  ;;  %v930_v40 = vadd.f32 %v1529_v16, %v646_v38  ;;  %v528_v41 = vpop.f32.mrf.mxu0  ;;  %v568_v42 = vpop.f32.mrf.mxu1 }
  0xb7   :  { %v883_v43 = vadd.f32 %v1529_v16, %v528_v41  ;;  %v899_v44 = vadd.f32 %v1529_v16, %v568_v42 }
  0xb8   :  { %978 = vst [vmem:[%s1792_s5 + $0x110] sm:$0xff] %v914_v39 }
  0xb9   :  { %994 = vst [vmem:[%s1792_s5 + $0x190] sm:$0xff] %v930_v40 }
  0xba   :  { %947 = vst [vmem:[%s1792_s5 + $0x18] sm:$0xff] %v883_v43 }
  0xbb   :  { %963 = vst [vmem:[%s1792_s5 + $0x98] sm:$0xff] %v899_v44 }
  0xbd   :  { %v608_v45 = vpop.f32.mrf.mxu2  ;;  %v648_v46 = vpop.f32.mrf.mxu3 }
  0xbe   :  { %v915_v47 = vadd.f32 %v1529_v16, %v608_v45  ;;  %v931_v48 = vadd.f32 %v1529_v16, %v648_v46  ;;  %v531_v49 = vpop.f32.mrf.mxu0  ;;  %v571_v50 = vpop.f32.mrf.mxu1 }
  0xbf   :  { %v884_v51 = vadd.f32 %v1529_v16, %v531_v49  ;;  %v900_v52 = vadd.f32 %v1529_v16, %v571_v50 }
  0xc0   :  { %979 = vst [vmem:[%s1792_s5 + $0x118] sm:$0xff] %v915_v47 }
  0xc1   :  { %995 = vst [vmem:[%s1792_s5 + $0x198] sm:$0xff] %v931_v48 }
  0xc2   :  { %948 = vst [vmem:[%s1792_s5 + $0x20] sm:$0xff] %v884_v51 }
  0xc3   :  { %964 = vst [vmem:[%s1792_s5 + $0xa0] sm:$0xff] %v900_v52 }
  0xc5   :  { %v611_v53 = vpop.f32.mrf.mxu2  ;;  %v651_v54 = vpop.f32.mrf.mxu3 }
  0xc6   :  { %v916_v55 = vadd.f32 %v1529_v16, %v611_v53  ;;  %v932_v56 = vadd.f32 %v1529_v16, %v651_v54  ;;  %v533_v57 = vpop.f32.mrf.mxu0  ;;  %v573_v58 = vpop.f32.mrf.mxu1 }
  0xc7   :  { %v885_v59 = vadd.f32 %v1529_v16, %v533_v57  ;;  %v901_v60 = vadd.f32 %v1529_v16, %v573_v58 }
  0xc8   :  { %980 = vst [vmem:[%s1792_s5 + $0x120] sm:$0xff] %v916_v55 }
  0xc9   :  { %996 = vst [vmem:[%s1792_s5 + $0x1a0] sm:$0xff] %v932_v56 }
  0xca   :  { %949 = vst [vmem:[%s1792_s5 + $0x28] sm:$0xff] %v885_v59 }
  0xcb   :  { %965 = vst [vmem:[%s1792_s5 + $0xa8] sm:$0xff] %v901_v60 }
  0xcd   :  { %v613_v61 = vpop.f32.mrf.mxu2  ;;  %v653_v62 = vpop.f32.mrf.mxu3 }
  0xce   :  { %v917_v63 = vadd.f32 %v1529_v16, %v613_v61  ;;  %v933_v0 = vadd.f32 %v1529_v16, %v653_v62  ;;  %v536_v1 = vpop.f32.mrf.mxu0  ;;  %v576_v2 = vpop.f32.mrf.mxu1 }
  0xcf   :  { %v886_v3 = vadd.f32 %v1529_v16, %v536_v1  ;;  %v902_v4 = vadd.f32 %v1529_v16, %v576_v2 }
  0xd0   :  { %981 = vst [vmem:[%s1792_s5 + $0x128] sm:$0xff] %v917_v63 }
  0xd1   :  { %997 = vst [vmem:[%s1792_s5 + $0x1a8] sm:$0xff] %v933_v0 }
  0xd2   :  { %950 = vst [vmem:[%s1792_s5 + $0x30] sm:$0xff] %v886_v3 }
  0xd3   :  { %966 = vst [vmem:[%s1792_s5 + $0xb0] sm:$0xff] %v902_v4 }
  0xd5   :  { %v616_v5 = vpop.f32.mrf.mxu2  ;;  %v656_v6 = vpop.f32.mrf.mxu3 }
  0xd6   :  { %v918_v7 = vadd.f32 %v1529_v16, %v616_v5  ;;  %v934_v8 = vadd.f32 %v1529_v16, %v656_v6  ;;  %v538_v9 = vpop.f32.mrf.mxu0  ;;  %v578_v11 = vpop.f32.mrf.mxu1 }
  0xd7   :  { %v887_v12 = vadd.f32 %v1529_v16, %v538_v9  ;;  %v903_v13 = vadd.f32 %v1529_v16, %v578_v11 }
  0xd8   :  { %982 = vst [vmem:[%s1792_s5 + $0x130] sm:$0xff] %v918_v7 }
  0xd9   :  { %998 = vst [vmem:[%s1792_s5 + $0x1b0] sm:$0xff] %v934_v8 }
  0xda   :  { %951 = vst [vmem:[%s1792_s5 + $0x38] sm:$0xff] %v887_v12 }
  0xdb   :  { %967 = vst [vmem:[%s1792_s5 + $0xb8] sm:$0xff] %v903_v13 }
  0xdd   :  { %v618_v14 = vpop.f32.mrf.mxu2  ;;  %v658_v15 = vpop.f32.mrf.mxu3 }
  0xde   :  { %v919_v10 = vadd.f32 %v1529_v16, %v618_v14  ;;  %v935_v17 = vadd.f32 %v1529_v16, %v658_v15  ;;  %v541_v18 = vpop.f32.mrf.mxu0  ;;  %v581_v19 = vpop.f32.mrf.mxu1 }
  0xdf   :  { %v888_v21 = vadd.f32 %v1529_v16, %v541_v18  ;;  %v904_v20 = vadd.f32 %v1529_v16, %v581_v19 }
  0xe0   :  { %983 = vst [vmem:[%s1792_s5 + $0x138] sm:$0xff] %v919_v10 }
  0xe1   :  { %999 = vst [vmem:[%s1792_s5 + $0x1b8] sm:$0xff] %v935_v17 }
  0xe2   :  { %952 = vst [vmem:[%s1792_s5 + $0x40] sm:$0xff] %v888_v21 }
  0xe3   :  { %968 = vst [vmem:[%s1792_s5 + $0xc0] sm:$0xff] %v904_v20 }
  0xe5   :  { %v621_v22 = vpop.f32.mrf.mxu2  ;;  %v661_v23 = vpop.f32.mrf.mxu3 }
  0xe6   :  { %v920_v24 = vadd.f32 %v1529_v16, %v621_v22  ;;  %v936_v25 = vadd.f32 %v1529_v16, %v661_v23  ;;  %v543_v26 = vpop.f32.mrf.mxu0  ;;  %v583_v27 = vpop.f32.mrf.mxu1 }
  0xe7   :  { %v889_v28 = vadd.f32 %v1529_v16, %v543_v26  ;;  %v905_v29 = vadd.f32 %v1529_v16, %v583_v27 }
  0xe8   :  { %984 = vst [vmem:[%s1792_s5 + $0x140] sm:$0xff] %v920_v24 }
  0xe9   :  { %1000 = vst [vmem:[%s1792_s5 + $0x1c0] sm:$0xff] %v936_v25 }
  0xea   :  { %953 = vst [vmem:[%s1792_s5 + $0x48] sm:$0xff] %v889_v28 }
  0xeb   :  { %969 = vst [vmem:[%s1792_s5 + $0xc8] sm:$0xff] %v905_v29 }
  0xed   :  { %v623_v30 = vpop.f32.mrf.mxu2  ;;  %v663_v31 = vpop.f32.mrf.mxu3 }
  0xee   :  { %v921_v32 = vadd.f32 %v1529_v16, %v623_v30  ;;  %v937_v33 = vadd.f32 %v1529_v16, %v663_v31  ;;  %v546_v34 = vpop.f32.mrf.mxu0  ;;  %v586_v35 = vpop.f32.mrf.mxu1 }
  0xef   :  { %v890_v36 = vadd.f32 %v1529_v16, %v546_v34  ;;  %v906_v37 = vadd.f32 %v1529_v16, %v586_v35 }
  0xf0   :  { %985 = vst [vmem:[%s1792_s5 + $0x148] sm:$0xff] %v921_v32 }
  0xf1   :  { %1001 = vst [vmem:[%s1792_s5 + $0x1c8] sm:$0xff] %v937_v33 }
  0xf2   :  { %954 = vst [vmem:[%s1792_s5 + $0x50] sm:$0xff] %v890_v36 }
  0xf3   :  { %970 = vst [vmem:[%s1792_s5 + $0xd0] sm:$0xff] %v906_v37 }
  0xf5   :  { %v626_v38 = vpop.f32.mrf.mxu2  ;;  %v666_v39 = vpop.f32.mrf.mxu3 }
  0xf6   :  { %v922_v40 = vadd.f32 %v1529_v16, %v626_v38  ;;  %v938_v41 = vadd.f32 %v1529_v16, %v666_v39  ;;  %v548_v42 = vpop.f32.mrf.mxu0  ;;  %v588_v43 = vpop.f32.mrf.mxu1 }
  0xf7   :  { %v891_v44 = vadd.f32 %v1529_v16, %v548_v42  ;;  %v907_v45 = vadd.f32 %v1529_v16, %v588_v43 }
  0xf8   :  { %986 = vst [vmem:[%s1792_s5 + $0x150] sm:$0xff] %v922_v40 }
  0xf9   :  { %1002 = vst [vmem:[%s1792_s5 + $0x1d0] sm:$0xff] %v938_v41 }
  0xfa   :  { %955 = vst [vmem:[%s1792_s5 + $0x58] sm:$0xff] %v891_v44 }
  0xfb   :  { %971 = vst [vmem:[%s1792_s5 + $0xd8] sm:$0xff] %v907_v45 }
  0xfd   :  { %v628_v46 = vpop.f32.mrf.mxu2  ;;  %v668_v47 = vpop.f32.mrf.mxu3 }
  0xfe   :  { %v923_v48 = vadd.f32 %v1529_v16, %v628_v46  ;;  %v939_v49 = vadd.f32 %v1529_v16, %v668_v47  ;;  %v551_v50 = vpop.f32.mrf.mxu0  ;;  %v591_v51 = vpop.f32.mrf.mxu1 }
  0xff   :  { %v892_v52 = vadd.f32 %v1529_v16, %v551_v50  ;;  %v908_v53 = vadd.f32 %v1529_v16, %v591_v51 }
 0x100   :  { %987 = vst [vmem:[%s1792_s5 + $0x158] sm:$0xff] %v923_v48 }
 0x101   :  { %1003 = vst [vmem:[%s1792_s5 + $0x1d8] sm:$0xff] %v939_v49 }
 0x102   :  { %956 = vst [vmem:[%s1792_s5 + $0x60] sm:$0xff] %v892_v52 }
 0x103   :  { %972 = vst [vmem:[%s1792_s5 + $0xe0] sm:$0xff] %v908_v53 }
 0x105   :  { %v631_v54 = vpop.f32.mrf.mxu2  ;;  %v671_v55 = vpop.f32.mrf.mxu3 }
 0x106   :  { %v924_v56 = vadd.f32 %v1529_v16, %v631_v54  ;;  %v940_v57 = vadd.f32 %v1529_v16, %v671_v55  ;;  %v553_v58 = vpop.f32.mrf.mxu0  ;;  %v593_v59 = vpop.f32.mrf.mxu1 }
 0x107   :  { %v893_v60 = vadd.f32 %v1529_v16, %v553_v58  ;;  %v909_v61 = vadd.f32 %v1529_v16, %v593_v59 }
 0x108   :  { %988 = vst [vmem:[%s1792_s5 + $0x160] sm:$0xff] %v924_v56 }
 0x109   :  { %1004 = vst [vmem:[%s1792_s5 + $0x1e0] sm:$0xff] %v940_v57 }
 0x10a   :  { %957 = vst [vmem:[%s1792_s5 + $0x68] sm:$0xff] %v893_v60 }
 0x10b   :  { %973 = vst [vmem:[%s1792_s5 + $0xe8] sm:$0xff] %v909_v61 }
 0x10d   :  { %v633_v62 = vpop.f32.mrf.mxu2  ;;  %v673_v63 = vpop.f32.mrf.mxu3 }
 0x10e   :  { %v925_v0 = vadd.f32 %v1529_v16, %v633_v62  ;;  %v941_v1 = vadd.f32 %v1529_v16, %v673_v63  ;;  %v556_v2 = vpop.f32.mrf.mxu0  ;;  %v596_v3 = vpop.f32.mrf.mxu1 }
 0x10f   :  { %v894_v4 = vadd.f32 %v1529_v16, %v556_v2  ;;  %v910_v5 = vadd.f32 %v1529_v16, %v596_v3 }
 0x110   :  { %989 = vst [vmem:[%s1792_s5 + $0x168] sm:$0xff] %v925_v0 }
 0x111   :  { %1005 = vst [vmem:[%s1792_s5 + $0x1e8] sm:$0xff] %v941_v1 }
 0x112   :  { %958 = vst [vmem:[%s1792_s5 + $0x70] sm:$0xff] %v894_v4 }
 0x113   :  { %974 = vst [vmem:[%s1792_s5 + $0xf0] sm:$0xff] %v910_v5 }
 0x115   :  { %v636_v6 = vpop.f32.mrf.mxu2  ;;  %v676_v7 = vpop.f32.mrf.mxu3 }
 0x116   :  { %v926_v8 = vadd.f32 %v1529_v16, %v636_v6  ;;  %v942_v9 = vadd.f32 %v1529_v16, %v676_v7  ;;  %v558_v11 = vpop.f32.mrf.mxu0  ;;  %v598_v12 = vpop.f32.mrf.mxu1 }
 0x117   :  { %v895_v13 = vadd.f32 %v1529_v16, %v558_v11  ;;  %v911_v14 = vadd.f32 %v1529_v16, %v598_v12 }
 0x118   :  { %990 = vst [vmem:[%s1792_s5 + $0x170] sm:$0xff] %v926_v8 }
 0x119   :  { %1006 = vst [vmem:[%s1792_s5 + $0x1f0] sm:$0xff] %v942_v9 }
 0x11a   :  { %959 = vst [vmem:[%s1792_s5 + $0x78] sm:$0xff] %v895_v13 }
 0x11b   :  { %975 = vst [vmem:[%s1792_s5 + $0xf8] sm:$0xff] %v911_v14 }
 0x11d   :  { %v638_v15 = vpop.f32.mrf.mxu2  ;;  %v678_v10 = vpop.f32.mrf.mxu3 }
 0x11e   :  { %v927_v17 = vadd.f32 %v1529_v16, %v638_v15  ;;  %v943_v18 = vadd.f32 %v1529_v16, %v678_v10 }
 0x120   :  { %991 = vst [vmem:[%s1792_s5 + $0x178] sm:$0xff] %v927_v17 }
 0x121   :  { %1007 = vst [vmem:[%s1792_s5 + $0x1f8] sm:$0xff] %v943_v18 }

// kernel: _lambda_.18
= control target key start
LH: loop header
LB: loop body
LE: loop exit
PB: predicated region body
PF: predicated region fallthrough
CT: control target
= control target key end

     0   :  { %s674_s3 = inlined_call_operand.vmem [shape: bf16[1,128,128], index: 3, kind: input, shape index: {}]   ;;  %s675_s0 = inlined_call_operand.vmem [shape: bf16[1,128,128], index: 0, kind: input, shape index: {}]   ;;  %s676_s1 = inlined_call_operand.vmem [shape: f32[1,128], index: 1, kind: input, shape index: {}]   ;;  %s677_s2 = inlined_call_operand.vmem [shape: f32[1,128], index: 2, kind: input, shape index: {}]   ;;  %s678_s4 = inlined_call_operand.vmem [shape: f32[1,128], index: 4, kind: input, shape index: {}]   ;;  %s679_s5 = inlined_call_operand.vmem [shape: f32[1,128,128], index: 5, kind: output, shape index: {}]  }
   0x1   :  { %v427_v0 = vld [vmem:[%s674_s3 + $0x38] sm:$0xff]  ;;  %v426_v1 = vld [vmem:[%s674_s3 + $0x30] sm:$0xff]  ;;  %v429_v2 = vld [vmem:[%s675_s0] sm:$0xff]  }
   0x2   :  { %248 = vmatpush.bf16.msra.mxu0 %v427_v0  ;;  %467 = vmatpush.bf16.msra.mxu1 %v427_v0  ;;  %v425_v3 = vld [vmem:[%s674_s3 + $0x28] sm:$0xff]  ;;  %v461_v4 = vld [vmem:[%s675_s0 + $0x10] sm:$0xff]   ;;  %v463_v5 = vld [vmem:[%s675_s0 + $0x20] sm:$0xff]   ;;  %v430_v7 = vunpack.c.l.bf16 %v429_v2  ;;  %v431_v8 = vunpack.c.h.bf16 %v429_v2 }
   0x3   :  { %468 = vmatpush.bf16.msra.mxu2 %v427_v0  ;;  %469 = vmatpush.bf16.msra.mxu3 %v427_v0  ;;  %v465_v6 = vld [vmem:[%s675_s0 + $0x30] sm:$0xff]   ;;  %v548_v9 = vld [vmem:[%s676_s1] ss:$0 sm:$0xff]  ;;  %v438_v10 = vunpack.c.l.bf16 %v461_v4  ;;  %v439_v11 = vunpack.c.h.bf16 %v461_v4  ;;  %v446_v13 = vunpack.c.l.bf16 %v463_v5  ;;  %v447_v14 = vunpack.c.h.bf16 %v463_v5  ;;  %v423_v22 = vld [vmem:[%s674_s3 + $0x18] sm:$0xff] }
   0x4   :  { %v424_v12 = vld [vmem:[%s674_s3 + $0x20] sm:$0xff]  ;;  %v454_v15 = vunpack.c.l.bf16 %v465_v6  ;;  %v455_v16 = vunpack.c.h.bf16 %v465_v6  ;;  %v76_v17 = vmul.f32 %v548_v9, %v430_v7  ;;  %v77_v18 = vmul.f32 %v548_v9, %v431_v8  ;;  %v422_v31 = vld [vmem:[%s674_s3 + $0x10] sm:$0xff]  ;;  %v460_v36 = vld [vmem:[%s675_s0 + $0x8] sm:$0xff]  }
   0x5   :  { %v558_v19 = vld [vmem:[%s677_s2] ss:$0 sm:$0xff]  ;;  %v80_v20 = vmul.f32 %v548_v9, %v438_v10  ;;  %v81_v21 = vmul.f32 %v548_v9, %v439_v11  ;;  %v84_v23 = vmul.f32 %v548_v9, %v446_v13  ;;  %v85_v24 = vmul.f32 %v548_v9, %v447_v14  ;;  %v421_v37 = vld [vmem:[%s674_s3 + $0x8] sm:$0xff]  ;;  %v462_v40 = vld [vmem:[%s675_s0 + $0x18] sm:$0xff]  }
   0x6   :  { %249 = vmatpush.bf16.msra.mxu0 %v426_v1  ;;  %470 = vmatpush.bf16.msra.mxu1 %v426_v1  ;;  %v88_v25 = vmul.f32 %v548_v9, %v454_v15  ;;  %v89_v26 = vmul.f32 %v548_v9, %v455_v16  ;;  %v96_v27 = vadd.f32 %v558_v19, %v76_v17  ;;  %v434_v46 = vunpack.c.l.bf16 %v460_v36  ;;  %v464_v48 = vld [vmem:[%s675_s0 + $0x28] sm:$0xff]   ;;  %v466_v52 = vld [vmem:[%s675_s0 + $0x38] sm:$0xff]   ;;  %v420_v57 = vld [vmem:[%s674_s3] sm:$0xff] }
   0x7   :  { %471 = vmatpush.bf16.msra.mxu2 %v426_v1  ;;  %472 = vmatpush.bf16.msra.mxu3 %v426_v1  ;;  %v97_v28 = vadd.f32 %v558_v19, %v77_v18  ;;  %v100_v29 = vadd.f32 %v558_v19, %v80_v20  ;;  %v101_v30 = vadd.f32 %v558_v19, %v81_v21  ;;  %v435_v51 = vunpack.c.h.bf16 %v460_v36 }
   0x8   :  { %v104_v32 = vadd.f32 %v558_v19, %v84_v23  ;;  %v105_v33 = vadd.f32 %v558_v19, %v85_v24  ;;  %v108_v34 = vadd.f32 %v558_v19, %v88_v25  ;;  %v109_v35 = vadd.f32 %v558_v19, %v89_v26 }
   0x9   :  { %vm112_vm0 = vcmp.ge.f32.partialorder %v96_v27, 0.0  ;;  %vm113_vm1 = vcmp.ge.f32.partialorder %v97_v28, 0.0  ;;  %v128_v38 = vmul.f32 0.2, %v96_v27  ;;  %v129_v39 = vmul.f32 0.2, %v97_v28 }
   0xa   :  { %250 = vmatpush.bf16.msra.mxu0 %v425_v3  ;;  %473 = vmatpush.bf16.msra.mxu1 %v425_v3  ;;  %vm116_vm2 = vcmp.ge.f32.partialorder %v100_v29, 0.0  ;;  %vm117_vm3 = vcmp.ge.f32.partialorder %v101_v30, 0.0  ;;  %v132_v41 = vmul.f32 0.2, %v100_v29  ;;  %v133_v42 = vmul.f32 0.2, %v101_v30 }
   0xb   :  { %474 = vmatpush.bf16.msra.mxu2 %v425_v3  ;;  %475 = vmatpush.bf16.msra.mxu3 %v425_v3  ;;  %v136_v43 = vmul.f32 0.2, %v104_v32  ;;  %v137_v44 = vmul.f32 0.2, %v105_v33  ;;  %v140_v45 = vmul.f32 0.2, %v108_v34  ;;  %v144_v49 = vsel %vm112_vm0, %v96_v27, %v128_v38 }
   0xc   :  { %vm120_vm4 = vcmp.ge.f32.partialorder %v104_v32, 0.0  ;;  %vm121_vm5 = vcmp.ge.f32.partialorder %v105_v33, 0.0  ;;  %vm124_vm6 = vcmp.ge.f32.partialorder %v108_v34, 0.0  ;;  %v141_v47 = vmul.f32 0.2, %v109_v35 }
   0xd   :  { %v145_v50 = vsel %vm113_vm1, %v97_v28, %v129_v39  ;;  %vm125_vm7 = vcmp.ge.f32.partialorder %v109_v35, 0.0  ;;  %v148_v53 = vsel %vm116_vm2, %v100_v29, %v132_v41  ;;  %v149_v54 = vsel %vm117_vm3, %v101_v30, %v133_v42  ;;  %v493_v42 = vld [vmem:[%s678_s4] ss:$0 sm:$0xff] }
   0xe   :  { %251 = vmatpush.bf16.msra.mxu0 %v424_v12  ;;  %476 = vmatpush.bf16.msra.mxu1 %v424_v12  ;;  %v442_v55 = vunpack.c.l.bf16 %v462_v40  ;;  %v443_v56 = vunpack.c.h.bf16 %v462_v40  ;;  %v152_v58 = vsel %vm120_vm4, %v104_v32, %v136_v43  ;;  %v153_v59 = vsel %vm121_vm5, %v105_v33, %v137_v44 }
   0xf   :  { %477 = vmatpush.bf16.msra.mxu2 %v424_v12  ;;  %478 = vmatpush.bf16.msra.mxu3 %v424_v12  ;;  %v156_v60 = vsel %vm124_vm6, %v108_v34, %v140_v45  ;;  %v450_v61 = vunpack.c.l.bf16 %v464_v48  ;;  %v157_v62 = vsel %vm125_vm7, %v109_v35, %v141_v47  ;;  %v451_v63 = vunpack.c.h.bf16 %v464_v48 }
  0x10   :  { %v458_v0 = vunpack.c.l.bf16 %v466_v52  ;;  %v459_v1 = vunpack.c.h.bf16 %v466_v52  ;;  %v176_v2 = vpack.c.bf16 %v145_v50, %v144_v49  ;;  %v78_v3 = vmul.f32 %v548_v9, %v434_v46 }
  0x11   :  { %v178_v4 = vpack.c.bf16 %v149_v54, %v148_v53  ;;  %v79_v5 = vmul.f32 %v548_v9, %v435_v51  ;;  %v82_v6 = vmul.f32 %v548_v9, %v442_v55  ;;  %v83_v7 = vmul.f32 %v548_v9, %v443_v56 }
  0x12   :  { %252 = vmatpush.bf16.msra.mxu0 %v423_v22  ;;  %479 = vmatpush.bf16.msra.mxu1 %v423_v22  ;;  %v180_v8 = vpack.c.bf16 %v153_v59, %v152_v58  ;;  %v182_v10 = vpack.c.bf16 %v157_v62, %v156_v60  ;;  %v86_v11 = vmul.f32 %v548_v9, %v450_v61 }
  0x13   :  { %480 = vmatpush.bf16.msra.mxu2 %v423_v22  ;;  %481 = vmatpush.bf16.msra.mxu3 %v423_v22  ;;  %v87_v12 = vmul.f32 %v548_v9, %v451_v63  ;;  %v90_v13 = vmul.f32 %v548_v9, %v458_v0  ;;  %v91_v14 = vmul.f32 %v548_v9, %v459_v1 }
  0x14   :  { %v98_v15 = vadd.f32 %v558_v19, %v78_v3  ;;  %v99_v16 = vadd.f32 %v558_v19, %v79_v5  ;;  %v102_v17 = vadd.f32 %v558_v19, %v82_v6  ;;  %v103_v18 = vadd.f32 %v558_v19, %v83_v7 }
  0x15   :  { %v106_v20 = vadd.f32 %v558_v19, %v86_v11  ;;  %v107_v21 = vadd.f32 %v558_v19, %v87_v12  ;;  %v110_v22 = vadd.f32 %v558_v19, %v90_v13  ;;  %v111_v9 = vadd.f32 %v558_v19, %v91_v14 }
  0x16   :  { %253 = vmatpush.bf16.msra.mxu0 %v422_v31  ;;  %482 = vmatpush.bf16.msra.mxu1 %v422_v31  ;;  %vm114_vm8 = vcmp.ge.f32.partialorder %v98_v15, 0.0  ;;  %v130_v23 = vmul.f32 0.2, %v98_v15  ;;  %vm115_vm9 = vcmp.ge.f32.partialorder %v99_v16, 0.0  ;;  %v131_v24 = vmul.f32 0.2, %v99_v16 }
  0x17   :  { %483 = vmatpush.bf16.msra.mxu2 %v422_v31  ;;  %484 = vmatpush.bf16.msra.mxu3 %v422_v31  ;;  %vm118_vm10 = vcmp.ge.f32.partialorder %v102_v17, 0.0  ;;  %vm119_vm11 = vcmp.ge.f32.partialorder %v103_v18, 0.0  ;;  %v134_v25 = vmul.f32 0.2, %v102_v17  ;;  %v135_v26 = vmul.f32 0.2, %v103_v18 }
  0x18   :  { %v138_v27 = vmul.f32 0.2, %v106_v20  ;;  %v139_v28 = vmul.f32 0.2, %v107_v21  ;;  %v142_v29 = vmul.f32 0.2, %v110_v22  ;;  %v146_v31 = vsel %vm114_vm8, %v98_v15, %v130_v23 }
  0x19   :  { %v143_v30 = vmul.f32 0.2, %v111_v9  ;;  %vm122_vm12 = vcmp.ge.f32.partialorder %v106_v20, 0.0  ;;  %vm123_vm13 = vcmp.ge.f32.partialorder %v107_v21, 0.0  ;;  %vm126_vm14 = vcmp.ge.f32.partialorder %v110_v22, 0.0 }
  0x1a   :  { %254 = vmatpush.bf16.msra.mxu0 %v421_v37  ;;  %485 = vmatpush.bf16.msra.mxu1 %v421_v37  ;;  %vm127_vm15 = vcmp.ge.f32.partialorder %v111_v9, 0.0  ;;  %v147_v32 = vsel %vm115_vm9, %v99_v16, %v131_v24  ;;  %v150_v19 = vsel %vm118_vm10, %v102_v17, %v134_v25  ;;  %v151_v33 = vsel %vm119_vm11, %v103_v18, %v135_v26 }
  0x1b   :  { %486 = vmatpush.bf16.msra.mxu2 %v421_v37  ;;  %487 = vmatpush.bf16.msra.mxu3 %v421_v37  ;;  %v154_v34 = vsel %vm122_vm12, %v106_v20, %v138_v27  ;;  %v155_v35 = vsel %vm123_vm13, %v107_v21, %v139_v28  ;;  %v158_v36 = vsel %vm126_vm14, %v110_v22, %v142_v29 }
  0x1c   :  { %v159_v37 = vsel %vm127_vm15, %v111_v9, %v143_v30  ;;  %v177_v38 = vpack.c.bf16 %v147_v32, %v146_v31  ;;  %v179_v39 = vpack.c.bf16 %v151_v33, %v150_v19  ;;  %v181_v40 = vpack.c.bf16 %v155_v35, %v154_v34 }
  0x1d   :  { %v183_v41 = vpack.c.bf16 %v159_v37, %v158_v36 }
  0x1e   :  { %255 = vmatpush.bf16.msra.mxu0 %v420_v57  ;;  %488 = vmatpush.bf16.msra.mxu1 %v420_v57 }
  0x1f   :  { %489 = vmatpush.bf16.msra.mxu2 %v420_v57  ;;  %490 = vmatpush.bf16.msra.mxu3 %v420_v57 }
  0x21   :  { %256 = vmatmul.bf16.vlgmr.msra.gmra.mxu0 %v176_v2  ;;  %266 = vmatmul.bf16.vlgmr.msra.gmra.mxu1 %v178_v4 }
  0x22   :  { %276 = vmatmul.bf16.vlgmr.msra.gmra.mxu2 %v180_v8  ;;  %286 = vmatmul.bf16.vlgmr.msra.gmra.mxu3 %v182_v10 }
  0x31   :  { %261 = vmatmul.bf16.gmra.mxu0 %v177_v38  ;;  %271 = vmatmul.bf16.gmra.mxu1 %v179_v39 }
  0x32   :  { %281 = vmatmul.bf16.gmra.mxu2 %v181_v40  ;;  %291 = vmatmul.bf16.gmra.mxu3 %v183_v41 }
  0x9e   :  { %v257_v43 = vpop.f32.mrf.mxu0  ;;  %v267_v44 = vpop.f32.mrf.mxu1 }
  0x9f   :  { %v352_v45 = vadd.f32 %v493_v42, %v257_v43  ;;  %v356_v46 = vadd.f32 %v493_v42, %v267_v44 }
  0xa1   :  { %368 = vst [vmem:[%s679_s5] sm:$0xff] %v352_v45 }
  0xa2   :  { %372 = vst [vmem:[%s679_s5 + $0x20] sm:$0xff] %v356_v46 }
  0xa5   :  { %v277_v47 = vpop.f32.mrf.mxu2  ;;  %v287_v48 = vpop.f32.mrf.mxu3 }
  0xa6   :  { %v360_v49 = vadd.f32 %v493_v42, %v277_v47  ;;  %v364_v50 = vadd.f32 %v493_v42, %v287_v48  ;;  %v259_v51 = vpop.f32.mrf.mxu0  ;;  %v269_v52 = vpop.f32.mrf.mxu1 }
  0xa7   :  { %v353_v53 = vadd.f32 %v493_v42, %v259_v51  ;;  %v357_v54 = vadd.f32 %v493_v42, %v269_v52 }
  0xa8   :  { %376 = vst [vmem:[%s679_s5 + $0x40] sm:$0xff] %v360_v49 }
  0xa9   :  { %380 = vst [vmem:[%s679_s5 + $0x60] sm:$0xff] %v364_v50 }
  0xaa   :  { %369 = vst [vmem:[%s679_s5 + $0x8] sm:$0xff] %v353_v53 }
  0xab   :  { %373 = vst [vmem:[%s679_s5 + $0x28] sm:$0xff] %v357_v54 }
  0xad   :  { %v279_v55 = vpop.f32.mrf.mxu2  ;;  %v289_v56 = vpop.f32.mrf.mxu3 }
  0xae   :  { %v361_v57 = vadd.f32 %v493_v42, %v279_v55  ;;  %v365_v58 = vadd.f32 %v493_v42, %v289_v56  ;;  %v262_v59 = vpop.f32.mrf.mxu0  ;;  %v272_v60 = vpop.f32.mrf.mxu1 }
  0xaf   :  { %v354_v61 = vadd.f32 %v493_v42, %v262_v59  ;;  %v358_v62 = vadd.f32 %v493_v42, %v272_v60 }
  0xb0   :  { %377 = vst [vmem:[%s679_s5 + $0x48] sm:$0xff] %v361_v57 }
  0xb1   :  { %381 = vst [vmem:[%s679_s5 + $0x68] sm:$0xff] %v365_v58 }
  0xb2   :  { %370 = vst [vmem:[%s679_s5 + $0x10] sm:$0xff] %v354_v61 }
  0xb3   :  { %374 = vst [vmem:[%s679_s5 + $0x30] sm:$0xff] %v358_v62 }
  0xb5   :  { %v282_v63 = vpop.f32.mrf.mxu2  ;;  %v292_v0 = vpop.f32.mrf.mxu3 }
  0xb6   :  { %v362_v1 = vadd.f32 %v493_v42, %v282_v63  ;;  %v366_v2 = vadd.f32 %v493_v42, %v292_v0  ;;  %v264_v3 = vpop.f32.mrf.mxu0  ;;  %v274_v4 = vpop.f32.mrf.mxu1 }
  0xb7   :  { %v355_v5 = vadd.f32 %v493_v42, %v264_v3  ;;  %v359_v6 = vadd.f32 %v493_v42, %v274_v4 }
  0xb8   :  { %378 = vst [vmem:[%s679_s5 + $0x50] sm:$0xff] %v362_v1 }
  0xb9   :  { %382 = vst [vmem:[%s679_s5 + $0x70] sm:$0xff] %v366_v2 }
  0xba   :  { %371 = vst [vmem:[%s679_s5 + $0x18] sm:$0xff] %v355_v5 }
  0xbb   :  { %375 = vst [vmem:[%s679_s5 + $0x38] sm:$0xff] %v359_v6 }
  0xbd   :  { %v284_v7 = vpop.f32.mrf.mxu2  ;;  %v294_v8 = vpop.f32.mrf.mxu3 }
  0xbe   :  { %v363_v10 = vadd.f32 %v493_v42, %v284_v7  ;;  %v367_v11 = vadd.f32 %v493_v42, %v294_v8 }
  0xc0   :  { %379 = vst [vmem:[%s679_s5 + $0x58] sm:$0xff] %v363_v10 }
  0xc1   :  { %383 = vst [vmem:[%s679_s5 + $0x78] sm:$0xff] %v367_v11 }

// kernel: tile.85
= control target key start
LH: loop header
LB: loop body
LE: loop exit
PB: predicated region body
PF: predicated region fallthrough
CT: control target
= control target key end

     0   :  { %s28_s0 = inlined_call_operand.vmem [shape: f32[16], index: 0, kind: input, shape index: {}]   ;;  %s29_s1 = inlined_call_operand.vmem [shape: f32[16,16], index: 1, kind: output, shape index: {}]  }
   0x1   :  { %v4_v0 = vld [vmem:[%s28_s0] ss:$0 sm:$0xff] }
   0x2   :  { %5 = vst [vmem:[%s29_s1] sm:$0xff] %v4_v0 }
   0x3   :  { %8 = vst [vmem:[%s29_s1 + $0x8] sm:$0xff] %v4_v0 }

// kernel: tile.87
= control target key start
LH: loop header
LB: loop body
LE: loop exit
PB: predicated region body
PF: predicated region fallthrough
CT: control target
= control target key end

     0   :  { %s7_s6 = smov 3  ;;  %s21_s9 = smov 3  ;;  %vm4_vm0 = vcmask 130048   ;;  %vm11_vm1 = vcmask 1048448   ;;  %vm18_vm2 = vcmask 917248   ;;  %vm25_vm3 = vcmask 786048   ;;  %s129_s0 = inlined_call_operand.vmem [shape: f32[16,16], index: 0, kind: input, shape index: {}]   ;;  %s130_s1 = inlined_call_operand.vmem [shape: f32[1,256], index: 1, kind: output, shape index: {}]  }
   0x1   :  { %v67_v0 = vld [vmem:[%s129_s0 + $0x7] ss:$8 sm:%s7_s6]   ;;  %s82_s10 = smov 112   ;;  %v69_v1 = vld [vmem:[%s129_s0 + $0x5] ss:$8 sm:%s21_s9]   ;;  %s83_s13 = smov 80  }
   0x2   :  { %9 = vrot.lane.b32.xlu0 %v67_v0, %s82_s10  ;;  %23 = vrot.lane.b32.xlu1 %v69_v1, %s83_s13  ;;  %s14_s14 = smov 3  ;;  %s28_s15 = smov 3  ;;  %vm32_vm4 = vcmask 654848   ;;  %vm39_vm5 = vcmask 523648   ;;  %vm46_vm6 = vcmask 392448   ;;  %vm53_vm7 = vcmask 261248  }
   0x3   :  { %s35_s16 = smov 3  ;;  %v68_v3 = vld [vmem:[%s129_s0 + $0x6] ss:$8 sm:%s14_s14]   ;;  %s84_s21 = smov 48   ;;  %v70_v4 = vld [vmem:[%s129_s0 + $0x4] ss:$8 sm:%s28_s15]  }
   0x4   :  { %v71_v2 = vld [vmem:[%s129_s0 + $0x3] ss:$8 sm:%s35_s16]   ;;  %s42_s24 = smov 3  ;;  %s85_s25 = smov 96  }
   0x5   :  { %37 = vrot.lane.b32.xlu2 %v71_v2, %s84_s21  ;;  %s86_s26 = smov 64   ;;  %s49_s27 = smov 3  ;;  %v72_v5 = vld [vmem:[%s129_s0 + $0x2] ss:$8 sm:%s42_s24]  }
   0x6   :  { %v73_v6 = vld [vmem:[%s129_s0 + $0x1] ss:$8 sm:%s49_s27]   ;;  %s87_s3 = smov 32   ;;  %s88_s4 = smov 16  }
   0x7   :  { %s2_s5 = smov 3 }
   0x8   :  { %v3_v7 = vld [vmem:[%s129_s0] ss:$8 sm:%s2_s5]  }
   0x9   :  { %5 = vst.msk [vmem:[#allocation0] ss:$8 sm:$0x3] %vm4_vm0, %v3_v7  }
   0xa   :  { %16 = vrot.lane.b32.xlu0 %v68_v3, %s85_s25  ;;  %30 = vrot.lane.b32.xlu1 %v70_v4, %s86_s26 }
   0xd   :  { %44 = vrot.lane.b32.xlu2 %v72_v5, %s87_s3 }
  0x12   :  { %51 = vrot.lane.b32.xlu0 %v73_v6, %s88_s4 }
  0x5f   :  { %v38_v8 = vpop.permute.xlu2 %37  }
  0x67   :  { %v45_v9 = vpop.permute.xlu2 %44  }
  0x74   :  { %v10_v10 = vpop.permute.xlu0 %9   ;;  %v24_v11 = vpop.permute.xlu1 %23  }
  0x75   :  { %12 = vst.msk [vmem:[#allocation0] ss:$8 sm:$0x3] %vm11_vm1, %v10_v10  }
  0x7c   :  { %v17_v12 = vpop.permute.xlu0 %16   ;;  %v31_v13 = vpop.permute.xlu1 %30  }
  0x7d   :  { %19 = vst.msk [vmem:[#allocation0] ss:$8 sm:$0x3] %vm18_vm2, %v17_v12  }
  0x7e   :  { %26 = vst.msk [vmem:[#allocation0] ss:$8 sm:$0x3] %vm25_vm3, %v24_v11  }
  0x7f   :  { %33 = vst.msk [vmem:[#allocation0] ss:$8 sm:$0x3] %vm32_vm4, %v31_v13  }
  0x80   :  { %40 = vst.msk [vmem:[#allocation0] ss:$8 sm:$0x3] %vm39_vm5, %v38_v8  }
  0x81   :  { %47 = vst.msk [vmem:[#allocation0] ss:$8 sm:$0x3] %vm46_vm6, %v45_v9  }
  0x84   :  { %v52_v14 = vpop.permute.xlu0 %51  }
  0x85   :  { %54 = vst.msk [vmem:[#allocation0] ss:$8 sm:$0x3] %vm53_vm7, %v52_v14  }
  0x8c   :  { %v57_v15 = vld [vmem:[#allocation0] sm:$0x1]  ;;  %v62_v16 = vld [vmem:[#allocation0 + $0x8] sm:$0x1] }
  0x8d   :  { %60 = vst [vmem:[%s130_s1] sm:$0x1] %v57_v15 }
  0x8e   :  { %74 = vst [vmem:[%s130_s1 + $0x1] sm:$0x1] %v62_v16 }

// kernel: _lambda_.19
= control target key start
LH: loop header
LB: loop body
LE: loop exit
PB: predicated region body
PF: predicated region fallthrough
CT: control target
= control target key end

     0   :  { %vm14_vm0 = vcmask 130048   ;;  %v167_v0 = vmov 0.0   ;;  %vm142_vm1 = vcmask 122880   ;;  %s277_s0 = inlined_call_operand.vmem [shape: f32[128,16], index: 0, kind: input, shape index: {}]   ;;  %s278_s1 = inlined_call_operand.vmem [shape: f32[1,16], index: 1, kind: output, shape index: {0}]   ;;  %s279_s2 = inlined_call_operand.vmem [shape: f32[1,16], index: 2, kind: output, shape index: {1}]  }
   0x1   :  { %15 = vst.msk [vmem:[#allocation2] sm:$0xff] %vm14_vm0, %v167_v0  ;;  %v17_v1 = vld [vmem:[%s277_s0] sm:$0xff]  ;;  %v18_v2 = vld [vmem:[%s277_s0 + $0x8] sm:$0xff]  ;;  %v19_v3 = vld [vmem:[%s277_s0 + $0x10] sm:$0xff] }
   0x2   :  { %16 = vst.msk [vmem:[#allocation3] sm:$0xff] %vm14_vm0, %v167_v0  ;;  %v20_v4 = vld [vmem:[%s277_s0 + $0x18] sm:$0xff]  ;;  %v35_v5 = vsel %vm14_vm0, %v17_v1, 0.0  ;;  %v36_v6 = vsel %vm14_vm0, %v18_v2, 0.0  ;;  %v21_v7 = vld [vmem:[%s277_s0 + $0x20] sm:$0xff]  ;;  %v38_v9 = vsel %vm14_vm0, %v19_v3, 0.0  ;;  %v69_v16 = vmul.f32 %v17_v1, %v17_v1 }
   0x3   :  { %v37_v8 = vadd.f32 %v36_v6, %v35_v5  ;;  %v40_v10 = vsel %vm14_vm0, %v20_v4, 0.0  ;;  %v22_v11 = vld [vmem:[%s277_s0 + $0x28] sm:$0xff]  ;;  %v42_v13 = vsel %vm14_vm0, %v21_v7, 0.0  ;;  %v23_v14 = vld [vmem:[%s277_s0 + $0x30] sm:$0xff]  ;;  %v70_v17 = vmul.f32 %v18_v2, %v18_v2  ;;  %v24_v20 = vld [vmem:[%s277_s0 + $0x38] sm:$0xff] }
   0x4   :  { %v71_v18 = vmul.f32 %v19_v3, %v19_v3  ;;  %v44_v19 = vsel %vm14_vm0, %v22_v11, 0.0  ;;  %v72_v22 = vmul.f32 %v20_v4, %v20_v4  ;;  %v46_v23 = vsel %vm14_vm0, %v23_v14, 0.0  ;;  %v25_v25 = vld [vmem:[%s277_s0 + $0x40] sm:$0xff]  ;;  %v26_v32 = vld [vmem:[%s277_s0 + $0x48] sm:$0xff]  ;;  %v27_v38 = vld [vmem:[%s277_s0 + $0x50] sm:$0xff] }
   0x5   :  { %v39_v12 = vadd.f32 %v38_v9, %v37_v8  ;;  %v73_v24 = vmul.f32 %v21_v7, %v21_v7  ;;  %v85_v27 = vsel %vm14_vm0, %v69_v16, 0.0  ;;  %v86_v28 = vsel %vm14_vm0, %v70_v17, 0.0  ;;  %v28_v44 = vld [vmem:[%s277_s0 + $0x58] sm:$0xff]  ;;  %v29_v50 = vld [vmem:[%s277_s0 + $0x60] sm:$0xff]  ;;  %v30_v56 = vld [vmem:[%s277_s0 + $0x68] sm:$0xff] }
   0x6   :  { %v88_v29 = vsel %vm14_vm0, %v71_v18, 0.0  ;;  %v48_v30 = vsel %vm14_vm0, %v24_v20, 0.0  ;;  %v87_v31 = vadd.f32 %v86_v28, %v85_v27  ;;  %v74_v34 = vmul.f32 %v22_v11, %v22_v11  ;;  %v31_v62 = vld [vmem:[%s277_s0 + $0x70] sm:$0xff]  ;;  %v32_v4 = vld [vmem:[%s277_s0 + $0x78] sm:$0xff] }
   0x7   :  { %v41_v15 = vadd.f32 %v40_v10, %v39_v12  ;;  %v90_v35 = vsel %vm14_vm0, %v72_v22, 0.0  ;;  %v50_v36 = vsel %vm14_vm0, %v25_v25, 0.0  ;;  %v75_v40 = vmul.f32 %v23_v14, %v23_v14 }
   0x8   :  { %v89_v37 = vadd.f32 %v88_v29, %v87_v31  ;;  %v92_v41 = vsel %vm14_vm0, %v73_v24, 0.0  ;;  %v52_v42 = vsel %vm14_vm0, %v26_v32, 0.0  ;;  %v76_v46 = vmul.f32 %v24_v20, %v24_v20  ;;  %v33_v18 = vld [vmem:[#allocation2] sm:$0xff] }
   0x9   :  { %v43_v21 = vadd.f32 %v42_v13, %v41_v15  ;;  %v94_v47 = vsel %vm14_vm0, %v74_v34, 0.0  ;;  %v54_v48 = vsel %vm14_vm0, %v27_v38, 0.0  ;;  %v77_v52 = vmul.f32 %v25_v25, %v25_v25 }
   0xa   :  { %v91_v43 = vadd.f32 %v90_v35, %v89_v37  ;;  %v96_v53 = vsel %vm14_vm0, %v75_v40, 0.0  ;;  %v56_v54 = vsel %vm14_vm0, %v28_v44, 0.0  ;;  %v78_v58 = vmul.f32 %v26_v32, %v26_v32  ;;  %v68_v32 = vld [vmem:[#allocation3] sm:$0xff] }
   0xb   :  { %v45_v26 = vadd.f32 %v44_v19, %v43_v21  ;;  %v98_v59 = vsel %vm14_vm0, %v76_v46, 0.0  ;;  %v58_v60 = vsel %vm14_vm0, %v29_v50, 0.0  ;;  %v79_v0 = vmul.f32 %v27_v38, %v27_v38 }
   0xc   :  { %v93_v49 = vadd.f32 %v92_v41, %v91_v43  ;;  %v100_v1 = vsel %vm14_vm0, %v77_v52, 0.0  ;;  %v60_v2 = vsel %vm14_vm0, %v30_v56, 0.0  ;;  %v80_v6 = vmul.f32 %v28_v44, %v28_v44 }
   0xd   :  { %v47_v33 = vadd.f32 %v46_v23, %v45_v26  ;;  %v102_v7 = vsel %vm14_vm0, %v78_v58, 0.0  ;;  %v62_v8 = vsel %vm14_vm0, %v31_v62, 0.0  ;;  %v81_v11 = vmul.f32 %v29_v50, %v29_v50 }
   0xe   :  { %v95_v55 = vadd.f32 %v94_v47, %v93_v49  ;;  %v104_v12 = vsel %vm14_vm0, %v79_v0, 0.0  ;;  %v64_v13 = vsel %vm14_vm0, %v32_v4, 0.0  ;;  %v82_v16 = vmul.f32 %v30_v56, %v30_v56 }
   0xf   :  { %v49_v39 = vadd.f32 %v48_v30, %v47_v33  ;;  %v106_v17 = vsel %vm14_vm0, %v80_v6, 0.0  ;;  %v83_v21 = vmul.f32 %v31_v62, %v31_v62  ;;  %v108_v22 = vsel %vm14_vm0, %v81_v11, 0.0 }
  0x10   :  { %v97_v61 = vadd.f32 %v96_v53, %v95_v55  ;;  %v84_v25 = vmul.f32 %v32_v4, %v32_v4  ;;  %v110_v26 = vsel %vm14_vm0, %v82_v16, 0.0 }
  0x11   :  { %v51_v45 = vadd.f32 %v50_v36, %v49_v39  ;;  %v112_v28 = vsel %vm14_vm0, %v83_v21, 0.0 }
  0x12   :  { %v99_v3 = vadd.f32 %v98_v59, %v97_v61  ;;  %v114_v30 = vsel %vm14_vm0, %v84_v25, 0.0 }
  0x13   :  { %v53_v51 = vadd.f32 %v52_v42, %v51_v45 }
  0x14   :  { %v101_v9 = vadd.f32 %v100_v1, %v99_v3 }
  0x15   :  { %v55_v57 = vadd.f32 %v54_v48, %v53_v51 }
  0x16   :  { %v103_v14 = vadd.f32 %v102_v7, %v101_v9 }
  0x17   :  { %v57_v63 = vadd.f32 %v56_v54, %v55_v57 }
  0x18   :  { %v105_v19 = vadd.f32 %v104_v12, %v103_v14 }
  0x19   :  { %v59_v5 = vadd.f32 %v58_v60, %v57_v63 }
  0x1a   :  { %v107_v23 = vadd.f32 %v106_v17, %v105_v19 }
  0x1b   :  { %v61_v10 = vadd.f32 %v60_v2, %v59_v5 }
  0x1c   :  { %v109_v27 = vadd.f32 %v108_v22, %v107_v23 }
  0x1d   :  { %v63_v15 = vadd.f32 %v62_v8, %v61_v10 }
  0x1e   :  { %v111_v29 = vadd.f32 %v110_v26, %v109_v27 }
  0x1f   :  { %v65_v20 = vadd.f32 %v64_v13, %v63_v15 }
  0x20   :  { %v113_v31 = vadd.f32 %v112_v28, %v111_v29 }
  0x21   :  { %v66_v24 = vadd.f32 %v65_v20, %v33_v18 }
  0x22   :  { %v115_v33 = vadd.f32 %v114_v30, %v113_v31 }
  0x23   :  { %67 = vst.msk [vmem:[#allocation2] sm:$0xff] %vm14_vm0, %v66_v24 }
  0x24   :  { %v116_v34 = vadd.f32 %v115_v33, %v68_v32 }
  0x26   :  { %117 = vst.msk [vmem:[#allocation3] sm:$0xff] %vm14_vm0, %v116_v34 }
  0x2a   :  { %v121_v35 = vld [vmem:[#allocation2] sm:$0xff] }
  0x2b   :  { %v122_v36 = vsel %vm14_vm0, %v121_v35, 0.0 }
  0x2c   :  { %v123_v37 = vrot.slane %v122_v36, 4 }
  0x2d   :  { %v129_v41 = vld [vmem:[#allocation3] sm:$0xff] }
  0x2e   :  { %v124_v38 = vadd.f32 %v123_v37, %v122_v36  ;;  %v130_v43 = vsel %vm14_vm0, %v129_v41, 0.0 }
  0x2f   :  { %v131_v44 = vrot.slane %v130_v43, 4 }
  0x30   :  { %v125_v39 = vrot.slane %v124_v38, 2 }
  0x31   :  { %v132_v46 = vadd.f32 %v131_v44, %v130_v43 }
  0x32   :  { %v126_v40 = vadd.f32 %v125_v39, %v124_v38 }
  0x33   :  { %v133_v48 = vrot.slane %v132_v46, 2 }
  0x34   :  { %v127_v42 = vrot.slane %v126_v40, 1 }
  0x35   :  { %v134_v49 = vadd.f32 %v133_v48, %v132_v46 }
  0x36   :  { %v128_v45 = vadd.f32 %v127_v42, %v126_v40 }
  0x37   :  { %v135_v50 = vrot.slane %v134_v49, 1 }
  0x38   :  { %v137_v47 = vmul.f32 0.0078125, %v128_v45 }
  0x39   :  { %v136_v51 = vadd.f32 %v135_v50, %v134_v49 }
  0x3a   :  { %143 = vst.msk [vmem:[%s278_s1] sm:$0x1] %vm142_vm1, %v137_v47  ;;  %v139_v52 = vmul.f32 %v137_v47, %v137_v47 }
  0x3b   :  { %v138_v53 = vmul.f32 0.0078125, %v136_v51 }
  0x3d   :  { %v140_v54 = vsub.f32 %v138_v53, %v139_v52 }
  0x3f   :  { %v141_v55 = vmax.f32 %v140_v54, 0.0 }
  0x41   :  { %v144_v56 = vadd.f32 1e-05, %v141_v55 }
  0x43   :  { %165 = vrsqrt.f32 %v144_v56  ;;  %vm151_vm3 = vweird.f32 %v144_v56 }
  0x49   :  { %v166_v57 = vpop.eup %165 }
  0x4a   :  { %v146_v58 = vmul.f32 %v166_v57, %v144_v56  ;;  %vm152_vm2 = vweird.f32 %v166_v57 }
  0x4b   :  { %vm153_vm4 = vmor %vm151_vm3, %vm152_vm2 }
  0x4c   :  { %v147_v59 = vmul.f32 %v166_v57, %v146_v58 }
  0x4e   :  { %v148_v60 = vmul.f32 0.5, %v147_v59 }
  0x50   :  { %v149_v61 = vsub.f32 1.5, %v148_v60 }
  0x52   :  { %v150_v62 = vmul.f32 %v166_v57, %v149_v61 }
  0x54   :  { %v154_v63 = vsel %vm153_vm4, %v166_v57, %v150_v62 }
  0x55   :  { %155 = vst.msk [vmem:[%s279_s2] sm:$0x1] %vm142_vm1, %v154_v63 }

// kernel: tile.94
= control target key start
LH: loop header
LB: loop body
LE: loop exit
PB: predicated region body
PF: predicated region fallthrough
CT: control target
= control target key end

     0   :  { %s28_s0 = inlined_call_operand.vmem [shape: f32[32], index: 0, kind: input, shape index: {}]   ;;  %s29_s1 = inlined_call_operand.vmem [shape: f32[16,32], index: 1, kind: output, shape index: {}]  }
   0x1   :  { %v4_v0 = vld [vmem:[%s28_s0] ss:$0 sm:$0xff] }
   0x2   :  { %5 = vst [vmem:[%s29_s1] sm:$0xff] %v4_v0 }
   0x3   :  { %8 = vst [vmem:[%s29_s1 + $0x8] sm:$0xff] %v4_v0 }

// kernel: tile.96
= control target key start
LH: loop header
LB: loop body
LE: loop exit
PB: predicated region body
PF: predicated region fallthrough
CT: control target
= control target key end

     0   :  { %s56_s8 = smov 96   ;;  %s57_s11 = smov 32   ;;  %vm3_vm0 = vcmask 261120   ;;  %vm9_vm1 = vcmask 1048320   ;;  %vm15_vm2 = vcmask 785920   ;;  %vm21_vm3 = vcmask 523520   ;;  %s93_s0 = inlined_call_operand.vmem [shape: f32[16,32], index: 0, kind: input, shape index: {}]   ;;  %s94_s1 = inlined_call_operand.vmem [shape: f32[1,512], index: 1, kind: output, shape index: {}]  }
   0x1   :  { %v47_v0 = vld [vmem:[%s93_s0 + $0x3] ss:$4 sm:$0xf]   ;;  %v49_v1 = vld [vmem:[%s93_s0 + $0x1] ss:$4 sm:$0xf]  }
   0x2   :  { %7 = vrot.lane.b32.xlu0 %v47_v0, %s56_s8  ;;  %19 = vrot.lane.b32.xlu1 %v49_v1, %s57_s11  ;;  %v48_v2 = vld [vmem:[%s93_s0 + $0x2] ss:$4 sm:$0xf]   ;;  %s58_s14 = smov 64  }
   0x3   :  { %v2_v3 = vld [vmem:[%s93_s0] ss:$4 sm:$0xf]  }
   0x4   :  { %4 = vst.msk [vmem:[#allocation0] ss:$8 sm:$0xf] %vm3_vm0, %v2_v3  }
   0xa   :  { %13 = vrot.lane.b32.xlu0 %v48_v2, %s58_s14 }
  0x74   :  { %v8_v4 = vpop.permute.xlu0 %7   ;;  %v20_v5 = vpop.permute.xlu1 %19  }
  0x75   :  { %10 = vst.msk [vmem:[#allocation0] ss:$8 sm:$0xf] %vm9_vm1, %v8_v4  }
  0x7c   :  { %v14_v6 = vpop.permute.xlu0 %13  }
  0x7d   :  { %16 = vst.msk [vmem:[#allocation0] ss:$8 sm:$0xf] %vm15_vm2, %v14_v6  }
  0x7e   :  { %22 = vst.msk [vmem:[#allocation0] ss:$8 sm:$0xf] %vm21_vm3, %v20_v5  }
  0x85   :  { %v25_v7 = vld [vmem:[#allocation0] sm:$0x1]  ;;  %v30_v8 = vld [vmem:[#allocation0 + $0x8] sm:$0x1]  ;;  %v36_v9 = vld [vmem:[#allocation0 + $0x10] sm:$0x1] }
  0x86   :  { %28 = vst [vmem:[%s94_s1] sm:$0x1] %v25_v7  ;;  %v42_v10 = vld [vmem:[#allocation0 + $0x18] sm:$0x1] }
  0x87   :  { %50 = vst [vmem:[%s94_s1 + $0x1] sm:$0x1] %v30_v8 }
  0x88   :  { %51 = vst [vmem:[%s94_s1 + $0x2] sm:$0x1] %v36_v9 }
  0x89   :  { %52 = vst [vmem:[%s94_s1 + $0x3] sm:$0x1] %v42_v10 }

// kernel: _lambda_.21
= control target key start
LH: loop header
LB: loop body
LE: loop exit
PB: predicated region body
PF: predicated region fallthrough
CT: control target
= control target key end

     0   :  { %vm14_vm0 = vcmask 261120   ;;  %v95_v0 = vmov 0.0   ;;  %vm70_vm1 = vcmask 253952   ;;  %s145_s0 = inlined_call_operand.vmem [shape: f32[32,32], index: 0, kind: input, shape index: {}]   ;;  %s146_s1 = inlined_call_operand.vmem [shape: f32[1,32], index: 1, kind: output, shape index: {0}]   ;;  %s147_s2 = inlined_call_operand.vmem [shape: f32[1,32], index: 2, kind: output, shape index: {1}]  }
   0x1   :  { %15 = vst.msk [vmem:[#allocation2] sm:$0xff] %vm14_vm0, %v95_v0  ;;  %v17_v1 = vld [vmem:[%s145_s0] sm:$0xff]  ;;  %v18_v2 = vld [vmem:[%s145_s0 + $0x8] sm:$0xff]  ;;  %v19_v3 = vld [vmem:[%s145_s0 + $0x10] sm:$0xff] }
   0x2   :  { %16 = vst.msk [vmem:[#allocation3] sm:$0xff] %vm14_vm0, %v95_v0  ;;  %v20_v4 = vld [vmem:[%s145_s0 + $0x18] sm:$0xff]  ;;  %v23_v5 = vsel %vm14_vm0, %v17_v1, 0.0  ;;  %v24_v6 = vsel %vm14_vm0, %v18_v2, 0.0  ;;  %v26_v7 = vsel %vm14_vm0, %v19_v3, 0.0  ;;  %v33_v8 = vmul.f32 %v17_v1, %v17_v1 }
   0x3   :  { %v25_v9 = vadd.f32 %v24_v6, %v23_v5  ;;  %v34_v10 = vmul.f32 %v18_v2, %v18_v2  ;;  %v35_v11 = vmul.f32 %v19_v3, %v19_v3  ;;  %v28_v12 = vsel %vm14_vm0, %v20_v4, 0.0 }
   0x4   :  { %v36_v13 = vmul.f32 %v20_v4, %v20_v4  ;;  %v37_v14 = vsel %vm14_vm0, %v33_v8, 0.0 }
   0x5   :  { %v27_v15 = vadd.f32 %v26_v7, %v25_v9  ;;  %v38_v16 = vsel %vm14_vm0, %v34_v10, 0.0  ;;  %v40_v17 = vsel %vm14_vm0, %v35_v11, 0.0 }
   0x6   :  { %v39_v18 = vadd.f32 %v38_v16, %v37_v14  ;;  %v42_v20 = vsel %vm14_vm0, %v36_v13, 0.0 }
   0x7   :  { %v29_v19 = vadd.f32 %v28_v12, %v27_v15 }
   0x8   :  { %v21_v21 = vld [vmem:[#allocation2] sm:$0xff]  ;;  %v41_v22 = vadd.f32 %v40_v17, %v39_v18 }
   0x9   :  { %v30_v23 = vadd.f32 %v29_v19, %v21_v21  ;;  %v32_v24 = vld [vmem:[#allocation3] sm:$0xff] }
   0xa   :  { %v43_v25 = vadd.f32 %v42_v20, %v41_v22 }
   0xb   :  { %31 = vst.msk [vmem:[#allocation2] sm:$0xff] %vm14_vm0, %v30_v23 }
   0xc   :  { %v44_v26 = vadd.f32 %v43_v25, %v32_v24 }
   0xe   :  { %45 = vst.msk [vmem:[#allocation3] sm:$0xff] %vm14_vm0, %v44_v26 }
  0x12   :  { %v49_v27 = vld [vmem:[#allocation2] sm:$0xff] }
  0x13   :  { %v50_v28 = vsel %vm14_vm0, %v49_v27, 0.0 }
  0x14   :  { %v51_v29 = vrot.slane %v50_v28, 4 }
  0x15   :  { %v57_v30 = vld [vmem:[#allocation3] sm:$0xff] }
  0x16   :  { %v52_v31 = vadd.f32 %v51_v29, %v50_v28  ;;  %v58_v32 = vsel %vm14_vm0, %v57_v30, 0.0 }
  0x17   :  { %v59_v33 = vrot.slane %v58_v32, 4 }
  0x18   :  { %v53_v34 = vrot.slane %v52_v31, 2 }
  0x19   :  { %v60_v35 = vadd.f32 %v59_v33, %v58_v32 }
  0x1a   :  { %v54_v36 = vadd.f32 %v53_v34, %v52_v31 }
  0x1b   :  { %v61_v37 = vrot.slane %v60_v35, 2 }
  0x1c   :  { %v55_v38 = vrot.slane %v54_v36, 1 }
  0x1d   :  { %v62_v39 = vadd.f32 %v61_v37, %v60_v35 }
  0x1e   :  { %v56_v40 = vadd.f32 %v55_v38, %v54_v36 }
  0x1f   :  { %v63_v41 = vrot.slane %v62_v39, 1 }
  0x20   :  { %v65_v42 = vmul.f32 0.03125, %v56_v40 }
  0x21   :  { %v64_v43 = vadd.f32 %v63_v41, %v62_v39 }
  0x22   :  { %v67_v44 = vmul.f32 %v65_v42, %v65_v42  ;;  %71 = vst.msk [vmem:[%s146_s1] sm:$0x1] %vm70_vm1, %v65_v42 }
  0x23   :  { %v66_v45 = vmul.f32 0.03125, %v64_v43 }
  0x25   :  { %v68_v46 = vsub.f32 %v66_v45, %v67_v44 }
  0x27   :  { %v69_v47 = vmax.f32 %v68_v46, 0.0 }
  0x29   :  { %v72_v48 = vadd.f32 1e-05, %v69_v47 }
  0x2b   :  { %93 = vrsqrt.f32 %v72_v48  ;;  %vm79_vm3 = vweird.f32 %v72_v48 }
  0x31   :  { %v94_v49 = vpop.eup %93 }
  0x32   :  { %v74_v50 = vmul.f32 %v94_v49, %v72_v48  ;;  %vm80_vm2 = vweird.f32 %v94_v49 }
  0x33   :  { %vm81_vm4 = vmor %vm79_vm3, %vm80_vm2 }
  0x34   :  { %v75_v51 = vmul.f32 %v94_v49, %v74_v50 }
  0x36   :  { %v76_v52 = vmul.f32 0.5, %v75_v51 }
  0x38   :  { %v77_v53 = vsub.f32 1.5, %v76_v52 }
  0x3a   :  { %v78_v54 = vmul.f32 %v94_v49, %v77_v53 }
  0x3c   :  { %v82_v55 = vsel %vm81_vm4, %v94_v49, %v78_v54 }
  0x3d   :  { %83 = vst.msk [vmem:[%s147_s2] sm:$0x1] %vm70_vm1, %v82_v55 }

// kernel: _lambda_.20
= control target key start
LH: loop header
LB: loop body
LE: loop exit
PB: predicated region body
PF: predicated region fallthrough
CT: control target
= control target key end

     0   :  { %s510_s3 = inlined_call_operand.vmem [shape: bf16[1,256,128], index: 3, kind: input, shape index: {}]   ;;  %s511_s0 = inlined_call_operand.vmem [shape: bf16[1,32,256], index: 0, kind: input, shape index: {}]   ;;  %s512_s1 = inlined_call_operand.vmem [shape: f32[1,256], index: 1, kind: input, shape index: {}]   ;;  %s513_s2 = inlined_call_operand.vmem [shape: f32[1,256], index: 2, kind: input, shape index: {}]   ;;  %s514_s4 = inlined_call_operand.vmem [shape: f32[1,128], index: 4, kind: input, shape index: {}]   ;;  %s515_s5 = inlined_call_operand.vmem [shape: f32[1,32,128], index: 5, kind: output, shape index: {}]  }
   0x1   :  { %v368_v0 = vld [vmem:[%s510_s3 + $0x38] sm:$0xff]  ;;  %v367_v2 = vld [vmem:[%s510_s3 + $0x30] sm:$0xff]  ;;  %v366_v4 = vld [vmem:[%s510_s3 + $0x28] sm:$0xff] }
   0x2   :  { %v376_v1 = vld [vmem:[%s510_s3 + $0x78] sm:$0xff]  ;;  %228 = vmatpush.bf16.msra.mxu0 %v368_v0  ;;  %377 = vmatpush.bf16.msra.mxu2 %v368_v0  ;;  %v375_v3 = vld [vmem:[%s510_s3 + $0x70] sm:$0xff]  ;;  %v28_v5 = vld [vmem:[%s511_s0] sm:$0xff] }
   0x3   :  { %247 = vmatpush.bf16.msra.mxu1 %v376_v1  ;;  %385 = vmatpush.bf16.msra.mxu3 %v376_v1  ;;  %v29_v6 = vld [vmem:[%s511_s0 + $0x8] sm:$0xff]  ;;  %v40_v7 = vld [vmem:[%s512_s1] sm:$0x3]  ;;  %v30_v8 = vld [vmem:[%s511_s0 + $0x10] sm:$0xff]  ;;  %v32_v11 = vunpack.c.l.bf16 %v28_v5  ;;  %v33_v18 = vunpack.c.h.bf16 %v28_v5 }
   0x4   :  { %v374_v9 = vld [vmem:[%s510_s3 + $0x68] sm:$0xff]  ;;  %v31_v10 = vld [vmem:[%s511_s0 + $0x18] sm:$0xff]  ;;  %v42_v12 = vperm.slane %v40_v7, 0  ;;  %v34_v13 = vunpack.c.l.bf16 %v29_v6  ;;  %v54_v14 = vld [vmem:[%s513_s2] sm:$0x3]  ;;  %v36_v15 = vunpack.c.l.bf16 %v30_v8  ;;  %v43_v19 = vperm.slane %v40_v7, 1 }
   0x5   :  { %v365_v16 = vld [vmem:[%s510_s3 + $0x20] sm:$0xff]  ;;  %v38_v17 = vunpack.c.l.bf16 %v31_v10  ;;  %v35_v21 = vunpack.c.h.bf16 %v29_v6  ;;  %v37_v22 = vunpack.c.h.bf16 %v30_v8  ;;  %v39_v23 = vunpack.c.h.bf16 %v31_v10  ;;  %v364_v28 = vld [vmem:[%s510_s3 + $0x18] sm:$0xff]  ;;  %v363_v39 = vld [vmem:[%s510_s3 + $0x10] sm:$0xff] }
   0x6   :  { %229 = vmatpush.bf16.msra.mxu0 %v367_v2  ;;  %378 = vmatpush.bf16.msra.mxu2 %v367_v2  ;;  %v373_v20 = vld [vmem:[%s510_s3 + $0x60] sm:$0xff]  ;;  %v46_v24 = vmul.f32 %v42_v12, %v32_v11  ;;  %v56_v25 = vperm.slane %v54_v14, 0  ;;  %v48_v26 = vmul.f32 %v42_v12, %v34_v13  ;;  %v50_v27 = vmul.f32 %v42_v12, %v36_v15  ;;  %v372_v32 = vld [vmem:[%s510_s3 + $0x58] sm:$0xff]  ;;  %v371_v42 = vld [vmem:[%s510_s3 + $0x50] sm:$0xff] }
   0x7   :  { %248 = vmatpush.bf16.msra.mxu1 %v375_v3  ;;  %386 = vmatpush.bf16.msra.mxu3 %v375_v3  ;;  %v52_v29 = vmul.f32 %v42_v12, %v38_v17  ;;  %v47_v30 = vmul.f32 %v43_v19, %v33_v18  ;;  %v57_v31 = vperm.slane %v54_v14, 1  ;;  %v49_v33 = vmul.f32 %v43_v19, %v35_v21  ;;  %v362_v46 = vld [vmem:[%s510_s3 + $0x8] sm:$0xff]  ;;  %v361_v58 = vld [vmem:[%s510_s3] sm:$0xff] }
   0x8   :  { %v51_v34 = vmul.f32 %v43_v19, %v37_v22  ;;  %v53_v35 = vmul.f32 %v43_v19, %v39_v23  ;;  %v60_v36 = vadd.f32 %v56_v25, %v46_v24  ;;  %v62_v37 = vadd.f32 %v56_v25, %v48_v26  ;;  %v370_v48 = vld [vmem:[%s510_s3 + $0x48] sm:$0xff]  ;;  %v369_v62 = vld [vmem:[%s510_s3 + $0x40] sm:$0xff] }
   0x9   :  { %v64_v38 = vadd.f32 %v56_v25, %v50_v27  ;;  %v66_v40 = vadd.f32 %v56_v25, %v52_v29  ;;  %v61_v41 = vadd.f32 %v57_v31, %v47_v30  ;;  %v63_v43 = vadd.f32 %v57_v31, %v49_v33  ;;  %v393_v7 = vld [vmem:[%s514_s4] ss:$0 sm:$0xff] }
   0xa   :  { %230 = vmatpush.bf16.msra.mxu0 %v366_v4  ;;  %379 = vmatpush.bf16.msra.mxu2 %v366_v4  ;;  %v65_v44 = vadd.f32 %v57_v31, %v51_v34  ;;  %v67_v45 = vadd.f32 %v57_v31, %v53_v35  ;;  %vm68_vm0 = vcmp.ge.f32.partialorder %v60_v36, 0.0  ;;  %v76_v47 = vmul.f32 0.2, %v60_v36 }
   0xb   :  { %249 = vmatpush.bf16.msra.mxu1 %v374_v9  ;;  %387 = vmatpush.bf16.msra.mxu3 %v374_v9  ;;  %vm70_vm1 = vcmp.ge.f32.partialorder %v62_v37, 0.0  ;;  %v78_v49 = vmul.f32 0.2, %v62_v37  ;;  %vm72_vm2 = vcmp.ge.f32.partialorder %v64_v38, 0.0  ;;  %v80_v50 = vmul.f32 0.2, %v64_v38 }
   0xc   :  { %vm74_vm3 = vcmp.ge.f32.partialorder %v66_v40, 0.0  ;;  %v82_v51 = vmul.f32 0.2, %v66_v40  ;;  %vm69_vm4 = vcmp.ge.f32.partialorder %v61_v41, 0.0  ;;  %v77_v52 = vmul.f32 0.2, %v61_v41 }
   0xd   :  { %v79_v53 = vmul.f32 0.2, %v63_v43  ;;  %v81_v54 = vmul.f32 0.2, %v65_v44  ;;  %v83_v55 = vmul.f32 0.2, %v67_v45  ;;  %v84_v56 = vsel %vm68_vm0, %v60_v36, %v76_v47 }
   0xe   :  { %231 = vmatpush.bf16.msra.mxu0 %v365_v16  ;;  %380 = vmatpush.bf16.msra.mxu2 %v365_v16  ;;  %vm71_vm5 = vcmp.ge.f32.partialorder %v63_v43, 0.0  ;;  %vm73_vm6 = vcmp.ge.f32.partialorder %v65_v44, 0.0  ;;  %vm75_vm7 = vcmp.ge.f32.partialorder %v67_v45, 0.0  ;;  %v86_v57 = vsel %vm70_vm1, %v62_v37, %v78_v49 }
   0xf   :  { %250 = vmatpush.bf16.msra.mxu1 %v373_v20  ;;  %388 = vmatpush.bf16.msra.mxu3 %v373_v20  ;;  %v88_v59 = vsel %vm72_vm2, %v64_v38, %v80_v50  ;;  %v90_v60 = vsel %vm74_vm3, %v66_v40, %v82_v51  ;;  %v85_v61 = vsel %vm69_vm4, %v61_v41, %v77_v52 }
  0x10   :  { %v87_v63 = vsel %vm71_vm5, %v63_v43, %v79_v53  ;;  %v89_v0 = vsel %vm73_vm6, %v65_v44, %v81_v54  ;;  %v91_v1 = vsel %vm75_vm7, %v67_v45, %v83_v55  ;;  %v96_v2 = vpack.c.bf16 %v86_v57, %v84_v56 }
  0x11   :  { %v98_v3 = vpack.c.bf16 %v90_v60, %v88_v59  ;;  %v97_v4 = vpack.c.bf16 %v87_v63, %v85_v61  ;;  %v99_v5 = vpack.c.bf16 %v91_v1, %v89_v0 }
  0x12   :  { %232 = vmatpush.bf16.msra.mxu0 %v364_v28  ;;  %381 = vmatpush.bf16.msra.mxu2 %v364_v28 }
  0x13   :  { %251 = vmatpush.bf16.msra.mxu1 %v372_v32  ;;  %389 = vmatpush.bf16.msra.mxu3 %v372_v32 }
  0x16   :  { %233 = vmatpush.bf16.msra.mxu0 %v363_v39  ;;  %382 = vmatpush.bf16.msra.mxu2 %v363_v39 }
  0x17   :  { %252 = vmatpush.bf16.msra.mxu1 %v371_v42  ;;  %390 = vmatpush.bf16.msra.mxu3 %v371_v42 }
  0x1a   :  { %234 = vmatpush.bf16.msra.mxu0 %v362_v46  ;;  %383 = vmatpush.bf16.msra.mxu2 %v362_v46 }
  0x1b   :  { %253 = vmatpush.bf16.msra.mxu1 %v370_v48  ;;  %391 = vmatpush.bf16.msra.mxu3 %v370_v48 }
  0x1e   :  { %235 = vmatpush.bf16.msra.mxu0 %v361_v58  ;;  %384 = vmatpush.bf16.msra.mxu2 %v361_v58 }
  0x1f   :  { %254 = vmatpush.bf16.msra.mxu1 %v369_v62  ;;  %392 = vmatpush.bf16.msra.mxu3 %v369_v62 }
  0x21   :  { %236 = vmatmul.bf16.vlgmr.msra.gmra.mxu0 %v96_v2  ;;  %241 = vmatmul.bf16.vlgmr.msra.gmra.mxu2 %v98_v3 }
  0x22   :  { %255 = vmatmul.bf16.vlgmr.msra.gmra.mxu1 %v97_v4  ;;  %260 = vmatmul.bf16.vlgmr.msra.gmra.mxu3 %v99_v5 }
  0x9e   :  { %v237_v6 = vpop.f32.mrf.mxu0 }
  0x9f   :  { %v256_v8 = vpop.f32.mrf.mxu1 }
  0xa0   :  { %v257_v9 = vadd.f32 %v256_v8, %v237_v6 }
  0xa2   :  { %v285_v10 = vadd.f32 %v393_v7, %v257_v9 }
  0xa4   :  { %289 = vst [vmem:[%s515_s5] sm:$0xff] %v285_v10  ;;  %v242_v11 = vpop.f32.mrf.mxu2 }
  0xa5   :  { %v261_v12 = vpop.f32.mrf.mxu3 }
  0xa6   :  { %v262_v13 = vadd.f32 %v261_v12, %v242_v11  ;;  %v239_v14 = vpop.f32.mrf.mxu0 }
  0xa7   :  { %v258_v15 = vpop.f32.mrf.mxu1 }
  0xa8   :  { %v287_v16 = vadd.f32 %v393_v7, %v262_v13  ;;  %v259_v17 = vadd.f32 %v258_v15, %v239_v14 }
  0xaa   :  { %291 = vst [vmem:[%s515_s5 + $0x10] sm:$0xff] %v287_v16  ;;  %v286_v18 = vadd.f32 %v393_v7, %v259_v17 }
  0xac   :  { %290 = vst [vmem:[%s515_s5 + $0x8] sm:$0xff] %v286_v18  ;;  %v244_v19 = vpop.f32.mrf.mxu2 }
  0xad   :  { %v263_v20 = vpop.f32.mrf.mxu3 }
  0xae   :  { %v264_v21 = vadd.f32 %v263_v20, %v244_v19 }
  0xb0   :  { %v288_v22 = vadd.f32 %v393_v7, %v264_v21 }
  0xb2   :  { %292 = vst [vmem:[%s515_s5 + $0x18] sm:$0xff] %v288_v22 }

// kernel: tile.103
= control target key start
LH: loop header
LB: loop body
LE: loop exit
PB: predicated region body
PF: predicated region fallthrough
CT: control target
= control target key end

     0   :  { %s28_s0 = inlined_call_operand.vmem [shape: f32[64], index: 0, kind: input, shape index: {}]   ;;  %s29_s1 = inlined_call_operand.vmem [shape: f32[16,64], index: 1, kind: output, shape index: {}]  }
   0x1   :  { %v4_v0 = vld [vmem:[%s28_s0] ss:$0 sm:$0xff] }
   0x2   :  { %5 = vst [vmem:[%s29_s1] sm:$0xff] %v4_v0 }
   0x3   :  { %8 = vst [vmem:[%s29_s1 + $0x8] sm:$0xff] %v4_v0 }

// kernel: tile.105
= control target key start
LH: loop header
LB: loop body
LE: loop exit
PB: predicated region body
PF: predicated region fallthrough
CT: control target
= control target key end

     0   :  { %vm3_vm0 = vcmask 523264   ;;  %vm10_vm1 = vcmask 1048064   ;;  %s111_s0 = inlined_call_operand.vmem [shape: f32[16,64], index: 0, kind: input, shape index: {}]   ;;  %s112_s1 = inlined_call_operand.vmem [shape: f32[1,1024], index: 1, kind: output, shape index: {}]  }
   0x1   :  { %v61_v0 = vld [vmem:[%s111_s0 + $0x1] ss:$2 sm:$0xff]   ;;  %v2_v1 = vld [vmem:[%s111_s0] ss:$2 sm:$0xff]   ;;  %s70_s0 = smov 64  }
   0x2   :  { %8 = vrot.lane.b32.xlu0 %v61_v0, %s70_s0  ;;  %4 = vst.msk [vmem:[#allocation0] ss:$8 sm:$0xf] %vm3_vm0, %v2_v1  }
   0x3   :  { %5 = vst.msk [vmem:[#allocation0] ss:$8 sm:$0xf0] %vm3_vm0, %v2_v1  }
  0x74   :  { %v9_v2 = vpop.permute.xlu0 %8  }
  0x75   :  { %11 = vst.msk [vmem:[#allocation0] ss:$8 sm:$0xf] %vm10_vm1, %v9_v2  }
  0x76   :  { %12 = vst.msk [vmem:[#allocation0] ss:$8 sm:$0xf0] %vm10_vm1, %v9_v2  }
  0x7c   :  { %v15_v3 = vld [vmem:[#allocation0] sm:$0x1]  ;;  %v20_v4 = vld [vmem:[#allocation0 + $0x8] sm:$0x1]  ;;  %v26_v5 = vld [vmem:[#allocation0 + $0x10] sm:$0x1] }
  0x7d   :  { %18 = vst [vmem:[%s112_s1] sm:$0x1] %v15_v3  ;;  %v32_v6 = vld [vmem:[#allocation0 + $0x18] sm:$0x1]  ;;  %v38_v7 = vld [vmem:[#allocation0 + $0x20] sm:$0x1] }
  0x7e   :  { %62 = vst [vmem:[%s112_s1 + $0x1] sm:$0x1] %v20_v4  ;;  %v44_v8 = vld [vmem:[#allocation0 + $0x28] sm:$0x1]  ;;  %v50_v9 = vld [vmem:[#allocation0 + $0x30] sm:$0x1] }
  0x7f   :  { %63 = vst [vmem:[%s112_s1 + $0x2] sm:$0x1] %v26_v5  ;;  %v56_v10 = vld [vmem:[#allocation0 + $0x38] sm:$0x1] }
  0x80   :  { %64 = vst [vmem:[%s112_s1 + $0x3] sm:$0x1] %v32_v6 }
  0x81   :  { %65 = vst [vmem:[%s112_s1 + $0x4] sm:$0x1] %v38_v7 }
  0x82   :  { %66 = vst [vmem:[%s112_s1 + $0x5] sm:$0x1] %v44_v8 }
  0x83   :  { %67 = vst [vmem:[%s112_s1 + $0x6] sm:$0x1] %v50_v9 }
  0x84   :  { %68 = vst [vmem:[%s112_s1 + $0x7] sm:$0x1] %v56_v10 }

// kernel: _lambda_.23
= control target key start
LH: loop header
LB: loop body
LE: loop exit
PB: predicated region body
PF: predicated region fallthrough
CT: control target
= control target key end

     0   :  { %vm14_vm0 = vcmask 523264   ;;  %v77_v0 = vmov 0.0   ;;  %vm52_vm1 = vcmask 516096   ;;  %s110_s0 = inlined_call_operand.vmem [shape: f32[8,64], index: 0, kind: input, shape index: {}]   ;;  %s111_s1 = inlined_call_operand.vmem [shape: f32[1,64], index: 1, kind: output, shape index: {0}]   ;;  %s112_s2 = inlined_call_operand.vmem [shape: f32[1,64], index: 2, kind: output, shape index: {1}]  }
   0x1   :  { %15 = vst.msk [vmem:[#allocation2] sm:$0xff] %vm14_vm0, %v77_v0  ;;  %v17_v1 = vld [vmem:[%s110_s0] sm:$0xff] }
   0x2   :  { %16 = vst.msk [vmem:[#allocation3] sm:$0xff] %vm14_vm0, %v77_v0  ;;  %v24_v2 = vmul.f32 %v17_v1, %v17_v1 }
   0x8   :  { %v18_v3 = vld [vmem:[#allocation2] sm:$0xff] }
   0x9   :  { %v20_v4 = vadd.f32 %v18_v3, %v17_v1  ;;  %v23_v5 = vld [vmem:[#allocation3] sm:$0xff] }
   0xa   :  { %v26_v6 = vadd.f32 %v24_v2, %v23_v5 }
   0xb   :  { %22 = vst.msk [vmem:[#allocation2] sm:$0xff] %vm14_vm0, %v20_v4 }
   0xc   :  { %27 = vst.msk [vmem:[#allocation3] sm:$0xff] %vm14_vm0, %v26_v6 }
  0x12   :  { %v31_v7 = vld [vmem:[#allocation2] sm:$0xff] }
  0x13   :  { %v32_v8 = vsel %vm14_vm0, %v31_v7, 0.0  ;;  %v39_v9 = vld [vmem:[#allocation3] sm:$0xff] }
  0x14   :  { %v33_v10 = vrot.slane %v32_v8, 4  ;;  %v40_v11 = vsel %vm14_vm0, %v39_v9, 0.0 }
  0x15   :  { %v41_v12 = vrot.slane %v40_v11, 4 }
  0x16   :  { %v34_v13 = vadd.f32 %v33_v10, %v32_v8 }
  0x17   :  { %v42_v14 = vadd.f32 %v41_v12, %v40_v11 }
  0x18   :  { %v35_v15 = vrot.slane %v34_v13, 2 }
  0x19   :  { %v43_v16 = vrot.slane %v42_v14, 2 }
  0x1a   :  { %v36_v17 = vadd.f32 %v35_v15, %v34_v13 }
  0x1b   :  { %v44_v18 = vadd.f32 %v43_v16, %v42_v14 }
  0x1c   :  { %v37_v19 = vrot.slane %v36_v17, 1 }
  0x1d   :  { %v45_v20 = vrot.slane %v44_v18, 1 }
  0x1e   :  { %v38_v21 = vadd.f32 %v37_v19, %v36_v17 }
  0x1f   :  { %v46_v22 = vadd.f32 %v45_v20, %v44_v18 }
  0x20   :  { %v47_v23 = vmul.f32 0.125, %v38_v21 }
  0x21   :  { %v48_v24 = vmul.f32 0.125, %v46_v22 }
  0x22   :  { %v49_v25 = vmul.f32 %v47_v23, %v47_v23  ;;  %53 = vst.msk [vmem:[%s111_s1] sm:$0x1] %vm52_vm1, %v47_v23 }
  0x24   :  { %v50_v26 = vsub.f32 %v48_v24, %v49_v25 }
  0x26   :  { %v51_v27 = vmax.f32 %v50_v26, 0.0 }
  0x28   :  { %v54_v28 = vadd.f32 1e-05, %v51_v27 }
  0x2a   :  { %75 = vrsqrt.f32 %v54_v28  ;;  %vm61_vm3 = vweird.f32 %v54_v28 }
  0x30   :  { %v76_v29 = vpop.eup %75 }
  0x31   :  { %v56_v30 = vmul.f32 %v76_v29, %v54_v28  ;;  %vm62_vm2 = vweird.f32 %v76_v29 }
  0x32   :  { %vm63_vm4 = vmor %vm61_vm3, %vm62_vm2 }
  0x33   :  { %v57_v31 = vmul.f32 %v76_v29, %v56_v30 }
  0x35   :  { %v58_v32 = vmul.f32 0.5, %v57_v31 }
  0x37   :  { %v59_v33 = vsub.f32 1.5, %v58_v32 }
  0x39   :  { %v60_v34 = vmul.f32 %v76_v29, %v59_v33 }
  0x3b   :  { %v64_v35 = vsel %vm63_vm4, %v76_v29, %v60_v34 }
  0x3c   :  { %65 = vst.msk [vmem:[%s112_s2] sm:$0x1] %vm52_vm1, %v64_v35 }

// kernel: tile.73
= control target key start
LH: loop header
LB: loop body
LE: loop exit
PB: predicated region body
PF: predicated region fallthrough
CT: control target
= control target key end

     0   :  { %s26_s0 = inlined_call_operand.<no memory space> [shape: f32[], index: 0, kind: input, shape index: {}]   ;;  %s27_s1 = inlined_call_operand.vmem [shape: f32[1,256], index: 1, kind: output, shape index: {}]  }
   0x1   :  { %v2_v0 = vstv %s26_s0 }
   0x2   :  { %3 = vst [vmem:[%s27_s1] sm:$0x1] %v2_v0 }
   0x3   :  { %6 = vst [vmem:[%s27_s1 + $0x1] sm:$0x1] %v2_v0 }

// kernel: _lambda_.22
= control target key start
LH: loop header
LB: loop body
LE: loop exit
PB: predicated region body
PF: predicated region fallthrough
CT: control target
= control target key end

     0   :  { %s705_s3 = inlined_call_operand.vmem [shape: bf16[1,512,128], index: 3, kind: input, shape index: {}]   ;;  %s706_s0 = inlined_call_operand.vmem [shape: bf16[1,8,512], index: 0, kind: input, shape index: {}]   ;;  %s707_s1 = inlined_call_operand.vmem [shape: f32[1,512], index: 1, kind: input, shape index: {}]   ;;  %s708_s2 = inlined_call_operand.vmem [shape: f32[1,512], index: 2, kind: input, shape index: {}]   ;;  %s709_s4 = inlined_call_operand.vmem [shape: f32[1,128], index: 4, kind: input, shape index: {}]   ;;  %s710_s5 = inlined_call_operand.vmem [shape: f32[1,8,128], index: 5, kind: output, shape index: {}]  }
   0x1   :  { %v535_v0 = vld [vmem:[%s705_s3 + $0x38] sm:$0xff]  ;;  %v534_v4 = vld [vmem:[%s705_s3 + $0x30] sm:$0xff]  ;;  %v533_v8 = vld [vmem:[%s705_s3 + $0x28] sm:$0xff] }
   0x2   :  { %v543_v1 = vld [vmem:[%s705_s3 + $0x78] sm:$0xff]  ;;  %332 = vmatpush.bf16.msra.mxu0 %v535_v0  ;;  %v542_v5 = vld [vmem:[%s705_s3 + $0x70] sm:$0xff]  ;;  %v541_v9 = vld [vmem:[%s705_s3 + $0x68] sm:$0xff] }
   0x3   :  { %v551_v2 = vld [vmem:[%s705_s3 + $0xb8] sm:$0xff]  ;;  %345 = vmatpush.bf16.msra.mxu1 %v543_v1  ;;  %v550_v6 = vld [vmem:[%s705_s3 + $0xb0] sm:$0xff]  ;;  %v549_v10 = vld [vmem:[%s705_s3 + $0xa8] sm:$0xff] }
   0x4   :  { %v559_v3 = vld [vmem:[%s705_s3 + $0xf8] sm:$0xff]  ;;  %358 = vmatpush.bf16.msra.mxu2 %v551_v2  ;;  %v558_v7 = vld [vmem:[%s705_s3 + $0xf0] sm:$0xff]  ;;  %v557_v11 = vld [vmem:[%s705_s3 + $0xe8] sm:$0xff] }
   0x5   :  { %371 = vmatpush.bf16.msra.mxu3 %v559_v3  ;;  %v532_v12 = vld [vmem:[%s705_s3 + $0x20] sm:$0xff]  ;;  %v26_v21 = vld [vmem:[%s706_s0 + $0x8] sm:$0xff]  ;;  %v531_v28 = vld [vmem:[%s705_s3 + $0x18] sm:$0xff] }
   0x6   :  { %333 = vmatpush.bf16.msra.mxu0 %v534_v4  ;;  %v540_v13 = vld [vmem:[%s705_s3 + $0x60] sm:$0xff]  ;;  %v29_v25 = vunpack.c.l.bf16 %v26_v21  ;;  %v30_v27 = vunpack.c.h.bf16 %v26_v21  ;;  %v539_v29 = vld [vmem:[%s705_s3 + $0x58] sm:$0xff]  ;;  %v530_v40 = vld [vmem:[%s705_s3 + $0x10] sm:$0xff] }
   0x7   :  { %346 = vmatpush.bf16.msra.mxu1 %v542_v5  ;;  %v548_v14 = vld [vmem:[%s705_s3 + $0xa0] sm:$0xff]  ;;  %v547_v34 = vld [vmem:[%s705_s3 + $0x98] sm:$0xff]  ;;  %v538_v41 = vld [vmem:[%s705_s3 + $0x50] sm:$0xff] }
   0x8   :  { %359 = vmatpush.bf16.msra.mxu2 %v550_v6  ;;  %v556_v15 = vld [vmem:[%s705_s3 + $0xe0] sm:$0xff]  ;;  %v555_v35 = vld [vmem:[%s705_s3 + $0xd8] sm:$0xff]  ;;  %v546_v44 = vld [vmem:[%s705_s3 + $0x90] sm:$0xff] }
   0x9   :  { %372 = vmatpush.bf16.msra.mxu3 %v558_v7  ;;  %v25_v16 = vld [vmem:[%s706_s0] sm:$0xff]  ;;  %v554_v45 = vld [vmem:[%s705_s3 + $0xd0] sm:$0xff]  ;;  %v529_v48 = vld [vmem:[%s705_s3 + $0x8] sm:$0xff] }
   0xa   :  { %334 = vmatpush.bf16.msra.mxu0 %v533_v8  ;;  %v27_v17 = vunpack.c.l.bf16 %v25_v16  ;;  %v31_v18 = vld [vmem:[%s707_s1] sm:$0xf]  ;;  %v28_v20 = vunpack.c.h.bf16 %v25_v16  ;;  %v537_v49 = vld [vmem:[%s705_s3 + $0x48] sm:$0xff] }
   0xb   :  { %347 = vmatpush.bf16.msra.mxu1 %v541_v9  ;;  %v45_v19 = vld [vmem:[%s708_s2] sm:$0xf]  ;;  %v33_v22 = vperm.slane %v31_v18, 0  ;;  %v34_v23 = vperm.slane %v31_v18, 1  ;;  %v35_v26 = vperm.slane %v31_v18, 2  ;;  %v36_v33 = vperm.slane %v31_v18, 3 }
   0xc   :  { %360 = vmatpush.bf16.msra.mxu2 %v549_v10  ;;  %v47_v24 = vperm.slane %v45_v19, 0  ;;  %v48_v32 = vperm.slane %v45_v19, 1  ;;  %v49_v37 = vperm.slane %v45_v19, 2  ;;  %v50_v38 = vperm.slane %v45_v19, 3  ;;  %v545_v50 = vld [vmem:[%s705_s3 + $0x88] sm:$0xff]  ;;  %v528_v56 = vld [vmem:[%s705_s3] sm:$0xff] }
   0xd   :  { %373 = vmatpush.bf16.msra.mxu3 %v557_v11  ;;  %v41_v30 = vmul.f32 %v33_v22, %v27_v17  ;;  %v42_v31 = vmul.f32 %v34_v23, %v28_v20  ;;  %v43_v36 = vmul.f32 %v35_v26, %v29_v25  ;;  %v44_v39 = vmul.f32 %v36_v33, %v30_v27  ;;  %v553_v51 = vld [vmem:[%s705_s3 + $0xc8] sm:$0xff]  ;;  %v536_v57 = vld [vmem:[%s705_s3 + $0x40] sm:$0xff] }
   0xe   :  { %335 = vmatpush.bf16.msra.mxu0 %v532_v12  ;;  %v544_v60 = vld [vmem:[%s705_s3 + $0x80] sm:$0xff] }
   0xf   :  { %348 = vmatpush.bf16.msra.mxu1 %v540_v13  ;;  %v55_v42 = vadd.f32 %v47_v24, %v41_v30  ;;  %v56_v43 = vadd.f32 %v48_v32, %v42_v31  ;;  %v57_v46 = vadd.f32 %v49_v37, %v43_v36  ;;  %v58_v47 = vadd.f32 %v50_v38, %v44_v39  ;;  %v552_v61 = vld [vmem:[%s705_s3 + $0xc0] sm:$0xff] }
  0x10   :  { %361 = vmatpush.bf16.msra.mxu2 %v548_v14  ;;  %v560_v10 = vld [vmem:[%s709_s4] ss:$0 sm:$0xff] }
  0x11   :  { %374 = vmatpush.bf16.msra.mxu3 %v556_v15  ;;  %v63_v52 = vmul.f32 0.2, %v55_v42  ;;  %v64_v53 = vmul.f32 0.2, %v56_v43  ;;  %vm59_vm0 = vcmp.ge.f32.partialorder %v55_v42, 0.0  ;;  %vm60_vm1 = vcmp.ge.f32.partialorder %v56_v43, 0.0 }
  0x12   :  { %336 = vmatpush.bf16.msra.mxu0 %v531_v28  ;;  %v65_v54 = vmul.f32 0.2, %v57_v46  ;;  %v66_v55 = vmul.f32 0.2, %v58_v47  ;;  %vm61_vm2 = vcmp.ge.f32.partialorder %v57_v46, 0.0  ;;  %vm62_vm3 = vcmp.ge.f32.partialorder %v58_v47, 0.0 }
  0x13   :  { %349 = vmatpush.bf16.msra.mxu1 %v539_v29  ;;  %v67_v58 = vsel %vm59_vm0, %v55_v42, %v63_v52  ;;  %v68_v59 = vsel %vm60_vm1, %v56_v43, %v64_v53 }
  0x14   :  { %362 = vmatpush.bf16.msra.mxu2 %v547_v34  ;;  %v69_v62 = vsel %vm61_vm2, %v57_v46, %v65_v54  ;;  %v70_v63 = vsel %vm62_vm3, %v58_v47, %v66_v55  ;;  %v72_v0 = vpack.c.bf16 %v67_v58, %v67_v58  ;;  %v73_v1 = vpack.c.bf16 %v68_v59, %v68_v59 }
  0x15   :  { %375 = vmatpush.bf16.msra.mxu3 %v555_v35  ;;  %v74_v2 = vpack.c.bf16 %v69_v62, %v69_v62  ;;  %v75_v3 = vpack.c.bf16 %v70_v63, %v70_v63 }
  0x16   :  { %337 = vmatpush.bf16.msra.mxu0 %v530_v40 }
  0x17   :  { %350 = vmatpush.bf16.msra.mxu1 %v538_v41 }
  0x18   :  { %363 = vmatpush.bf16.msra.mxu2 %v546_v44 }
  0x19   :  { %376 = vmatpush.bf16.msra.mxu3 %v554_v45 }
  0x1a   :  { %338 = vmatpush.bf16.msra.mxu0 %v529_v48 }
  0x1b   :  { %351 = vmatpush.bf16.msra.mxu1 %v537_v49 }
  0x1c   :  { %364 = vmatpush.bf16.msra.mxu2 %v545_v50 }
  0x1d   :  { %377 = vmatpush.bf16.msra.mxu3 %v553_v51 }
  0x1e   :  { %339 = vmatpush.bf16.msra.mxu0 %v528_v56 }
  0x1f   :  { %352 = vmatpush.bf16.msra.mxu1 %v536_v57 }
  0x20   :  { %365 = vmatpush.bf16.msra.mxu2 %v544_v60 }
  0x21   :  { %378 = vmatpush.bf16.msra.mxu3 %v552_v61  ;;  %340 = vmatmul.bf16.vlgmr.msra.gmra.mxu0 %v72_v0 }
  0x22   :  { %353 = vmatmul.bf16.vlgmr.msra.gmra.mxu1 %v73_v1 }
  0x23   :  { %366 = vmatmul.bf16.vlgmr.msra.gmra.mxu2 %v74_v2 }
  0x24   :  { %379 = vmatmul.bf16.vlgmr.msra.gmra.mxu3 %v75_v3 }
  0x9e   :  { %v341_v4 = vpop.f32.mrf.mxu0 }
  0x9f   :  { %v354_v5 = vpop.f32.mrf.mxu1 }
  0xa0   :  { %v355_v6 = vadd.f32 %v354_v5, %v341_v4 }
  0xa6   :  { %v367_v7 = vpop.f32.mrf.mxu2  ;;  %v343_v11 = vpop.f32.mrf.mxu0 }
  0xa7   :  { %v380_v8 = vpop.f32.mrf.mxu3  ;;  %v368_v9 = vadd.f32 %v367_v7, %v355_v6  ;;  %v356_v12 = vpop.f32.mrf.mxu1 }
  0xa9   :  { %v381_v13 = vadd.f32 %v380_v8, %v368_v9 }
  0xab   :  { %v394_v14 = vadd.f32 %v560_v10, %v381_v13 }
  0xad   :  { %395 = vst [vmem:[%s710_s5] sm:$0xff] %v394_v14 }
  0xae   :  { %v369_v15 = vpop.f32.mrf.mxu2 }
  0xaf   :  { %v382_v16 = vpop.f32.mrf.mxu3 }

// kernel: tile.113
= control target key start
LH: loop header
LB: loop body
LE: loop exit
PB: predicated region body
PF: predicated region fallthrough
CT: control target
= control target key end

     0   :  { %s22_s0 = inlined_call_operand.vmem [shape: f32[128], index: 0, kind: input, shape index: {}]   ;;  %s23_s1 = inlined_call_operand.vmem [shape: f32[4,128], index: 1, kind: output, shape index: {}]  }
   0x1   :  { %v4_v0 = vld [vmem:[%s22_s0] ss:$0 sm:$0xff] }
   0x2   :  { %5 = vst [vmem:[%s23_s1] sm:$0xf] %v4_v0 }

// kernel: _lambda_.25
= control target key start
LH: loop header
LB: loop body
LE: loop exit
PB: predicated region body
PF: predicated region fallthrough
CT: control target
= control target key end

     0   :  { %s922_s18 = smov 0   ;;  %s924_s19 = smov 0   ;;  %s993_s0 = inlined_call_operand.vmem [shape: bf16[4,8,256], index: 0, kind: input, shape index: {}]   ;;  %s994_s1 = inlined_call_operand.vmem [shape: f32[1,256], index: 1, kind: input, shape index: {}]   ;;  %s995_s2 = inlined_call_operand.vmem [shape: f32[1,256], index: 2, kind: input, shape index: {}]   ;;  %s996_s3 = inlined_call_operand.vmem [shape: bf16[4,256,128], index: 3, kind: input, shape index: {}]   ;;  %s997_s4 = inlined_call_operand.vmem [shape: f32[1,128], index: 4, kind: input, shape index: {}]   ;;  %s998_s5 = inlined_call_operand.vmem [shape: f32[4,8,128], index: 5, kind: output, shape index: {}]  }
   0x1   :  { %s926_s20 = smov 0  }
   0x2 LB: > { %s41_s21 = sadd.s32 1, %s886_s19  ;;  %p753_p0 = scmp.ge.s32.totalorder %s890_s20, 1  ;;  %s890_s20 = sphi %s926_s20, %s15_s20   ;;  %s886_s19 = sphi %s924_s19, %s1000_s19   ;;  %s882_s18 = sphi %s922_s18, %s999_s18  }
   0x3   : > { %p43_p1 = scmp.ge.s32.totalorder %s41_s21, 4  ;;  %p280_p2 = scmp.lt.s32.totalorder %s890_s20, 5 }
   0x5   : > { %s1002_s21 = smov (%p43_p1, %s41_s21), 0  ;;  %p281_p3 = pnand %p753_p0, %p280_p2 }
   0x6   : > { %p345_p4 = scmp.lt.s32.totalorder (!%p281_p3), %s882_s18, 3 }
   0x7   : > { %284 = sbr.rel (%p281_p3) target bundleno = 182 (0xb6), region = 40 }
   0xc   : > { %s1004_s18 = smov (!%p345_p4, %s882_s18), 3  ;;  %v402_v6 = vld [vmem:[%s994_s1] sm:$0x3] }
   0xd   : > { %s826_s22 = sshll.u32 %s1004_s18, 7  ;;  %s825_s26 = sshll.u32 %s1004_s18, 3  ;;  %v404_v11 = vperm.slane %v402_v6, 0  ;;  %v405_v13 = vperm.slane %v402_v6, 1  ;;  %v410_v16 = vld [vmem:[%s995_s2] sm:$0x3] }
   0xe   : > { %s946_s25 = scalar_lea.vmem %s996_s3, %s826_s22  ;;  %s356_s29 = scalar_lea.vmem %s993_s0, %s825_s26  ;;  %v412_v18 = vperm.slane %v410_v16, 0  ;;  %v413_v20 = vperm.slane %v410_v16, 1  ;;  %v867_v33 = vld [vmem:[%s997_s4] ss:$0 sm:$0xff] }
   0xf   : > { %v834_v0 = vld [vmem:[%s946_s25 + $0x38] sm:$0xff]  ;;  %v833_v2 = vld [vmem:[%s946_s25 + $0x30] sm:$0xff]  ;;  %v832_v4 = vld [vmem:[%s946_s25 + $0x28] sm:$0xff]  ;;  %s393_s13 = scalar_lea.vmem %s998_s5, %s825_s26 }
  0x10   : > { %v842_v1 = vld [vmem:[%s946_s25 + $0x78] sm:$0xff]  ;;  %551 = vmatpush.bf16.msra.mxu0 %v834_v0  ;;  %v841_v3 = vld [vmem:[%s946_s25 + $0x70] sm:$0xff]  ;;  %v840_v5 = vld [vmem:[%s946_s25 + $0x68] sm:$0xff] }
  0x11   : > { %564 = vmatpush.bf16.msra.mxu1 %v842_v1  ;;  %v831_v7 = vld [vmem:[%s946_s25 + $0x20] sm:$0xff]  ;;  %v830_v14 = vld [vmem:[%s946_s25 + $0x18] sm:$0xff]  ;;  %v829_v21 = vld [vmem:[%s946_s25 + $0x10] sm:$0xff] }
  0x12   : > { %v839_v8 = vld [vmem:[%s946_s25 + $0x60] sm:$0xff]  ;;  %v838_v15 = vld [vmem:[%s946_s25 + $0x58] sm:$0xff]  ;;  %v837_v22 = vld [vmem:[%s946_s25 + $0x50] sm:$0xff] }
  0x13   : > { %v399_v9 = vld [vmem:[%s356_s29] sm:$0xff]  ;;  %v828_v25 = vld [vmem:[%s946_s25 + $0x8] sm:$0xff] }
  0x14   : > { %552 = vmatpush.bf16.msra.mxu0 %v833_v2  ;;  %v400_v10 = vunpack.c.l.bf16 %v399_v9  ;;  %v401_v12 = vunpack.c.h.bf16 %v399_v9  ;;  %v836_v26 = vld [vmem:[%s946_s25 + $0x48] sm:$0xff]  ;;  %v827_v29 = vld [vmem:[%s946_s25] sm:$0xff] }
  0x15   : > { %565 = vmatpush.bf16.msra.mxu1 %v841_v3  ;;  %v835_v30 = vld [vmem:[%s946_s25 + $0x40] sm:$0xff] }
  0x16   : > { %v408_v17 = vmul.f32 %v404_v11, %v400_v10  ;;  %v409_v19 = vmul.f32 %v405_v13, %v401_v12 }
  0x18   : > { %553 = vmatpush.bf16.msra.mxu0 %v832_v4  ;;  %v416_v23 = vadd.f32 %v412_v18, %v408_v17  ;;  %v417_v24 = vadd.f32 %v413_v20, %v409_v19 }
  0x19   : > { %566 = vmatpush.bf16.msra.mxu1 %v840_v5 }
  0x1a   : > { %v418_v27 = vmax.f32 %v416_v23, 0.0  ;;  %v419_v28 = vmax.f32 %v417_v24, 0.0 }
  0x1c   : > { %554 = vmatpush.bf16.msra.mxu0 %v831_v7  ;;  %v421_v31 = vpack.c.bf16 %v418_v27, %v418_v27  ;;  %v422_v32 = vpack.c.bf16 %v419_v28, %v419_v28 }
  0x1d   : > { %567 = vmatpush.bf16.msra.mxu1 %v839_v8 }
  0x20   : > { %555 = vmatpush.bf16.msra.mxu0 %v830_v14 }
  0x21   : > { %568 = vmatpush.bf16.msra.mxu1 %v838_v15 }
  0x24   : > { %556 = vmatpush.bf16.msra.mxu0 %v829_v21 }
  0x25   : > { %569 = vmatpush.bf16.msra.mxu1 %v837_v22 }
  0x28   : > { %557 = vmatpush.bf16.msra.mxu0 %v828_v25 }
  0x29   : > { %570 = vmatpush.bf16.msra.mxu1 %v836_v26 }
  0x2c   : > { %558 = vmatpush.bf16.msra.mxu0 %v827_v29 }
  0x2d   : > { %571 = vmatpush.bf16.msra.mxu1 %v835_v30 }
  0x2f   : > { %559 = vmatmul.bf16.vlgmr.msra.gmra.mxu0 %v421_v31 }
  0x30   : > { %572 = vmatmul.bf16.vlgmr.msra.gmra.mxu1 %v422_v32 }
  0xac   : > { %v560_v34 = vpop.f32.mrf.mxu0 }
  0xad   : > { %v573_v35 = vpop.f32.mrf.mxu1 }
  0xae   : > { %v574_v36 = vadd.f32 %v573_v35, %v560_v34 }
  0xb0   : > { %v587_v37 = vadd.f32 %v867_v33, %v574_v36 }
  0xb2   : > { %588 = vst [vmem:[%s393_s13] sm:$0xff] %v587_v37 }
  0xb4   : > { %v562_v38 = vpop.f32.mrf.mxu0 }
  0xb5   : > { %v575_v39 = vpop.f32.mrf.mxu1 }
  0xb6 PF: > { %s15_s20 = sadd.s32 1, %s890_s20   ;;  %s999_s18 = smov %s886_s19 }
  0xb7   : > { %p12_p5 = scmp.ge.s32.totalorder %s15_s20, 6   ;;  %s1000_s19 = smov %s1002_s21 }
  0xb9   :  { %14 = sbr.rel (!%p12_p5) target bundleno = 2 (0x2), region = 90 }

// kernel: tile.123
= control target key start
LH: loop header
LB: loop body
LE: loop exit
PB: predicated region body
PF: predicated region fallthrough
CT: control target
= control target key end

     0   :  { %s22_s0 = inlined_call_operand.vmem [shape: f32[64], index: 0, kind: input, shape index: {}]   ;;  %s23_s1 = inlined_call_operand.vmem [shape: f32[4,64], index: 1, kind: output, shape index: {}]  }
   0x1   :  { %v4_v0 = vld [vmem:[%s22_s0] ss:$0 sm:$0xff] }
   0x2   :  { %5 = vst [vmem:[%s23_s1] sm:$0xf] %v4_v0 }

// kernel: tile.125
= control target key start
LH: loop header
LB: loop body
LE: loop exit
PB: predicated region body
PF: predicated region fallthrough
CT: control target
= control target key end

     0   :  { %s6_s8 = smov 3  ;;  %vm8_vm0 = vcmask 523264   ;;  %s31_s9 = smov 64   ;;  %vm15_vm1 = vcmask 1048064   ;;  %s51_s0 = inlined_call_operand.vmem [shape: f32[4,64], index: 0, kind: input, shape index: {}]   ;;  %s52_s1 = inlined_call_operand.vmem [shape: f32[1,256], index: 1, kind: output, shape index: {}]  }
   0x1   :  { %v4_v0 = vld [vmem:[%s51_s0] sm:$0xf]  ;;  %s11_s0 = smov 3 }
   0x2   :  { %5 = vst [vmem:[#allocation1] sm:$0xf] %v4_v0 }
   0x9   :  { %v12_v1 = vld [vmem:[#allocation1 + $0x1] ss:$2 sm:%s11_s0]   ;;  %v7_v2 = vld [vmem:[#allocation1] ss:$2 sm:%s6_s8]  }
   0xa   :  { %13 = vrot.lane.b32.xlu0 %v12_v1, %s31_s9  ;;  %9 = vst.msk [vmem:[#allocation0] ss:$8 sm:$0x3] %vm8_vm0, %v7_v2  }
  0x7c   :  { %v14_v3 = vpop.permute.xlu0 %13  }
  0x7d   :  { %16 = vst.msk [vmem:[#allocation0] ss:$8 sm:$0x3] %vm15_vm1, %v14_v3  }
  0x84   :  { %v19_v4 = vld [vmem:[#allocation0] sm:$0x1]  ;;  %v24_v5 = vld [vmem:[#allocation0 + $0x8] sm:$0x1] }
  0x85   :  { %22 = vst [vmem:[%s52_s1] sm:$0x1] %v19_v4 }
  0x86   :  { %29 = vst [vmem:[%s52_s1 + $0x1] sm:$0x1] %v24_v5 }

// kernel: _lambda_.24
= control target key start
LH: loop header
LB: loop body
LE: loop exit
PB: predicated region body
PF: predicated region fallthrough
CT: control target
= control target key end

     0   :  { %s1341_s3 = inlined_call_operand.vmem [shape: bf16[1,1024,128], index: 3, kind: input, shape index: {}]   ;;  %s1342_s0 = inlined_call_operand.vmem [shape: bf16[1,8,1024], index: 0, kind: input, shape index: {}]   ;;  %s1343_s1 = inlined_call_operand.vmem [shape: f32[1,1024], index: 1, kind: input, shape index: {}]   ;;  %s1344_s2 = inlined_call_operand.vmem [shape: f32[1,1024], index: 2, kind: input, shape index: {}]   ;;  %s1345_s4 = inlined_call_operand.vmem [shape: f32[1,128], index: 4, kind: input, shape index: {}]   ;;  %s1346_s5 = inlined_call_operand.vmem [shape: f32[1,8,128], index: 5, kind: output, shape index: {}]  }
   0x1   :  { %v1017_v0 = vld [vmem:[%s1341_s3 + $0x38] sm:$0xff]  ;;  %v1016_v4 = vld [vmem:[%s1341_s3 + $0x30] sm:$0xff]  ;;  %v1015_v8 = vld [vmem:[%s1341_s3 + $0x28] sm:$0xff] }
   0x2   :  { %v1025_v1 = vld [vmem:[%s1341_s3 + $0x78] sm:$0xff]  ;;  %634 = vmatpush.bf16.msra.mxu0 %v1017_v0  ;;  %v1024_v5 = vld [vmem:[%s1341_s3 + $0x70] sm:$0xff]  ;;  %v1023_v9 = vld [vmem:[%s1341_s3 + $0x68] sm:$0xff] }
   0x3   :  { %v1033_v2 = vld [vmem:[%s1341_s3 + $0xb8] sm:$0xff]  ;;  %647 = vmatpush.bf16.msra.mxu1 %v1025_v1  ;;  %v1032_v6 = vld [vmem:[%s1341_s3 + $0xb0] sm:$0xff]  ;;  %v1031_v10 = vld [vmem:[%s1341_s3 + $0xa8] sm:$0xff] }
   0x4   :  { %v1041_v3 = vld [vmem:[%s1341_s3 + $0xf8] sm:$0xff]  ;;  %660 = vmatpush.bf16.msra.mxu2 %v1033_v2  ;;  %v1040_v7 = vld [vmem:[%s1341_s3 + $0xf0] sm:$0xff]  ;;  %v1039_v11 = vld [vmem:[%s1341_s3 + $0xe8] sm:$0xff] }
   0x5   :  { %673 = vmatpush.bf16.msra.mxu3 %v1041_v3  ;;  %v1014_v12 = vld [vmem:[%s1341_s3 + $0x20] sm:$0xff]  ;;  %v26_v16 = vld [vmem:[%s1342_s0 + $0x8] sm:$0xff]  ;;  %v1013_v18 = vld [vmem:[%s1341_s3 + $0x18] sm:$0xff] }
   0x6   :  { %635 = vmatpush.bf16.msra.mxu0 %v1016_v4  ;;  %v1022_v13 = vld [vmem:[%s1341_s3 + $0x60] sm:$0xff]  ;;  %v1021_v19 = vld [vmem:[%s1341_s3 + $0x58] sm:$0xff]  ;;  %v31_v20 = vunpack.c.l.bf16 %v26_v16  ;;  %v32_v23 = vunpack.c.h.bf16 %v26_v16  ;;  %v1012_v38 = vld [vmem:[%s1341_s3 + $0x10] sm:$0xff] }
   0x7   :  { %648 = vmatpush.bf16.msra.mxu1 %v1024_v5  ;;  %v1030_v14 = vld [vmem:[%s1341_s3 + $0xa0] sm:$0xff]  ;;  %v1029_v25 = vld [vmem:[%s1341_s3 + $0x98] sm:$0xff]  ;;  %v1020_v39 = vld [vmem:[%s1341_s3 + $0x50] sm:$0xff] }
   0x8   :  { %661 = vmatpush.bf16.msra.mxu2 %v1032_v6  ;;  %v1038_v15 = vld [vmem:[%s1341_s3 + $0xe0] sm:$0xff]  ;;  %v1037_v26 = vld [vmem:[%s1341_s3 + $0xd8] sm:$0xff]  ;;  %v1028_v41 = vld [vmem:[%s1341_s3 + $0x90] sm:$0xff] }
   0x9   :  { %674 = vmatpush.bf16.msra.mxu3 %v1040_v7  ;;  %v1159_v17 = vld [vmem:[%s1343_s1] sm:$0xff]  ;;  %v1036_v42 = vld [vmem:[%s1341_s3 + $0xd0] sm:$0xff]  ;;  %v1011_v48 = vld [vmem:[%s1341_s3 + $0x8] sm:$0xff] }
   0xa   :  { %636 = vmatpush.bf16.msra.mxu0 %v1015_v8  ;;  %v41_v21 = vperm.slane %v1159_v17, 2  ;;  %v1171_v22 = vld [vmem:[%s1344_s2] sm:$0xff]  ;;  %v42_v24 = vperm.slane %v1159_v17, 3  ;;  %v39_v30 = vperm.slane %v1159_v17, 0  ;;  %v40_v36 = vperm.slane %v1159_v17, 1  ;;  %v1019_v49 = vld [vmem:[%s1341_s3 + $0x48] sm:$0xff] }
   0xb   :  { %649 = vmatpush.bf16.msra.mxu1 %v1023_v9  ;;  %v67_v27 = vperm.slane %v1171_v22, 2  ;;  %v68_v28 = vperm.slane %v1171_v22, 3  ;;  %v25_v29 = vld [vmem:[%s1342_s0] sm:$0xff]  ;;  %v65_v34 = vperm.slane %v1171_v22, 0  ;;  %v66_v37 = vperm.slane %v1171_v22, 1  ;;  %v1027_v50 = vld [vmem:[%s1341_s3 + $0x88] sm:$0xff] }
   0xc   :  { %662 = vmatpush.bf16.msra.mxu2 %v1031_v10  ;;  %v57_v31 = vmul.f32 %v41_v21, %v31_v20  ;;  %v58_v32 = vmul.f32 %v42_v24, %v32_v23  ;;  %v29_v33 = vunpack.c.l.bf16 %v25_v29  ;;  %v30_v35 = vunpack.c.h.bf16 %v25_v29  ;;  %v1035_v51 = vld [vmem:[%s1341_s3 + $0xc8] sm:$0xff]  ;;  %v1010_v56 = vld [vmem:[%s1341_s3] sm:$0xff]  ;;  %v1049_v62 = vld [vmem:[%s1341_s3 + $0x138] sm:$0xff] }
   0xd   :  { %675 = vmatpush.bf16.msra.mxu3 %v1039_v11  ;;  %v1018_v57 = vld [vmem:[%s1341_s3 + $0x40] sm:$0xff]  ;;  %v1057_v63 = vld [vmem:[%s1341_s3 + $0x178] sm:$0xff]  ;;  %v1048_v8 = vld [vmem:[%s1341_s3 + $0x130] sm:$0xff]  ;;  %v43_v23 = vperm.slane %v1159_v17, 4  ;;  %v45_v29 = vperm.slane %v1159_v17, 6 }
   0xe   :  { %637 = vmatpush.bf16.msra.mxu0 %v1014_v12  ;;  %v55_v40 = vmul.f32 %v39_v30, %v29_v33  ;;  %v83_v43 = vadd.f32 %v67_v27, %v57_v31  ;;  %v84_v44 = vadd.f32 %v68_v28, %v58_v32  ;;  %v56_v45 = vmul.f32 %v40_v36, %v30_v35  ;;  %v1026_v58 = vld [vmem:[%s1341_s3 + $0x80] sm:$0xff]  ;;  %v1065_v2 = vld [vmem:[%s1341_s3 + $0x1b8] sm:$0xff]  ;;  %v1056_v9 = vld [vmem:[%s1341_s3 + $0x170] sm:$0xff] }
   0xf   :  { %650 = vmatpush.bf16.msra.mxu1 %v1022_v13  ;;  %v1034_v59 = vld [vmem:[%s1341_s3 + $0xc0] sm:$0xff]  ;;  %v1073_v3 = vld [vmem:[%s1341_s3 + $0x1f8] sm:$0xff]  ;;  %v1064_v10 = vld [vmem:[%s1341_s3 + $0x1b0] sm:$0xff]  ;;  %v46_v31 = vperm.slane %v1159_v17, 7  ;;  %v69_v35 = vperm.slane %v1171_v22, 4 }
  0x10   :  { %663 = vmatpush.bf16.msra.mxu2 %v1030_v14  ;;  %v81_v46 = vadd.f32 %v65_v34, %v55_v40  ;;  %v82_v47 = vadd.f32 %v66_v37, %v56_v45  ;;  %v99_v52 = vmul.f32 0.2, %v83_v43  ;;  %v100_v53 = vmul.f32 0.2, %v84_v44  ;;  %v1072_v11 = vld [vmem:[%s1341_s3 + $0x1f0] sm:$0xff]  ;;  %v1047_v12 = vld [vmem:[%s1341_s3 + $0x128] sm:$0xff] }
  0x11   :  { %676 = vmatpush.bf16.msra.mxu3 %v1038_v15  ;;  %vm91_vm0 = vcmp.ge.f32.partialorder %v83_v43, 0.0  ;;  %vm92_vm1 = vcmp.ge.f32.partialorder %v84_v44, 0.0  ;;  %v1055_v13 = vld [vmem:[%s1341_s3 + $0x168] sm:$0xff]  ;;  %v27_v16 = vld [vmem:[%s1342_s0 + $0x10] sm:$0xff]  ;;  %v1054_v20 = vld [vmem:[%s1341_s3 + $0x160] sm:$0xff]  ;;  %v70_v37 = vperm.slane %v1171_v22, 5 }
  0x12   :  { %638 = vmatpush.bf16.msra.mxu0 %v1013_v18  ;;  %v97_v54 = vmul.f32 0.2, %v81_v46  ;;  %v98_v55 = vmul.f32 0.2, %v82_v47  ;;  %vm89_vm2 = vcmp.ge.f32.partialorder %v81_v46, 0.0  ;;  %vm90_vm3 = vcmp.ge.f32.partialorder %v82_v47, 0.0 }
  0x13   :  { %651 = vmatpush.bf16.msra.mxu1 %v1021_v19  ;;  %v107_v60 = vsel %vm91_vm0, %v83_v43, %v99_v52  ;;  %v108_v61 = vsel %vm92_vm1, %v84_v44, %v100_v53  ;;  %v1063_v14 = vld [vmem:[%s1341_s3 + $0x1a8] sm:$0xff]  ;;  %v28_v18 = vld [vmem:[%s1342_s0 + $0x18] sm:$0xff]  ;;  %v1046_v19 = vld [vmem:[%s1341_s3 + $0x120] sm:$0xff]  ;;  %v33_v21 = vunpack.c.l.bf16 %v27_v16  ;;  %v34_v24 = vunpack.c.h.bf16 %v27_v16 }
  0x14   :  { %664 = vmatpush.bf16.msra.mxu2 %v1029_v25  ;;  %v105_v0 = vsel %vm89_vm2, %v81_v46, %v97_v54  ;;  %v106_v1 = vsel %vm90_vm3, %v82_v47, %v98_v55  ;;  %v116_v4 = vpack.c.bf16 %v107_v60, %v107_v60  ;;  %v117_v5 = vpack.c.bf16 %v108_v61, %v108_v61  ;;  %v1071_v15 = vld [vmem:[%s1341_s3 + $0x1e8] sm:$0xff]  ;;  %v1070_v27 = vld [vmem:[%s1341_s3 + $0x1e0] sm:$0xff]  ;;  %v1045_v32 = vld [vmem:[%s1341_s3 + $0x118] sm:$0xff] }
  0x15   :  { %677 = vmatpush.bf16.msra.mxu3 %v1037_v26  ;;  %v114_v6 = vpack.c.bf16 %v105_v0, %v105_v0  ;;  %v115_v7 = vpack.c.bf16 %v106_v1, %v106_v1  ;;  %v44_v25 = vperm.slane %v1159_v17, 5  ;;  %v1062_v26 = vld [vmem:[%s1341_s3 + $0x1a0] sm:$0xff]  ;;  %v35_v28 = vunpack.c.l.bf16 %v28_v18  ;;  %v1053_v33 = vld [vmem:[%s1341_s3 + $0x158] sm:$0xff]  ;;  %v1044_v43 = vld [vmem:[%s1341_s3 + $0x110] sm:$0xff] }
  0x16   :  { %639 = vmatpush.bf16.msra.mxu0 %v1012_v38  ;;  %v36_v30 = vunpack.c.h.bf16 %v28_v18  ;;  %v59_v34 = vmul.f32 %v43_v23, %v33_v21  ;;  %v1061_v17 = vld [vmem:[%s1341_s3 + $0x198] sm:$0xff]  ;;  %v71_v40 = vperm.slane %v1171_v22, 6  ;;  %v1052_v44 = vld [vmem:[%s1341_s3 + $0x150] sm:$0xff]  ;;  %v1059_v52 = vld [vmem:[%s1341_s3 + $0x188] sm:$0xff] }
  0x17   :  { %652 = vmatpush.bf16.msra.mxu1 %v1020_v39  ;;  %v60_v36 = vmul.f32 %v44_v25, %v34_v24  ;;  %v1069_v38 = vld [vmem:[%s1341_s3 + $0x1d8] sm:$0xff]  ;;  %v61_v39 = vmul.f32 %v45_v29, %v35_v28  ;;  %v1060_v47 = vld [vmem:[%s1341_s3 + $0x190] sm:$0xff]  ;;  %v1067_v53 = vld [vmem:[%s1341_s3 + $0x1c8] sm:$0xff] }
  0x18   :  { %665 = vmatpush.bf16.msra.mxu2 %v1028_v41  ;;  %v62_v41 = vmul.f32 %v46_v31, %v36_v30  ;;  %v85_v45 = vadd.f32 %v69_v35, %v59_v34 }
  0x19   :  { %678 = vmatpush.bf16.msra.mxu3 %v1036_v42  ;;  %v72_v42 = vperm.slane %v1171_v22, 7  ;;  %v86_v46 = vadd.f32 %v70_v37, %v60_v36  ;;  %v1068_v22 = vld [vmem:[%s1341_s3 + $0x1d0] sm:$0xff] }
  0x1a   :  { %640 = vmatpush.bf16.msra.mxu0 %v1011_v48  ;;  %v87_v48 = vadd.f32 %v71_v40, %v61_v39  ;;  %v101_v54 = vmul.f32 0.2, %v85_v45  ;;  %vm93_vm4 = vcmp.ge.f32.partialorder %v85_v45, 0.0 }
  0x1b   :  { %653 = vmatpush.bf16.msra.mxu1 %v1019_v49  ;;  %v88_v49 = vadd.f32 %v72_v42, %v62_v41  ;;  %v102_v55 = vmul.f32 0.2, %v86_v46  ;;  %vm94_vm5 = vcmp.ge.f32.partialorder %v86_v46, 0.0 }
  0x1c   :  { %666 = vmatpush.bf16.msra.mxu2 %v1027_v50  ;;  %v1043_v50 = vld [vmem:[%s1341_s3 + $0x108] sm:$0xff]  ;;  %vm95_vm6 = vcmp.ge.f32.partialorder %v87_v48, 0.0  ;;  %v109_v60 = vsel %vm93_vm4, %v85_v45, %v101_v54 }
  0x1d   :  { %679 = vmatpush.bf16.msra.mxu3 %v1035_v51  ;;  %v1051_v51 = vld [vmem:[%s1341_s3 + $0x148] sm:$0xff]  ;;  %vm96_vm7 = vcmp.ge.f32.partialorder %v88_v49, 0.0  ;;  %v110_v61 = vsel %vm94_vm5, %v86_v46, %v102_v55 }
  0x1e   :  { %641 = vmatpush.bf16.msra.mxu0 %v1010_v56  ;;  %v103_v56 = vmul.f32 0.2, %v87_v48 }
  0x1f   :  { %654 = vmatpush.bf16.msra.mxu1 %v1018_v57  ;;  %v104_v57 = vmul.f32 0.2, %v88_v49 }
  0x20   :  { %667 = vmatpush.bf16.msra.mxu2 %v1026_v58  ;;  %v1042_v58 = vld [vmem:[%s1341_s3 + $0x100] sm:$0xff]  ;;  %v111_v0 = vsel %vm95_vm6, %v87_v48, %v103_v56 }
  0x21   :  { %680 = vmatpush.bf16.msra.mxu3 %v1034_v59  ;;  %642 = vmatmul.bf16.vlgmr.msra.gmra.mxu0 %v114_v6  ;;  %v1050_v59 = vld [vmem:[%s1341_s3 + $0x140] sm:$0xff]  ;;  %v112_v1 = vsel %vm96_vm7, %v88_v49, %v104_v57 }
  0x22   :  { %686 = vmatpush.bf16.msrb.mxu0 %v1049_v62  ;;  %655 = vmatmul.bf16.vlgmr.msra.gmra.mxu1 %v115_v7  ;;  %v1058_v62 = vld [vmem:[%s1341_s3 + $0x180] sm:$0xff] }
  0x23   :  { %699 = vmatpush.bf16.msrb.mxu1 %v1057_v63  ;;  %668 = vmatmul.bf16.vlgmr.msra.gmra.mxu2 %v116_v4  ;;  %v1066_v63 = vld [vmem:[%s1341_s3 + $0x1c0] sm:$0xff]  ;;  %v120_v4 = vpack.c.bf16 %v111_v0, %v111_v0 }
  0x24   :  { %712 = vmatpush.bf16.msrb.mxu2 %v1065_v2  ;;  %681 = vmatmul.bf16.vlgmr.msra.gmra.mxu3 %v117_v5  ;;  %v118_v2 = vpack.c.bf16 %v109_v60, %v109_v60  ;;  %v121_v5 = vpack.c.bf16 %v112_v1, %v112_v1 }
  0x25   :  { %725 = vmatpush.bf16.msrb.mxu3 %v1073_v3  ;;  %v119_v3 = vpack.c.bf16 %v110_v61, %v110_v61 }
  0x26   :  { %687 = vmatpush.bf16.msrb.mxu0 %v1048_v8 }
  0x27   :  { %700 = vmatpush.bf16.msrb.mxu1 %v1056_v9 }
  0x28   :  { %713 = vmatpush.bf16.msrb.mxu2 %v1064_v10 }
  0x29   :  { %726 = vmatpush.bf16.msrb.mxu3 %v1072_v11 }
  0x2a   :  { %688 = vmatpush.bf16.msrb.mxu0 %v1047_v12 }
  0x2b   :  { %701 = vmatpush.bf16.msrb.mxu1 %v1055_v13 }
  0x2c   :  { %714 = vmatpush.bf16.msrb.mxu2 %v1063_v14 }
  0x2d   :  { %727 = vmatpush.bf16.msrb.mxu3 %v1071_v15 }
  0x2e   :  { %689 = vmatpush.bf16.msrb.mxu0 %v1046_v19 }
  0x2f   :  { %702 = vmatpush.bf16.msrb.mxu1 %v1054_v20 }
  0x30   :  { %715 = vmatpush.bf16.msrb.mxu2 %v1062_v26  ;;  %v1074_v26 = vld [vmem:[%s1345_s4] ss:$0 sm:$0xff] }
  0x31   :  { %728 = vmatpush.bf16.msrb.mxu3 %v1070_v27 }
  0x32   :  { %690 = vmatpush.bf16.msrb.mxu0 %v1045_v32 }
  0x33   :  { %703 = vmatpush.bf16.msrb.mxu1 %v1053_v33 }
  0x34   :  { %716 = vmatpush.bf16.msrb.mxu2 %v1061_v17 }
  0x35   :  { %729 = vmatpush.bf16.msrb.mxu3 %v1069_v38 }
  0x36   :  { %691 = vmatpush.bf16.msrb.mxu0 %v1044_v43 }
  0x37   :  { %704 = vmatpush.bf16.msrb.mxu1 %v1052_v44 }
  0x38   :  { %717 = vmatpush.bf16.msrb.mxu2 %v1060_v47 }
  0x39   :  { %730 = vmatpush.bf16.msrb.mxu3 %v1068_v22 }
  0x3a   :  { %692 = vmatpush.bf16.msrb.mxu0 %v1043_v50 }
  0x3b   :  { %705 = vmatpush.bf16.msrb.mxu1 %v1051_v51 }
  0x3c   :  { %718 = vmatpush.bf16.msrb.mxu2 %v1059_v52 }
  0x3d   :  { %731 = vmatpush.bf16.msrb.mxu3 %v1067_v53 }
  0x3e   :  { %693 = vmatpush.bf16.msrb.mxu0 %v1042_v58 }
  0x3f   :  { %706 = vmatpush.bf16.msrb.mxu1 %v1050_v59 }
  0x40   :  { %719 = vmatpush.bf16.msrb.mxu2 %v1058_v62 }
  0x41   :  { %732 = vmatpush.bf16.msrb.mxu3 %v1066_v63  ;;  %694 = vmatmul.bf16.vlgmr.msrb.gmra.mxu0 %v118_v2 }
  0x42   :  { %707 = vmatmul.bf16.vlgmr.msrb.gmra.mxu1 %v119_v3 }
  0x43   :  { %720 = vmatmul.bf16.vlgmr.msrb.gmra.mxu2 %v120_v4 }
  0x44   :  { %733 = vmatmul.bf16.vlgmr.msrb.gmra.mxu3 %v121_v5 }
  0x9e   :  { %v643_v6 = vpop.f32.mrf.mxu0 }
  0x9f   :  { %v656_v7 = vpop.f32.mrf.mxu1 }
  0xa0   :  { %v657_v14 = vadd.f32 %v656_v7, %v643_v6 }
  0xa6   :  { %v669_v8 = vpop.f32.mrf.mxu2  ;;  %v645_v10 = vpop.f32.mrf.mxu0 }
  0xa7   :  { %v682_v9 = vpop.f32.mrf.mxu3  ;;  %v658_v11 = vpop.f32.mrf.mxu1  ;;  %v670_v15 = vadd.f32 %v669_v8, %v657_v14 }
  0xa9   :  { %v683_v16 = vadd.f32 %v682_v9, %v670_v15 }
  0xae   :  { %v671_v12 = vpop.f32.mrf.mxu2 }
  0xaf   :  { %v684_v13 = vpop.f32.mrf.mxu3 }
  0xbe   :  { %v695_v18 = vpop.f32.mrf.mxu0 }
  0xbf   :  { %v708_v19 = vpop.f32.mrf.mxu1  ;;  %v696_v20 = vadd.f32 %v695_v18, %v683_v16 }
  0xc1   :  { %v709_v21 = vadd.f32 %v708_v19, %v696_v20 }
  0xc6   :  { %v721_v23 = vpop.f32.mrf.mxu2  ;;  %v697_v27 = vpop.f32.mrf.mxu0 }
  0xc7   :  { %v734_v24 = vpop.f32.mrf.mxu3  ;;  %v722_v25 = vadd.f32 %v721_v23, %v709_v21  ;;  %v710_v28 = vpop.f32.mrf.mxu1 }
  0xc9   :  { %v735_v29 = vadd.f32 %v734_v24, %v722_v25 }
  0xcb   :  { %v748_v30 = vadd.f32 %v1074_v26, %v735_v29 }
  0xcd   :  { %749 = vst [vmem:[%s1346_s5] sm:$0xff] %v748_v30 }
  0xce   :  { %v723_v31 = vpop.f32.mrf.mxu2 }
  0xcf   :  { %v736_v32 = vpop.f32.mrf.mxu3 }

// kernel: tile.133
= control target key start
LH: loop header
LB: loop body
LE: loop exit
PB: predicated region body
PF: predicated region fallthrough
CT: control target
= control target key end

     0   :  { %s22_s0 = inlined_call_operand.vmem [shape: f32[32], index: 0, kind: input, shape index: {}]   ;;  %s23_s1 = inlined_call_operand.vmem [shape: f32[4,32], index: 1, kind: output, shape index: {}]  }
   0x1   :  { %v4_v0 = vld [vmem:[%s22_s0] ss:$0 sm:$0xff] }
   0x2   :  { %5 = vst [vmem:[%s23_s1] sm:$0xf] %v4_v0 }

// kernel: tile.135
= control target key start
LH: loop header
LB: loop body
LE: loop exit
PB: predicated region body
PF: predicated region fallthrough
CT: control target
= control target key end

     0   :  { %s37_s8 = smov 32   ;;  %s38_s9 = smov 64   ;;  %vm7_vm0 = vcmask 261120   ;;  %vm13_vm1 = vcmask 1048320   ;;  %vm19_vm2 = vcmask 785920   ;;  %vm25_vm3 = vcmask 523520   ;;  %s55_s0 = inlined_call_operand.vmem [shape: f32[4,32], index: 0, kind: input, shape index: {}]   ;;  %s56_s1 = inlined_call_operand.vmem [shape: f32[1,128], index: 1, kind: output, shape index: {}]  }
   0x1   :  { %v4_v0 = vld [vmem:[%s55_s0] sm:$0xf]  ;;  %s36_s0 = smov 96  }
   0x2   :  { %5 = vst [vmem:[#allocation1] sm:$0xf] %v4_v0 }
   0x9   :  { %v10_v1 = vld [vmem:[#allocation1 + $0x3] sm:$0x1]   ;;  %v22_v2 = vld [vmem:[#allocation1 + $0x1] sm:$0x1]   ;;  %v16_v3 = vld [vmem:[#allocation1 + $0x2] sm:$0x1]  }
   0xa   :  { %11 = vrot.lane.b32.xlu0 %v10_v1, %s36_s0  ;;  %23 = vrot.lane.b32.xlu1 %v22_v2, %s37_s8  ;;  %v6_v4 = vld [vmem:[#allocation1] sm:$0x1]  }
   0xb   :  { %8 = vst.msk [vmem:[#allocation0] sm:$0x1] %vm7_vm0, %v6_v4  }
  0x12   :  { %17 = vrot.lane.b32.xlu0 %v16_v3, %s38_s9 }
  0x7c   :  { %v12_v5 = vpop.permute.xlu0 %11   ;;  %v24_v6 = vpop.permute.xlu1 %23  }
  0x7d   :  { %14 = vst.msk [vmem:[#allocation0] sm:$0x1] %vm13_vm1, %v12_v5  }
  0x84   :  { %v18_v7 = vpop.permute.xlu0 %17  }
  0x85   :  { %20 = vst.msk [vmem:[#allocation0] sm:$0x1] %vm19_vm2, %v18_v7  }
  0x86   :  { %26 = vst.msk [vmem:[#allocation0] sm:$0x1] %vm25_vm3, %v24_v6  }
  0x8d   :  { %v29_v8 = vld [vmem:[#allocation0] sm:$0x1] }
  0x8e   :  { %32 = vst [vmem:[%s56_s1] sm:$0x1] %v29_v8 }

// kernel: _lambda_.27
= control target key start
LH: loop header
LB: loop body
LE: loop exit
PB: predicated region body
PF: predicated region fallthrough
CT: control target
= control target key end

     0   :  { %s1175_s18 = smov 0   ;;  %s1177_s19 = smov 0   ;;  %s1259_s0 = inlined_call_operand.vmem [shape: bf16[4,8,512], index: 0, kind: input, shape index: {}]   ;;  %s1260_s1 = inlined_call_operand.vmem [shape: f32[1,512], index: 1, kind: input, shape index: {}]   ;;  %s1261_s2 = inlined_call_operand.vmem [shape: f32[1,512], index: 2, kind: input, shape index: {}]   ;;  %s1262_s3 = inlined_call_operand.vmem [shape: bf16[4,512,128], index: 3, kind: input, shape index: {}]   ;;  %s1263_s4 = inlined_call_operand.vmem [shape: f32[1,128], index: 4, kind: input, shape index: {}]   ;;  %s1264_s5 = inlined_call_operand.vmem [shape: f32[4,8,128], index: 5, kind: output, shape index: {}]  }
   0x1   :  { %s1179_s20 = smov 0  }
   0x2 LB: > { %s41_s21 = sadd.s32 1, %s1139_s19  ;;  %p926_p0 = scmp.ge.s32.totalorder %s1143_s20, 1  ;;  %s1143_s20 = sphi %s1179_s20, %s15_s20   ;;  %s1139_s19 = sphi %s1177_s19, %s1266_s19   ;;  %s1135_s18 = sphi %s1175_s18, %s1265_s18  }
   0x3   : > { %p43_p1 = scmp.ge.s32.totalorder %s41_s21, 4  ;;  %p280_p2 = scmp.lt.s32.totalorder %s1143_s20, 5 }
   0x5   : > { %s1268_s21 = smov (%p43_p1, %s41_s21), 0  ;;  %p281_p3 = pnand %p926_p0, %p280_p2 }
   0x6   : > { %p345_p4 = scmp.lt.s32.totalorder (!%p281_p3), %s1135_s18, 3 }
   0x7   : > { %284 = sbr.rel (%p281_p3) target bundleno = 190 (0xbe), region = 40 }
   0xc   : > { %s1270_s18 = smov (!%p345_p4, %s1135_s18), 3  ;;  %v405_v12 = vld [vmem:[%s1260_s1] sm:$0xf] }
   0xd   : > { %s1063_s22 = sshll.u32 %s1270_s18, 8  ;;  %s1062_s26 = sshll.u32 %s1270_s18, 4  ;;  %v407_v20 = vperm.slane %v405_v12, 0  ;;  %v408_v22 = vperm.slane %v405_v12, 1  ;;  %v419_v25 = vld [vmem:[%s1261_s2] sm:$0xf] }
   0xe   : > { %s1199_s25 = scalar_lea.vmem %s1262_s3, %s1063_s22  ;;  %s356_s29 = scalar_lea.vmem %s1259_s0, %s1062_s26  ;;  %v409_v27 = vperm.slane %v405_v12, 2  ;;  %v410_v29 = vperm.slane %v405_v12, 3  ;;  %v421_v33 = vperm.slane %v419_v25, 0  ;;  %v422_v35 = vperm.slane %v419_v25, 1 }
   0xf   : > { %v1071_v0 = vld [vmem:[%s1199_s25 + $0x38] sm:$0xff]  ;;  %v1070_v4 = vld [vmem:[%s1199_s25 + $0x30] sm:$0xff]  ;;  %v1069_v8 = vld [vmem:[%s1199_s25 + $0x28] sm:$0xff]  ;;  %v423_v39 = vperm.slane %v419_v25, 2  ;;  %v424_v41 = vperm.slane %v419_v25, 3  ;;  %s931_s9 = sshll.u32 %s1270_s18, 3 }
  0x10   : > { %v1079_v1 = vld [vmem:[%s1199_s25 + $0x78] sm:$0xff]  ;;  %698 = vmatpush.bf16.msra.mxu0 %v1071_v0  ;;  %v1078_v5 = vld [vmem:[%s1199_s25 + $0x70] sm:$0xff]  ;;  %v1077_v9 = vld [vmem:[%s1199_s25 + $0x68] sm:$0xff]  ;;  %s393_s14 = scalar_lea.vmem %s1264_s5, %s931_s9 }
  0x11   : > { %v1087_v2 = vld [vmem:[%s1199_s25 + $0xb8] sm:$0xff]  ;;  %711 = vmatpush.bf16.msra.mxu1 %v1079_v1  ;;  %v1086_v6 = vld [vmem:[%s1199_s25 + $0xb0] sm:$0xff]  ;;  %v1085_v10 = vld [vmem:[%s1199_s25 + $0xa8] sm:$0xff] }
  0x12   : > { %v1095_v3 = vld [vmem:[%s1199_s25 + $0xf8] sm:$0xff]  ;;  %724 = vmatpush.bf16.msra.mxu2 %v1087_v2  ;;  %v1094_v7 = vld [vmem:[%s1199_s25 + $0xf0] sm:$0xff]  ;;  %v1093_v11 = vld [vmem:[%s1199_s25 + $0xe8] sm:$0xff] }
  0x13   : > { %737 = vmatpush.bf16.msra.mxu3 %v1095_v3  ;;  %v1068_v13 = vld [vmem:[%s1199_s25 + $0x20] sm:$0xff]  ;;  %v400_v18 = vld [vmem:[%s356_s29 + $0x8] sm:$0xff]  ;;  %v1067_v23 = vld [vmem:[%s1199_s25 + $0x18] sm:$0xff] }
  0x14   : > { %699 = vmatpush.bf16.msra.mxu0 %v1070_v4  ;;  %v1076_v14 = vld [vmem:[%s1199_s25 + $0x60] sm:$0xff]  ;;  %v1075_v24 = vld [vmem:[%s1199_s25 + $0x58] sm:$0xff]  ;;  %v403_v26 = vunpack.c.l.bf16 %v400_v18  ;;  %v404_v28 = vunpack.c.h.bf16 %v400_v18  ;;  %v1066_v36 = vld [vmem:[%s1199_s25 + $0x10] sm:$0xff] }
  0x15   : > { %712 = vmatpush.bf16.msra.mxu1 %v1078_v5  ;;  %v399_v15 = vld [vmem:[%s356_s29] sm:$0xff]  ;;  %v1083_v30 = vld [vmem:[%s1199_s25 + $0x98] sm:$0xff]  ;;  %v1074_v37 = vld [vmem:[%s1199_s25 + $0x50] sm:$0xff] }
  0x16   : > { %725 = vmatpush.bf16.msra.mxu2 %v1086_v6  ;;  %v1084_v16 = vld [vmem:[%s1199_s25 + $0xa0] sm:$0xff]  ;;  %v401_v19 = vunpack.c.l.bf16 %v399_v15  ;;  %v402_v21 = vunpack.c.h.bf16 %v399_v15  ;;  %v1091_v31 = vld [vmem:[%s1199_s25 + $0xd8] sm:$0xff]  ;;  %v417_v38 = vmul.f32 %v409_v27, %v403_v26  ;;  %v418_v40 = vmul.f32 %v410_v29, %v404_v28  ;;  %v1082_v42 = vld [vmem:[%s1199_s25 + $0x90] sm:$0xff] }
  0x17   : > { %738 = vmatpush.bf16.msra.mxu3 %v1094_v7  ;;  %v1092_v17 = vld [vmem:[%s1199_s25 + $0xe0] sm:$0xff]  ;;  %v1090_v43 = vld [vmem:[%s1199_s25 + $0xd0] sm:$0xff]  ;;  %v1065_v46 = vld [vmem:[%s1199_s25 + $0x8] sm:$0xff] }
  0x18   : > { %700 = vmatpush.bf16.msra.mxu0 %v1069_v8  ;;  %v415_v32 = vmul.f32 %v407_v20, %v401_v19  ;;  %v416_v34 = vmul.f32 %v408_v22, %v402_v21  ;;  %v1073_v47 = vld [vmem:[%s1199_s25 + $0x48] sm:$0xff]  ;;  %v431_v48 = vadd.f32 %v423_v39, %v417_v38  ;;  %v432_v49 = vadd.f32 %v424_v41, %v418_v40  ;;  %v1064_v54 = vld [vmem:[%s1199_s25] sm:$0xff] }
  0x19   : > { %713 = vmatpush.bf16.msra.mxu1 %v1077_v9  ;;  %v1081_v50 = vld [vmem:[%s1199_s25 + $0x88] sm:$0xff]  ;;  %v1072_v55 = vld [vmem:[%s1199_s25 + $0x40] sm:$0xff] }
  0x1a   : > { %726 = vmatpush.bf16.msra.mxu2 %v1085_v10  ;;  %v429_v44 = vadd.f32 %v421_v33, %v415_v32  ;;  %v430_v45 = vadd.f32 %v422_v35, %v416_v34  ;;  %v1089_v51 = vld [vmem:[%s1199_s25 + $0xc8] sm:$0xff]  ;;  %v435_v56 = vmax.f32 %v431_v48, 0.0  ;;  %v436_v57 = vmax.f32 %v432_v49, 0.0  ;;  %v1080_v58 = vld [vmem:[%s1199_s25 + $0x80] sm:$0xff] }
  0x1b   : > { %739 = vmatpush.bf16.msra.mxu3 %v1093_v11  ;;  %v1088_v59 = vld [vmem:[%s1199_s25 + $0xc0] sm:$0xff] }
  0x1c   : > { %701 = vmatpush.bf16.msra.mxu0 %v1068_v13  ;;  %v433_v52 = vmax.f32 %v429_v44, 0.0  ;;  %v434_v53 = vmax.f32 %v430_v45, 0.0  ;;  %v440_v62 = vpack.c.bf16 %v435_v56, %v435_v56  ;;  %v441_v63 = vpack.c.bf16 %v436_v57, %v436_v57  ;;  %v1120_v6 = vld [vmem:[%s1263_s4] ss:$0 sm:$0xff] }
  0x1d   : > { %714 = vmatpush.bf16.msra.mxu1 %v1076_v14 }
  0x1e   : > { %727 = vmatpush.bf16.msra.mxu2 %v1084_v16  ;;  %v438_v60 = vpack.c.bf16 %v433_v52, %v433_v52  ;;  %v439_v61 = vpack.c.bf16 %v434_v53, %v434_v53 }
  0x1f   : > { %740 = vmatpush.bf16.msra.mxu3 %v1092_v17 }
  0x20   : > { %702 = vmatpush.bf16.msra.mxu0 %v1067_v23 }
  0x21   : > { %715 = vmatpush.bf16.msra.mxu1 %v1075_v24 }
  0x22   : > { %728 = vmatpush.bf16.msra.mxu2 %v1083_v30 }
  0x23   : > { %741 = vmatpush.bf16.msra.mxu3 %v1091_v31 }
  0x24   : > { %703 = vmatpush.bf16.msra.mxu0 %v1066_v36 }
  0x25   : > { %716 = vmatpush.bf16.msra.mxu1 %v1074_v37 }
  0x26   : > { %729 = vmatpush.bf16.msra.mxu2 %v1082_v42 }
  0x27   : > { %742 = vmatpush.bf16.msra.mxu3 %v1090_v43 }
  0x28   : > { %704 = vmatpush.bf16.msra.mxu0 %v1065_v46 }
  0x29   : > { %717 = vmatpush.bf16.msra.mxu1 %v1073_v47 }
  0x2a   : > { %730 = vmatpush.bf16.msra.mxu2 %v1081_v50 }
  0x2b   : > { %743 = vmatpush.bf16.msra.mxu3 %v1089_v51 }
  0x2c   : > { %705 = vmatpush.bf16.msra.mxu0 %v1064_v54 }
  0x2d   : > { %718 = vmatpush.bf16.msra.mxu1 %v1072_v55 }
  0x2e   : > { %731 = vmatpush.bf16.msra.mxu2 %v1080_v58 }
  0x2f   : > { %744 = vmatpush.bf16.msra.mxu3 %v1088_v59  ;;  %706 = vmatmul.bf16.vlgmr.msra.gmra.mxu0 %v438_v60 }
  0x30   : > { %719 = vmatmul.bf16.vlgmr.msra.gmra.mxu1 %v439_v61 }
  0x31   : > { %732 = vmatmul.bf16.vlgmr.msra.gmra.mxu2 %v440_v62 }
  0x32   : > { %745 = vmatmul.bf16.vlgmr.msra.gmra.mxu3 %v441_v63 }
  0xac   : > { %v707_v0 = vpop.f32.mrf.mxu0 }
  0xad   : > { %v720_v1 = vpop.f32.mrf.mxu1 }
  0xae   : > { %v721_v2 = vadd.f32 %v720_v1, %v707_v0 }
  0xb4   : > { %v733_v3 = vpop.f32.mrf.mxu2  ;;  %v709_v7 = vpop.f32.mrf.mxu0 }
  0xb5   : > { %v746_v4 = vpop.f32.mrf.mxu3  ;;  %v734_v5 = vadd.f32 %v733_v3, %v721_v2  ;;  %v722_v8 = vpop.f32.mrf.mxu1 }
  0xb7   : > { %v747_v9 = vadd.f32 %v746_v4, %v734_v5 }
  0xb9   : > { %v760_v10 = vadd.f32 %v1120_v6, %v747_v9 }
  0xbb   : > { %761 = vst [vmem:[%s393_s14] sm:$0xff] %v760_v10 }
  0xbc   : > { %v735_v11 = vpop.f32.mrf.mxu2 }
  0xbd   : > { %v748_v12 = vpop.f32.mrf.mxu3 }
  0xbe PF: > { %s15_s20 = sadd.s32 1, %s1143_s20   ;;  %s1265_s18 = smov %s1139_s19 }
  0xbf   : > { %p12_p5 = scmp.ge.s32.totalorder %s15_s20, 6   ;;  %s1266_s19 = smov %s1268_s21 }
  0xc1   :  { %14 = sbr.rel (!%p12_p5) target bundleno = 2 (0x2), region = 90 }

// kernel: _lambda_.29
= control target key start
LH: loop header
LB: loop body
LE: loop exit
PB: predicated region body
PF: predicated region fallthrough
CT: control target
= control target key end

     0   :  { %s1021_s18 = smov 0   ;;  %s1023_s19 = smov 0   ;;  %s1092_s0 = inlined_call_operand.vmem [shape: bf16[4,32,256], index: 0, kind: input, shape index: {}]   ;;  %s1093_s1 = inlined_call_operand.vmem [shape: f32[1,256], index: 1, kind: input, shape index: {}]   ;;  %s1094_s2 = inlined_call_operand.vmem [shape: f32[1,256], index: 2, kind: input, shape index: {}]   ;;  %s1095_s3 = inlined_call_operand.vmem [shape: bf16[4,256,128], index: 3, kind: input, shape index: {}]   ;;  %s1096_s4 = inlined_call_operand.vmem [shape: f32[1,128], index: 4, kind: input, shape index: {}]   ;;  %s1097_s5 = inlined_call_operand.vmem [shape: f32[4,32,128], index: 5, kind: output, shape index: {}]  }
   0x1   :  { %s1025_s20 = smov 0  }
   0x2 LB: > { %s41_s21 = sadd.s32 1, %s985_s19  ;;  %p834_p0 = scmp.ge.s32.totalorder %s989_s20, 1  ;;  %s989_s20 = sphi %s1025_s20, %s15_s20   ;;  %s985_s19 = sphi %s1023_s19, %s1099_s19   ;;  %s981_s18 = sphi %s1021_s18, %s1098_s18  }
   0x3   : > { %p43_p1 = scmp.ge.s32.totalorder %s41_s21, 4  ;;  %p282_p2 = scmp.lt.s32.totalorder %s989_s20, 5 }
   0x5   : > { %s1101_s21 = smov (%p43_p1, %s41_s21), 0  ;;  %p283_p3 = pnand %p834_p0, %p282_p2 }
   0x6   : > { %p351_p4 = scmp.lt.s32.totalorder (!%p283_p3), %s981_s18, 3 }
   0x7   : > { %286 = sbr.rel (%p283_p3) target bundleno = 193 (0xc1), region = 40 }
   0xc   : > { %s1103_s18 = smov (!%p351_p4, %s981_s18), 3  ;;  %v424_v8 = vld [vmem:[%s1093_s1] sm:$0x3] }
   0xd   : > { %s908_s22 = sshll.u32 %s1103_s18, 7  ;;  %s907_s26 = sshll.u32 %s1103_s18, 5  ;;  %v426_v14 = vperm.slane %v424_v8, 0  ;;  %v427_v15 = vperm.slane %v424_v8, 1  ;;  %v438_v17 = vld [vmem:[%s1094_s2] sm:$0x3] }
   0xe   : > { %s1045_s25 = scalar_lea.vmem %s1095_s3, %s908_s22  ;;  %s362_s29 = scalar_lea.vmem %s1092_s0, %s907_s26  ;;  %v440_v27 = vperm.slane %v438_v17, 0  ;;  %v441_v28 = vperm.slane %v438_v17, 1  ;;  %v966_v63 = vld [vmem:[%s1096_s4] ss:$0 sm:$0xff] }
   0xf   : > { %v917_v0 = vld [vmem:[%s1045_s25 + $0x38] sm:$0xff]  ;;  %v916_v2 = vld [vmem:[%s1045_s25 + $0x30] sm:$0xff]  ;;  %v915_v4 = vld [vmem:[%s1045_s25 + $0x28] sm:$0xff]  ;;  %s402_s13 = scalar_lea.vmem %s1097_s5, %s907_s26 }
  0x10   : > { %v925_v1 = vld [vmem:[%s1045_s25 + $0x78] sm:$0xff]  ;;  %596 = vmatpush.bf16.msra.mxu0 %v917_v0  ;;  %926 = vmatpush.bf16.msra.mxu2 %v917_v0  ;;  %v924_v3 = vld [vmem:[%s1045_s25 + $0x70] sm:$0xff]  ;;  %v923_v5 = vld [vmem:[%s1045_s25 + $0x68] sm:$0xff] }
  0x11   : > { %615 = vmatpush.bf16.msra.mxu1 %v925_v1  ;;  %934 = vmatpush.bf16.msra.mxu3 %v925_v1  ;;  %v914_v6 = vld [vmem:[%s1045_s25 + $0x20] sm:$0xff]  ;;  %v413_v9 = vld [vmem:[%s362_s29 + $0x8] sm:$0xff]  ;;  %v414_v10 = vld [vmem:[%s362_s29 + $0x10] sm:$0xff] }
  0x12   : > { %v412_v7 = vld [vmem:[%s362_s29] sm:$0xff]  ;;  %v415_v11 = vld [vmem:[%s362_s29 + $0x18] sm:$0xff]  ;;  %v418_v16 = vunpack.c.l.bf16 %v413_v9  ;;  %v420_v18 = vunpack.c.l.bf16 %v414_v10  ;;  %v419_v22 = vunpack.c.h.bf16 %v413_v9  ;;  %v421_v23 = vunpack.c.h.bf16 %v414_v10  ;;  %v912_v33 = vld [vmem:[%s1045_s25 + $0x10] sm:$0xff] }
  0x13   : > { %v922_v12 = vld [vmem:[%s1045_s25 + $0x60] sm:$0xff]  ;;  %v416_v13 = vunpack.c.l.bf16 %v412_v7  ;;  %v422_v19 = vunpack.c.l.bf16 %v415_v11  ;;  %v417_v20 = vunpack.c.h.bf16 %v412_v7  ;;  %v913_v21 = vld [vmem:[%s1045_s25 + $0x18] sm:$0xff]  ;;  %v423_v24 = vunpack.c.h.bf16 %v415_v11  ;;  %v920_v37 = vld [vmem:[%s1045_s25 + $0x50] sm:$0xff] }
  0x14   : > { %597 = vmatpush.bf16.msra.mxu0 %v916_v2  ;;  %927 = vmatpush.bf16.msra.mxu2 %v916_v2  ;;  %v921_v25 = vld [vmem:[%s1045_s25 + $0x58] sm:$0xff]  ;;  %v432_v29 = vmul.f32 %v426_v14, %v418_v16  ;;  %v434_v30 = vmul.f32 %v426_v14, %v420_v18  ;;  %v433_v34 = vmul.f32 %v427_v15, %v419_v22  ;;  %v911_v43 = vld [vmem:[%s1045_s25 + $0x8] sm:$0xff]  ;;  %v910_v52 = vld [vmem:[%s1045_s25] sm:$0xff] }
  0x15   : > { %616 = vmatpush.bf16.msra.mxu1 %v924_v3  ;;  %935 = vmatpush.bf16.msra.mxu3 %v924_v3  ;;  %v430_v26 = vmul.f32 %v426_v14, %v416_v13  ;;  %v436_v31 = vmul.f32 %v426_v14, %v422_v19  ;;  %v431_v32 = vmul.f32 %v427_v15, %v417_v20  ;;  %v919_v47 = vld [vmem:[%s1045_s25 + $0x48] sm:$0xff]  ;;  %v918_v57 = vld [vmem:[%s1045_s25 + $0x40] sm:$0xff] }
  0x16   : > { %v435_v35 = vmul.f32 %v427_v15, %v421_v23  ;;  %v437_v36 = vmul.f32 %v427_v15, %v423_v24  ;;  %v446_v39 = vadd.f32 %v440_v27, %v432_v29  ;;  %v448_v40 = vadd.f32 %v440_v27, %v434_v30 }
  0x17   : > { %v444_v38 = vadd.f32 %v440_v27, %v430_v26  ;;  %v450_v41 = vadd.f32 %v440_v27, %v436_v31  ;;  %v445_v42 = vadd.f32 %v441_v28, %v431_v32  ;;  %v447_v44 = vadd.f32 %v441_v28, %v433_v34 }
  0x18   : > { %598 = vmatpush.bf16.msra.mxu0 %v915_v4  ;;  %928 = vmatpush.bf16.msra.mxu2 %v915_v4  ;;  %v449_v45 = vadd.f32 %v441_v28, %v435_v35  ;;  %v451_v46 = vadd.f32 %v441_v28, %v437_v36  ;;  %v454_v49 = vmax.f32 %v446_v39, 0.0  ;;  %v456_v50 = vmax.f32 %v448_v40, 0.0 }
  0x19   : > { %617 = vmatpush.bf16.msra.mxu1 %v923_v5  ;;  %936 = vmatpush.bf16.msra.mxu3 %v923_v5  ;;  %v452_v48 = vmax.f32 %v444_v38, 0.0  ;;  %v458_v51 = vmax.f32 %v450_v41, 0.0  ;;  %v453_v53 = vmax.f32 %v445_v42, 0.0  ;;  %v455_v54 = vmax.f32 %v447_v44, 0.0 }
  0x1a   : > { %v457_v55 = vmax.f32 %v449_v45, 0.0  ;;  %v459_v56 = vmax.f32 %v451_v46, 0.0 }
  0x1b   : > { %v464_v58 = vpack.c.bf16 %v454_v49, %v452_v48  ;;  %v466_v59 = vpack.c.bf16 %v458_v51, %v456_v50  ;;  %v465_v60 = vpack.c.bf16 %v455_v54, %v453_v53 }
  0x1c   : > { %599 = vmatpush.bf16.msra.mxu0 %v914_v6  ;;  %929 = vmatpush.bf16.msra.mxu2 %v914_v6  ;;  %v467_v61 = vpack.c.bf16 %v459_v56, %v457_v55 }
  0x1d   : > { %618 = vmatpush.bf16.msra.mxu1 %v922_v12  ;;  %937 = vmatpush.bf16.msra.mxu3 %v922_v12 }
  0x20   : > { %600 = vmatpush.bf16.msra.mxu0 %v913_v21  ;;  %930 = vmatpush.bf16.msra.mxu2 %v913_v21 }
  0x21   : > { %619 = vmatpush.bf16.msra.mxu1 %v921_v25  ;;  %938 = vmatpush.bf16.msra.mxu3 %v921_v25 }
  0x24   : > { %601 = vmatpush.bf16.msra.mxu0 %v912_v33  ;;  %931 = vmatpush.bf16.msra.mxu2 %v912_v33 }
  0x25   : > { %620 = vmatpush.bf16.msra.mxu1 %v920_v37  ;;  %939 = vmatpush.bf16.msra.mxu3 %v920_v37 }
  0x28   : > { %602 = vmatpush.bf16.msra.mxu0 %v911_v43  ;;  %932 = vmatpush.bf16.msra.mxu2 %v911_v43 }
  0x29   : > { %621 = vmatpush.bf16.msra.mxu1 %v919_v47  ;;  %940 = vmatpush.bf16.msra.mxu3 %v919_v47 }
  0x2c   : > { %603 = vmatpush.bf16.msra.mxu0 %v910_v52  ;;  %933 = vmatpush.bf16.msra.mxu2 %v910_v52 }
  0x2d   : > { %622 = vmatpush.bf16.msra.mxu1 %v918_v57  ;;  %941 = vmatpush.bf16.msra.mxu3 %v918_v57 }
  0x2f   : > { %604 = vmatmul.bf16.vlgmr.msra.gmra.mxu0 %v464_v58  ;;  %609 = vmatmul.bf16.vlgmr.msra.gmra.mxu2 %v466_v59 }
  0x30   : > { %623 = vmatmul.bf16.vlgmr.msra.gmra.mxu1 %v465_v60  ;;  %628 = vmatmul.bf16.vlgmr.msra.gmra.mxu3 %v467_v61 }
  0xac   : > { %v605_v62 = vpop.f32.mrf.mxu0 }
  0xad   : > { %v624_v0 = vpop.f32.mrf.mxu1 }
  0xae   : > { %v625_v1 = vadd.f32 %v624_v0, %v605_v62 }
  0xb0   : > { %v653_v2 = vadd.f32 %v966_v63, %v625_v1 }
  0xb2   : > { %657 = vst [vmem:[%s402_s13] sm:$0xff] %v653_v2  ;;  %v610_v3 = vpop.f32.mrf.mxu2 }
  0xb3   : > { %v629_v4 = vpop.f32.mrf.mxu3 }
  0xb4   : > { %v630_v5 = vadd.f32 %v629_v4, %v610_v3  ;;  %v607_v6 = vpop.f32.mrf.mxu0 }
  0xb5   : > { %v626_v7 = vpop.f32.mrf.mxu1 }
  0xb6   : > { %v655_v8 = vadd.f32 %v966_v63, %v630_v5  ;;  %v627_v9 = vadd.f32 %v626_v7, %v607_v6 }
  0xb8   : > { %659 = vst [vmem:[%s402_s13 + $0x10] sm:$0xff] %v655_v8  ;;  %v654_v10 = vadd.f32 %v966_v63, %v627_v9 }
  0xba   : > { %658 = vst [vmem:[%s402_s13 + $0x8] sm:$0xff] %v654_v10  ;;  %v612_v11 = vpop.f32.mrf.mxu2 }
  0xbb   : > { %v631_v12 = vpop.f32.mrf.mxu3 }
  0xbc   : > { %v632_v13 = vadd.f32 %v631_v12, %v612_v11 }
  0xbe   : > { %v656_v14 = vadd.f32 %v966_v63, %v632_v13 }
  0xc0   : > { %660 = vst [vmem:[%s402_s13 + $0x18] sm:$0xff] %v656_v14 }
  0xc1 PF: > { %s15_s20 = sadd.s32 1, %s989_s20   ;;  %s1098_s18 = smov %s985_s19 }
  0xc2   : > { %p12_p5 = scmp.ge.s32.totalorder %s15_s20, 6   ;;  %s1099_s19 = smov %s1101_s21 }
  0xc4   :  { %14 = sbr.rel (!%p12_p5) target bundleno = 2 (0x2), region = 90 }

// kernel: tile.144
= control target key start
LH: loop header
LB: loop body
LE: loop exit
PB: predicated region body
PF: predicated region fallthrough
CT: control target
= control target key end

     0   :  { %s22_s0 = inlined_call_operand.vmem [shape: f32[16], index: 0, kind: input, shape index: {}]   ;;  %s23_s1 = inlined_call_operand.vmem [shape: f32[4,16], index: 1, kind: output, shape index: {}]  }
   0x1   :  { %v4_v0 = vld [vmem:[%s22_s0] ss:$0 sm:$0xff] }
   0x2   :  { %5 = vst [vmem:[%s23_s1] sm:$0xf] %v4_v0 }

// kernel: tile.145
= control target key start
LH: loop header
LB: loop body
LE: loop exit
PB: predicated region body
PF: predicated region fallthrough
CT: control target
= control target key end

     0   :  { %s37_s8 = smov 16   ;;  %s38_s9 = smov 32   ;;  %vm7_vm0 = vcmask 130048   ;;  %vm13_vm1 = vcmask 523648   ;;  %vm19_vm2 = vcmask 392448   ;;  %vm25_vm3 = vcmask 261248   ;;  %s55_s0 = inlined_call_operand.vmem [shape: f32[4,16], index: 0, kind: input, shape index: {}]   ;;  %s56_s1 = inlined_call_operand.vmem [shape: f32[64], index: 1, kind: output, shape index: {}]  }
   0x1   :  { %v4_v0 = vld [vmem:[%s55_s0] sm:$0xf]  ;;  %s36_s0 = smov 48  }
   0x2   :  { %5 = vst [vmem:[#allocation1] sm:$0xf] %v4_v0 }
   0x9   :  { %v10_v1 = vld [vmem:[#allocation1 + $0x3] sm:$0x1]   ;;  %v22_v2 = vld [vmem:[#allocation1 + $0x1] sm:$0x1]   ;;  %v16_v3 = vld [vmem:[#allocation1 + $0x2] sm:$0x1]  }
   0xa   :  { %11 = vrot.lane.b32.xlu0 %v10_v1, %s36_s0  ;;  %23 = vrot.lane.b32.xlu1 %v22_v2, %s37_s8  ;;  %v6_v4 = vld [vmem:[#allocation1] sm:$0x1]  }
   0xb   :  { %8 = vst.msk [vmem:[#allocation0] sm:$0x1] %vm7_vm0, %v6_v4  }
  0x12   :  { %17 = vrot.lane.b32.xlu0 %v16_v3, %s38_s9 }
  0x7c   :  { %v12_v5 = vpop.permute.xlu0 %11   ;;  %v24_v6 = vpop.permute.xlu1 %23  }
  0x7d   :  { %14 = vst.msk [vmem:[#allocation0] sm:$0x1] %vm13_vm1, %v12_v5  }
  0x84   :  { %v18_v7 = vpop.permute.xlu0 %17  }
  0x85   :  { %20 = vst.msk [vmem:[#allocation0] sm:$0x1] %vm19_vm2, %v18_v7  }
  0x86   :  { %26 = vst.msk [vmem:[#allocation0] sm:$0x1] %vm25_vm3, %v24_v6  }
  0x8d   :  { %v29_v8 = vld [vmem:[#allocation0] sm:$0x1] }
  0x8e   :  { %32 = vst [vmem:[%s56_s1] sm:$0x1] %v29_v8 }

// kernel: _lambda_.31
= control target key start
LH: loop header
LB: loop body
LE: loop exit
PB: predicated region body
PF: predicated region fallthrough
CT: control target
= control target key end

     0   :  { %s1084_s18 = smov 0   ;;  %s1086_s19 = smov 0   ;;  %s1207_s0 = inlined_call_operand.vmem [shape: bf16[4,128,128], index: 0, kind: input, shape index: {}]   ;;  %s1208_s1 = inlined_call_operand.vmem [shape: f32[1,128], index: 1, kind: input, shape index: {}]   ;;  %s1209_s2 = inlined_call_operand.vmem [shape: f32[1,128], index: 2, kind: input, shape index: {}]   ;;  %s1210_s3 = inlined_call_operand.vmem [shape: bf16[4,128,128], index: 3, kind: input, shape index: {}]   ;;  %s1211_s4 = inlined_call_operand.vmem [shape: f32[1,128], index: 4, kind: input, shape index: {}]   ;;  %s1212_s5 = inlined_call_operand.vmem [shape: f32[4,128,128], index: 5, kind: output, shape index: {}]  }
   0x1   :  { %s1088_s20 = smov 0  }
   0x2 LB: > { %s41_s21 = sadd.s32 1, %s1048_s19  ;;  %p888_p0 = scmp.ge.s32.totalorder %s1052_s20, 1  ;;  %s1052_s20 = sphi %s1088_s20, %s15_s20   ;;  %s1048_s19 = sphi %s1086_s19, %s1214_s19   ;;  %s1044_s18 = sphi %s1084_s18, %s1213_s18  }
   0x3   : > { %p43_p1 = scmp.ge.s32.totalorder %s41_s21, 4  ;;  %p275_p2 = scmp.lt.s32.totalorder %s1052_s20, 5 }
   0x5   : > { %s1216_s21 = smov (%p43_p1, %s41_s21), 0  ;;  %p276_p3 = pnand %p888_p0, %p275_p2 }
   0x6   : > { %p339_p4 = scmp.lt.s32.totalorder (!%p276_p3), %s1044_s18, 3 }
   0x7   : > { %279 = sbr.rel (%p276_p3) target bundleno = 208 (0xd0), region = 40 }
   0xc   : > { %s1218_s18 = smov (!%p339_p4, %s1044_s18), 3  ;;  %v1126_v10 = vld [vmem:[%s1208_s1] ss:$0 sm:$0xff] }
   0xd   : > { %s929_s22 = sshll.u32 %s1218_s18, 6  ;;  %v1134_v20 = vld [vmem:[%s1209_s2] ss:$0 sm:$0xff]  ;;  %s931_s8 = sshll.u32 %s1218_s18, 7 }
   0xe   : > { %s1108_s25 = scalar_lea.vmem %s1210_s3, %s929_s22  ;;  %s1116_s28 = scalar_lea.vmem %s1207_s0, %s929_s22 }
   0xf   : > { %v939_v0 = vld [vmem:[%s1108_s25 + $0x38] sm:$0xff]  ;;  %v938_v1 = vld [vmem:[%s1108_s25 + $0x30] sm:$0xff]  ;;  %v937_v2 = vld [vmem:[%s1108_s25 + $0x28] sm:$0xff]  ;;  %s1180_s13 = scalar_lea.vmem %s1212_s5, %s931_s8 }
  0x10   : > { %582 = vmatpush.bf16.msra.mxu0 %v939_v0  ;;  %979 = vmatpush.bf16.msra.mxu1 %v939_v0  ;;  %v941_v3 = vld [vmem:[%s1116_s28] sm:$0xff]   ;;  %v973_v4 = vld [vmem:[%s1116_s28 + $0x10] sm:$0xff]   ;;  %v935_v15 = vld [vmem:[%s1108_s25 + $0x18] sm:$0xff] }
  0x11   : > { %980 = vmatpush.bf16.msra.mxu2 %v939_v0  ;;  %981 = vmatpush.bf16.msra.mxu3 %v939_v0  ;;  %v936_v5 = vld [vmem:[%s1108_s25 + $0x20] sm:$0xff]  ;;  %v977_v7 = vld [vmem:[%s1116_s28 + $0x30] sm:$0xff]   ;;  %v942_v8 = vunpack.c.l.bf16 %v941_v3  ;;  %v943_v9 = vunpack.c.h.bf16 %v941_v3  ;;  %v950_v11 = vunpack.c.l.bf16 %v973_v4  ;;  %v951_v12 = vunpack.c.h.bf16 %v973_v4  ;;  %v933_v34 = vld [vmem:[%s1108_s25 + $0x8] sm:$0xff] }
  0x12   : > { %v975_v6 = vld [vmem:[%s1116_s28 + $0x20] sm:$0xff]   ;;  %v966_v16 = vunpack.c.l.bf16 %v977_v7  ;;  %v967_v17 = vunpack.c.h.bf16 %v977_v7  ;;  %v934_v25 = vld [vmem:[%s1108_s25 + $0x10] sm:$0xff]  ;;  %v972_v43 = vld [vmem:[%s1116_s28 + $0x8] sm:$0xff]  }
  0x13   : > { %v958_v13 = vunpack.c.l.bf16 %v975_v6  ;;  %v959_v14 = vunpack.c.h.bf16 %v975_v6  ;;  %v442_v18 = vmul.f32 %v1126_v10, %v942_v8  ;;  %v443_v19 = vmul.f32 %v1126_v10, %v943_v9  ;;  %v932_v44 = vld [vmem:[%s1108_s25] sm:$0xff]  ;;  %v974_v47 = vld [vmem:[%s1116_s28 + $0x18] sm:$0xff]   ;;  %v976_v48 = vld [vmem:[%s1116_s28 + $0x28] sm:$0xff]  }
  0x14   : > { %583 = vmatpush.bf16.msra.mxu0 %v938_v1  ;;  %982 = vmatpush.bf16.msra.mxu1 %v938_v1  ;;  %v446_v21 = vmul.f32 %v1126_v10, %v950_v11  ;;  %v447_v22 = vmul.f32 %v1126_v10, %v951_v12  ;;  %v454_v26 = vmul.f32 %v1126_v10, %v966_v16  ;;  %v978_v49 = vld [vmem:[%s1116_s28 + $0x38] sm:$0xff]   ;;  %v946_v52 = vunpack.c.l.bf16 %v972_v43 }
  0x15   : > { %983 = vmatpush.bf16.msra.mxu2 %v938_v1  ;;  %984 = vmatpush.bf16.msra.mxu3 %v938_v1  ;;  %v450_v23 = vmul.f32 %v1126_v10, %v958_v13  ;;  %v451_v24 = vmul.f32 %v1126_v10, %v959_v14  ;;  %v455_v27 = vmul.f32 %v1126_v10, %v967_v17  ;;  %v947_v53 = vunpack.c.h.bf16 %v972_v43 }
  0x16   : > { %v462_v28 = vadd.f32 %v1134_v20, %v442_v18  ;;  %v463_v29 = vadd.f32 %v1134_v20, %v443_v19  ;;  %v466_v30 = vadd.f32 %v1134_v20, %v446_v21  ;;  %v467_v31 = vadd.f32 %v1134_v20, %v447_v22 }
  0x17   : > { %v470_v32 = vadd.f32 %v1134_v20, %v450_v23  ;;  %v471_v33 = vadd.f32 %v1134_v20, %v451_v24  ;;  %v474_v35 = vadd.f32 %v1134_v20, %v454_v26  ;;  %v475_v36 = vadd.f32 %v1134_v20, %v455_v27 }
  0x18   : > { %584 = vmatpush.bf16.msra.mxu0 %v937_v2  ;;  %985 = vmatpush.bf16.msra.mxu1 %v937_v2  ;;  %v478_v37 = vmax.f32 %v462_v28, 0.0  ;;  %v479_v38 = vmax.f32 %v463_v29, 0.0  ;;  %v482_v39 = vmax.f32 %v466_v30, 0.0  ;;  %v483_v40 = vmax.f32 %v467_v31, 0.0 }
  0x19   : > { %986 = vmatpush.bf16.msra.mxu2 %v937_v2  ;;  %987 = vmatpush.bf16.msra.mxu3 %v937_v2  ;;  %v486_v41 = vmax.f32 %v470_v32, 0.0  ;;  %v487_v42 = vmax.f32 %v471_v33, 0.0  ;;  %v490_v45 = vmax.f32 %v474_v35, 0.0  ;;  %v491_v46 = vmax.f32 %v475_v36, 0.0 }
  0x1a   : > { %v510_v50 = vpack.c.bf16 %v479_v38, %v478_v37  ;;  %v512_v51 = vpack.c.bf16 %v483_v40, %v482_v39  ;;  %v954_v55 = vunpack.c.l.bf16 %v974_v47  ;;  %v955_v56 = vunpack.c.h.bf16 %v974_v47 }
  0x1b   : > { %v514_v54 = vpack.c.bf16 %v487_v42, %v486_v41  ;;  %v962_v57 = vunpack.c.l.bf16 %v976_v48  ;;  %v516_v58 = vpack.c.bf16 %v491_v46, %v490_v45  ;;  %v963_v59 = vunpack.c.h.bf16 %v976_v48 }
  0x1c   : > { %585 = vmatpush.bf16.msra.mxu0 %v936_v5  ;;  %988 = vmatpush.bf16.msra.mxu1 %v936_v5  ;;  %v970_v60 = vunpack.c.l.bf16 %v978_v49  ;;  %v971_v61 = vunpack.c.h.bf16 %v978_v49  ;;  %v444_v62 = vmul.f32 %v1126_v10, %v946_v52  ;;  %v445_v63 = vmul.f32 %v1126_v10, %v947_v53 }
  0x1d   : > { %989 = vmatpush.bf16.msra.mxu2 %v936_v5  ;;  %990 = vmatpush.bf16.msra.mxu3 %v936_v5  ;;  %v448_v0 = vmul.f32 %v1126_v10, %v954_v55  ;;  %v449_v1 = vmul.f32 %v1126_v10, %v955_v56  ;;  %v452_v2 = vmul.f32 %v1126_v10, %v962_v57 }
  0x1e   : > { %v453_v3 = vmul.f32 %v1126_v10, %v963_v59  ;;  %v456_v4 = vmul.f32 %v1126_v10, %v970_v60  ;;  %v457_v5 = vmul.f32 %v1126_v10, %v971_v61  ;;  %v464_v6 = vadd.f32 %v1134_v20, %v444_v62 }
  0x1f   : > { %v465_v7 = vadd.f32 %v1134_v20, %v445_v63  ;;  %v468_v8 = vadd.f32 %v1134_v20, %v448_v0  ;;  %v469_v9 = vadd.f32 %v1134_v20, %v449_v1  ;;  %v472_v11 = vadd.f32 %v1134_v20, %v452_v2 }
  0x20   : > { %586 = vmatpush.bf16.msra.mxu0 %v935_v15  ;;  %991 = vmatpush.bf16.msra.mxu1 %v935_v15  ;;  %v473_v12 = vadd.f32 %v1134_v20, %v453_v3  ;;  %v476_v13 = vadd.f32 %v1134_v20, %v456_v4  ;;  %v477_v14 = vadd.f32 %v1134_v20, %v457_v5  ;;  %v1029_v20 = vld [vmem:[%s1211_s4] ss:$0 sm:$0xff] }
  0x21   : > { %992 = vmatpush.bf16.msra.mxu2 %v935_v15  ;;  %993 = vmatpush.bf16.msra.mxu3 %v935_v15  ;;  %v480_v15 = vmax.f32 %v464_v6, 0.0  ;;  %v481_v16 = vmax.f32 %v465_v7, 0.0  ;;  %v484_v10 = vmax.f32 %v468_v8, 0.0  ;;  %v485_v17 = vmax.f32 %v469_v9, 0.0 }
  0x22   : > { %v488_v18 = vmax.f32 %v472_v11, 0.0  ;;  %v489_v19 = vmax.f32 %v473_v12, 0.0  ;;  %v492_v21 = vmax.f32 %v476_v13, 0.0  ;;  %v493_v22 = vmax.f32 %v477_v14, 0.0 }
  0x23   : > { %v511_v23 = vpack.c.bf16 %v481_v16, %v480_v15  ;;  %v513_v24 = vpack.c.bf16 %v485_v17, %v484_v10 }
  0x24   : > { %587 = vmatpush.bf16.msra.mxu0 %v934_v25  ;;  %994 = vmatpush.bf16.msra.mxu1 %v934_v25  ;;  %v517_v26 = vpack.c.bf16 %v493_v22, %v492_v21 }
  0x25   : > { %995 = vmatpush.bf16.msra.mxu2 %v934_v25  ;;  %996 = vmatpush.bf16.msra.mxu3 %v934_v25  ;;  %v515_v25 = vpack.c.bf16 %v489_v19, %v488_v18 }
  0x28   : > { %588 = vmatpush.bf16.msra.mxu0 %v933_v34  ;;  %997 = vmatpush.bf16.msra.mxu1 %v933_v34 }
  0x29   : > { %998 = vmatpush.bf16.msra.mxu2 %v933_v34  ;;  %999 = vmatpush.bf16.msra.mxu3 %v933_v34 }
  0x2c   : > { %589 = vmatpush.bf16.msra.mxu0 %v932_v44  ;;  %1000 = vmatpush.bf16.msra.mxu1 %v932_v44 }
  0x2d   : > { %1001 = vmatpush.bf16.msra.mxu2 %v932_v44  ;;  %1002 = vmatpush.bf16.msra.mxu3 %v932_v44 }
  0x2f   : > { %590 = vmatmul.bf16.vlgmr.msra.gmra.mxu0 %v510_v50  ;;  %600 = vmatmul.bf16.vlgmr.msra.gmra.mxu1 %v512_v51 }
  0x30   : > { %610 = vmatmul.bf16.vlgmr.msra.gmra.mxu2 %v514_v54  ;;  %620 = vmatmul.bf16.vlgmr.msra.gmra.mxu3 %v516_v58 }
  0x3f   : > { %595 = vmatmul.bf16.gmra.mxu0 %v511_v23  ;;  %605 = vmatmul.bf16.gmra.mxu1 %v513_v24 }
  0x40   : > { %615 = vmatmul.bf16.gmra.mxu2 %v515_v25  ;;  %625 = vmatmul.bf16.gmra.mxu3 %v517_v26 }
  0xac   : > { %v591_v27 = vpop.f32.mrf.mxu0  ;;  %v601_v28 = vpop.f32.mrf.mxu1 }
  0xad   : > { %v686_v29 = vadd.f32 %v1029_v20, %v591_v27  ;;  %v690_v30 = vadd.f32 %v1029_v20, %v601_v28 }
  0xaf   : > { %702 = vst [vmem:[%s1180_s13] sm:$0xff] %v686_v29 }
  0xb0   : > { %706 = vst [vmem:[%s1180_s13 + $0x20] sm:$0xff] %v690_v30 }
  0xb3   : > { %v611_v31 = vpop.f32.mrf.mxu2  ;;  %v621_v32 = vpop.f32.mrf.mxu3 }
  0xb4   : > { %v694_v33 = vadd.f32 %v1029_v20, %v611_v31  ;;  %v698_v34 = vadd.f32 %v1029_v20, %v621_v32  ;;  %v593_v35 = vpop.f32.mrf.mxu0  ;;  %v603_v36 = vpop.f32.mrf.mxu1 }
  0xb5   : > { %v687_v37 = vadd.f32 %v1029_v20, %v593_v35  ;;  %v691_v38 = vadd.f32 %v1029_v20, %v603_v36 }
  0xb6   : > { %710 = vst [vmem:[%s1180_s13 + $0x40] sm:$0xff] %v694_v33 }
  0xb7   : > { %714 = vst [vmem:[%s1180_s13 + $0x60] sm:$0xff] %v698_v34 }
  0xb8   : > { %703 = vst [vmem:[%s1180_s13 + $0x8] sm:$0xff] %v687_v37 }
  0xb9   : > { %707 = vst [vmem:[%s1180_s13 + $0x28] sm:$0xff] %v691_v38 }
  0xbb   : > { %v613_v39 = vpop.f32.mrf.mxu2  ;;  %v623_v40 = vpop.f32.mrf.mxu3 }
  0xbc   : > { %v695_v41 = vadd.f32 %v1029_v20, %v613_v39  ;;  %v699_v42 = vadd.f32 %v1029_v20, %v623_v40  ;;  %v596_v43 = vpop.f32.mrf.mxu0  ;;  %v606_v44 = vpop.f32.mrf.mxu1 }
  0xbd   : > { %v688_v45 = vadd.f32 %v1029_v20, %v596_v43  ;;  %v692_v46 = vadd.f32 %v1029_v20, %v606_v44 }
  0xbe   : > { %711 = vst [vmem:[%s1180_s13 + $0x48] sm:$0xff] %v695_v41 }
  0xbf   : > { %715 = vst [vmem:[%s1180_s13 + $0x68] sm:$0xff] %v699_v42 }
  0xc0   : > { %704 = vst [vmem:[%s1180_s13 + $0x10] sm:$0xff] %v688_v45 }
  0xc1   : > { %708 = vst [vmem:[%s1180_s13 + $0x30] sm:$0xff] %v692_v46 }
  0xc3   : > { %v616_v47 = vpop.f32.mrf.mxu2  ;;  %v626_v48 = vpop.f32.mrf.mxu3 }
  0xc4   : > { %v696_v49 = vadd.f32 %v1029_v20, %v616_v47  ;;  %v700_v50 = vadd.f32 %v1029_v20, %v626_v48  ;;  %v598_v51 = vpop.f32.mrf.mxu0  ;;  %v608_v52 = vpop.f32.mrf.mxu1 }
  0xc5   : > { %v689_v53 = vadd.f32 %v1029_v20, %v598_v51  ;;  %v693_v54 = vadd.f32 %v1029_v20, %v608_v52 }
  0xc6   : > { %712 = vst [vmem:[%s1180_s13 + $0x50] sm:$0xff] %v696_v49 }
  0xc7   : > { %716 = vst [vmem:[%s1180_s13 + $0x70] sm:$0xff] %v700_v50 }
  0xc8   : > { %705 = vst [vmem:[%s1180_s13 + $0x18] sm:$0xff] %v689_v53 }
  0xc9   : > { %709 = vst [vmem:[%s1180_s13 + $0x38] sm:$0xff] %v693_v54 }
  0xcb   : > { %v618_v55 = vpop.f32.mrf.mxu2  ;;  %v628_v56 = vpop.f32.mrf.mxu3 }
  0xcc   : > { %v697_v57 = vadd.f32 %v1029_v20, %v618_v55  ;;  %v701_v58 = vadd.f32 %v1029_v20, %v628_v56 }
  0xce   : > { %713 = vst [vmem:[%s1180_s13 + $0x58] sm:$0xff] %v697_v57 }
  0xcf   : > { %717 = vst [vmem:[%s1180_s13 + $0x78] sm:$0xff] %v701_v58 }
  0xd0 PF: > { %s15_s20 = sadd.s32 1, %s1052_s20   ;;  %s1213_s18 = smov %s1048_s19 }
  0xd1   : > { %p12_p5 = scmp.ge.s32.totalorder %s15_s20, 6   ;;  %s1214_s19 = smov %s1216_s21 }
  0xd3   :  { %14 = sbr.rel (!%p12_p5) target bundleno = 2 (0x2), region = 90 }

// kernel: _lambda_.32
= control target key start
LH: loop header
LB: loop body
LE: loop exit
PB: predicated region body
PF: predicated region fallthrough
CT: control target
= control target key end

     0   :  { %vm14_vm0 = vcmask 64512   ;;  %v455_v0 = vmov 0.0   ;;  %vm430_vm1 = vcmask 57344   ;;  %s805_s0 = inlined_call_operand.vmem [shape: f32[512,8], index: 0, kind: input, shape index: {}]   ;;  %s806_s1 = inlined_call_operand.vmem [shape: f32[1,8], index: 1, kind: output, shape index: {0}]   ;;  %s807_s2 = inlined_call_operand.vmem [shape: f32[1,8], index: 2, kind: output, shape index: {1}]  }
   0x1   :  { %15 = vst.msk [vmem:[#allocation2] sm:$0xff] %vm14_vm0, %v455_v0  ;;  %v17_v1 = vld [vmem:[%s805_s0] sm:$0xff]  ;;  %v18_v2 = vld [vmem:[%s805_s0 + $0x8] sm:$0xff]  ;;  %v19_v3 = vld [vmem:[%s805_s0 + $0x10] sm:$0xff] }
   0x2   :  { %16 = vst.msk [vmem:[#allocation3] sm:$0xff] %vm14_vm0, %v455_v0  ;;  %v20_v4 = vld [vmem:[%s805_s0 + $0x18] sm:$0xff]  ;;  %v83_v5 = vsel %vm14_vm0, %v17_v1, 0.0  ;;  %v84_v6 = vsel %vm14_vm0, %v18_v2, 0.0  ;;  %v21_v7 = vld [vmem:[%s805_s0 + $0x20] sm:$0xff]  ;;  %v86_v9 = vsel %vm14_vm0, %v19_v3, 0.0  ;;  %v213_v24 = vmul.f32 %v17_v1, %v17_v1 }
   0x3   :  { %v85_v8 = vadd.f32 %v84_v6, %v83_v5  ;;  %v88_v10 = vsel %vm14_vm0, %v20_v4, 0.0  ;;  %v22_v11 = vld [vmem:[%s805_s0 + $0x28] sm:$0xff]  ;;  %v90_v13 = vsel %vm14_vm0, %v21_v7, 0.0  ;;  %v23_v14 = vld [vmem:[%s805_s0 + $0x30] sm:$0xff]  ;;  %v24_v17 = vld [vmem:[%s805_s0 + $0x38] sm:$0xff]  ;;  %v214_v25 = vmul.f32 %v18_v2, %v18_v2 }
   0x4   :  { %v92_v16 = vsel %vm14_vm0, %v22_v11, 0.0  ;;  %v94_v19 = vsel %vm14_vm0, %v23_v14, 0.0  ;;  %v25_v20 = vld [vmem:[%s805_s0 + $0x40] sm:$0xff]  ;;  %v26_v22 = vld [vmem:[%s805_s0 + $0x48] sm:$0xff]  ;;  %v96_v23 = vsel %vm14_vm0, %v24_v17, 0.0  ;;  %v215_v26 = vmul.f32 %v19_v3, %v19_v3  ;;  %v27_v30 = vld [vmem:[%s805_s0 + $0x50] sm:$0xff] }
   0x5   :  { %v87_v12 = vadd.f32 %v86_v9, %v85_v8  ;;  %v98_v28 = vsel %vm14_vm0, %v25_v20, 0.0  ;;  %v216_v29 = vmul.f32 %v20_v4, %v20_v4  ;;  %v100_v32 = vsel %vm14_vm0, %v26_v22, 0.0  ;;  %v28_v37 = vld [vmem:[%s805_s0 + $0x58] sm:$0xff]  ;;  %v29_v43 = vld [vmem:[%s805_s0 + $0x60] sm:$0xff]  ;;  %v30_v49 = vld [vmem:[%s805_s0 + $0x68] sm:$0xff] }
   0x6   :  { %v217_v33 = vmul.f32 %v21_v7, %v21_v7  ;;  %v277_v34 = vsel %vm14_vm0, %v213_v24, 0.0  ;;  %v278_v35 = vsel %vm14_vm0, %v214_v25, 0.0  ;;  %v280_v36 = vsel %vm14_vm0, %v215_v26, 0.0  ;;  %v31_v55 = vld [vmem:[%s805_s0 + $0x70] sm:$0xff]  ;;  %v32_v61 = vld [vmem:[%s805_s0 + $0x78] sm:$0xff]  ;;  %v33_v3 = vld [vmem:[%s805_s0 + $0x80] sm:$0xff] }
   0x7   :  { %v89_v15 = vadd.f32 %v88_v10, %v87_v12  ;;  %v279_v39 = vadd.f32 %v278_v35, %v277_v34  ;;  %v102_v40 = vsel %vm14_vm0, %v27_v30, 0.0  ;;  %v218_v41 = vmul.f32 %v22_v11, %v22_v11  ;;  %v34_v9 = vld [vmem:[%s805_s0 + $0x88] sm:$0xff] }
   0x8   :  { %v282_v42 = vsel %vm14_vm0, %v216_v29, 0.0  ;;  %v104_v46 = vsel %vm14_vm0, %v28_v37, 0.0  ;;  %v219_v47 = vmul.f32 %v23_v14, %v23_v14  ;;  %v284_v48 = vsel %vm14_vm0, %v217_v33, 0.0  ;;  %v38_v33 = vld [vmem:[%s805_s0 + $0xa8] sm:$0xff] }
   0x9   :  { %v91_v18 = vadd.f32 %v90_v13, %v89_v15  ;;  %v281_v45 = vadd.f32 %v280_v36, %v279_v39  ;;  %v106_v52 = vsel %vm14_vm0, %v29_v43, 0.0  ;;  %v220_v53 = vmul.f32 %v24_v17, %v24_v17  ;;  %v35_v15 = vld [vmem:[%s805_s0 + $0x90] sm:$0xff] }
   0xa   :  { %v286_v54 = vsel %vm14_vm0, %v218_v41, 0.0  ;;  %v108_v58 = vsel %vm14_vm0, %v30_v49, 0.0  ;;  %v221_v59 = vmul.f32 %v25_v20, %v25_v20  ;;  %v288_v60 = vsel %vm14_vm0, %v219_v47, 0.0  ;;  %v39_v39 = vld [vmem:[%s805_s0 + $0xb0] sm:$0xff] }
   0xb   :  { %v93_v21 = vadd.f32 %v92_v16, %v91_v18  ;;  %v283_v51 = vadd.f32 %v282_v42, %v281_v45  ;;  %v110_v0 = vsel %vm14_vm0, %v31_v55, 0.0  ;;  %v222_v1 = vmul.f32 %v26_v22, %v26_v22  ;;  %v40_v45 = vld [vmem:[%s805_s0 + $0xb8] sm:$0xff] }
   0xc   :  { %v290_v2 = vsel %vm14_vm0, %v220_v53, 0.0  ;;  %v112_v6 = vsel %vm14_vm0, %v32_v61, 0.0  ;;  %v223_v7 = vmul.f32 %v27_v30, %v27_v30  ;;  %v292_v8 = vsel %vm14_vm0, %v221_v59, 0.0 }
   0xd   :  { %v95_v27 = vadd.f32 %v94_v19, %v93_v21  ;;  %v285_v57 = vadd.f32 %v284_v48, %v283_v51  ;;  %v114_v12 = vsel %vm14_vm0, %v33_v3, 0.0  ;;  %v224_v13 = vmul.f32 %v28_v37, %v28_v37  ;;  %v36_v21 = vld [vmem:[%s805_s0 + $0x98] sm:$0xff]  ;;  %v41_v51 = vld [vmem:[%s805_s0 + $0xc0] sm:$0xff] }
   0xe   :  { %v294_v14 = vsel %vm14_vm0, %v222_v1, 0.0  ;;  %v116_v18 = vsel %vm14_vm0, %v34_v9, 0.0  ;;  %v225_v19 = vmul.f32 %v29_v43, %v29_v43  ;;  %v296_v20 = vsel %vm14_vm0, %v223_v7, 0.0 }
   0xf   :  { %v97_v31 = vadd.f32 %v96_v23, %v95_v27  ;;  %v287_v63 = vadd.f32 %v286_v54, %v285_v57  ;;  %v118_v24 = vsel %vm14_vm0, %v35_v15, 0.0  ;;  %v226_v25 = vmul.f32 %v30_v49, %v30_v49  ;;  %v37_v27 = vld [vmem:[%s805_s0 + $0xa0] sm:$0xff]  ;;  %v42_v57 = vld [vmem:[%s805_s0 + $0xc8] sm:$0xff] }
  0x10   :  { %v298_v26 = vsel %vm14_vm0, %v224_v13, 0.0  ;;  %v120_v30 = vsel %vm14_vm0, %v36_v21, 0.0  ;;  %v122_v36 = vsel %vm14_vm0, %v37_v27, 0.0  ;;  %v228_v37 = vmul.f32 %v32_v61, %v32_v61 }
  0x11   :  { %v99_v38 = vadd.f32 %v98_v28, %v97_v31  ;;  %v289_v5 = vadd.f32 %v288_v60, %v287_v63  ;;  %v227_v31 = vmul.f32 %v31_v55, %v31_v55  ;;  %v124_v42 = vsel %vm14_vm0, %v38_v33, 0.0  ;;  %v43_v63 = vld [vmem:[%s805_s0 + $0xd0] sm:$0xff] }
  0x12   :  { %v229_v43 = vmul.f32 %v33_v3, %v33_v3  ;;  %v126_v48 = vsel %vm14_vm0, %v39_v39, 0.0  ;;  %v230_v49 = vmul.f32 %v34_v9, %v34_v9  ;;  %v128_v54 = vsel %vm14_vm0, %v40_v45, 0.0 }
  0x13   :  { %v101_v44 = vadd.f32 %v100_v32, %v99_v38  ;;  %v291_v11 = vadd.f32 %v290_v2, %v289_v5  ;;  %v300_v32 = vsel %vm14_vm0, %v225_v19, 0.0  ;;  %v302_v38 = vsel %vm14_vm0, %v226_v25, 0.0  ;;  %v44_v5 = vld [vmem:[%s805_s0 + $0xd8] sm:$0xff] }
  0x14   :  { %v231_v55 = vmul.f32 %v35_v15, %v35_v15  ;;  %v130_v60 = vsel %vm14_vm0, %v41_v51, 0.0  ;;  %v232_v61 = vmul.f32 %v36_v21, %v36_v21  ;;  %v132_v2 = vsel %vm14_vm0, %v42_v57, 0.0 }
  0x15   :  { %v103_v50 = vadd.f32 %v102_v40, %v101_v44  ;;  %v293_v17 = vadd.f32 %v292_v8, %v291_v11  ;;  %v304_v44 = vsel %vm14_vm0, %v227_v31, 0.0  ;;  %v233_v3 = vmul.f32 %v37_v27, %v37_v27  ;;  %v45_v11 = vld [vmem:[%s805_s0 + $0xe0] sm:$0xff] }
  0x16   :  { %v134_v8 = vsel %vm14_vm0, %v43_v63, 0.0  ;;  %v234_v9 = vmul.f32 %v38_v33, %v38_v33  ;;  %v235_v15 = vmul.f32 %v39_v39, %v39_v39  ;;  %v236_v21 = vmul.f32 %v40_v45, %v40_v45 }
  0x17   :  { %v105_v56 = vadd.f32 %v104_v46, %v103_v50  ;;  %v295_v23 = vadd.f32 %v294_v14, %v293_v17  ;;  %v306_v50 = vsel %vm14_vm0, %v228_v37, 0.0  ;;  %v136_v14 = vsel %vm14_vm0, %v44_v5, 0.0  ;;  %v46_v17 = vld [vmem:[%s805_s0 + $0xe8] sm:$0xff] }
  0x18   :  { %v237_v27 = vmul.f32 %v41_v51, %v41_v51  ;;  %v238_v33 = vmul.f32 %v42_v57, %v42_v57  ;;  %v239_v39 = vmul.f32 %v43_v63, %v43_v63  ;;  %v240_v45 = vmul.f32 %v44_v5, %v44_v5 }
  0x19   :  { %v107_v62 = vadd.f32 %v106_v52, %v105_v56  ;;  %v297_v29 = vadd.f32 %v296_v20, %v295_v23  ;;  %v308_v56 = vsel %vm14_vm0, %v229_v43, 0.0  ;;  %v138_v20 = vsel %vm14_vm0, %v45_v11, 0.0  ;;  %v47_v23 = vld [vmem:[%s805_s0 + $0xf0] sm:$0xff] }
  0x1a   :  { %v241_v51 = vmul.f32 %v45_v11, %v45_v11  ;;  %v242_v57 = vmul.f32 %v46_v17, %v46_v17  ;;  %v243_v63 = vmul.f32 %v47_v23, %v47_v23 }
  0x1b   :  { %v109_v4 = vadd.f32 %v108_v58, %v107_v62  ;;  %v299_v35 = vadd.f32 %v298_v26, %v297_v29  ;;  %v310_v62 = vsel %vm14_vm0, %v230_v49, 0.0  ;;  %v140_v26 = vsel %vm14_vm0, %v46_v17, 0.0  ;;  %v48_v29 = vld [vmem:[%s805_s0 + $0xf8] sm:$0xff] }
  0x1c   :  { %v244_v5 = vmul.f32 %v48_v29, %v48_v29 }
  0x1d   :  { %v111_v10 = vadd.f32 %v110_v0, %v109_v4  ;;  %v301_v41 = vadd.f32 %v300_v32, %v299_v35  ;;  %v312_v4 = vsel %vm14_vm0, %v231_v55, 0.0  ;;  %v142_v32 = vsel %vm14_vm0, %v47_v23, 0.0  ;;  %v49_v35 = vld [vmem:[%s805_s0 + $0x100] sm:$0xff] }
  0x1e   :  { %v245_v11 = vmul.f32 %v49_v35, %v49_v35 }
  0x1f   :  { %v113_v16 = vadd.f32 %v112_v6, %v111_v10  ;;  %v303_v47 = vadd.f32 %v302_v38, %v301_v41  ;;  %v314_v10 = vsel %vm14_vm0, %v232_v61, 0.0  ;;  %v144_v38 = vsel %vm14_vm0, %v48_v29, 0.0  ;;  %v50_v41 = vld [vmem:[%s805_s0 + $0x108] sm:$0xff] }
  0x20   :  { %v246_v17 = vmul.f32 %v50_v41, %v50_v41 }
  0x21   :  { %v115_v22 = vadd.f32 %v114_v12, %v113_v16  ;;  %v305_v53 = vadd.f32 %v304_v44, %v303_v47  ;;  %v316_v16 = vsel %vm14_vm0, %v233_v3, 0.0  ;;  %v146_v44 = vsel %vm14_vm0, %v49_v35, 0.0  ;;  %v51_v47 = vld [vmem:[%s805_s0 + $0x110] sm:$0xff] }
  0x22   :  { %v247_v23 = vmul.f32 %v51_v47, %v51_v47 }
  0x23   :  { %v117_v28 = vadd.f32 %v116_v18, %v115_v22  ;;  %v307_v59 = vadd.f32 %v306_v50, %v305_v53  ;;  %v318_v22 = vsel %vm14_vm0, %v234_v9, 0.0  ;;  %v148_v50 = vsel %vm14_vm0, %v50_v41, 0.0  ;;  %v52_v53 = vld [vmem:[%s805_s0 + $0x118] sm:$0xff] }
  0x24   :  { %v248_v29 = vmul.f32 %v52_v53, %v52_v53 }
  0x25   :  { %v119_v34 = vadd.f32 %v118_v24, %v117_v28  ;;  %v309_v1 = vadd.f32 %v308_v56, %v307_v59  ;;  %v320_v28 = vsel %vm14_vm0, %v235_v15, 0.0  ;;  %v150_v56 = vsel %vm14_vm0, %v51_v47, 0.0  ;;  %v53_v59 = vld [vmem:[%s805_s0 + $0x120] sm:$0xff] }
  0x26   :  { %v249_v35 = vmul.f32 %v53_v59, %v53_v59 }
  0x27   :  { %v121_v40 = vadd.f32 %v120_v30, %v119_v34  ;;  %v311_v7 = vadd.f32 %v310_v62, %v309_v1  ;;  %v322_v34 = vsel %vm14_vm0, %v236_v21, 0.0  ;;  %v152_v62 = vsel %vm14_vm0, %v52_v53, 0.0  ;;  %v54_v1 = vld [vmem:[%s805_s0 + $0x128] sm:$0xff] }
  0x28   :  { %v250_v41 = vmul.f32 %v54_v1, %v54_v1 }
  0x29   :  { %v123_v46 = vadd.f32 %v122_v36, %v121_v40  ;;  %v313_v13 = vadd.f32 %v312_v4, %v311_v7  ;;  %v324_v40 = vsel %vm14_vm0, %v237_v27, 0.0  ;;  %v154_v4 = vsel %vm14_vm0, %v53_v59, 0.0  ;;  %v55_v7 = vld [vmem:[%s805_s0 + $0x130] sm:$0xff] }
  0x2a   :  { %v251_v47 = vmul.f32 %v55_v7, %v55_v7 }
  0x2b   :  { %v125_v52 = vadd.f32 %v124_v42, %v123_v46  ;;  %v315_v19 = vadd.f32 %v314_v10, %v313_v13  ;;  %v326_v46 = vsel %vm14_vm0, %v238_v33, 0.0  ;;  %v156_v10 = vsel %vm14_vm0, %v54_v1, 0.0  ;;  %v56_v13 = vld [vmem:[%s805_s0 + $0x138] sm:$0xff] }
  0x2c   :  { %v252_v53 = vmul.f32 %v56_v13, %v56_v13 }
  0x2d   :  { %v127_v58 = vadd.f32 %v126_v48, %v125_v52  ;;  %v317_v25 = vadd.f32 %v316_v16, %v315_v19  ;;  %v328_v52 = vsel %vm14_vm0, %v239_v39, 0.0  ;;  %v158_v16 = vsel %vm14_vm0, %v55_v7, 0.0  ;;  %v57_v19 = vld [vmem:[%s805_s0 + $0x140] sm:$0xff] }
  0x2e   :  { %v253_v59 = vmul.f32 %v57_v19, %v57_v19 }
  0x2f   :  { %v129_v0 = vadd.f32 %v128_v54, %v127_v58  ;;  %v319_v31 = vadd.f32 %v318_v22, %v317_v25  ;;  %v330_v58 = vsel %vm14_vm0, %v240_v45, 0.0  ;;  %v160_v22 = vsel %vm14_vm0, %v56_v13, 0.0  ;;  %v58_v25 = vld [vmem:[%s805_s0 + $0x148] sm:$0xff] }
  0x30   :  { %v254_v1 = vmul.f32 %v58_v25, %v58_v25 }
  0x31   :  { %v131_v6 = vadd.f32 %v130_v60, %v129_v0  ;;  %v321_v37 = vadd.f32 %v320_v28, %v319_v31  ;;  %v332_v0 = vsel %vm14_vm0, %v241_v51, 0.0  ;;  %v162_v28 = vsel %vm14_vm0, %v57_v19, 0.0  ;;  %v59_v31 = vld [vmem:[%s805_s0 + $0x150] sm:$0xff] }
  0x32   :  { %v255_v7 = vmul.f32 %v59_v31, %v59_v31 }
  0x33   :  { %v133_v12 = vadd.f32 %v132_v2, %v131_v6  ;;  %v323_v43 = vadd.f32 %v322_v34, %v321_v37  ;;  %v334_v6 = vsel %vm14_vm0, %v242_v57, 0.0  ;;  %v164_v34 = vsel %vm14_vm0, %v58_v25, 0.0  ;;  %v60_v37 = vld [vmem:[%s805_s0 + $0x158] sm:$0xff] }
  0x34   :  { %v256_v13 = vmul.f32 %v60_v37, %v60_v37 }
  0x35   :  { %v135_v18 = vadd.f32 %v134_v8, %v133_v12  ;;  %v325_v49 = vadd.f32 %v324_v40, %v323_v43  ;;  %v336_v12 = vsel %vm14_vm0, %v243_v63, 0.0  ;;  %v166_v40 = vsel %vm14_vm0, %v59_v31, 0.0  ;;  %v61_v43 = vld [vmem:[%s805_s0 + $0x160] sm:$0xff] }
  0x36   :  { %v257_v19 = vmul.f32 %v61_v43, %v61_v43 }
  0x37   :  { %v137_v24 = vadd.f32 %v136_v14, %v135_v18  ;;  %v327_v55 = vadd.f32 %v326_v46, %v325_v49  ;;  %v338_v18 = vsel %vm14_vm0, %v244_v5, 0.0  ;;  %v168_v46 = vsel %vm14_vm0, %v60_v37, 0.0  ;;  %v62_v49 = vld [vmem:[%s805_s0 + $0x168] sm:$0xff] }
  0x38   :  { %v258_v25 = vmul.f32 %v62_v49, %v62_v49 }
  0x39   :  { %v139_v30 = vadd.f32 %v138_v20, %v137_v24  ;;  %v329_v61 = vadd.f32 %v328_v52, %v327_v55  ;;  %v340_v24 = vsel %vm14_vm0, %v245_v11, 0.0  ;;  %v170_v52 = vsel %vm14_vm0, %v61_v43, 0.0  ;;  %v63_v55 = vld [vmem:[%s805_s0 + $0x170] sm:$0xff] }
  0x3a   :  { %v259_v31 = vmul.f32 %v63_v55, %v63_v55 }
  0x3b   :  { %v141_v36 = vadd.f32 %v140_v26, %v139_v30  ;;  %v331_v3 = vadd.f32 %v330_v58, %v329_v61  ;;  %v342_v30 = vsel %vm14_vm0, %v246_v17, 0.0  ;;  %v172_v58 = vsel %vm14_vm0, %v62_v49, 0.0  ;;  %v64_v61 = vld [vmem:[%s805_s0 + $0x178] sm:$0xff] }
  0x3c   :  { %v260_v37 = vmul.f32 %v64_v61, %v64_v61 }
  0x3d   :  { %v143_v42 = vadd.f32 %v142_v32, %v141_v36  ;;  %v333_v9 = vadd.f32 %v332_v0, %v331_v3  ;;  %v344_v36 = vsel %vm14_vm0, %v247_v23, 0.0  ;;  %v174_v0 = vsel %vm14_vm0, %v63_v55, 0.0  ;;  %v65_v3 = vld [vmem:[%s805_s0 + $0x180] sm:$0xff] }
  0x3e   :  { %v261_v43 = vmul.f32 %v65_v3, %v65_v3 }
  0x3f   :  { %v145_v48 = vadd.f32 %v144_v38, %v143_v42  ;;  %v335_v15 = vadd.f32 %v334_v6, %v333_v9  ;;  %v346_v42 = vsel %vm14_vm0, %v248_v29, 0.0  ;;  %v176_v6 = vsel %vm14_vm0, %v64_v61, 0.0  ;;  %v66_v9 = vld [vmem:[%s805_s0 + $0x188] sm:$0xff] }
  0x40   :  { %v262_v49 = vmul.f32 %v66_v9, %v66_v9 }
  0x41   :  { %v147_v54 = vadd.f32 %v146_v44, %v145_v48  ;;  %v337_v21 = vadd.f32 %v336_v12, %v335_v15  ;;  %v348_v48 = vsel %vm14_vm0, %v249_v35, 0.0  ;;  %v178_v12 = vsel %vm14_vm0, %v65_v3, 0.0  ;;  %v67_v15 = vld [vmem:[%s805_s0 + $0x190] sm:$0xff] }
  0x42   :  { %v263_v55 = vmul.f32 %v67_v15, %v67_v15 }
  0x43   :  { %v149_v60 = vadd.f32 %v148_v50, %v147_v54  ;;  %v339_v27 = vadd.f32 %v338_v18, %v337_v21  ;;  %v350_v54 = vsel %vm14_vm0, %v250_v41, 0.0  ;;  %v180_v18 = vsel %vm14_vm0, %v66_v9, 0.0  ;;  %v68_v21 = vld [vmem:[%s805_s0 + $0x198] sm:$0xff] }
  0x44   :  { %v264_v61 = vmul.f32 %v68_v21, %v68_v21 }
  0x45   :  { %v151_v2 = vadd.f32 %v150_v56, %v149_v60  ;;  %v341_v33 = vadd.f32 %v340_v24, %v339_v27  ;;  %v352_v60 = vsel %vm14_vm0, %v251_v47, 0.0  ;;  %v182_v24 = vsel %vm14_vm0, %v67_v15, 0.0  ;;  %v69_v27 = vld [vmem:[%s805_s0 + $0x1a0] sm:$0xff] }
  0x46   :  { %v265_v3 = vmul.f32 %v69_v27, %v69_v27 }
  0x47   :  { %v153_v8 = vadd.f32 %v152_v62, %v151_v2  ;;  %v343_v39 = vadd.f32 %v342_v30, %v341_v33  ;;  %v354_v2 = vsel %vm14_vm0, %v252_v53, 0.0  ;;  %v184_v30 = vsel %vm14_vm0, %v68_v21, 0.0  ;;  %v70_v33 = vld [vmem:[%s805_s0 + $0x1a8] sm:$0xff] }
  0x48   :  { %v266_v9 = vmul.f32 %v70_v33, %v70_v33 }
  0x49   :  { %v155_v14 = vadd.f32 %v154_v4, %v153_v8  ;;  %v345_v45 = vadd.f32 %v344_v36, %v343_v39  ;;  %v356_v8 = vsel %vm14_vm0, %v253_v59, 0.0  ;;  %v186_v36 = vsel %vm14_vm0, %v69_v27, 0.0  ;;  %v71_v39 = vld [vmem:[%s805_s0 + $0x1b0] sm:$0xff] }
  0x4a   :  { %v267_v15 = vmul.f32 %v71_v39, %v71_v39 }
  0x4b   :  { %v157_v20 = vadd.f32 %v156_v10, %v155_v14  ;;  %v347_v51 = vadd.f32 %v346_v42, %v345_v45  ;;  %v358_v14 = vsel %vm14_vm0, %v254_v1, 0.0  ;;  %v188_v42 = vsel %vm14_vm0, %v70_v33, 0.0  ;;  %v72_v45 = vld [vmem:[%s805_s0 + $0x1b8] sm:$0xff] }
  0x4c   :  { %v268_v21 = vmul.f32 %v72_v45, %v72_v45 }
  0x4d   :  { %v159_v26 = vadd.f32 %v158_v16, %v157_v20  ;;  %v349_v57 = vadd.f32 %v348_v48, %v347_v51  ;;  %v360_v20 = vsel %vm14_vm0, %v255_v7, 0.0  ;;  %v190_v48 = vsel %vm14_vm0, %v71_v39, 0.0  ;;  %v73_v51 = vld [vmem:[%s805_s0 + $0x1c0] sm:$0xff] }
  0x4e   :  { %v269_v27 = vmul.f32 %v73_v51, %v73_v51 }
  0x4f   :  { %v161_v32 = vadd.f32 %v160_v22, %v159_v26  ;;  %v351_v63 = vadd.f32 %v350_v54, %v349_v57  ;;  %v362_v26 = vsel %vm14_vm0, %v256_v13, 0.0  ;;  %v192_v54 = vsel %vm14_vm0, %v72_v45, 0.0  ;;  %v74_v57 = vld [vmem:[%s805_s0 + $0x1c8] sm:$0xff] }
  0x50   :  { %v270_v33 = vmul.f32 %v74_v57, %v74_v57  ;;  %v388_v39 = vsel %vm14_vm0, %v269_v27, 0.0 }
  0x51   :  { %v163_v38 = vadd.f32 %v162_v28, %v161_v32  ;;  %v353_v5 = vadd.f32 %v352_v60, %v351_v63  ;;  %v364_v32 = vsel %vm14_vm0, %v257_v19, 0.0  ;;  %v194_v60 = vsel %vm14_vm0, %v73_v51, 0.0  ;;  %v75_v63 = vld [vmem:[%s805_s0 + $0x1d0] sm:$0xff] }
  0x53   :  { %v165_v44 = vadd.f32 %v164_v34, %v163_v38  ;;  %v355_v11 = vadd.f32 %v354_v2, %v353_v5  ;;  %v366_v38 = vsel %vm14_vm0, %v258_v25, 0.0  ;;  %v196_v2 = vsel %vm14_vm0, %v74_v57, 0.0  ;;  %v76_v5 = vld [vmem:[%s805_s0 + $0x1d8] sm:$0xff] }
  0x55   :  { %v167_v50 = vadd.f32 %v166_v40, %v165_v44  ;;  %v357_v17 = vadd.f32 %v356_v8, %v355_v11  ;;  %v368_v44 = vsel %vm14_vm0, %v259_v31, 0.0  ;;  %v198_v8 = vsel %vm14_vm0, %v75_v63, 0.0  ;;  %v77_v11 = vld [vmem:[%s805_s0 + $0x1e0] sm:$0xff] }
  0x57   :  { %v169_v56 = vadd.f32 %v168_v46, %v167_v50  ;;  %v359_v23 = vadd.f32 %v358_v14, %v357_v17  ;;  %v370_v50 = vsel %vm14_vm0, %v260_v37, 0.0  ;;  %v200_v14 = vsel %vm14_vm0, %v76_v5, 0.0  ;;  %v78_v17 = vld [vmem:[%s805_s0 + $0x1e8] sm:$0xff] }
  0x58   :  { %v274_v51 = vmul.f32 %v78_v17, %v78_v17 }
  0x59   :  { %v171_v62 = vadd.f32 %v170_v52, %v169_v56  ;;  %v361_v29 = vadd.f32 %v360_v20, %v359_v23  ;;  %v372_v56 = vsel %vm14_vm0, %v261_v43, 0.0  ;;  %v202_v20 = vsel %vm14_vm0, %v77_v11, 0.0  ;;  %v79_v23 = vld [vmem:[%s805_s0 + $0x1f0] sm:$0xff] }
  0x5a   :  { %v272_v43 = vmul.f32 %v76_v5, %v76_v5 }
  0x5b   :  { %v173_v4 = vadd.f32 %v172_v58, %v171_v62  ;;  %v363_v35 = vadd.f32 %v362_v26, %v361_v29  ;;  %v374_v62 = vsel %vm14_vm0, %v262_v49, 0.0  ;;  %v204_v26 = vsel %vm14_vm0, %v78_v17, 0.0  ;;  %v80_v29 = vld [vmem:[%s805_s0 + $0x1f8] sm:$0xff] }
  0x5c   :  { %v208_v37 = vsel %vm14_vm0, %v80_v29, 0.0  ;;  %v276_v57 = vmul.f32 %v80_v29, %v80_v29 }
  0x5d   :  { %v175_v10 = vadd.f32 %v174_v0, %v173_v4  ;;  %v365_v41 = vadd.f32 %v364_v32, %v363_v35  ;;  %v376_v4 = vsel %vm14_vm0, %v263_v55, 0.0  ;;  %v206_v32 = vsel %vm14_vm0, %v79_v23, 0.0 }
  0x5f   :  { %v177_v16 = vadd.f32 %v176_v6, %v175_v10  ;;  %v367_v47 = vadd.f32 %v366_v38, %v365_v41  ;;  %v378_v10 = vsel %vm14_vm0, %v264_v61, 0.0  ;;  %v271_v38 = vmul.f32 %v75_v63, %v75_v63 }
  0x61   :  { %v179_v22 = vadd.f32 %v178_v12, %v177_v16  ;;  %v369_v53 = vadd.f32 %v368_v44, %v367_v47  ;;  %v380_v16 = vsel %vm14_vm0, %v265_v3, 0.0  ;;  %v390_v44 = vsel %vm14_vm0, %v270_v33, 0.0 }
  0x62   :  { %v273_v47 = vmul.f32 %v77_v11, %v77_v11 }
  0x63   :  { %v181_v28 = vadd.f32 %v180_v18, %v179_v22  ;;  %v371_v59 = vadd.f32 %v370_v50, %v369_v53  ;;  %v382_v22 = vsel %vm14_vm0, %v266_v9, 0.0 }
  0x64   :  { %v396_v55 = vsel %vm14_vm0, %v273_v47, 0.0 }
  0x65   :  { %v183_v34 = vadd.f32 %v182_v24, %v181_v28  ;;  %v373_v1 = vadd.f32 %v372_v56, %v371_v59  ;;  %v384_v28 = vsel %vm14_vm0, %v267_v15, 0.0 }
  0x67   :  { %v185_v40 = vadd.f32 %v184_v30, %v183_v34  ;;  %v375_v7 = vadd.f32 %v374_v62, %v373_v1  ;;  %v386_v34 = vsel %vm14_vm0, %v268_v21, 0.0  ;;  %v402_v62 = vsel %vm14_vm0, %v276_v57, 0.0 }
  0x69   :  { %v187_v46 = vadd.f32 %v186_v36, %v185_v40  ;;  %v377_v13 = vadd.f32 %v376_v4, %v375_v7 }
  0x6b   :  { %v189_v52 = vadd.f32 %v188_v42, %v187_v46  ;;  %v379_v19 = vadd.f32 %v378_v10, %v377_v13  ;;  %v81_v42 = vld [vmem:[#allocation2] sm:$0xff] }
  0x6d   :  { %v191_v58 = vadd.f32 %v190_v48, %v189_v52  ;;  %v381_v25 = vadd.f32 %v380_v16, %v379_v19  ;;  %v392_v48 = vsel %vm14_vm0, %v271_v38, 0.0  ;;  %v394_v52 = vsel %vm14_vm0, %v272_v43, 0.0 }
  0x6f   :  { %v193_v0 = vadd.f32 %v192_v54, %v191_v58  ;;  %v383_v31 = vadd.f32 %v382_v22, %v381_v25  ;;  %v275_v54 = vmul.f32 %v79_v23, %v79_v23  ;;  %v398_v58 = vsel %vm14_vm0, %v274_v51, 0.0 }
  0x71   :  { %v195_v6 = vadd.f32 %v194_v60, %v193_v0  ;;  %v385_v36 = vadd.f32 %v384_v28, %v383_v31  ;;  %v400_v60 = vsel %vm14_vm0, %v275_v54, 0.0 }
  0x73   :  { %v197_v12 = vadd.f32 %v196_v2, %v195_v6  ;;  %v387_v41 = vadd.f32 %v386_v34, %v385_v36  ;;  %v212_v2 = vld [vmem:[#allocation3] sm:$0xff] }
  0x75   :  { %v199_v18 = vadd.f32 %v198_v8, %v197_v12  ;;  %v389_v46 = vadd.f32 %v388_v39, %v387_v41 }
  0x77   :  { %v201_v24 = vadd.f32 %v200_v14, %v199_v18  ;;  %v391_v50 = vadd.f32 %v390_v44, %v389_v46 }
  0x79   :  { %v203_v30 = vadd.f32 %v202_v20, %v201_v24  ;;  %v393_v53 = vadd.f32 %v392_v48, %v391_v50 }
  0x7b   :  { %v205_v35 = vadd.f32 %v204_v26, %v203_v30  ;;  %v395_v56 = vadd.f32 %v394_v52, %v393_v53 }
  0x7d   :  { %v207_v40 = vadd.f32 %v206_v32, %v205_v35  ;;  %v397_v59 = vadd.f32 %v396_v55, %v395_v56 }
  0x7f   :  { %v209_v45 = vadd.f32 %v208_v37, %v207_v40  ;;  %v399_v61 = vadd.f32 %v398_v58, %v397_v59 }
  0x81   :  { %v210_v49 = vadd.f32 %v209_v45, %v81_v42  ;;  %v401_v0 = vadd.f32 %v400_v60, %v399_v61 }
  0x83   :  { %211 = vst.msk [vmem:[#allocation2] sm:$0xff] %vm14_vm0, %v210_v49  ;;  %v403_v4 = vadd.f32 %v402_v62, %v401_v0 }
  0x85   :  { %v404_v6 = vadd.f32 %v403_v4, %v212_v2 }
  0x87   :  { %405 = vst.msk [vmem:[#allocation3] sm:$0xff] %vm14_vm0, %v404_v6 }
  0x8a   :  { %v409_v63 = vld [vmem:[#allocation2] sm:$0xff] }
  0x8b   :  { %v410_v1 = vsel %vm14_vm0, %v409_v63, 0.0 }
  0x8c   :  { %v411_v3 = vrot.slane %v410_v1, 4 }
  0x8e   :  { %v412_v5 = vadd.f32 %v411_v3, %v410_v1  ;;  %v417_v11 = vld [vmem:[#allocation3] sm:$0xff] }
  0x8f   :  { %v418_v13 = vsel %vm14_vm0, %v417_v11, 0.0 }
  0x90   :  { %v413_v7 = vrot.slane %v412_v5, 2  ;;  %v419_v14 = vrot.slane %v418_v13, 4 }
  0x92   :  { %v414_v8 = vadd.f32 %v413_v7, %v412_v5  ;;  %v420_v15 = vadd.f32 %v419_v14, %v418_v13 }
  0x94   :  { %v415_v9 = vrot.slane %v414_v8, 1  ;;  %v421_v16 = vrot.slane %v420_v15, 2 }
  0x96   :  { %v416_v10 = vadd.f32 %v415_v9, %v414_v8  ;;  %v422_v17 = vadd.f32 %v421_v16, %v420_v15 }
  0x98   :  { %v425_v12 = vmul.f32 0.001953125, %v416_v10  ;;  %v423_v18 = vrot.slane %v422_v17, 1 }
  0x9a   :  { %431 = vst.msk [vmem:[%s806_s1] sm:$0x1] %vm430_vm1, %v425_v12  ;;  %v424_v19 = vadd.f32 %v423_v18, %v422_v17  ;;  %v427_v20 = vmul.f32 %v425_v12, %v425_v12 }
  0x9c   :  { %v426_v21 = vmul.f32 0.001953125, %v424_v19 }
  0x9e   :  { %v428_v22 = vsub.f32 %v426_v21, %v427_v20 }
  0xa0   :  { %v429_v23 = vmax.f32 %v428_v22, 0.0 }
  0xa2   :  { %v432_v24 = vadd.f32 1e-05, %v429_v23 }
  0xa4   :  { %453 = vrsqrt.f32 %v432_v24  ;;  %vm439_vm3 = vweird.f32 %v432_v24 }
  0xaa   :  { %v454_v25 = vpop.eup %453 }
  0xab   :  { %v434_v26 = vmul.f32 %v454_v25, %v432_v24  ;;  %vm440_vm2 = vweird.f32 %v454_v25 }
  0xac   :  { %vm441_vm4 = vmor %vm439_vm3, %vm440_vm2 }
  0xad   :  { %v435_v27 = vmul.f32 %v454_v25, %v434_v26 }
  0xaf   :  { %v436_v28 = vmul.f32 0.5, %v435_v27 }
  0xb1   :  { %v437_v29 = vsub.f32 1.5, %v436_v28 }
  0xb3   :  { %v438_v30 = vmul.f32 %v454_v25, %v437_v29 }
  0xb5   :  { %v442_v31 = vsel %vm441_vm4, %v454_v25, %v438_v30 }
  0xb6   :  { %443 = vst.msk [vmem:[%s807_s2] sm:$0x1] %vm430_vm1, %v442_v31 }

// kernel: _lambda_.33
= control target key start
LH: loop header
LB: loop body
LE: loop exit
PB: predicated region body
PF: predicated region fallthrough
CT: control target
= control target key end

     0   :  { %s2116_s18 = smov 0   ;;  %s2118_s19 = smov 0   ;;  %s2474_s0 = inlined_call_operand.vmem [shape: bf16[4,512,128], index: 0, kind: input, shape index: {}]   ;;  %s2475_s1 = inlined_call_operand.vmem [shape: f32[1,128], index: 1, kind: input, shape index: {}]   ;;  %s2476_s2 = inlined_call_operand.vmem [shape: f32[1,128], index: 2, kind: input, shape index: {}]   ;;  %s2477_s3 = inlined_call_operand.vmem [shape: bf16[4,128,128], index: 3, kind: input, shape index: {}]   ;;  %s2478_s4 = inlined_call_operand.vmem [shape: f32[1,128], index: 4, kind: input, shape index: {}]   ;;  %s2479_s5 = inlined_call_operand.vmem [shape: f32[4,512,128], index: 5, kind: output, shape index: {}]  }
   0x1   :  { %s2120_s20 = smov 0  }
   0x2 LB: > { %s41_s21 = sadd.s32 1, %s2080_s19  ;;  %p1672_p0 = scmp.ge.s32.totalorder %s2084_s20, 1  ;;  %s2084_s20 = sphi %s2120_s20, %s15_s20   ;;  %s2080_s19 = sphi %s2118_s19, %s2481_s19   ;;  %s2076_s18 = sphi %s2116_s18, %s2480_s18  }
   0x3   : > { %p43_p1 = scmp.ge.s32.totalorder %s41_s21, 4  ;;  %p275_p2 = scmp.lt.s32.totalorder %s2084_s20, 5 }
   0x5   : > { %s2483_s21 = smov (%p43_p1, %s41_s21), 0  ;;  %p276_p3 = pnand %p1672_p0, %p275_p2 }
   0x6   : > { %p339_p4 = scmp.lt.s32.totalorder (!%p276_p3), %s2076_s18, 3 }
   0x7   : > { %279 = sbr.rel (%p276_p3) target bundleno = 311 (0x137), region = 40 }
   0xc   : > { %s2485_s18 = smov (!%p339_p4, %s2076_s18), 3  ;;  %v2159_v10 = vld [vmem:[%s2475_s1] ss:$0 sm:$0xff] }
   0xd   : > { %s1714_s22 = sshll.u32 %s2485_s18, 6  ;;  %s1713_s26 = sshll.u32 %s2485_s18, 8  ;;  %v2167_v20 = vld [vmem:[%s2476_s2] ss:$0 sm:$0xff] }
   0xe   : > { %s2140_s25 = scalar_lea.vmem %s2477_s3, %s1714_s22  ;;  %s2148_s29 = scalar_lea.vmem %s2474_s0, %s1713_s26 }
   0xf   : > { %v1723_v0 = vld [vmem:[%s2140_s25 + $0x38] sm:$0xff]  ;;  %v1722_v1 = vld [vmem:[%s2140_s25 + $0x30] sm:$0xff]  ;;  %v1721_v2 = vld [vmem:[%s2140_s25 + $0x28] sm:$0xff]  ;;  %s1715_s11 = sshll.u32 %s2485_s18, 9 }
  0x10   : > { %942 = vmatpush.bf16.msra.mxu0 %v1723_v0  ;;  %1883 = vmatpush.bf16.msra.mxu1 %v1723_v0  ;;  %v1725_v3 = vld [vmem:[%s2148_s29] sm:$0xff]   ;;  %v1719_v15 = vld [vmem:[%s2140_s25 + $0x18] sm:$0xff]  ;;  %v1718_v25 = vld [vmem:[%s2140_s25 + $0x10] sm:$0xff]  ;;  %s2337_s14 = scalar_lea.vmem %s2479_s5, %s1715_s11 }
  0x11   : > { %1884 = vmatpush.bf16.msra.mxu2 %v1723_v0  ;;  %1885 = vmatpush.bf16.msra.mxu3 %v1723_v0  ;;  %v1859_v4 = vld [vmem:[%s2148_s29 + $0x40] sm:$0xff]   ;;  %v1726_v8 = vunpack.c.l.bf16 %v1725_v3  ;;  %v1727_v9 = vunpack.c.h.bf16 %v1725_v3  ;;  %v1717_v34 = vld [vmem:[%s2140_s25 + $0x8] sm:$0xff] }
  0x12   : > { %v1720_v5 = vld [vmem:[%s2140_s25 + $0x20] sm:$0xff]  ;;  %v1758_v11 = vunpack.c.l.bf16 %v1859_v4  ;;  %v1759_v12 = vunpack.c.h.bf16 %v1859_v4  ;;  %v1852_v43 = vld [vmem:[%s2148_s29 + $0x8] sm:$0xff]  }
  0x13   : > { %v1867_v6 = vld [vmem:[%s2148_s29 + $0x80] sm:$0xff]   ;;  %v586_v18 = vmul.f32 %v2159_v10, %v1726_v8  ;;  %v587_v19 = vmul.f32 %v2159_v10, %v1727_v9  ;;  %v1860_v47 = vld [vmem:[%s2148_s29 + $0x48] sm:$0xff]   ;;  %v1730_v52 = vunpack.c.l.bf16 %v1852_v43  ;;  %v1731_v53 = vunpack.c.h.bf16 %v1852_v43 }
  0x14   : > { %943 = vmatpush.bf16.msra.mxu0 %v1722_v1  ;;  %1886 = vmatpush.bf16.msra.mxu1 %v1722_v1  ;;  %v1875_v7 = vld [vmem:[%s2148_s29 + $0xc0] sm:$0xff]   ;;  %v1790_v13 = vunpack.c.l.bf16 %v1867_v6  ;;  %v1791_v14 = vunpack.c.h.bf16 %v1867_v6  ;;  %v602_v21 = vmul.f32 %v2159_v10, %v1758_v11  ;;  %v603_v22 = vmul.f32 %v2159_v10, %v1759_v12  ;;  %v1868_v48 = vld [vmem:[%s2148_s29 + $0x88] sm:$0xff]  }
  0x15   : > { %1887 = vmatpush.bf16.msra.mxu2 %v1722_v1  ;;  %1888 = vmatpush.bf16.msra.mxu3 %v1722_v1  ;;  %v1822_v16 = vunpack.c.l.bf16 %v1875_v7  ;;  %v1823_v17 = vunpack.c.h.bf16 %v1875_v7  ;;  %v654_v28 = vadd.f32 %v2167_v20, %v586_v18  ;;  %v655_v29 = vadd.f32 %v2167_v20, %v587_v19  ;;  %v1716_v44 = vld [vmem:[%s2140_s25] sm:$0xff]  ;;  %v1876_v49 = vld [vmem:[%s2148_s29 + $0xc8] sm:$0xff]   ;;  %v1853_v19 = vld [vmem:[%s2148_s29 + $0x10] sm:$0xff]  }
  0x16   : > { %v618_v23 = vmul.f32 %v2159_v10, %v1790_v13  ;;  %v619_v24 = vmul.f32 %v2159_v10, %v1791_v14  ;;  %v670_v30 = vadd.f32 %v2167_v20, %v602_v21  ;;  %v671_v31 = vadd.f32 %v2167_v20, %v603_v22  ;;  %v1861_v21 = vld [vmem:[%s2148_s29 + $0x50] sm:$0xff]  }
  0x17   : > { %v634_v26 = vmul.f32 %v2159_v10, %v1822_v16  ;;  %v635_v27 = vmul.f32 %v2159_v10, %v1823_v17  ;;  %v718_v37 = vmax.f32 %v654_v28, 0.0  ;;  %v719_v38 = vmax.f32 %v655_v29, 0.0 }
  0x18   : > { %944 = vmatpush.bf16.msra.mxu0 %v1721_v2  ;;  %1889 = vmatpush.bf16.msra.mxu1 %v1721_v2  ;;  %v686_v32 = vadd.f32 %v2167_v20, %v618_v23  ;;  %v687_v33 = vadd.f32 %v2167_v20, %v619_v24  ;;  %v734_v39 = vmax.f32 %v670_v30, 0.0  ;;  %v735_v40 = vmax.f32 %v671_v31, 0.0 }
  0x19   : > { %1890 = vmatpush.bf16.msra.mxu2 %v1721_v2  ;;  %1891 = vmatpush.bf16.msra.mxu3 %v1721_v2  ;;  %v702_v35 = vadd.f32 %v2167_v20, %v634_v26  ;;  %v703_v36 = vadd.f32 %v2167_v20, %v635_v27  ;;  %v846_v50 = vpack.c.bf16 %v719_v38, %v718_v37  ;;  %v1762_v55 = vunpack.c.l.bf16 %v1860_v47  ;;  %v1869_v26 = vld [vmem:[%s2148_s29 + $0x90] sm:$0xff]  }
  0x1a   : > { %v750_v41 = vmax.f32 %v686_v32, 0.0  ;;  %v751_v42 = vmax.f32 %v687_v33, 0.0  ;;  %v854_v51 = vpack.c.bf16 %v735_v40, %v734_v39  ;;  %v1763_v56 = vunpack.c.h.bf16 %v1860_v47  ;;  %v1877_v27 = vld [vmem:[%s2148_s29 + $0xd0] sm:$0xff]  }
  0x1b   : > { %v766_v45 = vmax.f32 %v702_v35, 0.0  ;;  %v767_v46 = vmax.f32 %v703_v36, 0.0  ;;  %v1794_v57 = vunpack.c.l.bf16 %v1868_v48  ;;  %v1795_v59 = vunpack.c.h.bf16 %v1868_v48 }
  0x1c   : > { %945 = vmatpush.bf16.msra.mxu0 %v1720_v5  ;;  %1892 = vmatpush.bf16.msra.mxu1 %v1720_v5  ;;  %v862_v54 = vpack.c.bf16 %v751_v42, %v750_v41  ;;  %v1826_v60 = vunpack.c.l.bf16 %v1876_v49  ;;  %v1827_v61 = vunpack.c.h.bf16 %v1876_v49  ;;  %v588_v62 = vmul.f32 %v2159_v10, %v1730_v52 }
  0x1d   : > { %1893 = vmatpush.bf16.msra.mxu2 %v1720_v5  ;;  %1894 = vmatpush.bf16.msra.mxu3 %v1720_v5  ;;  %v870_v58 = vpack.c.bf16 %v767_v46, %v766_v45  ;;  %v589_v63 = vmul.f32 %v2159_v10, %v1731_v53  ;;  %v604_v0 = vmul.f32 %v2159_v10, %v1762_v55  ;;  %v1734_v28 = vunpack.c.l.bf16 %v1853_v19 }
  0x1e   : > { %v605_v1 = vmul.f32 %v2159_v10, %v1763_v56  ;;  %v620_v2 = vmul.f32 %v2159_v10, %v1794_v57  ;;  %v621_v3 = vmul.f32 %v2159_v10, %v1795_v59  ;;  %v636_v4 = vmul.f32 %v2159_v10, %v1826_v60 }
  0x1f   : > { %v637_v5 = vmul.f32 %v2159_v10, %v1827_v61  ;;  %v656_v6 = vadd.f32 %v2167_v20, %v588_v62  ;;  %v657_v7 = vadd.f32 %v2167_v20, %v589_v63  ;;  %v672_v8 = vadd.f32 %v2167_v20, %v604_v0  ;;  %v1854_v62 = vld [vmem:[%s2148_s29 + $0x18] sm:$0xff]  }
  0x20   : > { %946 = vmatpush.bf16.msra.mxu0 %v1719_v15  ;;  %1895 = vmatpush.bf16.msra.mxu1 %v1719_v15  ;;  %v673_v9 = vadd.f32 %v2167_v20, %v605_v1  ;;  %v688_v11 = vadd.f32 %v2167_v20, %v620_v2  ;;  %v689_v12 = vadd.f32 %v2167_v20, %v621_v3  ;;  %v1735_v29 = vunpack.c.h.bf16 %v1853_v19  ;;  %v1862_v1 = vld [vmem:[%s2148_s29 + $0x58] sm:$0xff]  }
  0x21   : > { %1896 = vmatpush.bf16.msra.mxu2 %v1719_v15  ;;  %1897 = vmatpush.bf16.msra.mxu3 %v1719_v15  ;;  %v704_v13 = vadd.f32 %v2167_v20, %v636_v4  ;;  %v705_v14 = vadd.f32 %v2167_v20, %v637_v5  ;;  %v720_v15 = vmax.f32 %v656_v6, 0.0  ;;  %v721_v16 = vmax.f32 %v657_v7, 0.0  ;;  %v1870_v2 = vld [vmem:[%s2148_s29 + $0x98] sm:$0xff]  }
  0x22   : > { %v736_v17 = vmax.f32 %v672_v8, 0.0  ;;  %v737_v18 = vmax.f32 %v673_v9, 0.0  ;;  %v752_v22 = vmax.f32 %v688_v11, 0.0  ;;  %v753_v23 = vmax.f32 %v689_v12, 0.0  ;;  %v1878_v3 = vld [vmem:[%s2148_s29 + $0xd8] sm:$0xff]  }
  0x23   : > { %v768_v24 = vmax.f32 %v704_v13, 0.0  ;;  %v1766_v30 = vunpack.c.l.bf16 %v1861_v21  ;;  %v1767_v31 = vunpack.c.h.bf16 %v1861_v21  ;;  %v847_v32 = vpack.c.bf16 %v721_v16, %v720_v15 }
  0x24   : > { %947 = vmatpush.bf16.msra.mxu0 %v1718_v25  ;;  %1898 = vmatpush.bf16.msra.mxu1 %v1718_v25  ;;  %v855_v33 = vpack.c.bf16 %v737_v18, %v736_v17  ;;  %v1799_v35 = vunpack.c.h.bf16 %v1869_v26  ;;  %v863_v36 = vpack.c.bf16 %v753_v23, %v752_v22  ;;  %v1830_v38 = vunpack.c.l.bf16 %v1877_v27 }
  0x25   : > { %1899 = vmatpush.bf16.msra.mxu2 %v1718_v25  ;;  %1900 = vmatpush.bf16.msra.mxu3 %v1718_v25  ;;  %v769_v25 = vmax.f32 %v705_v14, 0.0  ;;  %v1831_v39 = vunpack.c.h.bf16 %v1877_v27  ;;  %v590_v40 = vmul.f32 %v2159_v10, %v1734_v28  ;;  %v591_v41 = vmul.f32 %v2159_v10, %v1735_v29 }
  0x26   : > { %v606_v42 = vmul.f32 %v2159_v10, %v1766_v30  ;;  %v607_v43 = vmul.f32 %v2159_v10, %v1767_v31  ;;  %v623_v45 = vmul.f32 %v2159_v10, %v1799_v35  ;;  %v638_v46 = vmul.f32 %v2159_v10, %v1830_v38  ;;  %v1855_v38 = vld [vmem:[%s2148_s29 + $0x20] sm:$0xff]  }
  0x27   : > { %v871_v37 = vpack.c.bf16 %v769_v25, %v768_v24  ;;  %v639_v47 = vmul.f32 %v2159_v10, %v1831_v39  ;;  %v658_v48 = vadd.f32 %v2167_v20, %v590_v40  ;;  %v659_v49 = vadd.f32 %v2167_v20, %v591_v41  ;;  %v1863_v39 = vld [vmem:[%s2148_s29 + $0x60] sm:$0xff]  }
  0x28   : > { %948 = vmatpush.bf16.msra.mxu0 %v1717_v34  ;;  %1901 = vmatpush.bf16.msra.mxu1 %v1717_v34  ;;  %v691_v53 = vadd.f32 %v2167_v20, %v623_v45  ;;  %v1738_v6 = vunpack.c.l.bf16 %v1854_v62  ;;  %v1739_v7 = vunpack.c.h.bf16 %v1854_v62  ;;  %v1770_v9 = vunpack.c.l.bf16 %v1862_v1  ;;  %v1879_v45 = vld [vmem:[%s2148_s29 + $0xe0] sm:$0xff]  }
  0x29   : > { %1902 = vmatpush.bf16.msra.mxu2 %v1717_v34  ;;  %1903 = vmatpush.bf16.msra.mxu3 %v1717_v34  ;;  %v1798_v34 = vunpack.c.l.bf16 %v1869_v26  ;;  %v707_v55 = vadd.f32 %v2167_v20, %v639_v47  ;;  %v722_v56 = vmax.f32 %v658_v48, 0.0  ;;  %v723_v57 = vmax.f32 %v659_v49, 0.0 }
  0x2a   : > { %v755_v61 = vmax.f32 %v691_v53, 0.0  ;;  %v1771_v11 = vunpack.c.h.bf16 %v1862_v1  ;;  %v1802_v12 = vunpack.c.l.bf16 %v1870_v2  ;;  %v1803_v14 = vunpack.c.h.bf16 %v1870_v2 }
  0x2b   : > { %v771_v0 = vmax.f32 %v707_v55, 0.0  ;;  %v848_v4 = vpack.c.bf16 %v723_v57, %v722_v56  ;;  %v1834_v15 = vunpack.c.l.bf16 %v1878_v3  ;;  %v1835_v16 = vunpack.c.h.bf16 %v1878_v3 }
  0x2c   : > { %949 = vmatpush.bf16.msra.mxu0 %v1716_v44  ;;  %1904 = vmatpush.bf16.msra.mxu1 %v1716_v44  ;;  %v592_v17 = vmul.f32 %v2159_v10, %v1738_v6  ;;  %v593_v18 = vmul.f32 %v2159_v10, %v1739_v7  ;;  %v608_v19 = vmul.f32 %v2159_v10, %v1770_v9  ;;  %v1743_v47 = vunpack.c.h.bf16 %v1855_v38 }
  0x2d   : > { %1905 = vmatpush.bf16.msra.mxu2 %v1716_v44  ;;  %1906 = vmatpush.bf16.msra.mxu3 %v1716_v44  ;;  %v622_v44 = vmul.f32 %v2159_v10, %v1798_v34  ;;  %v609_v21 = vmul.f32 %v2159_v10, %v1771_v11  ;;  %v624_v22 = vmul.f32 %v2159_v10, %v1802_v12  ;;  %v1774_v48 = vunpack.c.l.bf16 %v1863_v39 }
  0x2e   : > { %v625_v23 = vmul.f32 %v2159_v10, %v1803_v14  ;;  %v640_v24 = vmul.f32 %v2159_v10, %v1834_v15  ;;  %v641_v25 = vmul.f32 %v2159_v10, %v1835_v16  ;;  %v660_v26 = vadd.f32 %v2167_v20, %v592_v17  ;;  %v1856_v17 = vld [vmem:[%s2148_s29 + $0x28] sm:$0xff]  }
  0x2f   : > { %950 = vmatmul.bf16.vlgmr.msra.gmra.mxu0 %v846_v50  ;;  %990 = vmatmul.bf16.vlgmr.msra.gmra.mxu1 %v854_v51  ;;  %v674_v50 = vadd.f32 %v2167_v20, %v606_v42  ;;  %v675_v51 = vadd.f32 %v2167_v20, %v607_v43  ;;  %v690_v52 = vadd.f32 %v2167_v20, %v622_v44  ;;  %v1871_v44 = vld [vmem:[%s2148_s29 + $0xa0] sm:$0xff]   ;;  %v1775_v49 = vunpack.c.h.bf16 %v1863_v39 }
  0x30   : > { %1030 = vmatmul.bf16.vlgmr.msra.gmra.mxu2 %v862_v54  ;;  %1070 = vmatmul.bf16.vlgmr.msra.gmra.mxu3 %v870_v58  ;;  %v706_v54 = vadd.f32 %v2167_v20, %v638_v46  ;;  %v661_v27 = vadd.f32 %v2167_v20, %v593_v18  ;;  %v676_v28 = vadd.f32 %v2167_v20, %v608_v19  ;;  %v724_v34 = vmax.f32 %v660_v26, 0.0 }
  0x31   : > { %v738_v58 = vmax.f32 %v674_v50, 0.0  ;;  %v739_v59 = vmax.f32 %v675_v51, 0.0  ;;  %v754_v60 = vmax.f32 %v690_v52, 0.0  ;;  %v677_v29 = vadd.f32 %v2167_v20, %v609_v21  ;;  %v1864_v21 = vld [vmem:[%s2148_s29 + $0x68] sm:$0xff]  }
  0x32   : > { %v770_v63 = vmax.f32 %v706_v54, 0.0  ;;  %v692_v30 = vadd.f32 %v2167_v20, %v624_v22  ;;  %v693_v31 = vadd.f32 %v2167_v20, %v625_v23  ;;  %v725_v35 = vmax.f32 %v661_v27, 0.0  ;;  %v1872_v22 = vld [vmem:[%s2148_s29 + $0xa8] sm:$0xff]  }
  0x33   : > { %v856_v5 = vpack.c.bf16 %v739_v59, %v738_v58  ;;  %v864_v8 = vpack.c.bf16 %v755_v61, %v754_v60  ;;  %v1742_v46 = vunpack.c.l.bf16 %v1855_v38  ;;  %v1806_v52 = vunpack.c.l.bf16 %v1871_v44  ;;  %v1880_v23 = vld [vmem:[%s2148_s29 + $0xe8] sm:$0xff]  }
  0x34   : > { %v872_v13 = vpack.c.bf16 %v771_v0, %v770_v63  ;;  %v756_v40 = vmax.f32 %v692_v30, 0.0  ;;  %v757_v41 = vmax.f32 %v693_v31, 0.0  ;;  %v849_v50 = vpack.c.bf16 %v725_v35, %v724_v34 }
  0x35   : > { %v1807_v53 = vunpack.c.h.bf16 %v1871_v44  ;;  %v1838_v56 = vunpack.c.l.bf16 %v1879_v45  ;;  %v1839_v57 = vunpack.c.h.bf16 %v1879_v45  ;;  %v594_v58 = vmul.f32 %v2159_v10, %v1742_v46 }
  0x36   : > { %v865_v54 = vpack.c.bf16 %v757_v41, %v756_v40  ;;  %v595_v59 = vmul.f32 %v2159_v10, %v1743_v47  ;;  %v610_v60 = vmul.f32 %v2159_v10, %v1774_v48  ;;  %v611_v61 = vmul.f32 %v2159_v10, %v1775_v49 }
  0x37   : > { %v626_v62 = vmul.f32 %v2159_v10, %v1806_v52  ;;  %v627_v63 = vmul.f32 %v2159_v10, %v1807_v53  ;;  %v642_v0 = vmul.f32 %v2159_v10, %v1838_v56  ;;  %v643_v1 = vmul.f32 %v2159_v10, %v1839_v57  ;;  %v1857_v56 = vld [vmem:[%s2148_s29 + $0x30] sm:$0xff]  }
  0x38   : > { %v662_v2 = vadd.f32 %v2167_v20, %v594_v58  ;;  %v663_v3 = vadd.f32 %v2167_v20, %v595_v59  ;;  %v1746_v26 = vunpack.c.l.bf16 %v1856_v17  ;;  %v1747_v27 = vunpack.c.h.bf16 %v1856_v17  ;;  %v1865_v57 = vld [vmem:[%s2148_s29 + $0x70] sm:$0xff]  }
  0x39   : > { %v694_v6 = vadd.f32 %v2167_v20, %v626_v62  ;;  %v695_v7 = vadd.f32 %v2167_v20, %v627_v63  ;;  %v711_v9 = vadd.f32 %v2167_v20, %v643_v1  ;;  %v1779_v30 = vunpack.c.h.bf16 %v1864_v21  ;;  %v1873_v62 = vld [vmem:[%s2148_s29 + $0xb0] sm:$0xff]  }
  0x3a   : > { %v726_v11 = vmax.f32 %v662_v2, 0.0  ;;  %v727_v12 = vmax.f32 %v663_v3, 0.0  ;;  %v1810_v31 = vunpack.c.l.bf16 %v1872_v22  ;;  %v1842_v34 = vunpack.c.l.bf16 %v1880_v23  ;;  %v1881_v63 = vld [vmem:[%s2148_s29 + $0xf0] sm:$0xff]  }
  0x3b   : > { %v758_v15 = vmax.f32 %v694_v6, 0.0  ;;  %v759_v16 = vmax.f32 %v695_v7, 0.0  ;;  %v775_v19 = vmax.f32 %v711_v9, 0.0  ;;  %v1843_v35 = vunpack.c.h.bf16 %v1880_v23 }
  0x3c   : > { %v613_v39 = vmul.f32 %v2159_v10, %v1779_v30  ;;  %v628_v40 = vmul.f32 %v2159_v10, %v1810_v31  ;;  %v1751_v1 = vunpack.c.h.bf16 %v1857_v56  ;;  %v1782_v2 = vunpack.c.l.bf16 %v1865_v57 }
  0x3d   : > { %v1783_v3 = vunpack.c.h.bf16 %v1865_v57  ;;  %v1814_v6 = vunpack.c.l.bf16 %v1873_v62  ;;  %v1815_v7 = vunpack.c.h.bf16 %v1873_v62 }
  0x3e   : > { %v681_v47 = vadd.f32 %v2167_v20, %v613_v39  ;;  %v696_v48 = vadd.f32 %v2167_v20, %v628_v40  ;;  %v1866_v39 = vld [vmem:[%s2148_s29 + $0x78] sm:$0xff]  }
  0x3f   : > { %955 = vmatmul.bf16.gmra.mxu0 %v847_v32  ;;  %995 = vmatmul.bf16.gmra.mxu1 %v855_v33  ;;  %v708_v32 = vadd.f32 %v2167_v20, %v640_v24  ;;  %v709_v33 = vadd.f32 %v2167_v20, %v641_v25  ;;  %v850_v24 = vpack.c.bf16 %v727_v12, %v726_v11  ;;  %v1846_v11 = vunpack.c.l.bf16 %v1881_v63  ;;  %v1874_v40 = vld [vmem:[%s2148_s29 + $0xb8] sm:$0xff]  }
  0x40   : > { %1035 = vmatmul.bf16.gmra.mxu2 %v863_v36  ;;  %1075 = vmatmul.bf16.gmra.mxu3 %v871_v37  ;;  %v740_v36 = vmax.f32 %v676_v28, 0.0  ;;  %v741_v37 = vmax.f32 %v677_v29, 0.0  ;;  %v866_v28 = vpack.c.bf16 %v759_v16, %v758_v15  ;;  %v1778_v29 = vunpack.c.l.bf16 %v1864_v21 }
  0x41   : > { %v772_v42 = vmax.f32 %v708_v32, 0.0  ;;  %v773_v43 = vmax.f32 %v709_v33, 0.0  ;;  %v1811_v33 = vunpack.c.h.bf16 %v1872_v22  ;;  %v760_v58 = vmax.f32 %v696_v48, 0.0 }
  0x42   : > { %v857_v51 = vpack.c.bf16 %v741_v37, %v740_v36  ;;  %v596_v36 = vmul.f32 %v2159_v10, %v1746_v26  ;;  %v597_v37 = vmul.f32 %v2159_v10, %v1747_v27  ;;  %v612_v38 = vmul.f32 %v2159_v10, %v1778_v29 }
  0x43   : > { %v873_v55 = vpack.c.bf16 %v773_v43, %v772_v42  ;;  %v629_v41 = vmul.f32 %v2159_v10, %v1811_v33  ;;  %v644_v42 = vmul.f32 %v2159_v10, %v1842_v34  ;;  %v645_v43 = vmul.f32 %v2159_v10, %v1843_v35 }
  0x44   : > { %v664_v44 = vadd.f32 %v2167_v20, %v596_v36  ;;  %v665_v45 = vadd.f32 %v2167_v20, %v597_v37  ;;  %v680_v46 = vadd.f32 %v2167_v20, %v612_v38  ;;  %v1847_v12 = vunpack.c.h.bf16 %v1881_v63  ;;  %v1858_v36 = vld [vmem:[%s2148_s29 + $0x38] sm:$0xff]  }
  0x45   : > { %v697_v49 = vadd.f32 %v2167_v20, %v629_v41  ;;  %v614_v15 = vmul.f32 %v2159_v10, %v1782_v2  ;;  %v615_v16 = vmul.f32 %v2159_v10, %v1783_v3  ;;  %v630_v17 = vmul.f32 %v2159_v10, %v1814_v6  ;;  %v1882_v41 = vld [vmem:[%s2148_s29 + $0xf8] sm:$0xff]  }
  0x46   : > { %v728_v52 = vmax.f32 %v664_v44, 0.0  ;;  %v729_v53 = vmax.f32 %v665_v45, 0.0  ;;  %v647_v21 = vmul.f32 %v2159_v10, %v1847_v12  ;;  %v1754_v44 = vunpack.c.l.bf16 %v1858_v36 }
  0x47   : > { %v761_v59 = vmax.f32 %v697_v49, 0.0  ;;  %v698_v26 = vadd.f32 %v2167_v20, %v630_v17  ;;  %v1755_v45 = vunpack.c.h.bf16 %v1858_v36  ;;  %v1787_v48 = vunpack.c.h.bf16 %v1866_v39 }
  0x48   : > { %v715_v29 = vadd.f32 %v2167_v20, %v647_v21  ;;  %v1818_v49 = vunpack.c.l.bf16 %v1874_v40 }
  0x49   : > { %v762_v34 = vmax.f32 %v698_v26, 0.0  ;;  %v617_v57 = vmul.f32 %v2159_v10, %v1787_v48 }
  0x4a   : > { %v779_v38 = vmax.f32 %v715_v29, 0.0 }
  0x4f   : > { %960 = vmatmul.bf16.gmra.mxu0 %v848_v4  ;;  %1000 = vmatmul.bf16.gmra.mxu1 %v856_v5  ;;  %v678_v4 = vadd.f32 %v2167_v20, %v610_v60  ;;  %v679_v5 = vadd.f32 %v2167_v20, %v611_v61 }
  0x50   : > { %1040 = vmatmul.bf16.gmra.mxu2 %v864_v8  ;;  %1080 = vmatmul.bf16.gmra.mxu3 %v872_v13  ;;  %v710_v8 = vadd.f32 %v2167_v20, %v642_v0  ;;  %v1750_v0 = vunpack.c.l.bf16 %v1857_v56 }
  0x51   : > { %v742_v13 = vmax.f32 %v678_v4, 0.0  ;;  %v743_v14 = vmax.f32 %v679_v5, 0.0  ;;  %v851_v4 = vpack.c.bf16 %v729_v53, %v728_v52  ;;  %v1850_v52 = vunpack.c.l.bf16 %v1882_v41 }
  0x52   : > { %v774_v18 = vmax.f32 %v710_v8, 0.0  ;;  %v867_v8 = vpack.c.bf16 %v761_v59, %v760_v58  ;;  %v1851_v53 = vunpack.c.h.bf16 %v1882_v41  ;;  %v632_v58 = vmul.f32 %v2159_v10, %v1818_v49 }
  0x53   : > { %v858_v25 = vpack.c.bf16 %v743_v14, %v742_v13  ;;  %v598_v13 = vmul.f32 %v2159_v10, %v1750_v0  ;;  %v599_v14 = vmul.f32 %v2159_v10, %v1751_v1  ;;  %v685_v1 = vadd.f32 %v2167_v20, %v617_v57 }
  0x54   : > { %v874_v32 = vpack.c.bf16 %v775_v19, %v774_v18  ;;  %v631_v18 = vmul.f32 %v2159_v10, %v1815_v7  ;;  %v646_v19 = vmul.f32 %v2159_v10, %v1846_v11  ;;  %v700_v2 = vadd.f32 %v2167_v20, %v632_v58 }
  0x55   : > { %v666_v22 = vadd.f32 %v2167_v20, %v598_v13  ;;  %v667_v23 = vadd.f32 %v2167_v20, %v599_v14 }
  0x56   : > { %v699_v27 = vadd.f32 %v2167_v20, %v631_v18 }
  0x57   : > { %v730_v30 = vmax.f32 %v666_v22, 0.0  ;;  %v731_v31 = vmax.f32 %v667_v23, 0.0 }
  0x58   : > { %v763_v35 = vmax.f32 %v699_v27, 0.0 }
  0x5f   : > { %965 = vmatmul.bf16.gmra.mxu0 %v849_v50  ;;  %1005 = vmatmul.bf16.gmra.mxu1 %v857_v51  ;;  %v712_v50 = vadd.f32 %v2167_v20, %v644_v42  ;;  %v713_v51 = vadd.f32 %v2167_v20, %v645_v43  ;;  %v852_v42 = vpack.c.bf16 %v731_v31, %v730_v30 }
  0x60   : > { %1045 = vmatmul.bf16.gmra.mxu2 %v865_v54  ;;  %1085 = vmatmul.bf16.gmra.mxu3 %v873_v55  ;;  %v744_v54 = vmax.f32 %v680_v46, 0.0  ;;  %v745_v55 = vmax.f32 %v681_v47, 0.0  ;;  %v868_v46 = vpack.c.bf16 %v763_v35, %v762_v34  ;;  %v1786_v47 = vunpack.c.l.bf16 %v1866_v39 }
  0x61   : > { %v776_v60 = vmax.f32 %v712_v50, 0.0  ;;  %v777_v61 = vmax.f32 %v713_v51, 0.0  ;;  %v1819_v51 = vunpack.c.h.bf16 %v1874_v40 }
  0x62   : > { %v859_v5 = vpack.c.bf16 %v745_v55, %v744_v54  ;;  %v600_v54 = vmul.f32 %v2159_v10, %v1754_v44  ;;  %v601_v55 = vmul.f32 %v2159_v10, %v1755_v45  ;;  %v616_v56 = vmul.f32 %v2159_v10, %v1786_v47 }
  0x63   : > { %v875_v9 = vpack.c.bf16 %v777_v61, %v776_v60  ;;  %v633_v59 = vmul.f32 %v2159_v10, %v1819_v51  ;;  %v648_v60 = vmul.f32 %v2159_v10, %v1850_v52  ;;  %v649_v61 = vmul.f32 %v2159_v10, %v1851_v53 }
  0x64   : > { %v668_v62 = vadd.f32 %v2167_v20, %v600_v54  ;;  %v669_v63 = vadd.f32 %v2167_v20, %v601_v55  ;;  %v684_v0 = vadd.f32 %v2167_v20, %v616_v56  ;;  %v749_v10 = vmax.f32 %v685_v1, 0.0 }
  0x65   : > { %v701_v3 = vadd.f32 %v2167_v20, %v633_v59 }
  0x66   : > { %v732_v6 = vmax.f32 %v668_v62, 0.0  ;;  %v733_v7 = vmax.f32 %v669_v63, 0.0 }
  0x67   : > { %v765_v11 = vmax.f32 %v701_v3, 0.0 }
  0x68   : > { %v853_v14 = vpack.c.bf16 %v733_v7, %v732_v6 }
  0x6f   : > { %970 = vmatmul.bf16.gmra.mxu0 %v850_v24  ;;  %1010 = vmatmul.bf16.gmra.mxu1 %v858_v25  ;;  %v682_v24 = vadd.f32 %v2167_v20, %v614_v15  ;;  %v683_v25 = vadd.f32 %v2167_v20, %v615_v16 }
  0x70   : > { %1050 = vmatmul.bf16.gmra.mxu2 %v866_v28  ;;  %1090 = vmatmul.bf16.gmra.mxu3 %v874_v32  ;;  %v714_v28 = vadd.f32 %v2167_v20, %v646_v19 }
  0x71   : > { %v746_v32 = vmax.f32 %v682_v24, 0.0  ;;  %v747_v33 = vmax.f32 %v683_v25, 0.0 }
  0x72   : > { %v778_v37 = vmax.f32 %v714_v28, 0.0 }
  0x73   : > { %v860_v43 = vpack.c.bf16 %v747_v33, %v746_v32 }
  0x74   : > { %v876_v50 = vpack.c.bf16 %v779_v38, %v778_v37 }
  0x7f   : > { %975 = vmatmul.bf16.gmra.mxu0 %v851_v4  ;;  %1015 = vmatmul.bf16.gmra.mxu1 %v859_v5  ;;  %v716_v4 = vadd.f32 %v2167_v20, %v648_v60  ;;  %v717_v5 = vadd.f32 %v2167_v20, %v649_v61  ;;  %v2329_v20 = vld [vmem:[%s2478_s4] ss:$0 sm:$0xff] }
  0x80   : > { %1055 = vmatmul.bf16.gmra.mxu2 %v867_v8  ;;  %1095 = vmatmul.bf16.gmra.mxu3 %v875_v9  ;;  %v748_v8 = vmax.f32 %v684_v0, 0.0  ;;  %v764_v9 = vmax.f32 %v700_v2, 0.0 }
  0x81   : > { %v780_v12 = vmax.f32 %v716_v4, 0.0  ;;  %v781_v13 = vmax.f32 %v717_v5, 0.0 }
  0x82   : > { %v861_v15 = vpack.c.bf16 %v749_v10, %v748_v8  ;;  %v869_v16 = vpack.c.bf16 %v765_v11, %v764_v9 }
  0x83   : > { %v877_v17 = vpack.c.bf16 %v781_v13, %v780_v12 }
  0x8f   : > { %980 = vmatmul.bf16.gmra.mxu0 %v852_v42  ;;  %1020 = vmatmul.bf16.gmra.mxu1 %v860_v43 }
  0x90   : > { %1060 = vmatmul.bf16.gmra.mxu2 %v868_v46  ;;  %1100 = vmatmul.bf16.gmra.mxu3 %v876_v50 }
  0x9f   : > { %985 = vmatmul.bf16.gmra.mxu0 %v853_v14  ;;  %1025 = vmatmul.bf16.gmra.mxu1 %v861_v15 }
  0xa0   : > { %1065 = vmatmul.bf16.gmra.mxu2 %v869_v16  ;;  %1105 = vmatmul.bf16.gmra.mxu3 %v877_v17 }
  0xac   : > { %v951_v18 = vpop.f32.mrf.mxu0  ;;  %v991_v19 = vpop.f32.mrf.mxu1 }
  0xad   : > { %v1310_v21 = vadd.f32 %v2329_v20, %v951_v18  ;;  %v1326_v22 = vadd.f32 %v2329_v20, %v991_v19 }
  0xaf   : > { %1934 = vtanh.f32 %v1310_v21 }
  0xb0   : > { %1936 = vtanh.f32 %v1326_v22 }
  0xb3   : > { %v1031_v23 = vpop.f32.mrf.mxu2  ;;  %v1071_v24 = vpop.f32.mrf.mxu3 }
  0xb4   : > { %v1342_v25 = vadd.f32 %v2329_v20, %v1031_v23  ;;  %v1358_v26 = vadd.f32 %v2329_v20, %v1071_v24  ;;  %v953_v27 = vpop.f32.mrf.mxu0  ;;  %v993_v28 = vpop.f32.mrf.mxu1 }
  0xb5   : > { %v1935_v29 = vpop.eup %1934  ;;  %v1311_v30 = vadd.f32 %v2329_v20, %v953_v27  ;;  %v1327_v31 = vadd.f32 %v2329_v20, %v993_v28 }
  0xb6   : > { %v1937_v32 = vpop.eup %1936  ;;  %1438 = vst [vmem:[%s2337_s14] sm:$0xff] %v1935_v29  ;;  %1938 = vtanh.f32 %v1342_v25 }
  0xb7   : > { %1454 = vst [vmem:[%s2337_s14 + $0x80] sm:$0xff] %v1937_v32  ;;  %1940 = vtanh.f32 %v1358_v26 }
  0xb8   : > { %1942 = vtanh.f32 %v1311_v30 }
  0xb9   : > { %1944 = vtanh.f32 %v1327_v31 }
  0xbb   : > { %v1033_v33 = vpop.f32.mrf.mxu2  ;;  %v1073_v34 = vpop.f32.mrf.mxu3 }
  0xbc   : > { %v1939_v35 = vpop.eup %1938  ;;  %v1343_v36 = vadd.f32 %v2329_v20, %v1033_v33  ;;  %v1359_v37 = vadd.f32 %v2329_v20, %v1073_v34  ;;  %v956_v38 = vpop.f32.mrf.mxu0 }
  0xbd   : > { %v996_v39 = vpop.f32.mrf.mxu1  ;;  %v1941_v40 = vpop.eup %1940  ;;  %1470 = vst [vmem:[%s2337_s14 + $0x100] sm:$0xff] %v1939_v35  ;;  %v1312_v41 = vadd.f32 %v2329_v20, %v956_v38 }
  0xbe   : > { %v1328_v42 = vadd.f32 %v2329_v20, %v996_v39  ;;  %v1943_v43 = vpop.eup %1942  ;;  %1486 = vst [vmem:[%s2337_s14 + $0x180] sm:$0xff] %v1941_v40  ;;  %1946 = vtanh.f32 %v1343_v36 }
  0xbf   : > { %v1945_v44 = vpop.eup %1944  ;;  %1439 = vst [vmem:[%s2337_s14 + $0x8] sm:$0xff] %v1943_v43  ;;  %1948 = vtanh.f32 %v1359_v37 }
  0xc0   : > { %1455 = vst [vmem:[%s2337_s14 + $0x88] sm:$0xff] %v1945_v44  ;;  %1950 = vtanh.f32 %v1312_v41 }
  0xc1   : > { %1952 = vtanh.f32 %v1328_v42 }
  0xc3   : > { %v1036_v45 = vpop.f32.mrf.mxu2  ;;  %v1076_v46 = vpop.f32.mrf.mxu3 }
  0xc4   : > { %v1947_v47 = vpop.eup %1946  ;;  %v1344_v48 = vadd.f32 %v2329_v20, %v1036_v45  ;;  %v1360_v49 = vadd.f32 %v2329_v20, %v1076_v46  ;;  %v958_v50 = vpop.f32.mrf.mxu0 }
  0xc5   : > { %v998_v51 = vpop.f32.mrf.mxu1  ;;  %v1949_v52 = vpop.eup %1948  ;;  %1471 = vst [vmem:[%s2337_s14 + $0x108] sm:$0xff] %v1947_v47  ;;  %v1313_v53 = vadd.f32 %v2329_v20, %v958_v50 }
  0xc6   : > { %v1329_v54 = vadd.f32 %v2329_v20, %v998_v51  ;;  %v1951_v55 = vpop.eup %1950  ;;  %1487 = vst [vmem:[%s2337_s14 + $0x188] sm:$0xff] %v1949_v52  ;;  %1954 = vtanh.f32 %v1344_v48 }
  0xc7   : > { %v1953_v56 = vpop.eup %1952  ;;  %1440 = vst [vmem:[%s2337_s14 + $0x10] sm:$0xff] %v1951_v55  ;;  %1956 = vtanh.f32 %v1360_v49 }
  0xc8   : > { %1456 = vst [vmem:[%s2337_s14 + $0x90] sm:$0xff] %v1953_v56  ;;  %1958 = vtanh.f32 %v1313_v53 }
  0xc9   : > { %1960 = vtanh.f32 %v1329_v54 }
  0xcb   : > { %v1038_v57 = vpop.f32.mrf.mxu2  ;;  %v1078_v58 = vpop.f32.mrf.mxu3 }
  0xcc   : > { %v1955_v59 = vpop.eup %1954  ;;  %v1345_v60 = vadd.f32 %v2329_v20, %v1038_v57  ;;  %v1361_v61 = vadd.f32 %v2329_v20, %v1078_v58  ;;  %v961_v62 = vpop.f32.mrf.mxu0 }
  0xcd   : > { %v1001_v63 = vpop.f32.mrf.mxu1  ;;  %v1957_v0 = vpop.eup %1956  ;;  %1472 = vst [vmem:[%s2337_s14 + $0x110] sm:$0xff] %v1955_v59  ;;  %v1314_v1 = vadd.f32 %v2329_v20, %v961_v62 }
  0xce   : > { %v1330_v2 = vadd.f32 %v2329_v20, %v1001_v63  ;;  %v1959_v3 = vpop.eup %1958  ;;  %1488 = vst [vmem:[%s2337_s14 + $0x190] sm:$0xff] %v1957_v0  ;;  %1962 = vtanh.f32 %v1345_v60 }
  0xcf   : > { %v1961_v4 = vpop.eup %1960  ;;  %1441 = vst [vmem:[%s2337_s14 + $0x18] sm:$0xff] %v1959_v3  ;;  %1964 = vtanh.f32 %v1361_v61 }
  0xd0   : > { %1457 = vst [vmem:[%s2337_s14 + $0x98] sm:$0xff] %v1961_v4  ;;  %1966 = vtanh.f32 %v1314_v1 }
  0xd1   : > { %1968 = vtanh.f32 %v1330_v2 }
  0xd3   : > { %v1041_v5 = vpop.f32.mrf.mxu2  ;;  %v1081_v6 = vpop.f32.mrf.mxu3 }
  0xd4   : > { %v1963_v7 = vpop.eup %1962  ;;  %v1346_v8 = vadd.f32 %v2329_v20, %v1041_v5  ;;  %v1362_v10 = vadd.f32 %v2329_v20, %v1081_v6  ;;  %v963_v9 = vpop.f32.mrf.mxu0 }
  0xd5   : > { %v1003_v11 = vpop.f32.mrf.mxu1  ;;  %v1965_v12 = vpop.eup %1964  ;;  %1473 = vst [vmem:[%s2337_s14 + $0x118] sm:$0xff] %v1963_v7  ;;  %v1315_v13 = vadd.f32 %v2329_v20, %v963_v9 }
  0xd6   : > { %v1331_v14 = vadd.f32 %v2329_v20, %v1003_v11  ;;  %v1967_v15 = vpop.eup %1966  ;;  %1489 = vst [vmem:[%s2337_s14 + $0x198] sm:$0xff] %v1965_v12  ;;  %1970 = vtanh.f32 %v1346_v8 }
  0xd7   : > { %v1969_v16 = vpop.eup %1968  ;;  %1442 = vst [vmem:[%s2337_s14 + $0x20] sm:$0xff] %v1967_v15  ;;  %1972 = vtanh.f32 %v1362_v10 }
  0xd8   : > { %1458 = vst [vmem:[%s2337_s14 + $0xa0] sm:$0xff] %v1969_v16  ;;  %1974 = vtanh.f32 %v1315_v13 }
  0xd9   : > { %1976 = vtanh.f32 %v1331_v14 }
  0xdb   : > { %v1043_v17 = vpop.f32.mrf.mxu2  ;;  %v1083_v18 = vpop.f32.mrf.mxu3 }
  0xdc   : > { %v1971_v19 = vpop.eup %1970  ;;  %v1347_v21 = vadd.f32 %v2329_v20, %v1043_v17  ;;  %v1363_v22 = vadd.f32 %v2329_v20, %v1083_v18  ;;  %v966_v23 = vpop.f32.mrf.mxu0 }
  0xdd   : > { %v1006_v24 = vpop.f32.mrf.mxu1  ;;  %v1973_v25 = vpop.eup %1972  ;;  %1474 = vst [vmem:[%s2337_s14 + $0x120] sm:$0xff] %v1971_v19  ;;  %v1316_v26 = vadd.f32 %v2329_v20, %v966_v23 }
  0xde   : > { %v1332_v27 = vadd.f32 %v2329_v20, %v1006_v24  ;;  %v1975_v28 = vpop.eup %1974  ;;  %1490 = vst [vmem:[%s2337_s14 + $0x1a0] sm:$0xff] %v1973_v25  ;;  %1978 = vtanh.f32 %v1347_v21 }
  0xdf   : > { %v1977_v29 = vpop.eup %1976  ;;  %1443 = vst [vmem:[%s2337_s14 + $0x28] sm:$0xff] %v1975_v28  ;;  %1980 = vtanh.f32 %v1363_v22 }
  0xe0   : > { %1459 = vst [vmem:[%s2337_s14 + $0xa8] sm:$0xff] %v1977_v29  ;;  %1982 = vtanh.f32 %v1316_v26 }
  0xe1   : > { %1984 = vtanh.f32 %v1332_v27 }
  0xe3   : > { %v1046_v30 = vpop.f32.mrf.mxu2  ;;  %v1086_v31 = vpop.f32.mrf.mxu3 }
  0xe4   : > { %v1979_v32 = vpop.eup %1978  ;;  %v1348_v33 = vadd.f32 %v2329_v20, %v1046_v30  ;;  %v1364_v34 = vadd.f32 %v2329_v20, %v1086_v31  ;;  %v968_v35 = vpop.f32.mrf.mxu0 }
  0xe5   : > { %v1008_v36 = vpop.f32.mrf.mxu1  ;;  %v1981_v37 = vpop.eup %1980  ;;  %1475 = vst [vmem:[%s2337_s14 + $0x128] sm:$0xff] %v1979_v32  ;;  %v1317_v38 = vadd.f32 %v2329_v20, %v968_v35 }
  0xe6   : > { %v1333_v39 = vadd.f32 %v2329_v20, %v1008_v36  ;;  %v1983_v40 = vpop.eup %1982  ;;  %1491 = vst [vmem:[%s2337_s14 + $0x1a8] sm:$0xff] %v1981_v37  ;;  %1986 = vtanh.f32 %v1348_v33 }
  0xe7   : > { %v1985_v41 = vpop.eup %1984  ;;  %1444 = vst [vmem:[%s2337_s14 + $0x30] sm:$0xff] %v1983_v40  ;;  %1988 = vtanh.f32 %v1364_v34 }
  0xe8   : > { %1460 = vst [vmem:[%s2337_s14 + $0xb0] sm:$0xff] %v1985_v41  ;;  %1990 = vtanh.f32 %v1317_v38 }
  0xe9   : > { %1992 = vtanh.f32 %v1333_v39 }
  0xeb   : > { %v1048_v42 = vpop.f32.mrf.mxu2  ;;  %v1088_v43 = vpop.f32.mrf.mxu3 }
  0xec   : > { %v1987_v44 = vpop.eup %1986  ;;  %v1349_v45 = vadd.f32 %v2329_v20, %v1048_v42  ;;  %v1365_v46 = vadd.f32 %v2329_v20, %v1088_v43  ;;  %v971_v47 = vpop.f32.mrf.mxu0 }
  0xed   : > { %v1011_v48 = vpop.f32.mrf.mxu1  ;;  %v1989_v49 = vpop.eup %1988  ;;  %1476 = vst [vmem:[%s2337_s14 + $0x130] sm:$0xff] %v1987_v44  ;;  %v1318_v50 = vadd.f32 %v2329_v20, %v971_v47 }
  0xee   : > { %v1334_v51 = vadd.f32 %v2329_v20, %v1011_v48  ;;  %v1991_v52 = vpop.eup %1990  ;;  %1492 = vst [vmem:[%s2337_s14 + $0x1b0] sm:$0xff] %v1989_v49  ;;  %1994 = vtanh.f32 %v1349_v45 }
  0xef   : > { %v1993_v53 = vpop.eup %1992  ;;  %1445 = vst [vmem:[%s2337_s14 + $0x38] sm:$0xff] %v1991_v52  ;;  %1996 = vtanh.f32 %v1365_v46 }
  0xf0   : > { %1461 = vst [vmem:[%s2337_s14 + $0xb8] sm:$0xff] %v1993_v53  ;;  %1998 = vtanh.f32 %v1318_v50 }
  0xf1   : > { %2000 = vtanh.f32 %v1334_v51 }
  0xf3   : > { %v1051_v54 = vpop.f32.mrf.mxu2  ;;  %v1091_v55 = vpop.f32.mrf.mxu3 }
  0xf4   : > { %v1995_v56 = vpop.eup %1994  ;;  %v1350_v57 = vadd.f32 %v2329_v20, %v1051_v54  ;;  %v1366_v58 = vadd.f32 %v2329_v20, %v1091_v55  ;;  %v973_v59 = vpop.f32.mrf.mxu0 }
  0xf5   : > { %v1013_v60 = vpop.f32.mrf.mxu1  ;;  %v1997_v61 = vpop.eup %1996  ;;  %1477 = vst [vmem:[%s2337_s14 + $0x138] sm:$0xff] %v1995_v56  ;;  %v1319_v62 = vadd.f32 %v2329_v20, %v973_v59 }
  0xf6   : > { %v1335_v63 = vadd.f32 %v2329_v20, %v1013_v60  ;;  %v1999_v0 = vpop.eup %1998  ;;  %1493 = vst [vmem:[%s2337_s14 + $0x1b8] sm:$0xff] %v1997_v61  ;;  %2002 = vtanh.f32 %v1350_v57 }
  0xf7   : > { %v2001_v1 = vpop.eup %2000  ;;  %1446 = vst [vmem:[%s2337_s14 + $0x40] sm:$0xff] %v1999_v0  ;;  %2004 = vtanh.f32 %v1366_v58 }
  0xf8   : > { %1462 = vst [vmem:[%s2337_s14 + $0xc0] sm:$0xff] %v2001_v1  ;;  %2006 = vtanh.f32 %v1319_v62 }
  0xf9   : > { %2008 = vtanh.f32 %v1335_v63 }
  0xfb   : > { %v1053_v2 = vpop.f32.mrf.mxu2  ;;  %v1093_v3 = vpop.f32.mrf.mxu3 }
  0xfc   : > { %v2003_v4 = vpop.eup %2002  ;;  %v1351_v5 = vadd.f32 %v2329_v20, %v1053_v2  ;;  %v1367_v6 = vadd.f32 %v2329_v20, %v1093_v3  ;;  %v976_v7 = vpop.f32.mrf.mxu0 }
  0xfd   : > { %v1016_v8 = vpop.f32.mrf.mxu1  ;;  %v2005_v10 = vpop.eup %2004  ;;  %1478 = vst [vmem:[%s2337_s14 + $0x140] sm:$0xff] %v2003_v4  ;;  %v1320_v9 = vadd.f32 %v2329_v20, %v976_v7 }
  0xfe   : > { %v1336_v11 = vadd.f32 %v2329_v20, %v1016_v8  ;;  %v2007_v12 = vpop.eup %2006  ;;  %1494 = vst [vmem:[%s2337_s14 + $0x1c0] sm:$0xff] %v2005_v10  ;;  %2010 = vtanh.f32 %v1351_v5 }
  0xff   : > { %v2009_v13 = vpop.eup %2008  ;;  %1447 = vst [vmem:[%s2337_s14 + $0x48] sm:$0xff] %v2007_v12  ;;  %2012 = vtanh.f32 %v1367_v6 }
 0x100   : > { %1463 = vst [vmem:[%s2337_s14 + $0xc8] sm:$0xff] %v2009_v13  ;;  %2014 = vtanh.f32 %v1320_v9 }
 0x101   : > { %2016 = vtanh.f32 %v1336_v11 }
 0x103   : > { %v1056_v14 = vpop.f32.mrf.mxu2  ;;  %v1096_v15 = vpop.f32.mrf.mxu3 }
 0x104   : > { %v2011_v16 = vpop.eup %2010  ;;  %v1352_v17 = vadd.f32 %v2329_v20, %v1056_v14  ;;  %v1368_v18 = vadd.f32 %v2329_v20, %v1096_v15  ;;  %v978_v19 = vpop.f32.mrf.mxu0 }
 0x105   : > { %v1018_v21 = vpop.f32.mrf.mxu1  ;;  %v2013_v22 = vpop.eup %2012  ;;  %1479 = vst [vmem:[%s2337_s14 + $0x148] sm:$0xff] %v2011_v16  ;;  %v1321_v23 = vadd.f32 %v2329_v20, %v978_v19 }
 0x106   : > { %v1337_v24 = vadd.f32 %v2329_v20, %v1018_v21  ;;  %v2015_v25 = vpop.eup %2014  ;;  %1495 = vst [vmem:[%s2337_s14 + $0x1c8] sm:$0xff] %v2013_v22  ;;  %2018 = vtanh.f32 %v1352_v17 }
 0x107   : > { %v2017_v26 = vpop.eup %2016  ;;  %1448 = vst [vmem:[%s2337_s14 + $0x50] sm:$0xff] %v2015_v25  ;;  %2020 = vtanh.f32 %v1368_v18 }
 0x108   : > { %1464 = vst [vmem:[%s2337_s14 + $0xd0] sm:$0xff] %v2017_v26  ;;  %2022 = vtanh.f32 %v1321_v23 }
 0x109   : > { %2024 = vtanh.f32 %v1337_v24 }
 0x10b   : > { %v1058_v27 = vpop.f32.mrf.mxu2  ;;  %v1098_v28 = vpop.f32.mrf.mxu3 }
 0x10c   : > { %v2019_v29 = vpop.eup %2018  ;;  %v1353_v30 = vadd.f32 %v2329_v20, %v1058_v27  ;;  %v1369_v31 = vadd.f32 %v2329_v20, %v1098_v28  ;;  %v981_v32 = vpop.f32.mrf.mxu0 }
 0x10d   : > { %v1021_v33 = vpop.f32.mrf.mxu1  ;;  %v2021_v34 = vpop.eup %2020  ;;  %1480 = vst [vmem:[%s2337_s14 + $0x150] sm:$0xff] %v2019_v29  ;;  %v1322_v35 = vadd.f32 %v2329_v20, %v981_v32 }
 0x10e   : > { %v1338_v36 = vadd.f32 %v2329_v20, %v1021_v33  ;;  %v2023_v37 = vpop.eup %2022  ;;  %1496 = vst [vmem:[%s2337_s14 + $0x1d0] sm:$0xff] %v2021_v34  ;;  %2026 = vtanh.f32 %v1353_v30 }
 0x10f   : > { %v2025_v38 = vpop.eup %2024  ;;  %1449 = vst [vmem:[%s2337_s14 + $0x58] sm:$0xff] %v2023_v37  ;;  %2028 = vtanh.f32 %v1369_v31 }
 0x110   : > { %1465 = vst [vmem:[%s2337_s14 + $0xd8] sm:$0xff] %v2025_v38  ;;  %2030 = vtanh.f32 %v1322_v35 }
 0x111   : > { %2032 = vtanh.f32 %v1338_v36 }
 0x113   : > { %v1061_v39 = vpop.f32.mrf.mxu2  ;;  %v1101_v40 = vpop.f32.mrf.mxu3 }
 0x114   : > { %v2027_v41 = vpop.eup %2026  ;;  %v1354_v42 = vadd.f32 %v2329_v20, %v1061_v39  ;;  %v1370_v43 = vadd.f32 %v2329_v20, %v1101_v40  ;;  %v983_v44 = vpop.f32.mrf.mxu0 }
 0x115   : > { %v1023_v45 = vpop.f32.mrf.mxu1  ;;  %v2029_v46 = vpop.eup %2028  ;;  %1481 = vst [vmem:[%s2337_s14 + $0x158] sm:$0xff] %v2027_v41  ;;  %v1323_v47 = vadd.f32 %v2329_v20, %v983_v44 }
 0x116   : > { %v1339_v48 = vadd.f32 %v2329_v20, %v1023_v45  ;;  %v2031_v49 = vpop.eup %2030  ;;  %1497 = vst [vmem:[%s2337_s14 + $0x1d8] sm:$0xff] %v2029_v46  ;;  %2034 = vtanh.f32 %v1354_v42 }
 0x117   : > { %v2033_v50 = vpop.eup %2032  ;;  %1450 = vst [vmem:[%s2337_s14 + $0x60] sm:$0xff] %v2031_v49  ;;  %2036 = vtanh.f32 %v1370_v43 }
 0x118   : > { %1466 = vst [vmem:[%s2337_s14 + $0xe0] sm:$0xff] %v2033_v50  ;;  %2038 = vtanh.f32 %v1323_v47 }
 0x119   : > { %2040 = vtanh.f32 %v1339_v48 }
 0x11b   : > { %v1063_v51 = vpop.f32.mrf.mxu2  ;;  %v1103_v52 = vpop.f32.mrf.mxu3 }
 0x11c   : > { %v2035_v53 = vpop.eup %2034  ;;  %v1355_v54 = vadd.f32 %v2329_v20, %v1063_v51  ;;  %v1371_v55 = vadd.f32 %v2329_v20, %v1103_v52  ;;  %v986_v56 = vpop.f32.mrf.mxu0 }
 0x11d   : > { %v1026_v57 = vpop.f32.mrf.mxu1  ;;  %v2037_v58 = vpop.eup %2036  ;;  %1482 = vst [vmem:[%s2337_s14 + $0x160] sm:$0xff] %v2035_v53  ;;  %v1324_v59 = vadd.f32 %v2329_v20, %v986_v56 }
 0x11e   : > { %v1340_v60 = vadd.f32 %v2329_v20, %v1026_v57  ;;  %v2039_v61 = vpop.eup %2038  ;;  %1498 = vst [vmem:[%s2337_s14 + $0x1e0] sm:$0xff] %v2037_v58  ;;  %2042 = vtanh.f32 %v1355_v54 }
 0x11f   : > { %v2041_v62 = vpop.eup %2040  ;;  %1451 = vst [vmem:[%s2337_s14 + $0x68] sm:$0xff] %v2039_v61  ;;  %2044 = vtanh.f32 %v1371_v55 }
 0x120   : > { %1467 = vst [vmem:[%s2337_s14 + $0xe8] sm:$0xff] %v2041_v62  ;;  %2046 = vtanh.f32 %v1324_v59 }
 0x121   : > { %2048 = vtanh.f32 %v1340_v60 }
 0x123   : > { %v1066_v63 = vpop.f32.mrf.mxu2  ;;  %v1106_v0 = vpop.f32.mrf.mxu3 }
 0x124   : > { %v2043_v1 = vpop.eup %2042  ;;  %v1356_v2 = vadd.f32 %v2329_v20, %v1066_v63  ;;  %v1372_v3 = vadd.f32 %v2329_v20, %v1106_v0  ;;  %v988_v4 = vpop.f32.mrf.mxu0 }
 0x125   : > { %v1028_v5 = vpop.f32.mrf.mxu1  ;;  %v2045_v6 = vpop.eup %2044  ;;  %1483 = vst [vmem:[%s2337_s14 + $0x168] sm:$0xff] %v2043_v1  ;;  %v1325_v7 = vadd.f32 %v2329_v20, %v988_v4 }
 0x126   : > { %v1341_v8 = vadd.f32 %v2329_v20, %v1028_v5  ;;  %v2047_v10 = vpop.eup %2046  ;;  %1499 = vst [vmem:[%s2337_s14 + $0x1e8] sm:$0xff] %v2045_v6  ;;  %2050 = vtanh.f32 %v1356_v2 }
 0x127   : > { %v2049_v9 = vpop.eup %2048  ;;  %1452 = vst [vmem:[%s2337_s14 + $0x70] sm:$0xff] %v2047_v10  ;;  %2052 = vtanh.f32 %v1372_v3 }
 0x128   : > { %1468 = vst [vmem:[%s2337_s14 + $0xf0] sm:$0xff] %v2049_v9  ;;  %2054 = vtanh.f32 %v1325_v7 }
 0x129   : > { %2056 = vtanh.f32 %v1341_v8 }
 0x12b   : > { %v1068_v11 = vpop.f32.mrf.mxu2  ;;  %v1108_v12 = vpop.f32.mrf.mxu3 }
 0x12c   : > { %v2051_v13 = vpop.eup %2050  ;;  %v1357_v14 = vadd.f32 %v2329_v20, %v1068_v11  ;;  %v1373_v15 = vadd.f32 %v2329_v20, %v1108_v12 }
 0x12d   : > { %v2053_v16 = vpop.eup %2052  ;;  %1484 = vst [vmem:[%s2337_s14 + $0x170] sm:$0xff] %v2051_v13 }
 0x12e   : > { %v2055_v17 = vpop.eup %2054  ;;  %1500 = vst [vmem:[%s2337_s14 + $0x1f0] sm:$0xff] %v2053_v16  ;;  %2058 = vtanh.f32 %v1357_v14 }
 0x12f   : > { %v2057_v18 = vpop.eup %2056  ;;  %1453 = vst [vmem:[%s2337_s14 + $0x78] sm:$0xff] %v2055_v17  ;;  %2060 = vtanh.f32 %v1373_v15 }
 0x130   : > { %1469 = vst [vmem:[%s2337_s14 + $0xf8] sm:$0xff] %v2057_v18 }
 0x134   : > { %v2059_v19 = vpop.eup %2058 }
 0x135   : > { %v2061_v21 = vpop.eup %2060  ;;  %1485 = vst [vmem:[%s2337_s14 + $0x178] sm:$0xff] %v2059_v19 }
 0x136   : > { %1501 = vst [vmem:[%s2337_s14 + $0x1f8] sm:$0xff] %v2061_v21 }
 0x137 PF: > { %s15_s20 = sadd.s32 1, %s2084_s20   ;;  %s2480_s18 = smov %s2080_s19 }
 0x138   : > { %p12_p5 = scmp.ge.s32.totalorder %s15_s20, 6   ;;  %s2481_s19 = smov %s2483_s21 }
 0x13a   :  { %14 = sbr.rel (!%p12_p5) target bundleno = 2 (0x2), region = 90 }

</bundles_post_ra>
